<compile_context>
chip_gen: v7x
topology: tpu7x:2x2x1
jax: 0.10.0
libtpu: 0.0.40
codegen_flags: <defaults>
</compile_context>

<pallas_src>
import functools
from typing import NamedTuple, Tuple

import numpy as np
import jax
import jax.numpy as jnp
from jax.experimental import pallas as pl
from jax.experimental.pallas import tpu as pltpu

STRIDES = (4, 2, 1)
KSIZES = (8, 4, 3)
COUTS = (32, 64, 64)
FC_HIDDEN = 512


class Cfg(NamedTuple):
    N: int                        # batch as seen by the kernel (padded to 16)
    Cin: int
    H: int
    W: int
    num_actions: int
    pads: Tuple[int, int, int]
    Hs: Tuple[int, int, int, int]  # spatial H of layer-0..3 activations
    Ws: Tuple[int, int, int, int]
    Hp: Tuple[int, int, int]       # H-padded height of each conv input
    Gs: Tuple[int, int]            # slots per group of the stride-grouped conv1/conv2 inputs
    Kin: Tuple[int, int, int]      # lane width of each conv's input rows  (W_in * C_in)
    Kout: Tuple[int, int, int]     # lane width of each conv's output rows (W_out * C_out)


def make_config(batch_pad, in_channels, H, W, num_actions):
    cdiv = lambda a, b: -(-a // b)
    # Same padding formula as the torch module (img_height only, symmetric).
    pads = tuple(int(((s - 1) * H - s + k) // 2) for s, k in zip(STRIDES, KSIZES))
    Hs, Ws = [H], [W]
    for s, k, p in zip(STRIDES, KSIZES, pads):
        Hs.append((Hs[-1] + 2 * p - k) // s + 1)
        Ws.append((Ws[-1] + 2 * p - k) // s + 1)
    Cs = (in_channels,) + COUTS
    Hp = tuple(Hs[l] + 2 * pads[l] for l in range(3))
    Gs = (cdiv(Hp[0], STRIDES[0]), cdiv(Hp[1], STRIDES[1]))
    Kin = tuple(Ws[l] * Cs[l] for l in range(3))
    Kout = tuple(Ws[l + 1] * Cs[l + 1] for l in range(3))
    return Cfg(batch_pad, in_channels, H, W, num_actions, pads,
               tuple(Hs), tuple(Ws), Hp, Gs, Kin, Kout)


# ----------------------------------------------------------------------------
# Fused Pallas kernel: conv1 -> conv2 -> conv3 (step 0) + streamed fc1 + fc2
# ----------------------------------------------------------------------------
def _make_kernel(cfg):
    N = cfg.N
    H1, H2, H3 = cfg.Hs[1], cfg.Hs[2], cfg.Hs[3]
    s1, s2 = STRIDES[0], STRIDES[1]
    k1, k2, k3 = KSIZES
    G0, G2 = cfg.Gs
    pad2, pad3 = cfg.pads[1], cfg.pads[2]
    Hp2 = cfg.Hp[2]

    def conv_grouped(src_ref, w_ref, b_ref, k, s, G, Ho):
        """relu(sum_ky LHS(ky) @ Wexp[ky] + b).  The stride-grouped source makes
        every ky's LHS one contiguous, 16-row-aligned first-dim slice (no
        per-(ky,ho) gather copies)."""
        acc = None
        for ky in range(k):
            base = (ky % s) * G + ky // s
            lhs = src_ref[base * N:(base + Ho) * N]              # bf16
            part = jnp.dot(lhs, w_ref[ky], preferred_element_type=jnp.float32)
            acc = part if acc is None else acc + part
        return jnp.maximum(acc + b_ref[...], 0.0)                # f32 epilogue

    def conv_rows(src_ref, w_ref, b_ref, k, Ho):
        """Stride-1 conv: plain H-padded rows, contiguous slices per ky."""
        acc = None
        for ky in range(k):
            lhs = src_ref[ky * N:(ky + Ho) * N]
            part = jnp.dot(lhs, w_ref[ky], preferred_element_type=jnp.float32)
            acc = part if acc is None else acc + part
        return jnp.maximum(acc + b_ref[...], 0.0)

    def zero_pad_slots(ref, s, G, pad, h_valid):
        """Zero only the H-pad positions of a stride-grouped buffer (per group:
        a contiguous prefix and suffix of slots); valid rows are overwritten."""
        cols = ref.shape[1]
        for g in range(s):
            pre = min(G, max(0, -(-(pad - g) // s)))             # ceil((pad-g)/s)
            suf = min(G, max(0, -(-(pad + h_valid - g) // s)))
            if pre > 0:
                ref[g * G * N:(g * G + pre) * N] = jnp.zeros((pre * N, cols), ref.dtype)
            if suf < G:
                ref[(g * G + suf) * N:(g + 1) * G * N] = jnp.zeros(
                    ((G - suf) * N, cols), ref.dtype)

    def kernel(xp_ref,
               w1_ref, b1_ref, w2_ref, b2_ref, w3_ref, b3_ref,
               w4_ref, b4_ref, w5_ref, b5_ref,
               out_ref,
               p2_ref, p3_ref, a3_ref, fc_acc_ref):
        pid = pl.program_id(0)

        # All conv work runs once, on grid step 0, while the pipeline is already
        # prefetching w4 block 1 in the background.
        @pl.when(pid == 0)
        def _():
            # conv1 -> conv2's stride-grouped input
            zero_pad_slots(p2_ref, s2, G2, pad2, H1)
            y1 = conv_grouped(xp_ref, w1_ref, b1_ref, k1, s1, G0, H1)
            y1 = y1.astype(jnp.bfloat16)
            for h in range(H1):
                r = h + pad2
                dst = (r % s2) * G2 + r // s2
                p2_ref[dst * N:(dst + 1) * N] = y1[h * N:(h + 1) * N]

            # conv2 -> conv3's plain H-padded input (next layer is stride 1)
            if pad3 > 0:
                p3_ref[0:pad3 * N] = jnp.zeros((pad3 * N, p3_ref.shape[1]), p3_ref.dtype)
                p3_ref[(pad3 + H2) * N:Hp2 * N] = jnp.zeros(
                    ((Hp2 - pad3 - H2) * N, p3_ref.shape[1]), p3_ref.dtype)
            y2 = conv_grouped(p2_ref, w2_ref, b2_ref, k2, s2, G2, H2)
            p3_ref[pad3 * N:(pad3 + H2) * N] = y2.astype(jnp.bfloat16)

            # conv3 (stride 1)
            y3 = conv_rows(p3_ref, w3_ref, b3_ref, k3, H3)
            a3_ref[...] = y3.astype(jnp.bfloat16).reshape(H3, N, y3.shape[-1])

            # fc1 accumulator init
            fc_acc_ref[...] = jnp.zeros_like(fc_acc_ref)

        # fc1: one K block per grid step -- one h3 row block of a3 against the
        # streamed w4 block (its DMA overlaps step 0's conv compute).
        fc_acc_ref[...] += jnp.dot(a3_ref[pid], w4_ref[0],
                                   preferred_element_type=jnp.float32)

        @pl.when(pid == H3 - 1)
        def _():
            hid = jnp.maximum(fc_acc_ref[...] + b4_ref[...], 0.0)
            out = jnp.dot(hid.astype(jnp.bfloat16), w5_ref[...],
                          preferred_element_type=jnp.float32) + b5_ref[...]
            out_ref[...] = out.astype(out_ref.dtype)

    return kernel


@functools.partial(jax.jit, static_argnums=(0,))
def nature_dqn_forward(cfg, x_nchw, prep):
    """x_nchw: (B, Cin, H, W) float32 (torch layout), B <= cfg.N."""
    N, Cin, H, W = cfg.N, cfg.Cin, cfg.H, cfg.W
    B = x_nchw.shape[0]
    assert B <= N
    p1, s1, G0 = cfg.pads[0], STRIDES[0], cfg.Gs[0]
    H3 = cfg.Hs[3]

    # Tiny host-side layout glue: pad the batch to the bf16 sublane tile, then
    # NCHW -> stride-grouped, H-padded rows (row = (group, slot, n), lanes = w*Cin+c).
    x = x_nchw.astype(jnp.float32)
    if B < N:
        x = jnp.pad(x, ((0, N - B), (0, 0), (0, 0), (0, 0)))
    xt = jnp.transpose(x, (2, 0, 3, 1))                            # (H, N, W, Cin)
    xt = jnp.pad(xt, ((p1, s1 * G0 - H - p1), (0, 0), (0, 0), (0, 0)))
    xt = xt.reshape(G0, s1, N, W * Cin).transpose(1, 0, 2, 3)      # (g, slot, N, W*Cin)
    xp = xt.reshape(s1 * G0 * N, W * Cin).astype(jnp.bfloat16)

    args = (xp, prep["w1"], prep["b1"], prep["w2"], prep["b2"],
            prep["w3"], prep["b3"], prep["w4"], prep["b4"],
            prep["w5"], prep["b5"])

    def const_spec(shape):
        nd = len(shape)
        return pl.BlockSpec(shape, lambda h, _nd=nd: (0,) * _nd)   # loaded once (index fixed)

    in_specs = [const_spec(a.shape) for a in args]
    # Stream w4 one (1, W3*C3, 512) block per grid step.
    in_specs[7] = pl.BlockSpec((1,) + prep["w4"].shape[1:], lambda h: (h, 0, 0))

    out = pl.pallas_call(
        _make_kernel(cfg),
        out_shape=jax.ShapeDtypeStruct((N, cfg.num_actions), jnp.float32),
        grid=(H3,),
        in_specs=in_specs,
        out_specs=pl.BlockSpec((N, cfg.num_actions), lambda h: (0, 0)),
        scratch_shapes=[
            pltpu.VMEM((STRIDES[1] * cfg.Gs[1] * N, cfg.Kin[1]), jnp.bfloat16),  # conv2 input (grouped)
            pltpu.VMEM((cfg.Hp[2] * N, cfg.Kin[2]), jnp.bfloat16),               # conv3 input (H-padded)
            pltpu.VMEM((H3, N, cfg.Kout[2]), jnp.bfloat16),                      # conv3 output rows
            pltpu.VMEM((N, FC_HIDDEN), jnp.float32),                             # fc1 accumulator
        ],
        compiler_params=pltpu.CompilerParams(
            dimension_semantics=("arbitrary",),
            vmem_limit_bytes=28 * 1024 * 1024),
    )(*args)
    return out[:B]


# ----------------------------------------------------------------------------
# Parameters: torch-layout init + one-time offline conversion for the kernel
# ----------------------------------------------------------------------------
def init_params(key, in_channels, H, W, num_actions):
    keys = jax.random.split(key, 10)

    def winit(k, shape, fan_in):
        return jax.random.normal(k, shape, jnp.float32) / jnp.sqrt(fan_in)

    def binit(k, n, fan_in):
        return (jax.random.normal(k, (n,), jnp.float32) / jnp.sqrt(fan_in)) * 0.1

    fc1_in = H * W * 64  # matches nn.Linear(img_width*img_height*64, 512)
    return {
        "w1": winit(keys[0], (KSIZES[0], KSIZES[0], in_channels, COUTS[0]),
                    KSIZES[0] * KSIZES[0] * in_channels),
        "b1": binit(keys[1], COUTS[0], KSIZES[0] * KSIZES[0] * in_channels),
        "w2": winit(keys[2], (KSIZES[1], KSIZES[1], COUTS[0], COUTS[1]),
                    KSIZES[1] * KSIZES[1] * COUTS[0]),
        "b2": binit(keys[3], COUTS[1], KSIZES[1] * KSIZES[1] * COUTS[0]),
        "w3": winit(keys[4], (KSIZES[2], KSIZES[2], COUTS[1], COUTS[2]),
                    KSIZES[2] * KSIZES[2] * COUTS[1]),
        "b3": binit(keys[5], COUTS[2], KSIZES[2] * KSIZES[2] * COUTS[1]),
        "w4": winit(keys[6], (fc1_in, FC_HIDDEN), fc1_in),  # (in, out), torch Flatten (c,h,w) rows
        "b4": binit(keys[7], FC_HIDDEN, fc1_in),
        "w5": winit(keys[8], (FC_HIDDEN, num_actions), FC_HIDDEN),
        "b5": binit(keys[9], num_actions, FC_HIDDEN),
    }


def _expand_conv_weight(w_hwio, b, stride, pad, W_in, W_out, k):
    """Fold the kx taps, the W stride and the W padding into
    (k, W_in*Cin, W_out*Cout): taps that fall into the W padding are dropped,
    so neither the K rows nor the output columns carry any zero padding."""
    _, _, Cin, Cout = w_hwio.shape
    sel = np.zeros((W_in, W_out, k), np.float32)
    for wo in range(W_out):
        for kx in range(k):
            wi = wo * stride + kx - pad
            if 0 <= wi < W_in:
                sel[wi, wo, kx] = 1.0
    wexp = jnp.einsum("wvx,yxcd->ywcvd", jnp.asarray(sel), w_hwio,
                      precision=jax.lax.Precision.HIGHEST)
    wexp = wexp.reshape(k, W_in * Cin, W_out * Cout).astype(jnp.bfloat16)
    bexp = jnp.tile(b, (W_out,)).reshape(1, W_out * Cout).astype(jnp.float32)
    return wexp, bexp


def prepare_params(params, cfg):
    prep = {}
    for l in range(3):
        wexp, bexp = _expand_conv_weight(
            params[f"w{l+1}"], params[f"b{l+1}"], STRIDES[l], cfg.pads[l],
            cfg.Ws[l], cfg.Ws[l + 1], KSIZES[l])
        prep[f"w{l+1}"], prep[f"b{l+1}"] = wexp, bexp

    H3, W3, C3 = cfg.Hs[3], cfg.Ws[3], COUTS[2]
    # Permute fc1 rows from torch Flatten order (c, h, w) to the kernel's
    # (h, w, c) row layout and split into per-h3 K blocks (offline, zero cost).
    w4 = params["w4"].reshape(C3, H3, W3, FC_HIDDEN).transpose(1, 2, 0, 3)
    prep["w4"] = w4.reshape(H3, W3 * C3, FC_HIDDEN).astype(jnp.bfloat16)
    prep["b4"] = params["b4"].reshape(1, FC_HIDDEN).astype(jnp.float32)
    prep["w5"] = params["w5"].astype(jnp.bfloat16)
    prep["b5"] = params["b5"].reshape(1, -1).astype(jnp.float32)
    return prep


def reference_forward(params, x, cfg):
    """Pure-JAX f32 reference of the torch module (NCHW activations, HWIO weights)."""
    hi = jax.lax.Precision.HIGHEST
    y = x.astype(jnp.float32)
    for l in range(3):
        y = jax.lax.conv_general_dilated(
            y, params[f"w{l+1}"], window_strides=(STRIDES[l],) * 2,
            padding=((cfg.pads[l], cfg.pads[l]),) * 2,
            dimension_numbers=("NCHW", "HWIO", "NCHW"), precision=hi)
        y = jax.nn.relu(y + params[f"b{l+1}"][None, :, None, None])
    y = y.reshape(y.shape[0], -1)                    # Flatten on NCHW == (c, h, w)
    y = jax.nn.relu(jnp.dot(y, params["w4"], precision=hi) + params["b4"])
    return jnp.dot(y, params["w5"], precision=hi) + params["b5"]


if __name__ == "__main__":
    key = jax.random.PRNGKey(0)
    kx, kp = jax.random.split(key)

    # observation_space = (H, W, n_channels) with n_channels=1 and frame-stack 4
    # -> conv input channels 4; num_actions = 4.
    B, C_in, H, W = 2, 4, 8, 8
    num_actions = 4
    N_pad = 16  # batch padded to the bf16 sublane tile (alignment + MXU M-occupancy)

    cfg = make_config(N_pad, C_in, H, W, num_actions)
    x = jax.random.normal(kx, (B, C_in, H, W), jnp.float32)   # NCHW like torch
    params = init_params(kp, C_in, H, W, num_actions)
    prep = prepare_params(params, cfg)

    out = nature_dqn_forward(cfg, x, prep)
    out = jax.block_until_ready(out)
    assert out.shape == (B, num_actions), out.shape
    assert out.dtype == jnp.float32

    # Correctness vs. an f32 reference of the torch module (bf16 MXU path => loose tol).
    ref = jax.block_until_ready(reference_forward(params, x, cfg))
    np.testing.assert_allclose(np.asarray(out), np.asarray(ref), rtol=5e-2, atol=1e-1)

    print("KERNEL_OK")
</pallas_src>

<mosaic_0001>
module attributes {stable_mosaic.version = 11 : i64} {
  func.func @kernel(%arg0: i32, %arg1: memref<576x32xbf16, #tpu.memory_space<vmem>>, %arg2: memref<8x32x256xbf16, #tpu.memory_space<vmem>>, %arg3: memref<1x256xf32, #tpu.memory_space<vmem>>, %arg4: memref<4x256x512xbf16, #tpu.memory_space<vmem>>, %arg5: memref<1x512xf32, #tpu.memory_space<vmem>>, %arg6: memref<3x512x512xbf16, #tpu.memory_space<vmem>>, %arg7: memref<1x512xf32, #tpu.memory_space<vmem>>, %arg8: memref<1x512x512xbf16, #tpu.memory_space<vmem>>, %arg9: memref<1x512xf32, #tpu.memory_space<vmem>>, %arg10: memref<512x4xbf16, #tpu.memory_space<vmem>>, %arg11: memref<1x4xf32, #tpu.memory_space<vmem>>, %arg12: memref<16x4xf32, #tpu.memory_space<vmem>>, %arg13: memref<288x256xbf16, #tpu.memory_space<vmem>>, %arg14: memref<160x512xbf16, #tpu.memory_space<vmem>>, %arg15: memref<8x16x512xbf16, #tpu.memory_space<vmem>>, %arg16: memref<16x512xf32, #tpu.memory_space<vmem>>) attributes {dimension_semantics = [#tpu.dimension_semantics<arbitrary>], iteration_bounds = array<i64: 8>, scalar_prefetch = 0 : i64, scratch_operands = 4 : i64, tpu.core_type = #tpu.core_type<tc>, window_params = [{pipeline_mode = #tpu.pipeline_mode<synchronous>, transform_indices = @transform_0, window_bounds = array<i64: 576, 32>}, {pipeline_mode = #tpu.pipeline_mode<synchronous>, transform_indices = @transform_1, window_bounds = array<i64: 8, 32, 256>}, {pipeline_mode = #tpu.pipeline_mode<synchronous>, transform_indices = @transform_2, window_bounds = array<i64: 1, 256>}, {pipeline_mode = #tpu.pipeline_mode<synchronous>, transform_indices = @transform_3, window_bounds = array<i64: 4, 256, 512>}, {pipeline_mode = #tpu.pipeline_mode<synchronous>, transform_indices = @transform_4, window_bounds = array<i64: 1, 512>}, {pipeline_mode = #tpu.pipeline_mode<synchronous>, transform_indices = @transform_5, window_bounds = array<i64: 3, 512, 512>}, {pipeline_mode = #tpu.pipeline_mode<synchronous>, transform_indices = @transform_6, window_bounds = array<i64: 1, 512>}, {transform_indices = @transform_7, window_bounds = array<i64: 1, 512, 512>}, {pipeline_mode = #tpu.pipeline_mode<synchronous>, transform_indices = @transform_8, window_bounds = array<i64: 1, 512>}, {pipeline_mode = #tpu.pipeline_mode<synchronous>, transform_indices = @transform_9, window_bounds = array<i64: 512, 4>}, {pipeline_mode = #tpu.pipeline_mode<synchronous>, transform_indices = @transform_10, window_bounds = array<i64: 1, 4>}, {pipeline_mode = #tpu.pipeline_mode<synchronous>, transform_indices = @transform_11, window_bounds = array<i64: 16, 4>}]} {
    %c0_i32 = arith.constant 0 : i32
    %0 = arith.cmpi eq, %arg0, %c0_i32 : i32
    %1 = arith.extui %0 : i1 to i32
    %c0_i32_0 = arith.constant 0 : i32
    %2 = arith.cmpi ne, %1, %c0_i32_0 : i32
    scf.if %2 {
      %cst_10 = arith.constant 0.000000e+00 : bf16
      %15 = vector.broadcast %cst_10 : bf16 to vector<48x256xbf16>
      %c0_11 = arith.constant 0 : index
      %c0_12 = arith.constant 0 : index
      %16 = vector.load %arg13[%c0_11, %c0_12] : memref<288x256xbf16, #tpu.memory_space<vmem>>, vector<48x256xbf16>
      tpu.vector_store %arg13[%c0_11, %c0_12], %15 {strides = array<i32>} : memref<288x256xbf16, #tpu.memory_space<vmem>>, vector<48x256xbf16>,
      %cst_13 = arith.constant 0.000000e+00 : bf16
      %17 = vector.broadcast %cst_13 : bf16 to vector<32x256xbf16>
      %c112 = arith.constant 112 : index
      %c0_14 = arith.constant 0 : index
      %18 = vector.load %arg13[%c112, %c0_14] : memref<288x256xbf16, #tpu.memory_space<vmem>>, vector<32x256xbf16>
      tpu.vector_store %arg13[%c112, %c0_14], %17 {strides = array<i32>} : memref<288x256xbf16, #tpu.memory_space<vmem>>, vector<32x256xbf16>,
      %cst_15 = arith.constant 0.000000e+00 : bf16
      %19 = vector.broadcast %cst_15 : bf16 to vector<32x256xbf16>
      %c144 = arith.constant 144 : index
      %c0_16 = arith.constant 0 : index
      %20 = vector.load %arg13[%c144, %c0_16] : memref<288x256xbf16, #tpu.memory_space<vmem>>, vector<32x256xbf16>
      tpu.vector_store %arg13[%c144, %c0_16], %19 {strides = array<i32>} : memref<288x256xbf16, #tpu.memory_space<vmem>>, vector<32x256xbf16>,
      %cst_17 = arith.constant 0.000000e+00 : bf16
      %21 = vector.broadcast %cst_17 : bf16 to vector<48x256xbf16>
      %c240 = arith.constant 240 : index
      %c0_18 = arith.constant 0 : index
      %22 = vector.load %arg13[%c240, %c0_18] : memref<288x256xbf16, #tpu.memory_space<vmem>>, vector<48x256xbf16>
      tpu.vector_store %arg13[%c240, %c0_18], %21 {strides = array<i32>} : memref<288x256xbf16, #tpu.memory_space<vmem>>, vector<48x256xbf16>,
      %c0_19 = arith.constant 0 : index
      %c0_20 = arith.constant 0 : index
      %23 = vector.load %arg1[%c0_19, %c0_20] : memref<576x32xbf16, #tpu.memory_space<vmem>>, vector<128x32xbf16>
      %c0_21 = arith.constant 0 : index
      %c0_22 = arith.constant 0 : index
      %c0_23 = arith.constant 0 : index
      %24 = vector.load %arg2[%c0_21, %c0_22, %c0_23] : memref<8x32x256xbf16, #tpu.memory_space<vmem>>, vector<1x32x256xbf16>
      %25 = vector.shape_cast %24 : vector<1x32x256xbf16> to vector<32x256xbf16>
      %cst_24 = arith.constant dense<0.000000e+00> : vector<128x256xf32>
      %26 = tpu.matmul %23, %25, %cst_24 {dimension_numbers = #tpu.dot_dimension_numbers<[1], [0], [0], [1], [0, 0, 1, 1], [], []>} : vector<128x32xbf16>, vector<32x256xbf16>, vector<128x256xf32> -> vector<128x256xf32>
      %c144_25 = arith.constant 144 : index
      %c0_26 = arith.constant 0 : index
      %27 = vector.load %arg1[%c144_25, %c0_26] : memref<576x32xbf16, #tpu.memory_space<vmem>>, vector<128x32xbf16>
      %c1 = arith.constant 1 : index
      %c0_27 = arith.constant 0 : index
      %c0_28 = arith.constant 0 : index
      %28 = vector.load %arg2[%c1, %c0_27, %c0_28] : memref<8x32x256xbf16, #tpu.memory_space<vmem>>, vector<1x32x256xbf16>
      %29 = vector.shape_cast %28 : vector<1x32x256xbf16> to vector<32x256xbf16>
      %cst_29 = arith.constant dense<0.000000e+00> : vector<128x256xf32>
      %30 = tpu.matmul %27, %29, %cst_29 {dimension_numbers = #tpu.dot_dimension_numbers<[1], [0], [0], [1], [0, 0, 1, 1], [], []>} : vector<128x32xbf16>, vector<32x256xbf16>, vector<128x256xf32> -> vector<128x256xf32>
      %31 = arith.addf %26, %30 : vector<128x256xf32>
      %c288 = arith.constant 288 : index
      %c0_30 = arith.constant 0 : index
      %32 = vector.load %arg1[%c288, %c0_30] : memref<576x32xbf16, #tpu.memory_space<vmem>>, vector<128x32xbf16>
      %c2 = arith.constant 2 : index
      %c0_31 = arith.constant 0 : index
      %c0_32 = arith.constant 0 : index
      %33 = vector.load %arg2[%c2, %c0_31, %c0_32] : memref<8x32x256xbf16, #tpu.memory_space<vmem>>, vector<1x32x256xbf16>
      %34 = vector.shape_cast %33 : vector<1x32x256xbf16> to vector<32x256xbf16>
      %cst_33 = arith.constant dense<0.000000e+00> : vector<128x256xf32>
      %35 = tpu.matmul %32, %34, %cst_33 {dimension_numbers = #tpu.dot_dimension_numbers<[1], [0], [0], [1], [0, 0, 1, 1], [], []>} : vector<128x32xbf16>, vector<32x256xbf16>, vector<128x256xf32> -> vector<128x256xf32>
      %36 = arith.addf %31, %35 : vector<128x256xf32>
      %c432 = arith.constant 432 : index
      %c0_34 = arith.constant 0 : index
      %37 = vector.load %arg1[%c432, %c0_34] : memref<576x32xbf16, #tpu.memory_space<vmem>>, vector<128x32xbf16>
      %c3 = arith.constant 3 : index
      %c0_35 = arith.constant 0 : index
      %c0_36 = arith.constant 0 : index
      %38 = vector.load %arg2[%c3, %c0_35, %c0_36] : memref<8x32x256xbf16, #tpu.memory_space<vmem>>, vector<1x32x256xbf16>
      %39 = vector.shape_cast %38 : vector<1x32x256xbf16> to vector<32x256xbf16>
      %cst_37 = arith.constant dense<0.000000e+00> : vector<128x256xf32>
      %40 = tpu.matmul %37, %39, %cst_37 {dimension_numbers = #tpu.dot_dimension_numbers<[1], [0], [0], [1], [0, 0, 1, 1], [], []>} : vector<128x32xbf16>, vector<32x256xbf16>, vector<128x256xf32> -> vector<128x256xf32>
      %41 = arith.addf %36, %40 : vector<128x256xf32>
      %c16 = arith.constant 16 : index
      %c0_38 = arith.constant 0 : index
      %42 = vector.load %arg1[%c16, %c0_38] : memref<576x32xbf16, #tpu.memory_space<vmem>>, vector<128x32xbf16>
      %c4 = arith.constant 4 : index
      %c0_39 = arith.constant 0 : index
      %c0_40 = arith.constant 0 : index
      %43 = vector.load %arg2[%c4, %c0_39, %c0_40] : memref<8x32x256xbf16, #tpu.memory_space<vmem>>, vector<1x32x256xbf16>
      %44 = vector.shape_cast %43 : vector<1x32x256xbf16> to vector<32x256xbf16>
      %cst_41 = arith.constant dense<0.000000e+00> : vector<128x256xf32>
      %45 = tpu.matmul %42, %44, %cst_41 {dimension_numbers = #tpu.dot_dimension_numbers<[1], [0], [0], [1], [0, 0, 1, 1], [], []>} : vector<128x32xbf16>, vector<32x256xbf16>, vector<128x256xf32> -> vector<128x256xf32>
      %46 = arith.addf %41, %45 : vector<128x256xf32>
      %c160 = arith.constant 160 : index
      %c0_42 = arith.constant 0 : index
      %47 = vector.load %arg1[%c160, %c0_42] : memref<576x32xbf16, #tpu.memory_space<vmem>>, vector<128x32xbf16>
      %c5 = arith.constant 5 : index
      %c0_43 = arith.constant 0 : index
      %c0_44 = arith.constant 0 : index
      %48 = vector.load %arg2[%c5, %c0_43, %c0_44] : memref<8x32x256xbf16, #tpu.memory_space<vmem>>, vector<1x32x256xbf16>
      %49 = vector.shape_cast %48 : vector<1x32x256xbf16> to vector<32x256xbf16>
      %cst_45 = arith.constant dense<0.000000e+00> : vector<128x256xf32>
      %50 = tpu.matmul %47, %49, %cst_45 {dimension_numbers = #tpu.dot_dimension_numbers<[1], [0], [0], [1], [0, 0, 1, 1], [], []>} : vector<128x32xbf16>, vector<32x256xbf16>, vector<128x256xf32> -> vector<128x256xf32>
      %51 = arith.addf %46, %50 : vector<128x256xf32>
      %c304 = arith.constant 304 : index
      %c0_46 = arith.constant 0 : index
      %52 = vector.load %arg1[%c304, %c0_46] : memref<576x32xbf16, #tpu.memory_space<vmem>>, vector<128x32xbf16>
      %c6 = arith.constant 6 : index
      %c0_47 = arith.constant 0 : index
      %c0_48 = arith.constant 0 : index
      %53 = vector.load %arg2[%c6, %c0_47, %c0_48] : memref<8x32x256xbf16, #tpu.memory_space<vmem>>, vector<1x32x256xbf16>
      %54 = vector.shape_cast %53 : vector<1x32x256xbf16> to vector<32x256xbf16>
      %cst_49 = arith.constant dense<0.000000e+00> : vector<128x256xf32>
      %55 = tpu.matmul %52, %54, %cst_49 {dimension_numbers = #tpu.dot_dimension_numbers<[1], [0], [0], [1], [0, 0, 1, 1], [], []>} : vector<128x32xbf16>, vector<32x256xbf16>, vector<128x256xf32> -> vector<128x256xf32>
      %56 = arith.addf %51, %55 : vector<128x256xf32>
      %c448 = arith.constant 448 : index
      %c0_50 = arith.constant 0 : index
      %57 = vector.load %arg1[%c448, %c0_50] : memref<576x32xbf16, #tpu.memory_space<vmem>>, vector<128x32xbf16>
      %c7 = arith.constant 7 : index
      %c0_51 = arith.constant 0 : index
      %c0_52 = arith.constant 0 : index
      %58 = vector.load %arg2[%c7, %c0_51, %c0_52] : memref<8x32x256xbf16, #tpu.memory_space<vmem>>, vector<1x32x256xbf16>
      %59 = vector.shape_cast %58 : vector<1x32x256xbf16> to vector<32x256xbf16>
      %cst_53 = arith.constant dense<0.000000e+00> : vector<128x256xf32>
      %60 = tpu.matmul %57, %59, %cst_53 {dimension_numbers = #tpu.dot_dimension_numbers<[1], [0], [0], [1], [0, 0, 1, 1], [], []>} : vector<128x32xbf16>, vector<32x256xbf16>, vector<128x256xf32> -> vector<128x256xf32>
      %61 = arith.addf %56, %60 : vector<128x256xf32>
      %c0_54 = arith.constant 0 : index
      %c0_55 = arith.constant 0 : index
      %62 = vector.load %arg3[%c0_54, %c0_55] : memref<1x256xf32, #tpu.memory_space<vmem>>, vector<1x256xf32>
      %63 = vector.broadcast %62 : vector<1x256xf32> to vector<128x256xf32>
      %64 = arith.addf %61, %63 : vector<128x256xf32>
      %cst_56 = arith.constant 0.000000e+00 : f32
      %65 = vector.broadcast %cst_56 : f32 to vector<128x256xf32>
      %66 = arith.maximumf %64, %65 : vector<128x256xf32>
      %67 = arith.truncf %66 : vector<128x256xf32> to vector<128x256xbf16>
      %68 = vector.extract_strided_slice %67 {offsets = [0, 0], sizes = [16, 256], strides = [1, 1]} : vector<128x256xbf16> to vector<16x256xbf16>
      %c176 = arith.constant 176 : index
      %c0_57 = arith.constant 0 : index
      %69 = vector.load %arg13[%c176, %c0_57] : memref<288x256xbf16, #tpu.memory_space<vmem>>, vector<16x256xbf16>
      tpu.vector_store %arg13[%c176, %c0_57], %68 {strides = array<i32>} : memref<288x256xbf16, #tpu.memory_space<vmem>>, vector<16x256xbf16>,
      %70 = vector.extract_strided_slice %67 {offsets = [16, 0], sizes = [16, 256], strides = [1, 1]} : vector<128x256xbf16> to vector<16x256xbf16>
      %c48 = arith.constant 48 : index
      %c0_58 = arith.constant 0 : index
      %71 = vector.load %arg13[%c48, %c0_58] : memref<288x256xbf16, #tpu.memory_space<vmem>>, vector<16x256xbf16>
      tpu.vector_store %arg13[%c48, %c0_58], %70 {strides = array<i32>} : memref<288x256xbf16, #tpu.memory_space<vmem>>, vector<16x256xbf16>,
      %72 = vector.extract_strided_slice %67 {offsets = [32, 0], sizes = [16, 256], strides = [1, 1]} : vector<128x256xbf16> to vector<16x256xbf16>
      %c192 = arith.constant 192 : index
      %c0_59 = arith.constant 0 : index
      %73 = vector.load %arg13[%c192, %c0_59] : memref<288x256xbf16, #tpu.memory_space<vmem>>, vector<16x256xbf16>
      tpu.vector_store %arg13[%c192, %c0_59], %72 {strides = array<i32>} : memref<288x256xbf16, #tpu.memory_space<vmem>>, vector<16x256xbf16>,
      %74 = vector.extract_strided_slice %67 {offsets = [48, 0], sizes = [16, 256], strides = [1, 1]} : vector<128x256xbf16> to vector<16x256xbf16>
      %c64 = arith.constant 64 : index
      %c0_60 = arith.constant 0 : index
      %75 = vector.load %arg13[%c64, %c0_60] : memref<288x256xbf16, #tpu.memory_space<vmem>>, vector<16x256xbf16>
      tpu.vector_store %arg13[%c64, %c0_60], %74 {strides = array<i32>} : memref<288x256xbf16, #tpu.memory_space<vmem>>, vector<16x256xbf16>,
      %76 = vector.extract_strided_slice %67 {offsets = [64, 0], sizes = [16, 256], strides = [1, 1]} : vector<128x256xbf16> to vector<16x256xbf16>
      %c208 = arith.constant 208 : index
      %c0_61 = arith.constant 0 : index
      %77 = vector.load %arg13[%c208, %c0_61] : memref<288x256xbf16, #tpu.memory_space<vmem>>, vector<16x256xbf16>
      tpu.vector_store %arg13[%c208, %c0_61], %76 {strides = array<i32>} : memref<288x256xbf16, #tpu.memory_space<vmem>>, vector<16x256xbf16>,
      %78 = vector.extract_strided_slice %67 {offsets = [80, 0], sizes = [16, 256], strides = [1, 1]} : vector<128x256xbf16> to vector<16x256xbf16>
      %c80 = arith.constant 80 : index
      %c0_62 = arith.constant 0 : index
      %79 = vector.load %arg13[%c80, %c0_62] : memref<288x256xbf16, #tpu.memory_space<vmem>>, vector<16x256xbf16>
      tpu.vector_store %arg13[%c80, %c0_62], %78 {strides = array<i32>} : memref<288x256xbf16, #tpu.memory_space<vmem>>, vector<16x256xbf16>,
      %80 = vector.extract_strided_slice %67 {offsets = [96, 0], sizes = [16, 256], strides = [1, 1]} : vector<128x256xbf16> to vector<16x256xbf16>
      %c224 = arith.constant 224 : index
      %c0_63 = arith.constant 0 : index
      %81 = vector.load %arg13[%c224, %c0_63] : memref<288x256xbf16, #tpu.memory_space<vmem>>, vector<16x256xbf16>
      tpu.vector_store %arg13[%c224, %c0_63], %80 {strides = array<i32>} : memref<288x256xbf16, #tpu.memory_space<vmem>>, vector<16x256xbf16>,
      %82 = vector.extract_strided_slice %67 {offsets = [112, 0], sizes = [16, 256], strides = [1, 1]} : vector<128x256xbf16> to vector<16x256xbf16>
      %c96 = arith.constant 96 : index
      %c0_64 = arith.constant 0 : index
      %83 = vector.load %arg13[%c96, %c0_64] : memref<288x256xbf16, #tpu.memory_space<vmem>>, vector<16x256xbf16>
      tpu.vector_store %arg13[%c96, %c0_64], %82 {strides = array<i32>} : memref<288x256xbf16, #tpu.memory_space<vmem>>, vector<16x256xbf16>,
      %cst_65 = arith.constant 0.000000e+00 : bf16
      %84 = vector.broadcast %cst_65 : bf16 to vector<16x512xbf16>
      %c0_66 = arith.constant 0 : index
      %c0_67 = arith.constant 0 : index
      %85 = vector.load %arg14[%c0_66, %c0_67] : memref<160x512xbf16, #tpu.memory_space<vmem>>, vector<16x512xbf16>
      tpu.vector_store %arg14[%c0_66, %c0_67], %84 {strides = array<i32>} : memref<160x512xbf16, #tpu.memory_space<vmem>>, vector<16x512xbf16>,
      %cst_68 = arith.constant 0.000000e+00 : bf16
      %86 = vector.broadcast %cst_68 : bf16 to vector<16x512xbf16>
      %c144_69 = arith.constant 144 : index
      %c0_70 = arith.constant 0 : index
      %87 = vector.load %arg14[%c144_69, %c0_70] : memref<160x512xbf16, #tpu.memory_space<vmem>>, vector<16x512xbf16>
      tpu.vector_store %arg14[%c144_69, %c0_70], %86 {strides = array<i32>} : memref<160x512xbf16, #tpu.memory_space<vmem>>, vector<16x512xbf16>,
      %c0_71 = arith.constant 0 : index
      %c0_72 = arith.constant 0 : index
      %88 = vector.load %arg13[%c0_71, %c0_72] : memref<288x256xbf16, #tpu.memory_space<vmem>>, vector<128x256xbf16>
      %c0_73 = arith.constant 0 : index
      %c0_74 = arith.constant 0 : index
      %c0_75 = arith.constant 0 : index
      %89 = vector.load %arg4[%c0_73, %c0_74, %c0_75] : memref<4x256x512xbf16, #tpu.memory_space<vmem>>, vector<1x256x512xbf16>
      %90 = vector.shape_cast %89 : vector<1x256x512xbf16> to vector<256x512xbf16>
      %cst_76 = arith.constant dense<0.000000e+00> : vector<128x512xf32>
      %91 = tpu.matmul %88, %90, %cst_76 {dimension_numbers = #tpu.dot_dimension_numbers<[1], [0], [0], [1], [0, 0, 1, 1], [], []>} : vector<128x256xbf16>, vector<256x512xbf16>, vector<128x512xf32> -> vector<128x512xf32>
      %c144_77 = arith.constant 144 : index
      %c0_78 = arith.constant 0 : index
      %92 = vector.load %arg13[%c144_77, %c0_78] : memref<288x256xbf16, #tpu.memory_space<vmem>>, vector<128x256xbf16>
      %c1_79 = arith.constant 1 : index
      %c0_80 = arith.constant 0 : index
      %c0_81 = arith.constant 0 : index
      %93 = vector.load %arg4[%c1_79, %c0_80, %c0_81] : memref<4x256x512xbf16, #tpu.memory_space<vmem>>, vector<1x256x512xbf16>
      %94 = vector.shape_cast %93 : vector<1x256x512xbf16> to vector<256x512xbf16>
      %cst_82 = arith.constant dense<0.000000e+00> : vector<128x512xf32>
      %95 = tpu.matmul %92, %94, %cst_82 {dimension_numbers = #tpu.dot_dimension_numbers<[1], [0], [0], [1], [0, 0, 1, 1], [], []>} : vector<128x256xbf16>, vector<256x512xbf16>, vector<128x512xf32> -> vector<128x512xf32>
      %96 = arith.addf %91, %95 : vector<128x512xf32>
      %c16_83 = arith.constant 16 : index
      %c0_84 = arith.constant 0 : index
      %97 = vector.load %arg13[%c16_83, %c0_84] : memref<288x256xbf16, #tpu.memory_space<vmem>>, vector<128x256xbf16>
      %c2_85 = arith.constant 2 : index
      %c0_86 = arith.constant 0 : index
      %c0_87 = arith.constant 0 : index
      %98 = vector.load %arg4[%c2_85, %c0_86, %c0_87] : memref<4x256x512xbf16, #tpu.memory_space<vmem>>, vector<1x256x512xbf16>
      %99 = vector.shape_cast %98 : vector<1x256x512xbf16> to vector<256x512xbf16>
      %cst_88 = arith.constant dense<0.000000e+00> : vector<128x512xf32>
      %100 = tpu.matmul %97, %99, %cst_88 {dimension_numbers = #tpu.dot_dimension_numbers<[1], [0], [0], [1], [0, 0, 1, 1], [], []>} : vector<128x256xbf16>, vector<256x512xbf16>, vector<128x512xf32> -> vector<128x512xf32>
      %101 = arith.addf %96, %100 : vector<128x512xf32>
      %c160_89 = arith.constant 160 : index
      %c0_90 = arith.constant 0 : index
      %102 = vector.load %arg13[%c160_89, %c0_90] : memref<288x256xbf16, #tpu.memory_space<vmem>>, vector<128x256xbf16>
      %c3_91 = arith.constant 3 : index
      %c0_92 = arith.constant 0 : index
      %c0_93 = arith.constant 0 : index
      %103 = vector.load %arg4[%c3_91, %c0_92, %c0_93] : memref<4x256x512xbf16, #tpu.memory_space<vmem>>, vector<1x256x512xbf16>
      %104 = vector.shape_cast %103 : vector<1x256x512xbf16> to vector<256x512xbf16>
      %cst_94 = arith.constant dense<0.000000e+00> : vector<128x512xf32>
      %105 = tpu.matmul %102, %104, %cst_94 {dimension_numbers = #tpu.dot_dimension_numbers<[1], [0], [0], [1], [0, 0, 1, 1], [], []>} : vector<128x256xbf16>, vector<256x512xbf16>, vector<128x512xf32> -> vector<128x512xf32>
      %106 = arith.addf %101, %105 : vector<128x512xf32>
      %c0_95 = arith.constant 0 : index
      %c0_96 = arith.constant 0 : index
      %107 = vector.load %arg5[%c0_95, %c0_96] : memref<1x512xf32, #tpu.memory_space<vmem>>, vector<1x512xf32>
      %108 = vector.broadcast %107 : vector<1x512xf32> to vector<128x512xf32>
      %109 = arith.addf %106, %108 : vector<128x512xf32>
      %cst_97 = arith.constant 0.000000e+00 : f32
      %110 = vector.broadcast %cst_97 : f32 to vector<128x512xf32>
      %111 = arith.maximumf %109, %110 : vector<128x512xf32>
      %112 = arith.truncf %111 : vector<128x512xf32> to vector<128x512xbf16>
      %c16_98 = arith.constant 16 : index
      %c0_99 = arith.constant 0 : index
      %113 = vector.load %arg14[%c16_98, %c0_99] : memref<160x512xbf16, #tpu.memory_space<vmem>>, vector<128x512xbf16>
      tpu.vector_store %arg14[%c16_98, %c0_99], %112 {strides = array<i32>} : memref<160x512xbf16, #tpu.memory_space<vmem>>, vector<128x512xbf16>,
      %c0_100 = arith.constant 0 : index
      %c0_101 = arith.constant 0 : index
      %114 = vector.load %arg14[%c0_100, %c0_101] : memref<160x512xbf16, #tpu.memory_space<vmem>>, vector<128x512xbf16>
      %c0_102 = arith.constant 0 : index
      %c0_103 = arith.constant 0 : index
      %c0_104 = arith.constant 0 : index
      %115 = vector.load %arg6[%c0_102, %c0_103, %c0_104] : memref<3x512x512xbf16, #tpu.memory_space<vmem>>, vector<1x512x512xbf16>
      %116 = vector.shape_cast %115 : vector<1x512x512xbf16> to vector<512x512xbf16>
      %cst_105 = arith.constant dense<0.000000e+00> : vector<128x512xf32>
      %117 = tpu.matmul %114, %116, %cst_105 {dimension_numbers = #tpu.dot_dimension_numbers<[1], [0], [0], [1], [0, 0, 1, 1], [], []>} : vector<128x512xbf16>, vector<512x512xbf16>, vector<128x512xf32> -> vector<128x512xf32>
      %c16_106 = arith.constant 16 : index
      %c0_107 = arith.constant 0 : index
      %118 = vector.load %arg14[%c16_106, %c0_107] : memref<160x512xbf16, #tpu.memory_space<vmem>>, vector<128x512xbf16>
      %c1_108 = arith.constant 1 : index
      %c0_109 = arith.constant 0 : index
      %c0_110 = arith.constant 0 : index
      %119 = vector.load %arg6[%c1_108, %c0_109, %c0_110] : memref<3x512x512xbf16, #tpu.memory_space<vmem>>, vector<1x512x512xbf16>
      %120 = vector.shape_cast %119 : vector<1x512x512xbf16> to vector<512x512xbf16>
      %cst_111 = arith.constant dense<0.000000e+00> : vector<128x512xf32>
      %121 = tpu.matmul %118, %120, %cst_111 {dimension_numbers = #tpu.dot_dimension_numbers<[1], [0], [0], [1], [0, 0, 1, 1], [], []>} : vector<128x512xbf16>, vector<512x512xbf16>, vector<128x512xf32> -> vector<128x512xf32>
      %122 = arith.addf %117, %121 : vector<128x512xf32>
      %c32 = arith.constant 32 : index
      %c0_112 = arith.constant 0 : index
      %123 = vector.load %arg14[%c32, %c0_112] : memref<160x512xbf16, #tpu.memory_space<vmem>>, vector<128x512xbf16>
      %c2_113 = arith.constant 2 : index
      %c0_114 = arith.constant 0 : index
      %c0_115 = arith.constant 0 : index
      %124 = vector.load %arg6[%c2_113, %c0_114, %c0_115] : memref<3x512x512xbf16, #tpu.memory_space<vmem>>, vector<1x512x512xbf16>
      %125 = vector.shape_cast %124 : vector<1x512x512xbf16> to vector<512x512xbf16>
      %cst_116 = arith.constant dense<0.000000e+00> : vector<128x512xf32>
      %126 = tpu.matmul %123, %125, %cst_116 {dimension_numbers = #tpu.dot_dimension_numbers<[1], [0], [0], [1], [0, 0, 1, 1], [], []>} : vector<128x512xbf16>, vector<512x512xbf16>, vector<128x512xf32> -> vector<128x512xf32>
      %127 = arith.addf %122, %126 : vector<128x512xf32>
      %c0_117 = arith.constant 0 : index
      %c0_118 = arith.constant 0 : index
      %128 = vector.load %arg7[%c0_117, %c0_118] : memref<1x512xf32, #tpu.memory_space<vmem>>, vector<1x512xf32>
      %129 = vector.broadcast %128 : vector<1x512xf32> to vector<128x512xf32>
      %130 = arith.addf %127, %129 : vector<128x512xf32>
      %cst_119 = arith.constant 0.000000e+00 : f32
      %131 = vector.broadcast %cst_119 : f32 to vector<128x512xf32>
      %132 = arith.maximumf %130, %131 : vector<128x512xf32>
      %133 = arith.truncf %132 : vector<128x512xf32> to vector<128x512xbf16>
      %134 = vector.shape_cast %133 : vector<128x512xbf16> to vector<8x16x512xbf16>
      %c0_120 = arith.constant 0 : index
      %c0_121 = arith.constant 0 : index
      %c0_122 = arith.constant 0 : index
      %135 = vector.load %arg15[%c0_120, %c0_121, %c0_122] : memref<8x16x512xbf16, #tpu.memory_space<vmem>>, vector<8x16x512xbf16>
      tpu.vector_store %arg15[%c0_120, %c0_121, %c0_122], %134 {strides = array<i32>} : memref<8x16x512xbf16, #tpu.memory_space<vmem>>, vector<8x16x512xbf16>,
      %cst_123 = arith.constant 0.000000e+00 : f32
      %136 = vector.broadcast %cst_123 : f32 to vector<16x512xf32>
      %c0_124 = arith.constant 0 : index
      %c0_125 = arith.constant 0 : index
      %137 = vector.load %arg16[%c0_124, %c0_125] : memref<16x512xf32, #tpu.memory_space<vmem>>, vector<16x512xf32>
      tpu.vector_store %arg16[%c0_124, %c0_125], %136 {strides = array<i32>} : memref<16x512xf32, #tpu.memory_space<vmem>>, vector<16x512xf32>,
    } else {
    }
    %c0 = arith.constant 0 : index
    %c0_1 = arith.constant 0 : index
    %3 = vector.load %arg16[%c0, %c0_1] : memref<16x512xf32, #tpu.memory_space<vmem>>, vector<16x512xf32>
    %4 = arith.index_cast %arg0 : i32 to index
    %c0_2 = arith.constant 0 : index
    %c0_3 = arith.constant 0 : index
    %5 = vector.load %arg15[%4, %c0_2, %c0_3] : memref<8x16x512xbf16, #tpu.memory_space<vmem>>, vector<1x16x512xbf16>
    %6 = vector.shape_cast %5 : vector<1x16x512xbf16> to vector<16x512xbf16>
    %c0_4 = arith.constant 0 : index
    %c0_5 = arith.constant 0 : index
    %c0_6 = arith.constant 0 : index
    %7 = vector.load %arg8[%c0_4, %c0_5, %c0_6] : memref<1x512x512xbf16, #tpu.memory_space<vmem>>, vector<1x512x512xbf16>
    %8 = vector.shape_cast %7 : vector<1x512x512xbf16> to vector<512x512xbf16>
    %cst = arith.constant dense<0.000000e+00> : vector<16x512xf32>
    %9 = tpu.matmul %6, %8, %cst {dimension_numbers = #tpu.dot_dimension_numbers<[1], [0], [0], [1], [0, 0, 1, 1], [], []>} : vector<16x512xbf16>, vector<512x512xbf16>, vector<16x512xf32> -> vector<16x512xf32>
    %10 = arith.addf %3, %9 : vector<16x512xf32>
    %c0_7 = arith.constant 0 : index
    %c0_8 = arith.constant 0 : index
    %11 = vector.load %arg16[%c0_7, %c0_8] : memref<16x512xf32, #tpu.memory_space<vmem>>, vector<16x512xf32>
    tpu.vector_store %arg16[%c0_7, %c0_8], %10 {strides = array<i32>} : memref<16x512xf32, #tpu.memory_space<vmem>>, vector<16x512xf32>,
    %c7_i32 = arith.constant 7 : i32
    %12 = arith.cmpi eq, %arg0, %c7_i32 : i32
    %13 = arith.extui %12 : i1 to i32
    %c0_i32_9 = arith.constant 0 : i32
    %14 = arith.cmpi ne, %13, %c0_i32_9 : i32
    scf.if %14 {
      %c0_10 = arith.constant 0 : index
      %c0_11 = arith.constant 0 : index
      %15 = vector.load %arg16[%c0_10, %c0_11] : memref<16x512xf32, #tpu.memory_space<vmem>>, vector<16x512xf32>
      %c0_12 = arith.constant 0 : index
      %c0_13 = arith.constant 0 : index
      %16 = vector.load %arg9[%c0_12, %c0_13] : memref<1x512xf32, #tpu.memory_space<vmem>>, vector<1x512xf32>
      %17 = vector.broadcast %16 : vector<1x512xf32> to vector<16x512xf32>
      %18 = arith.addf %15, %17 : vector<16x512xf32>
      %cst_14 = arith.constant 0.000000e+00 : f32
      %19 = vector.broadcast %cst_14 : f32 to vector<16x512xf32>
      %20 = arith.maximumf %18, %19 : vector<16x512xf32>
      %21 = arith.truncf %20 : vector<16x512xf32> to vector<16x512xbf16>
      %c0_15 = arith.constant 0 : index
      %c0_16 = arith.constant 0 : index
      %22 = vector.load %arg10[%c0_15, %c0_16] : memref<512x4xbf16, #tpu.memory_space<vmem>>, vector<512x4xbf16>
      %cst_17 = arith.constant dense<0.000000e+00> : vector<16x4xf32>
      %23 = tpu.matmul %21, %22, %cst_17 {dimension_numbers = #tpu.dot_dimension_numbers<[1], [0], [0], [1], [0, 0, 1, 1], [], []>} : vector<16x512xbf16>, vector<512x4xbf16>, vector<16x4xf32> -> vector<16x4xf32>
      %c0_18 = arith.constant 0 : index
      %c0_19 = arith.constant 0 : index
      %24 = vector.load %arg11[%c0_18, %c0_19] : memref<1x4xf32, #tpu.memory_space<vmem>>, vector<1x4xf32>
      %25 = vector.broadcast %24 : vector<1x4xf32> to vector<16x4xf32>
      %26 = arith.addf %23, %25 : vector<16x4xf32>
      %c0_20 = arith.constant 0 : index
      %c0_21 = arith.constant 0 : index
      %27 = vector.load %arg12[%c0_20, %c0_21] : memref<16x4xf32, #tpu.memory_space<vmem>>, vector<16x4xf32>
      tpu.vector_store %arg12[%c0_20, %c0_21], %26 {strides = array<i32>} : memref<16x4xf32, #tpu.memory_space<vmem>>, vector<16x4xf32>,
    } else {
    }
    return
  }
  func.func @transform_0(%arg0: i32) -> (i32, i32) {
    %c0_i32 = arith.constant 0 : i32
    %c0_i32_0 = arith.constant 0 : i32
    %c0_i32_1 = arith.constant 0 : i32
    return %c0_i32, %c0_i32_0 : i32, i32
  }
  func.func @transform_1(%arg0: i32) -> (i32, i32, i32) {
    %c0_i32 = arith.constant 0 : i32
    %c0_i32_0 = arith.constant 0 : i32
    %c0_i32_1 = arith.constant 0 : i32
    %c0_i32_2 = arith.constant 0 : i32
    return %c0_i32, %c0_i32_0, %c0_i32_1 : i32, i32, i32
  }
  func.func @transform_2(%arg0: i32) -> (i32, i32) {
    %c0_i32 = arith.constant 0 : i32
    %c0_i32_0 = arith.constant 0 : i32
    %c0_i32_1 = arith.constant 0 : i32
    return %c0_i32, %c0_i32_0 : i32, i32
  }
  func.func @transform_3(%arg0: i32) -> (i32, i32, i32) {
    %c0_i32 = arith.constant 0 : i32
    %c0_i32_0 = arith.constant 0 : i32
    %c0_i32_1 = arith.constant 0 : i32
    %c0_i32_2 = arith.constant 0 : i32
    return %c0_i32, %c0_i32_0, %c0_i32_1 : i32, i32, i32
  }
  func.func @transform_4(%arg0: i32) -> (i32, i32) {
    %c0_i32 = arith.constant 0 : i32
    %c0_i32_0 = arith.constant 0 : i32
    %c0_i32_1 = arith.constant 0 : i32
    return %c0_i32, %c0_i32_0 : i32, i32
  }
  func.func @transform_5(%arg0: i32) -> (i32, i32, i32) {
    %c0_i32 = arith.constant 0 : i32
    %c0_i32_0 = arith.constant 0 : i32
    %c0_i32_1 = arith.constant 0 : i32
    %c0_i32_2 = arith.constant 0 : i32
    return %c0_i32, %c0_i32_0, %c0_i32_1 : i32, i32, i32
  }
  func.func @transform_6(%arg0: i32) -> (i32, i32) {
    %c0_i32 = arith.constant 0 : i32
    %c0_i32_0 = arith.constant 0 : i32
    %c0_i32_1 = arith.constant 0 : i32
    return %c0_i32, %c0_i32_0 : i32, i32
  }
  func.func @transform_7(%arg0: i32) -> (i32, i32, i32) {
    %c0_i32 = arith.constant 0 : i32
    %c0_i32_0 = arith.constant 0 : i32
    %c0_i32_1 = arith.constant 0 : i32
    return %arg0, %c0_i32, %c0_i32_0 : i32, i32, i32
  }
  func.func @transform_8(%arg0: i32) -> (i32, i32) {
    %c0_i32 = arith.constant 0 : i32
    %c0_i32_0 = arith.constant 0 : i32
    %c0_i32_1 = arith.constant 0 : i32
    return %c0_i32, %c0_i32_0 : i32, i32
  }
  func.func @transform_9(%arg0: i32) -> (i32, i32) {
    %c0_i32 = arith.constant 0 : i32
    %c0_i32_0 = arith.constant 0 : i32
    %c0_i32_1 = arith.constant 0 : i32
    return %c0_i32, %c0_i32_0 : i32, i32
  }
  func.func @transform_10(%arg0: i32) -> (i32, i32) {
    %c0_i32 = arith.constant 0 : i32
    %c0_i32_0 = arith.constant 0 : i32
    %c0_i32_1 = arith.constant 0 : i32
    return %c0_i32, %c0_i32_0 : i32, i32
  }
  func.func @transform_11(%arg0: i32) -> (i32, i32) {
    %c0_i32 = arith.constant 0 : i32
    %c0_i32_0 = arith.constant 0 : i32
    %c0_i32_1 = arith.constant 0 : i32
    return %c0_i32, %c0_i32_0 : i32, i32
  }
}

</mosaic_0001>

<bundles_post_ra>
// kernel: nature_dqn_forward.1
= control target key start
LH: loop header
LB: loop body
LE: loop exit
PB: predicated region body
PF: predicated region fallthrough
CT: control target
= control target key end

     0   :  { %s16233_s0 = inlined_call_operand.vmem [shape: bf16[576,32], index: 0, kind: input, shape index: {}]   ;;  %s16234_s1 = inlined_call_operand.hbm [shape: bf16[8,32,256], index: 1, kind: input, shape index: {}]   ;;  %s16235_s2 = inlined_call_operand.hbm [shape: f32[1,256], index: 2, kind: input, shape index: {}]   ;;  %s16236_s3 = inlined_call_operand.hbm [shape: bf16[4,256,512], index: 3, kind: input, shape index: {}]   ;;  %s16237_s4 = inlined_call_operand.hbm [shape: f32[1,512], index: 4, kind: input, shape index: {}]   ;;  %s16238_s5 = inlined_call_operand.hbm [shape: bf16[3,512,512], index: 5, kind: input, shape index: {}]   ;;  %s16239_s6 = inlined_call_operand.hbm [shape: f32[1,512], index: 6, kind: input, shape index: {}]   ;;  %s16240_s7 = inlined_call_operand.hbm [shape: bf16[8,512,512], index: 7, kind: input, shape index: {}]   ;;  %s16241_s8 = inlined_call_operand.hbm [shape: f32[1,512], index: 8, kind: input, shape index: {}]   ;;  %s16242_s9 = inlined_call_operand.vmem [shape: bf16[512,4], index: 9, kind: input, shape index: {}]   ;;  %s16243_s10 = inlined_call_operand.hbm [shape: f32[1,4], index: 10, kind: input, shape index: {}]   ;;  %s16244_s11 = inlined_call_operand.vmem [shape: f32[16,4], index: 11, kind: output, shape index: {}]  }
   0x1   :  { %16248 = sst [smem:[#allocation26_spill]] %s16235_s2 }
   0x2   :  { %16249 = sst [smem:[#allocation27_spill]] %s16237_s4 }
   0x3   :  { %16250 = sst [smem:[#allocation28_spill]] %s16244_s11 }
   0x4   :  { %16 = vsyncpa [#allocation7], 0 }
   0x5   :  { %17 = vsyncpa [#allocation9], 0 }
   0x6   :  { %18 = vsyncpa [#allocation12], 0 }
   0x7   :  { %19 = vsyncpa [#allocation15], 0  ;;  %s14550_s17 = smov 0   ;;  %s14552_s18 = smov 0  }
   0x8   :  { %s14554_s19 = smov 0   ;;  %s14556_s20 = smov 0  }
   0x9 LB: > { %s14475_s21 = smov [#allocation8]   ;;  %s14571_s23 = sadd.s32 4294967295, %s14473_s20   ;;  %s14473_s20 = sphi %s14556_s20, %s16277_s20   ;;  %s14469_s19 = sphi %s14554_s19, %s16276_s19   ;;  %s14465_s18 = sphi %s14552_s18, %s16275_s18   ;;  %s14461_s17 = sphi %s14550_s17, %s16274_s17  }
   0xa   : > { %s316_s22 = sshll.u32 %s14475_s21, 4  ;;  %p10927_p0 = scmp.ge.s32.totalorder %s14473_s20, 1  ;;  %s317_s22 = int_to_ptr.vmem [resolvable:$true] %s316_s22 }
   0xb   : > { %p16245_p1 = scmp.eq.s32.totalorder %s14571_s23, 0  ;;  %p287_p2 = scmp.lt.s32.totalorder %s14473_s20, 9 }
   0xc   : > { %s14476_s25 = smov [#allocation11]   ;;  %s14477_s27 = smov [#allocation6]  }
   0xd   : > { %p14577_p4 = pnand %p10927_p0, %p287_p2  ;;  %s340_s26 = sshll.u32 %s14476_s25, 4  ;;  %s14583_s26 = int_to_ptr.vmem [resolvable:$true] %s340_s26 }
   0xe   : > { %s302_s28 = sshll.u32 %s14477_s27, 4  ;;  %s16253_s2 = sld [smem:[#allocation26_spill]]  ;;  %s14591_s28 = int_to_ptr.vmem [resolvable:$true] %s302_s28 }
   0xf   : > { %s16251_s24 = scalar_select %p14577_p4, 1, 0 }
  0x10   : > { %p12773_p5 = pneg %p14577_p4 }
  0x12   : > { %p14587_p6 = pnand %p12773_p5, %p16245_p1 }
  0x14   : > { %s14161_s13 = scalar_lea.hbm %s16253_s2, 32  ;;  %p14601_p8 = pneg %p14587_p6 }
  0x15   : > { %p14162_p7 = scmp.ne.s32.totalorder %s16253_s2, %s14161_s13  ;;  %p14168_p11 = scmp.lt.u32.totalorder %s14161_s13, %s16253_s2 }
  0x17   : > { %p14164_p9 = pnand %p14601_p8, %p14162_p7 }
  0x19   : > { %p14165_p10 = pneg %p14164_p9 }
  0x1b   : > { %p14170_p12 = pnand %p14168_p11, %p14165_p10 }
  0x1d   : > { %14173 = shalt.err (!%p14170_p12)
}
  0x1e   : > { %s14174_s27 = scalar_lea.vmem %s317_s22, 32  ;;  %p14182_p5 = scmp.lt.s32.totalorder %s317_s22, %s317_s22 }
  0x1f   : > { %p14175_p13 = scmp.ne.s32.totalorder %s317_s22, %s14174_s27  ;;  %p14183_p3 = scmp.lt.s32.totalorder %s14174_s27, %s14174_s27 }
  0x21   : > { %p14177_p0 = pnand %p14175_p13, %p14601_p8  ;;  %p14184_p1 = por %p14183_p3, %p14182_p5 }
  0x23   : > { %p14178_p2 = pneg %p14177_p0 }
  0x25   : > { %p14185_p4 = pnand %p14184_p1, %p14178_p2 }
  0x27   : > { %14188 = shalt.err (!%p14185_p4)
}
  0x28   : > { %12779 = dma.hbm_to_vmem [thread:$0]  (!%p14587_p6), %s16253_s2, 32, %s317_s22, [#allocation9]  }
  0x29   : > { %s16255_s4 = sld [smem:[#allocation27_spill]] }
  0x2f   : > { %s14189_s15 = scalar_lea.hbm %s16255_s4, 64 }
  0x30   : > { %p14190_p7 = scmp.ne.s32.totalorder %s16255_s4, %s14189_s15  ;;  %p14196_p1 = scmp.lt.u32.totalorder %s14189_s15, %s16255_s4 }
  0x32   : > { %p14192_p9 = pnand %p14190_p7, %p14601_p8 }
  0x34   : > { %p14193_p3 = pneg %p14192_p9 }
  0x36   : > { %p14198_p4 = pnand %p14196_p1, %p14193_p3 }
  0x38   : > { %14201 = shalt.err (!%p14198_p4)
}
  0x39   : > { %s14202_s22 = scalar_lea.vmem %s14583_s26, 64  ;;  %p14210_p13 = scmp.lt.s32.totalorder %s14583_s26, %s14583_s26 }
  0x3a   : > { %p14203_p10 = scmp.ne.s32.totalorder %s14583_s26, %s14202_s22  ;;  %p14211_p0 = scmp.lt.s32.totalorder %s14202_s22, %s14202_s22 }
  0x3c   : > { %p14205_p11 = pnand %p14203_p10, %p14601_p8  ;;  %p14212_p2 = por %p14211_p0, %p14210_p13 }
  0x3e   : > { %p14206_p12 = pneg %p14205_p11 }
  0x40   : > { %p14213_p5 = pnand %p14212_p2, %p14206_p12 }
  0x42   : > { %14216 = shalt.err (!%p14213_p5)
}
  0x43   : > { %12785 = dma.hbm_to_vmem [thread:$0]  (!%p14587_p6), %s16255_s4, 64, %s14583_s26, [#allocation12]  }
  0x44   : > { %s14217_s14 = scalar_lea.hbm %s16234_s1, 4096 }
  0x45   : > { %p14218_p7 = scmp.ne.s32.totalorder %s16234_s1, %s14217_s14  ;;  %p14224_p1 = scmp.lt.u32.totalorder %s14217_s14, %s16234_s1 }
  0x47   : > { %p14220_p9 = pnand %p14218_p7, %p14601_p8 }
  0x49   : > { %p14221_p3 = pneg %p14220_p9 }
  0x4b   : > { %p14226_p4 = pnand %p14224_p1, %p14221_p3 }
  0x4d   : > { %14229 = shalt.err (!%p14226_p4)
}
  0x4e   : > { %s14230_s26 = scalar_lea.vmem %s14591_s28, 4096  ;;  %p14238_p13 = scmp.lt.s32.totalorder %s14591_s28, %s14591_s28 }
  0x4f   : > { %p14231_p10 = scmp.ne.s32.totalorder %s14591_s28, %s14230_s26  ;;  %p14239_p0 = scmp.lt.s32.totalorder %s14230_s26, %s14230_s26 }
  0x51   : > { %p14233_p11 = pnand %p14231_p10, %p14601_p8  ;;  %p14240_p2 = por %p14239_p0, %p14238_p13 }
  0x53   : > { %p14234_p12 = pneg %p14233_p11 }
  0x55   : > { %p14241_p5 = pnand %p14240_p2, %p14234_p12 }
  0x57   : > { %14244 = shalt.err (!%p14241_p5)
}
  0x58   : > { %s14478_s22 = smov 128   ;;  %s14479_s11 = smov 8  }
  0x59   : > { %12776 = dma.hbm_to_vmem [thread:$0]  (!%p14587_p6), %s16234_s1, 4096, %s14591_s28, [#allocation7], %s14478_s22, %s14478_s22, %s14479_s11  }
  0x5a   : > { %s14480_s13 = smov [#allocation10]   ;;  %s14245_s25 = scalar_lea.hbm %s16236_s3, 32768 }
  0x5b   : > { %s326_s14 = sshll.u32 %s14480_s13, 4  ;;  %p14246_p7 = scmp.ne.s32.totalorder %s16236_s3, %s14245_s25  ;;  %s327_s14 = int_to_ptr.vmem [resolvable:$true] %s326_s14 }
  0x5c   : > { %p14252_p1 = scmp.lt.u32.totalorder %s14245_s25, %s16236_s3 }
  0x5d   : > { %p14248_p9 = pnand %p14246_p7, %p14601_p8 }
  0x5f   : > { %p14249_p3 = pneg %p14248_p9 }
  0x61   : > { %p14254_p4 = pnand %p14252_p1, %p14249_p3 }
  0x63   : > { %14257 = shalt.err (!%p14254_p4)
}
  0x64   : > { %s14258_s28 = scalar_lea.vmem %s327_s14, 32768  ;;  %p14266_p13 = scmp.lt.s32.totalorder %s327_s14, %s327_s14 }
  0x65   : > { %p14259_p10 = scmp.ne.s32.totalorder %s327_s14, %s14258_s28  ;;  %p14267_p0 = scmp.lt.s32.totalorder %s14258_s28, %s14258_s28 }
  0x67   : > { %p14261_p11 = pnand %p14259_p10, %p14601_p8  ;;  %p14268_p2 = por %p14267_p0, %p14266_p13 }
  0x69   : > { %p14262_p12 = pneg %p14261_p11 }
  0x6b   : > { %p14269_p5 = pnand %p14268_p2, %p14262_p12 }
  0x6d   : > { %14272 = shalt.err (!%p14269_p5)
}
  0x6e   : > { %s14481_s22 = smov 256   ;;  %s14482_s11 = smov 16  }
  0x6f   : > { %12782 = dma.hbm_to_vmem [thread:$0]  (!%p14587_p6), %s16236_s3, 32768, %s327_s14, [#allocation9], %s14481_s22, %s14481_s22, %s14482_s11  }
  0x70   : > { %s14483_s30 = smov [#allocation13]   ;;  %s14484_s13 = smov [#allocation14]  }
  0x71   : > { %s350_s12 = sshll.u32 %s14483_s30, 4  ;;  %s364_s15 = sshll.u32 %s14484_s13, 4  ;;  %s351_s12 = int_to_ptr.vmem [resolvable:$true] %s350_s12  ;;  %s14684_s15 = int_to_ptr.vmem [resolvable:$true] %s364_s15 }
  0x72   : > { %s14273_s27 = scalar_lea.hbm %s16238_s5, 49152 }
  0x73   : > { %p14274_p7 = scmp.ne.s32.totalorder %s16238_s5, %s14273_s27  ;;  %p14280_p1 = scmp.lt.u32.totalorder %s14273_s27, %s16238_s5 }
  0x75   : > { %p14276_p9 = pnand %p14274_p7, %p14601_p8 }
  0x77   : > { %p14277_p3 = pneg %p14276_p9 }
  0x79   : > { %p14282_p4 = pnand %p14280_p1, %p14277_p3 }
  0x7b   : > { %14285 = shalt.err (!%p14282_p4)
}
  0x7c   : > { %s14286_s4 = scalar_lea.vmem %s351_s12, 49152  ;;  %p14294_p13 = scmp.lt.s32.totalorder %s351_s12, %s351_s12 }
  0x7d   : > { %p14287_p10 = scmp.ne.s32.totalorder %s351_s12, %s14286_s4  ;;  %p14295_p0 = scmp.lt.s32.totalorder %s14286_s4, %s14286_s4 }
  0x7f   : > { %p14289_p11 = pnand %p14287_p10, %p14601_p8  ;;  %p14296_p2 = por %p14295_p0, %p14294_p13 }
  0x81   : > { %p14290_p12 = pneg %p14289_p11 }
  0x83   : > { %p14297_p5 = pnand %p14296_p2, %p14290_p12 }
  0x85   : > { %14300 = shalt.err (!%p14297_p5)
}
  0x86   : > { %12788 = dma.hbm_to_vmem [thread:$0]  (!%p14587_p6), %s16238_s5, 49152, %s351_s12, [#allocation12], %s14481_s22, %s14481_s22, %s14482_s11  }
  0x87   : > { %s14301_s27 = scalar_lea.hbm %s16239_s6, 64 }
  0x88   : > { %p14302_p7 = scmp.ne.s32.totalorder %s16239_s6, %s14301_s27  ;;  %p14308_p1 = scmp.lt.u32.totalorder %s14301_s27, %s16239_s6 }
  0x8a   : > { %p14304_p9 = pnand %p14302_p7, %p14601_p8 }
  0x8c   : > { %p14305_p3 = pneg %p14304_p9 }
  0x8e   : > { %p14310_p4 = pnand %p14308_p1, %p14305_p3 }
  0x90   : > { %14313 = shalt.err (!%p14310_p4)
}
  0x91   : > { %s14314_s12 = scalar_lea.vmem %s14684_s15, 64  ;;  %p14322_p13 = scmp.lt.s32.totalorder %s14684_s15, %s14684_s15 }
  0x92   : > { %p14315_p10 = scmp.ne.s32.totalorder %s14684_s15, %s14314_s12  ;;  %p14323_p0 = scmp.lt.s32.totalorder %s14314_s12, %s14314_s12 }
  0x94   : > { %p14317_p11 = pnand %p14315_p10, %p14601_p8  ;;  %p14324_p2 = por %p14323_p0, %p14322_p13 }
  0x96   : > { %p14318_p12 = pneg %p14317_p11 }
  0x98   : > { %p14325_p5 = pnand %p14324_p2, %p14318_p12 }
  0x9a   : > { %14328 = shalt.err (!%p14325_p5)
}
  0x9b   : > { %12791 = dma.hbm_to_vmem [thread:$0]  (!%p14587_p6), %s16239_s6, 64, %s14684_s15, [#allocation15]  }
  0x9c   : > { %s14485_s13 = smov [#allocation17]   ;;  %s14486_s25 = smov [#allocation18]  }
  0x9d   : > { %s375_s21 = sshll.u32 %s14485_s13, 4  ;;  %s389_s27 = sshll.u32 %s14486_s25, 4  ;;  %s376_s21 = int_to_ptr.vmem [resolvable:$true] %s375_s21  ;;  %s14730_s27 = int_to_ptr.vmem [resolvable:$true] %s389_s27 }
  0x9e   : > { %s14329_s2 = scalar_lea.hbm %s16241_s8, 64 }
  0x9f   : > { %p14330_p7 = scmp.ne.s32.totalorder %s16241_s8, %s14329_s2  ;;  %p14336_p1 = scmp.lt.u32.totalorder %s14329_s2, %s16241_s8 }
  0xa1   : > { %p14332_p9 = pnand %p14330_p7, %p14601_p8 }
  0xa3   : > { %p14333_p3 = pneg %p14332_p9 }
  0xa5   : > { %p14338_p4 = pnand %p14336_p1, %p14333_p3 }
  0xa7   : > { %14341 = shalt.err (!%p14338_p4)
}
  0xa8   : > { %s14342_s30 = scalar_lea.vmem %s376_s21, 64  ;;  %p14350_p13 = scmp.lt.s32.totalorder %s376_s21, %s376_s21 }
  0xa9   : > { %p14343_p10 = scmp.ne.s32.totalorder %s376_s21, %s14342_s30  ;;  %p14351_p0 = scmp.lt.s32.totalorder %s14342_s30, %s14342_s30 }
  0xab   : > { %p14345_p11 = pnand %p14343_p10, %p14601_p8  ;;  %p14352_p2 = por %p14351_p0, %p14350_p13 }
  0xad   : > { %p14346_p12 = pneg %p14345_p11 }
  0xaf   : > { %p14353_p5 = pnand %p14352_p2, %p14346_p12 }
  0xb1   : > { %14356 = shalt.err (!%p14353_p5)
}
  0xb2   : > { %12794 = dma.hbm_to_vmem [thread:$0]  (!%p14587_p6), %s16241_s8, 64, %s376_s21, [#allocation9]  }
  0xb3   : > { %s14357_s2 = scalar_lea.hbm %s16243_s10, 16 }
  0xb4   : > { %p14358_p7 = scmp.ne.s32.totalorder %s16243_s10, %s14357_s2  ;;  %p14364_p1 = scmp.lt.u32.totalorder %s14357_s2, %s16243_s10 }
  0xb6   : > { %p14360_p9 = pnand %p14358_p7, %p14601_p8 }
  0xb8   : > { %p14361_p3 = pneg %p14360_p9 }
  0xba   : > { %p14366_p4 = pnand %p14364_p1, %p14361_p3 }
  0xbc   : > { %14369 = shalt.err (!%p14366_p4)
}
  0xbd   : > { %s14370_s21 = scalar_lea.vmem %s14730_s27, 16  ;;  %s14377_s30 = scalar_lea.vmem %s14730_s27, 32 }
  0xbe   : > { %p14371_p10 = scmp.ne.s32.totalorder %s14730_s27, %s14370_s21  ;;  %p14378_p13 = scmp.lt.s32.totalorder %s14730_s27, %s14730_s27 }
  0xbf   : > { %p14379_p0 = scmp.lt.s32.totalorder %s14377_s30, %s14370_s21 }
  0xc0   : > { %p14373_p11 = pnand %p14371_p10, %p14601_p8 }
  0xc1   : > { %p14380_p2 = por %p14379_p0, %p14378_p13 }
  0xc2   : > { %p14374_p12 = pneg %p14373_p11 }
  0xc4   : > { %p14381_p5 = pnand %p14380_p2, %p14374_p12 }
  0xc6   : > { %14384 = shalt.err (!%p14381_p5)
}
  0xc7   : > { %12797 = dma.hbm_to_vmem [thread:$0]  (!%p14587_p6), %s16243_s10, 16, %s14730_s27, [#allocation12]  }
  0xc8   : > { %s14775_s29 = sadd.s32 1, %s14473_s20   ;;  %s179_s16 = sadd.s32 1, %s14469_s19 }
  0xc9   : > { %s176_s26 = ssub.s32 %s14473_s20, %s14775_s29  ;;  %p186_p8 = scmp.ne.s32.totalorder %s14469_s19, %s14465_s18 }
  0xca   : > { %p177_p7 = scmp.eq.s32.totalorder %s176_s26, 0  ;;  %p187_p9 = scmp.eq.s32.totalorder %s14473_s20, 0 }
  0xcb   : > { %p192_p3 = scmp.ne.s32.totalorder %s14465_s18, %s14461_s17  ;;  %p12810_p1 = scmp.lt.s32.totalorder %s14473_s20, 8 }
  0xcc   : > { %s14787_s28 = scalar_select %p177_p7, %s14469_s19, %s179_s16  }
  0xcd   : > { %p188_p4 = por %p187_p9, %p186_p8  ;;  %p16256_p10 = scmp.eq.s32.totalorder %s14571_s23, 0 }
  0xce   : > { %s400_s14 = sand.u32 1, %s14473_s20   ;;  %s402_s27 = sand.u32 1, %s14469_s19  }
  0xcf   : > { %p14791_p11 = por %p16256_p10, %p192_p3  ;;  %s10937_s12 = sshll.u32 %s402_s27, 10 }
  0xd0   : > { %s11917_s4 = sshll.u32 %s14473_s20, 14  ;;  %s404_s17 = scalar_lea.vmem [#allocation16], %s10937_s12 }
  0xd1   : > { %s14801_s30 = scalar_lea.hbm %s16240_s7, %s11917_s4  ;;  %s411_s13 = sshll.u32 %s404_s17, 4  ;;  %s14803_s13 = int_to_ptr.vmem [resolvable:$true] %s411_s13 }
  0xd2   : > { %p14805_p6 = pnand %p12810_p1, %p188_p4  ;;  %s14809_s20 = scalar_lea.sflag [#allocation7], %s400_s14 }
  0xd3   : > { %s14385_s16 = scalar_lea.hbm %s14801_s30, 16384  ;;  %s14390_s12 = scalar_lea.hbm %s16240_s7, 131072 }
  0xd4   : > { %p14386_p12 = scmp.ne.s32.totalorder %s14801_s30, %s14385_s16  ;;  %p14387_p13 = pneg %p14805_p6 }
  0xd5   : > { %p14391_p5 = scmp.lt.u32.totalorder %s14801_s30, %s16240_s7  ;;  %p14392_p8 = scmp.lt.u32.totalorder %s14390_s12, %s14385_s16 }
  0xd6   : > { %p14388_p0 = pnand %p14387_p13, %p14386_p12  ;;  %p14394_p9 = scmp.lt.u32.totalorder %s14385_s16, %s14801_s30 }
  0xd7   : > { %p14393_p7 = por %p14392_p8, %p14391_p5 }
  0xd8   : > { %p14389_p2 = pneg %p14388_p0 }
  0xd9   : > { %p14395_p3 = por %p14394_p9, %p14393_p7 }
  0xdb   : > { %p14396_p1 = pnand %p14395_p3, %p14389_p2 }
  0xdd   : > { %14399 = shalt.err (!%p14396_p1)
}
  0xde   : > { %s14400_s14 = scalar_lea.vmem %s14803_s13, 16384  ;;  %s14487_s21 = smov [#allocation16]  }
  0xdf   : > { %p14401_p4 = scmp.ne.s32.totalorder %s14803_s13, %s14400_s14  ;;  %s14405_s17 = sshll.u32 %s14487_s21, 4  ;;  %s14406_s17 = int_to_ptr.vmem [resolvable:$false] %s14405_s17 }
  0xe0   : > { %s14407_s26 = scalar_lea.vmem %s14406_s17, 32768  ;;  %p14408_p0 = scmp.lt.s32.totalorder %s14803_s13, %s14406_s17 }
  0xe1   : > { %p14403_p10 = pnand %p14401_p4, %p14387_p13  ;;  %p14409_p5 = scmp.lt.s32.totalorder %s14407_s26, %s14400_s14 }
  0xe3   : > { %p14404_p12 = pneg %p14403_p10  ;;  %p14410_p8 = por %p14409_p5, %p14408_p0 }
  0xe5   : > { %p14411_p7 = pnand %p14410_p8, %p14404_p12 }
  0xe7   : > { %14414 = shalt.err (!%p14411_p7)
}
  0xe8   : > { %12801 = dma.hbm_to_vmem [thread:$0]  (!%p14805_p6), %s14801_s30, 16384, %s14803_s13, %s14809_s20, %s14481_s22, %s14481_s22, %s14482_s11  }
  0xe9   : > { %p16259_p13 = scmp.ne.s32.totalorder %s16251_s24, 0 }
  0xea   : > { %p16260_p2 = scmp.eq.s32.totalorder (!%p16259_p13), %s14571_s23, 0 }
  0xeb   : > { %423 = sbr.rel (%p16259_p13) target bundleno = 2768 (0xad0), region = 64 }
  0xf2   : > { %14432 = dma.done.wait (%p16260_p2), [#allocation7], 4096   ;;  %p16261_p9 = pmov %p16260_p2 }
  0xf3   : > { %p16262_p3 = pmov %p16260_p2 }
  0xf4   : > { %14434 = vsyncadd (%p16261_p9), [#allocation7], 4294963200 }
  0xf5   : > { %14436 = dma.done.wait (%p16262_p3), [#allocation9], 32800   ;;  %p16263_p1 = pmov %p16260_p2 }
  0xf7   : > { %14438 = vsyncadd (%p16263_p1), [#allocation9], 4294934496  ;;  %p16264_p4 = pmov %p16263_p1 }
  0xf8   : > { %p16265_p6 = pmov %p16263_p1 }
  0xf9   : > { %14440 = dma.done.wait (%p16264_p4), [#allocation12], 49216  }
  0xfa   : > { %14442 = vsyncadd (%p16265_p6), [#allocation12], 4294918080  ;;  %p16266_p10 = pmov %p16263_p1 }
  0xfb   : > { %p16267_p12 = pmov %p16263_p1 }
  0xfc   : > { %14444 = dma.done.wait (%p16266_p10), [#allocation15], 64  }
  0xfd   : > { %14446 = vsyncadd (%p16267_p12), [#allocation15], 4294967232  ;;  %s449_s24 = sand.u32 1, %s14571_s23   ;;  %s451_s22 = sand.u32 1, %s14465_s18  }
  0xfe   : > { %s10947_s11 = sshll.u32 %s451_s22, 10  ;;  %s450_s30 = scalar_lea.sflag [#allocation7], %s449_s24 }
  0xff   : > { %s14860_s13 = scalar_lea.vmem [#allocation16], %s10947_s11 }
 0x100   : > { %14448 = dma.done.wait (%p14791_p11), %s450_s30, 16384  }
 0x101   : > { %14450 = vsyncadd (%p14791_p11), %s450_s30, 4294950912  ;;  %p16268_p0 = pmov %p16263_p1 }
 0x103   : > { %14452 = dma.done.wait (%p16268_p0), [#allocation9], 64   ;;  %p16269_p5 = pmov %p16268_p0 }
 0x104   : > { %p16270_p8 = pmov %p16268_p0 }
 0x105   : > { %14454 = vsyncadd (%p16269_p5), [#allocation9], 4294967232 }
 0x106   : > { %14456 = dma.done.wait (%p16270_p8), [#allocation12], 16   ;;  %p16271_p7 = pmov %p16268_p0 }
 0x107   : > { %p16272_p13 = scmp.ne.s32.totalorder %s14571_s23, 0 }
 0x108   : > { %14458 = vsyncadd (%p16271_p7), [#allocation12], 4294967280  ;;  %v12865_v0 = vld [vmem:[#allocation6 + $0x24] ss:$8 sps:$4 sm:$0xff] (!%p16272_p13)   ;;  %v12867_v1 = vld [vmem:[#allocation6 + $0x20] ss:$8 sps:$4 sm:$0xff] (!%p16272_p13)  }
 0x109   : > { %499 = sbr.rel (%p16272_p13) target bundleno = 2185 (0x889), region = 104  ;;  %v14488_v2 = vmov (!%p16272_p13), 0   ;;  %646 = vmatprep.subr.bf16.mxu0 (!%p16272_p13), %v12865_v0  ;;  %v12868_v3 = vld [vmem:[#allocation6 + $0x34] ss:$8 sps:$4 sm:$0xff] (!%p16272_p13)   ;;  %v12870_v4 = vld [vmem:[#allocation6 + $0x30] ss:$8 sps:$4 sm:$0xff] (!%p16272_p13)  }
 0x10a   : > { %678 = vmatprep.mubr.bf16.mxu0 (!%p16272_p13), %v14488_v2  ;;  %3085 = vmatprep.mubr.bf16.mxu1 (!%p16272_p13), %v14488_v2  ;;  %v12874_v5 = vld [vmem:[#allocation6 + $0x4] ss:$8 sps:$4 sm:$0xff] (!%p16272_p13)   ;;  %vm621_vm0 = vcmask (!%p16272_p13), 261120   ;;  %v12872_v7 = vld [vmem:[#allocation6] ss:$8 sps:$4 sm:$0xff] (!%p16272_p13)   ;;  %v12875_v10 = vld [vmem:[%s16233_s0 + $0x50] sm:$0xff] (!%p16272_p13)  }
 0x10b   : > { %647 = vmatpush1.bf16.msra.mxu0 (!%p16272_p13), %v12867_v1  ;;  %v12871_v6 = vld [vmem:[%s16233_s0 + $0x48] sm:$0xff] (!%p16272_p13)   ;;  %v12881_v8 = vld [vmem:[#allocation6 + $0x14] ss:$8 sps:$4 sm:$0xff] (!%p16272_p13)   ;;  %v12879_v9 = vld [vmem:[#allocation6 + $0x10] ss:$8 sps:$4 sm:$0xff] (!%p16272_p13)  }
 0x10c   : > { %648 = vmatprep.subr.bf16.mxu0 (!%p16272_p13), %v12868_v3  ;;  %v12888_v11 = vld [vmem:[#allocation6 + $0x44] ss:$8 sps:$4 sm:$0xff] (!%p16272_p13)   ;;  %v12876_v12 = vld [vmem:[%s16233_s0 + $0x58] sm:$0xff] (!%p16272_p13)   ;;  %v12882_v15 = vld [vmem:[%s16233_s0 + $0x70] sm:$0xff] (!%p16272_p13)  }
 0x10d   : > { %v12877_v13 = vld [vmem:[%s16233_s0 + $0x60] sm:$0xff] (!%p16272_p13)   ;;  %v12878_v14 = vld [vmem:[%s16233_s0 + $0x68] sm:$0xff] (!%p16272_p13)   ;;  %v12883_v16 = vld [vmem:[%s16233_s0 + $0x78] sm:$0xff] (!%p16272_p13)  }
 0x10e   : > { %v12884_v17 = vld [vmem:[%s16233_s0 + $0x80] sm:$0xff] (!%p16272_p13)   ;;  %v12895_v20 = vld [vmem:[#allocation6 + $0x54] ss:$8 sps:$4 sm:$0xff] (!%p16272_p13)   ;;  %v12893_v21 = vld [vmem:[#allocation6 + $0x50] ss:$8 sps:$4 sm:$0xff] (!%p16272_p13)  }
 0x10f   : > { %649 = vmatpush1.bf16.msra.mxu0 (!%p16272_p13), %v12870_v4  ;;  %v12885_v18 = vld [vmem:[%s16233_s0] sm:$0xff] (!%p16272_p13)   ;;  %v12889_v23 = vld [vmem:[%s16233_s0 + $0x8] sm:$0xff] (!%p16272_p13)   ;;  %v12890_v24 = vld [vmem:[%s16233_s0 + $0x10] sm:$0xff] (!%p16272_p13)  }
 0x110   : > { %843 = vmatprep.subr.bf16.mxu0 %v12874_v5  ;;  %v12886_v19 = vld [vmem:[#allocation6 + $0x40] ss:$8 sps:$4 sm:$0xff]   ;;  %v12902_v22 = vld [vmem:[#allocation6 + $0x64] ss:$8 sps:$4 sm:$0xff]   ;;  %v12891_v25 = vld [vmem:[%s16233_s0 + $0x18] sm:$0xff]  }
 0x111   : > { %v12892_v26 = vld [vmem:[%s16233_s0 + $0x20] sm:$0xff]   ;;  %v12896_v27 = vld [vmem:[%s16233_s0 + $0x28] sm:$0xff]   ;;  %v12897_v28 = vld [vmem:[%s16233_s0 + $0x30] sm:$0xff]  }
 0x112   : > { %10963 = vmatmul.mubr.msk.bf16.vlgmr.msra.gmra.mrb[0].mxu0 %vm621_vm0, %v12871_v6  ;;  %v12898_v29 = vld [vmem:[%s16233_s0 + $0x38] sm:$0xff]   ;;  %v12899_v30 = vld [vmem:[%s16233_s0 + $0x90] sm:$0xff]   ;;  %v12900_v31 = vld [vmem:[#allocation6 + $0x60] ss:$8 sps:$4 sm:$0xff]  }
 0x113   : > { %844 = vmatpush1.bf16.msra.mxu0 %v12872_v7  ;;  %688 = vmatprep.mubr.bf16.mxu0 %v14488_v2  ;;  %v12909_v32 = vld [vmem:[#allocation6 + $0x74] ss:$8 sps:$4 sm:$0xff]   ;;  %v12907_v33 = vld [vmem:[#allocation6 + $0x70] ss:$8 sps:$4 sm:$0xff]   ;;  %v12916_v34 = vld [vmem:[#allocation6 + $0x84] ss:$8 sps:$4 sm:$0xff]  }
 0x114   : > { %845 = vmatprep.subr.bf16.mxu0 %v12881_v8  ;;  %v12903_v35 = vld [vmem:[%s16233_s0 + $0x98] sm:$0xff]   ;;  %v12904_v36 = vld [vmem:[%s16233_s0 + $0xa0] sm:$0xff]   ;;  %v12905_v37 = vld [vmem:[%s16233_s0 + $0xa8] sm:$0xff]  }
 0x115   : > { %v12906_v38 = vld [vmem:[%s16233_s0 + $0xb0] sm:$0xff]   ;;  %v12910_v39 = vld [vmem:[%s16233_s0 + $0xb8] sm:$0xff]   ;;  %v12911_v40 = vld [vmem:[%s16233_s0 + $0xc0] sm:$0xff]  }
 0x116   : > { %v12912_v41 = vld [vmem:[%s16233_s0 + $0xc8] sm:$0xff]   ;;  %v12913_v42 = vld [vmem:[%s16233_s0 + $0xd8] sm:$0xff]   ;;  %v12917_v47 = vld [vmem:[%s16233_s0 + $0xe0] sm:$0xff]  }
 0x117   : > { %846 = vmatpush1.bf16.msra.mxu0 %v12879_v9  ;;  %v12914_v43 = vld [vmem:[#allocation6 + $0x80] ss:$8 sps:$4 sm:$0xff]   ;;  %v12923_v44 = vld [vmem:[#allocation6 + $0x94] ss:$8 sps:$4 sm:$0xff]   ;;  %v12921_v45 = vld [vmem:[#allocation6 + $0x90] ss:$8 sps:$4 sm:$0xff]  }
 0x118   : > { %1061 = vmatprep.subr.bf16.mxu0 %v12888_v11  ;;  %v12930_v46 = vld [vmem:[#allocation6 + $0xa4] ss:$8 sps:$4 sm:$0xff]   ;;  %v12919_v49 = vld [vmem:[%s16233_s0 + $0xf0] sm:$0xff]   ;;  %v12920_v50 = vld [vmem:[%s16233_s0 + $0xf8] sm:$0xff]  }
 0x119   : > { %v12918_v48 = vld [vmem:[%s16233_s0 + $0xe8] sm:$0xff]   ;;  %v12924_v51 = vld [vmem:[%s16233_s0 + $0x100] sm:$0xff]   ;;  %v12926_v53 = vld [vmem:[%s16233_s0 + $0x110] sm:$0xff]  }
 0x11a   : > { %10964 = vmatmul.mubr.msk.bf16.gmra.mrb[4].mxu0 %vm621_vm0, %v12875_v10  ;;  %v12925_v52 = vld [vmem:[%s16233_s0 + $0x108] sm:$0xff]   ;;  %v12937_v56 = vld [vmem:[#allocation6 + $0xb4] ss:$8 sps:$4 sm:$0xff]   ;;  %v12935_v57 = vld [vmem:[#allocation6 + $0xb0] ss:$8 sps:$4 sm:$0xff]  }
 0x11b   : > { %698 = vmatprep.mubr.bf16.mxu0 %v14488_v2  ;;  %v12927_v54 = vld [vmem:[%s16233_s0 + $0x8] sm:$0xff]   ;;  %v12931_v59 = vld [vmem:[%s16233_s0 + $0x10] sm:$0xff]   ;;  %v12932_v60 = vld [vmem:[%s16233_s0 + $0x18] sm:$0xff]  }
 0x11c   : > { %v12928_v55 = vld [vmem:[#allocation6 + $0xa0] ss:$8 sps:$4 sm:$0xff]   ;;  %v12944_v58 = vld [vmem:[#allocation6 + $0xc4] ss:$8 sps:$4 sm:$0xff]   ;;  %v12938_v63 = vld [vmem:[%s16233_s0 + $0x30] sm:$0xff]  }
 0x11d   : > { %v12933_v61 = vld [vmem:[%s16233_s0 + $0x20] sm:$0xff]   ;;  %v12934_v62 = vld [vmem:[%s16233_s0 + $0x28] sm:$0xff]   ;;  %v12939_v0 = vld [vmem:[%s16233_s0 + $0x38] sm:$0xff]  }
 0x11e   : > { %v12940_v1 = vld [vmem:[%s16233_s0 + $0x40] sm:$0xff]   ;;  %v12941_v3 = vld [vmem:[%s16233_s0 + $0x50] sm:$0xff]   ;;  %v12945_v8 = vld [vmem:[%s16233_s0 + $0x58] sm:$0xff]  }
 0x11f   : > { %v12942_v4 = vld [vmem:[#allocation6 + $0xc0] ss:$8 sps:$4 sm:$0xff]   ;;  %v12951_v5 = vld [vmem:[#allocation6 + $0xd4] ss:$8 sps:$4 sm:$0xff]   ;;  %v12949_v6 = vld [vmem:[#allocation6 + $0xd0] ss:$8 sps:$4 sm:$0xff]  }
 0x120   : > { %v12958_v7 = vld [vmem:[#allocation6 + $0xe4] ss:$8 sps:$4 sm:$0xff]   ;;  %v12948_v11 = vld [vmem:[%s16233_s0 + $0x70] sm:$0xff]  }
 0x121   : > { %v12946_v9 = vld [vmem:[%s16233_s0 + $0x60] sm:$0xff]   ;;  %v12947_v10 = vld [vmem:[%s16233_s0 + $0x68] sm:$0xff]  }
 0x122   : > { %10965 = vmatmul.mubr.msk.bf16.gmra.mrb[8].mxu0 %vm621_vm0, %v12876_v12  ;;  %v12952_v12 = vld [vmem:[%s16233_s0 + $0x78] sm:$0xff]  }
 0x123   : > { %708 = vmatprep.mubr.bf16.mxu0 %v14488_v2 }
 0x12a   : > { %10966 = vmatmul.mubr.msk.bf16.gmra.mrb[12].mxu0 %vm621_vm0, %v12877_v13  ;;  %v12953_v13 = vld [vmem:[%s16233_s0 + $0x80] sm:$0xff]  }
 0x12b   : > { %718 = vmatprep.mubr.bf16.mxu0 %v14488_v2 }
 0x132   : > { %10967 = vmatmul.mubr.msk.bf16.gmra.mrb[16].mxu0 %vm621_vm0, %v12878_v14  ;;  %v12954_v14 = vld [vmem:[%s16233_s0 + $0x88] sm:$0xff]  }
 0x133   : > { %728 = vmatprep.mubr.bf16.mxu0 %v14488_v2 }
 0x13a   : > { %10968 = vmatmul.mubr.msk.bf16.gmra.mrb[20].mxu0 %vm621_vm0, %v12882_v15  ;;  %v12977_v15 = vld [vmem:[#allocation10 + $0x204] ss:$16 sps:$4 sm:$0xff]  }
 0x13b   : > { %738 = vmatprep.mubr.bf16.mxu0 %v14488_v2  ;;  %3053 = vmatprep.subr.bf16.mxu1 %v12977_v15  ;;  %v13045_v15 = vld [vmem:[#allocation10 + $0x2cc] ss:$16 sps:$4 sm:$0xff]  }
 0x142   : > { %10969 = vmatmul.mubr.msk.bf16.gmra.mrb[24].mxu0 %vm621_vm0, %v12883_v16  ;;  %v12979_v16 = vld [vmem:[#allocation10 + $0x200] ss:$16 sps:$4 sm:$0xff]  }
 0x143   : > { %748 = vmatprep.mubr.bf16.mxu0 %v14488_v2  ;;  %3054 = vmatpush1.bf16.msra.mxu1 %v12979_v16  ;;  %v13043_v16 = vld [vmem:[#allocation10 + $0x2c8] ss:$16 sps:$4 sm:$0xff]  }
 0x14a   : > { %10970 = vmatmul.mubr.msk.bf16.gmra.mrb[28].mxu0 %vm621_vm0, %v12884_v17  ;;  %v12980_v17 = vld [vmem:[#allocation10 + $0x224] ss:$16 sps:$4 sm:$0xff]  }
 0x14b   : > { %875 = vmatprep.mubr.bf16.mxu0 %v14488_v2  ;;  %3055 = vmatprep.subr.bf16.mxu1 %v12980_v17  ;;  %v13048_v17 = vld [vmem:[#allocation10 + $0x2ec] ss:$16 sps:$4 sm:$0xff]  }
 0x152   : > { %10983 = vmatmul.mubr.msk.bf16.vlgmr.msra.gmra.mrb[0].mxu0 %vm621_vm0, %v12885_v18  ;;  %v12982_v18 = vld [vmem:[#allocation10 + $0x220] ss:$16 sps:$4 sm:$0xff]  }
 0x153   : > { %1062 = vmatpush1.bf16.msra.mxu0 %v12886_v19  ;;  %885 = vmatprep.mubr.bf16.mxu0 %v14488_v2  ;;  %v12955_v19 = vld [vmem:[%s16233_s0 + $0x98] sm:$0xff]  }
 0x154   : > { %1063 = vmatprep.subr.bf16.mxu0 %v12895_v20  ;;  %v12983_v20 = vld [vmem:[#allocation10 + $0x244] ss:$16 sps:$4 sm:$0xff]   ;;  %3056 = vmatpush1.bf16.msra.mxu1 %v12982_v18  ;;  %v13046_v18 = vld [vmem:[#allocation10 + $0x2e8] ss:$16 sps:$4 sm:$0xff]  }
 0x155   : > { %3057 = vmatprep.subr.bf16.mxu1 %v12983_v20  ;;  %v13049_v20 = vld [vmem:[#allocation10 + $0x308] ss:$16 sps:$4 sm:$0xff]  }
 0x157   : > { %1064 = vmatpush1.bf16.msra.mxu0 %v12893_v21  ;;  %v12956_v21 = vld [vmem:[#allocation6 + $0xe0] ss:$8 sps:$4 sm:$0xff]  }
 0x158   : > { %1311 = vmatprep.subr.bf16.mxu0 %v12902_v22  ;;  %v12965_v22 = vld [vmem:[#allocation6 + $0xf4] ss:$8 sps:$4 sm:$0xff]  }
 0x15a   : > { %10984 = vmatmul.mubr.msk.bf16.gmra.mrb[4].mxu0 %vm621_vm0, %v12889_v23  ;;  %v12985_v23 = vld [vmem:[#allocation10 + $0x240] ss:$16 sps:$4 sm:$0xff]  }
 0x15b   : > { %895 = vmatprep.mubr.bf16.mxu0 %v14488_v2  ;;  %3058 = vmatpush1.bf16.msra.mxu1 %v12985_v23  ;;  %v13057_v23 = vld [vmem:[#allocation10 + $0x34c] ss:$16 sps:$4 sm:$0xff]  }
 0x162   : > { %10985 = vmatmul.mubr.msk.bf16.gmra.mrb[8].mxu0 %vm621_vm0, %v12890_v24  ;;  %v12986_v24 = vld [vmem:[#allocation10 + $0x264] ss:$16 sps:$4 sm:$0xff]  }
 0x163   : > { %905 = vmatprep.mubr.bf16.mxu0 %v14488_v2  ;;  %3059 = vmatprep.subr.bf16.mxu1 %v12986_v24  ;;  %v13055_v24 = vld [vmem:[#allocation10 + $0x348] ss:$16 sps:$4 sm:$0xff]  }
 0x16a   : > { %10986 = vmatmul.mubr.msk.bf16.gmra.mrb[12].mxu0 %vm621_vm0, %v12891_v25  ;;  %v12963_v25 = vld [vmem:[#allocation6 + $0xf0] ss:$8 sps:$4 sm:$0xff]  }
 0x16b   : > { %915 = vmatprep.mubr.bf16.mxu0 %v14488_v2 }
 0x172   : > { %10987 = vmatmul.mubr.msk.bf16.gmra.mrb[16].mxu0 %vm621_vm0, %v12892_v26  ;;  %v12988_v26 = vld [vmem:[#allocation10 + $0x260] ss:$16 sps:$4 sm:$0xff]  }
 0x173   : > { %925 = vmatprep.mubr.bf16.mxu0 %v14488_v2  ;;  %3060 = vmatpush1.bf16.msra.mxu1 %v12988_v26  ;;  %v13058_v26 = vld [vmem:[#allocation10 + $0x368] ss:$16 sps:$4 sm:$0xff]  }
 0x17a   : > { %10988 = vmatmul.mubr.msk.bf16.gmra.mrb[20].mxu0 %vm621_vm0, %v12896_v27  ;;  %v12959_v27 = vld [vmem:[%s16233_s0 + $0xa0] sm:$0xff]  }
 0x17b   : > { %935 = vmatprep.mubr.bf16.mxu0 %v14488_v2 }
 0x182   : > { %10989 = vmatmul.mubr.msk.bf16.gmra.mrb[24].mxu0 %vm621_vm0, %v12897_v28  ;;  %v12989_v28 = vld [vmem:[#allocation10 + $0x284] ss:$16 sps:$4 sm:$0xff]  }
 0x183   : > { %945 = vmatprep.mubr.bf16.mxu0 %v14488_v2  ;;  %3061 = vmatprep.subr.bf16.mxu1 %v12989_v28  ;;  %v13061_v28 = vld [vmem:[#allocation10 + $0x388] ss:$16 sps:$4 sm:$0xff]  }
 0x18a   : > { %10990 = vmatmul.mubr.msk.bf16.gmra.mrb[28].mxu0 %vm621_vm0, %v12898_v29  ;;  %v12991_v29 = vld [vmem:[#allocation10 + $0x280] ss:$16 sps:$4 sm:$0xff]  }
 0x18b   : > { %1093 = vmatprep.mubr.bf16.mxu0 %v14488_v2  ;;  %3062 = vmatpush1.bf16.msra.mxu1 %v12991_v29  ;;  %v13066_v29 = vld [vmem:[#allocation10 + $0x3ac] ss:$16 sps:$4 sm:$0xff]  }
 0x192   : > { %11003 = vmatmul.mubr.msk.bf16.vlgmr.msra.gmra.mrb[0].mxu0 %vm621_vm0, %v12899_v30  ;;  %v12992_v30 = vld [vmem:[#allocation10 + $0x2a4] ss:$16 sps:$4 sm:$0xff]  }
 0x193   : > { %1312 = vmatpush1.bf16.msra.mxu0 %v12900_v31  ;;  %1103 = vmatprep.mubr.bf16.mxu0 %v14488_v2  ;;  %v12994_v31 = vld [vmem:[#allocation10 + $0x2a0] ss:$16 sps:$4 sm:$0xff]  }
 0x194   : > { %1313 = vmatprep.subr.bf16.mxu0 %v12909_v32  ;;  %v12960_v32 = vld [vmem:[%s16233_s0 + $0xa8] sm:$0xff]   ;;  %3063 = vmatprep.subr.bf16.mxu1 %v12992_v30 }
 0x195   : > { %3064 = vmatpush1.bf16.msra.mxu1 %v12994_v31  ;;  %v13064_v30 = vld [vmem:[#allocation10 + $0x3a8] ss:$16 sps:$4 sm:$0xff]   ;;  %v13069_v31 = vld [vmem:[#allocation10 + $0x3cc] ss:$16 sps:$4 sm:$0xff]  }
 0x197   : > { %1314 = vmatpush1.bf16.msra.mxu0 %v12907_v33  ;;  %v12995_v33 = vld [vmem:[#allocation10 + $0x2c4] ss:$16 sps:$4 sm:$0xff]  }
 0x198   : > { %1561 = vmatprep.subr.bf16.mxu0 %v12916_v34  ;;  %v12997_v34 = vld [vmem:[#allocation10 + $0x2c0] ss:$16 sps:$4 sm:$0xff]   ;;  %3065 = vmatprep.subr.bf16.mxu1 %v12995_v33  ;;  %v13072_v33 = vld [vmem:[#allocation10 + $0x3ec] ss:$16 sps:$4 sm:$0xff]  }
 0x199   : > { %3066 = vmatpush1.bf16.msra.mxu1 %v12997_v34  ;;  %v13070_v34 = vld [vmem:[#allocation10 + $0x3e8] ss:$16 sps:$4 sm:$0xff]  }
 0x19a   : > { %11004 = vmatmul.mubr.msk.bf16.gmra.mrb[4].mxu0 %vm621_vm0, %v12903_v35  ;;  %v12998_v35 = vld [vmem:[#allocation10 + $0x2e4] ss:$16 sps:$4 sm:$0xff]  }
 0x19b   : > { %1113 = vmatprep.mubr.bf16.mxu0 %v14488_v2  ;;  %3067 = vmatprep.subr.bf16.mxu1 %v12998_v35  ;;  %v13075_v35 = vld [vmem:[#allocation10 + $0x4] ss:$16 sps:$4 sm:$0xff]  }
 0x1a2   : > { %11005 = vmatmul.mubr.msk.bf16.gmra.mrb[8].mxu0 %vm621_vm0, %v12904_v36  ;;  %v13000_v36 = vld [vmem:[#allocation10 + $0x2e0] ss:$16 sps:$4 sm:$0xff]  }
 0x1a3   : > { %1123 = vmatprep.mubr.bf16.mxu0 %v14488_v2  ;;  %3068 = vmatpush1.bf16.msra.mxu1 %v13000_v36  ;;  %v2458_v36 = vlaneseq }
 0x1aa   : > { %11006 = vmatmul.mubr.msk.bf16.gmra.mrb[12].mxu0 %vm621_vm0, %v12905_v37  ;;  %v12961_v37 = vld [vmem:[%s16233_s0 + $0xb0] sm:$0xff]  }
 0x1ab   : > { %1133 = vmatprep.mubr.bf16.mxu0 %v14488_v2 }
 0x1b2   : > { %11007 = vmatmul.mubr.msk.bf16.gmra.mrb[16].mxu0 %vm621_vm0, %v12906_v38  ;;  %v13001_v38 = vld [vmem:[#allocation10 + $0x304] ss:$16 sps:$4 sm:$0xff]  }
 0x1b3   : > { %1143 = vmatprep.mubr.bf16.mxu0 %v14488_v2  ;;  %3069 = vmatprep.subr.bf16.mxu1 %v13001_v38 }
 0x1ba   : > { %11008 = vmatmul.mubr.msk.bf16.gmra.mrb[20].mxu0 %vm621_vm0, %v12910_v39  ;;  %v13003_v39 = vld [vmem:[#allocation10 + $0x300] ss:$16 sps:$4 sm:$0xff]  }
 0x1bb   : > { %1153 = vmatprep.mubr.bf16.mxu0 %v14488_v2  ;;  %3070 = vmatpush1.bf16.msra.mxu1 %v13003_v39  ;;  %v2456_v39 = vld [vmem:[#allocation8] sm:$0x3] }
 0x1c2   : > { %11009 = vmatmul.mubr.msk.bf16.gmra.mrb[24].mxu0 %vm621_vm0, %v12911_v40  ;;  %v13004_v40 = vld [vmem:[#allocation10 + $0x324] ss:$16 sps:$4 sm:$0xff]  }
 0x1c3   : > { %1163 = vmatprep.mubr.bf16.mxu0 %v14488_v2  ;;  %3071 = vmatprep.subr.bf16.mxu1 %v13004_v40 }
 0x1ca   : > { %11010 = vmatmul.mubr.msk.bf16.gmra.mrb[28].mxu0 %vm621_vm0, %v12912_v41  ;;  %v13006_v41 = vld [vmem:[#allocation10 + $0x320] ss:$16 sps:$4 sm:$0xff]  }
 0x1cb   : > { %1343 = vmatprep.mubr.bf16.mxu0 %v14488_v2  ;;  %3072 = vmatpush1.bf16.msra.mxu1 %v13006_v41 }
 0x1d2   : > { %11023 = vmatmul.mubr.msk.bf16.vlgmr.msra.gmra.mrb[0].mxu0 %vm621_vm0, %v12913_v42  ;;  %v12962_v42 = vld [vmem:[%s16233_s0 + $0xb8] sm:$0xff]  }
 0x1d3   : > { %1562 = vmatpush1.bf16.msra.mxu0 %v12914_v43  ;;  %1353 = vmatprep.mubr.bf16.mxu0 %v14488_v2  ;;  %v13007_v43 = vld [vmem:[#allocation10 + $0x344] ss:$16 sps:$4 sm:$0xff]  }
 0x1d4   : > { %1563 = vmatprep.subr.bf16.mxu0 %v12923_v44  ;;  %v13009_v44 = vld [vmem:[#allocation10 + $0x340] ss:$16 sps:$4 sm:$0xff]   ;;  %3073 = vmatprep.subr.bf16.mxu1 %v13007_v43 }
 0x1d5   : > { %3074 = vmatpush1.bf16.msra.mxu1 %v13009_v44 }
 0x1d7   : > { %1564 = vmatpush1.bf16.msra.mxu0 %v12921_v45  ;;  %v13010_v45 = vld [vmem:[#allocation10 + $0x364] ss:$16 sps:$4 sm:$0xff]  }
 0x1d8   : > { %1811 = vmatprep.subr.bf16.mxu0 %v12930_v46  ;;  %v13012_v46 = vld [vmem:[#allocation10 + $0x360] ss:$16 sps:$4 sm:$0xff]   ;;  %3075 = vmatprep.subr.bf16.mxu1 %v13010_v45 }
 0x1d9   : > { %3076 = vmatpush1.bf16.msra.mxu1 %v13012_v46 }
 0x1da   : > { %11024 = vmatmul.mubr.msk.bf16.gmra.mrb[4].mxu0 %vm621_vm0, %v12917_v47  ;;  %v12966_v47 = vld [vmem:[%s16233_s0 + $0xc0] sm:$0xff]  }
 0x1db   : > { %1363 = vmatprep.mubr.bf16.mxu0 %v14488_v2 }
 0x1e2   : > { %11025 = vmatmul.mubr.msk.bf16.gmra.mrb[8].mxu0 %vm621_vm0, %v12918_v48  ;;  %v13013_v48 = vld [vmem:[#allocation10 + $0x384] ss:$16 sps:$4 sm:$0xff]  }
 0x1e3   : > { %1373 = vmatprep.mubr.bf16.mxu0 %v14488_v2  ;;  %3077 = vmatprep.subr.bf16.mxu1 %v13013_v48 }
 0x1ea   : > { %11026 = vmatmul.mubr.msk.bf16.gmra.mrb[12].mxu0 %vm621_vm0, %v12919_v49  ;;  %v13015_v49 = vld [vmem:[#allocation10 + $0x380] ss:$16 sps:$4 sm:$0xff]  }
 0x1eb   : > { %1383 = vmatprep.mubr.bf16.mxu0 %v14488_v2  ;;  %3078 = vmatpush1.bf16.msra.mxu1 %v13015_v49 }
 0x1f2   : > { %11027 = vmatmul.mubr.msk.bf16.gmra.mrb[16].mxu0 %vm621_vm0, %v12920_v50  ;;  %v13016_v50 = vld [vmem:[#allocation10 + $0x3a4] ss:$16 sps:$4 sm:$0xff]  }
 0x1f3   : > { %1393 = vmatprep.mubr.bf16.mxu0 %v14488_v2  ;;  %3079 = vmatprep.subr.bf16.mxu1 %v13016_v50 }
 0x1fa   : > { %11028 = vmatmul.mubr.msk.bf16.gmra.mrb[20].mxu0 %vm621_vm0, %v12924_v51  ;;  %v13018_v51 = vld [vmem:[#allocation10 + $0x3a0] ss:$16 sps:$4 sm:$0xff]  }
 0x1fb   : > { %1403 = vmatprep.mubr.bf16.mxu0 %v14488_v2  ;;  %3080 = vmatpush1.bf16.msra.mxu1 %v13018_v51 }
 0x202   : > { %11029 = vmatmul.mubr.msk.bf16.gmra.mrb[24].mxu0 %vm621_vm0, %v12925_v52  ;;  %v12967_v52 = vld [vmem:[%s16233_s0 + $0xc8] sm:$0xff]  }
 0x203   : > { %1413 = vmatprep.mubr.bf16.mxu0 %v14488_v2 }
 0x20a   : > { %11030 = vmatmul.mubr.msk.bf16.gmra.mrb[28].mxu0 %vm621_vm0, %v12926_v53  ;;  %v13019_v53 = vld [vmem:[#allocation10 + $0x3c4] ss:$16 sps:$4 sm:$0xff]  }
 0x20b   : > { %1593 = vmatprep.mubr.bf16.mxu0 %v14488_v2  ;;  %3081 = vmatprep.subr.bf16.mxu1 %v13019_v53 }
 0x212   : > { %11043 = vmatmul.mubr.msk.bf16.vlgmr.msra.gmra.mrb[0].mxu0 %vm621_vm0, %v12927_v54  ;;  %v13021_v54 = vld [vmem:[#allocation10 + $0x3c0] ss:$16 sps:$4 sm:$0xff]  }
 0x213   : > { %1812 = vmatpush1.bf16.msra.mxu0 %v12928_v55  ;;  %1603 = vmatprep.mubr.bf16.mxu0 %v14488_v2  ;;  %v13022_v55 = vld [vmem:[#allocation10 + $0x3e4] ss:$16 sps:$4 sm:$0xff]  }
 0x214   : > { %1813 = vmatprep.subr.bf16.mxu0 %v12937_v56  ;;  %3082 = vmatpush1.bf16.msra.mxu1 %v13021_v54  ;;  %v13024_v56 = vld [vmem:[#allocation10 + $0x3e0] ss:$16 sps:$4 sm:$0xff]  }
 0x215   : > { %3083 = vmatprep.subr.bf16.mxu1 %v13022_v55 }
 0x217   : > { %1814 = vmatpush1.bf16.msra.mxu0 %v12935_v57  ;;  %v12968_v57 = vld [vmem:[%s16233_s0 + $0xd0] sm:$0xff]  }
 0x218   : > { %2061 = vmatprep.subr.bf16.mxu0 %v12944_v58  ;;  %3084 = vmatpush1.bf16.msra.mxu1 %v13024_v56  ;;  %v12969_v58 = vld [vmem:[%s16233_s0 + $0xe0] sm:$0xff]  }
 0x21a   : > { %11044 = vmatmul.mubr.msk.bf16.gmra.mrb[4].mxu0 %vm621_vm0, %v12931_v59  ;;  %v12970_v59 = vld [vmem:[%s16233_s0 + $0xe8] sm:$0xff]  }
 0x21b   : > { %1613 = vmatprep.mubr.bf16.mxu0 %v14488_v2  ;;  %3086 = vmatmul.mubr.bf16.vlgmr.msra.gmra.mrb[0].mxu1 %v14488_v2 }
 0x21c   : > { %3095 = vmatprep.mubr.bf16.mxu1 %v14488_v2 }
 0x222   : > { %11045 = vmatmul.mubr.msk.bf16.gmra.mrb[8].mxu0 %vm621_vm0, %v12932_v60  ;;  %v12971_v60 = vld [vmem:[%s16233_s0 + $0xf0] sm:$0xff]  }
 0x223   : > { %1623 = vmatprep.mubr.bf16.mxu0 %v14488_v2  ;;  %3096 = vmatmul.mubr.bf16.gmra.mrb[4].mxu1 %v14488_v2 }
 0x22a   : > { %11046 = vmatmul.mubr.msk.bf16.gmra.mrb[12].mxu0 %vm621_vm0, %v12933_v61  ;;  %v12972_v61 = vld [vmem:[%s16233_s0 + $0xf8] sm:$0xff]  }
 0x22b   : > { %1633 = vmatprep.mubr.bf16.mxu0 %v14488_v2 }
 0x232   : > { %11047 = vmatmul.mubr.msk.bf16.gmra.mrb[16].mxu0 %vm621_vm0, %v12934_v62  ;;  %v12973_v62 = vld [vmem:[%s16233_s0 + $0x100] sm:$0xff]  }
 0x233   : > { %1643 = vmatprep.mubr.bf16.mxu0 %v14488_v2 }
 0x23a   : > { %11048 = vmatmul.mubr.msk.bf16.gmra.mrb[20].mxu0 %vm621_vm0, %v12938_v63  ;;  %v12974_v63 = vld [vmem:[%s16233_s0 + $0x108] sm:$0xff]  }
 0x23b   : > { %1653 = vmatprep.mubr.bf16.mxu0 %v14488_v2 }
 0x242   : > { %11049 = vmatmul.mubr.msk.bf16.gmra.mrb[24].mxu0 %vm621_vm0, %v12939_v0  ;;  %v12975_v0 = vld [vmem:[%s16233_s0 + $0x110] sm:$0xff]  }
 0x243   : > { %1663 = vmatprep.mubr.bf16.mxu0 %v14488_v2 }
 0x24a   : > { %11050 = vmatmul.mubr.msk.bf16.gmra.mrb[28].mxu0 %vm621_vm0, %v12940_v1  ;;  %v12976_v1 = vld [vmem:[%s16233_s0 + $0x118] sm:$0xff]  }
 0x24b   : > { %1843 = vmatprep.mubr.bf16.mxu0 %v14488_v2 }
 0x252   : > { %11063 = vmatmul.mubr.msk.bf16.vlgmr.msra.gmra.mrb[0].mxu0 %vm621_vm0, %v12941_v3  ;;  %v13027_v3 = vld [vmem:[#allocation10 + $0x20c] ss:$16 sps:$4 sm:$0xff]  }
 0x253   : > { %2062 = vmatpush1.bf16.msra.mxu0 %v12942_v4  ;;  %1853 = vmatprep.mubr.bf16.mxu0 %v14488_v2  ;;  %v13025_v4 = vld [vmem:[#allocation10 + $0x208] ss:$16 sps:$4 sm:$0xff]  }
 0x254   : > { %2063 = vmatprep.subr.bf16.mxu0 %v12951_v5  ;;  %3166 = vmatprep.subr.bf16.mxu1 %v13027_v3  ;;  %v13030_v5 = vld [vmem:[#allocation10 + $0x22c] ss:$16 sps:$4 sm:$0xff]  }
 0x255   : > { %3167 = vmatpush1.bf16.msra.mxu1 %v13025_v4 }
 0x256   : > { %3168 = vmatprep.subr.bf16.mxu1 %v13030_v5 }
 0x257   : > { %2064 = vmatpush1.bf16.msra.mxu0 %v12949_v6  ;;  %v13028_v6 = vld [vmem:[#allocation10 + $0x228] ss:$16 sps:$4 sm:$0xff]  }
 0x258   : > { %2311 = vmatprep.subr.bf16.mxu0 %v12958_v7  ;;  %v13033_v7 = vld [vmem:[#allocation10 + $0x24c] ss:$16 sps:$4 sm:$0xff]  }
 0x259   : > { %3169 = vmatpush1.bf16.msra.mxu1 %v13028_v6 }
 0x25a   : > { %11064 = vmatmul.mubr.msk.bf16.gmra.mrb[4].mxu0 %vm621_vm0, %v12945_v8  ;;  %v13031_v8 = vld [vmem:[#allocation10 + $0x248] ss:$16 sps:$4 sm:$0xff]   ;;  %3170 = vmatprep.subr.bf16.mxu1 %v13033_v7 }
 0x25b   : > { %1863 = vmatprep.mubr.bf16.mxu0 %v14488_v2 }
 0x25d   : > { %3171 = vmatpush1.bf16.msra.mxu1 %v13031_v8 }
 0x262   : > { %11065 = vmatmul.mubr.msk.bf16.gmra.mrb[8].mxu0 %vm621_vm0, %v12946_v9  ;;  %v13036_v9 = vld [vmem:[#allocation10 + $0x26c] ss:$16 sps:$4 sm:$0xff]  }
 0x263   : > { %1873 = vmatprep.mubr.bf16.mxu0 %v14488_v2  ;;  %3172 = vmatprep.subr.bf16.mxu1 %v13036_v9 }
 0x26a   : > { %11066 = vmatmul.mubr.msk.bf16.gmra.mrb[12].mxu0 %vm621_vm0, %v12947_v10  ;;  %v13034_v10 = vld [vmem:[#allocation10 + $0x268] ss:$16 sps:$4 sm:$0xff]  }
 0x26b   : > { %1883 = vmatprep.mubr.bf16.mxu0 %v14488_v2  ;;  %3173 = vmatpush1.bf16.msra.mxu1 %v13034_v10 }
 0x272   : > { %11067 = vmatmul.mubr.msk.bf16.gmra.mrb[16].mxu0 %vm621_vm0, %v12948_v11  ;;  %v13039_v11 = vld [vmem:[#allocation10 + $0x28c] ss:$16 sps:$4 sm:$0xff]  }
 0x273   : > { %1893 = vmatprep.mubr.bf16.mxu0 %v14488_v2  ;;  %3174 = vmatprep.subr.bf16.mxu1 %v13039_v11 }
 0x27a   : > { %11068 = vmatmul.mubr.msk.bf16.gmra.mrb[20].mxu0 %vm621_vm0, %v12952_v12  ;;  %v13037_v12 = vld [vmem:[#allocation10 + $0x288] ss:$16 sps:$4 sm:$0xff]  }
 0x27b   : > { %1903 = vmatprep.mubr.bf16.mxu0 %v14488_v2  ;;  %3175 = vmatpush1.bf16.msra.mxu1 %v13037_v12 }
 0x282   : > { %11069 = vmatmul.mubr.msk.bf16.gmra.mrb[24].mxu0 %vm621_vm0, %v12953_v13  ;;  %v13042_v13 = vld [vmem:[#allocation10 + $0x2ac] ss:$16 sps:$4 sm:$0xff]  }
 0x283   : > { %1913 = vmatprep.mubr.bf16.mxu0 %v14488_v2  ;;  %3176 = vmatprep.subr.bf16.mxu1 %v13042_v13 }
 0x28a   : > { %11070 = vmatmul.mubr.msk.bf16.gmra.mrb[28].mxu0 %vm621_vm0, %v12954_v14  ;;  %v13040_v14 = vld [vmem:[#allocation10 + $0x2a8] ss:$16 sps:$4 sm:$0xff]  }
 0x28b   : > { %2093 = vmatprep.mubr.bf16.mxu0 %v14488_v2  ;;  %3177 = vmatpush1.bf16.msra.mxu1 %v13040_v14 }
 0x28c   : > { %3178 = vmatprep.subr.bf16.mxu1 %v13045_v15 }
 0x28f   : > { %3179 = vmatpush1.bf16.msra.mxu1 %v13043_v16 }
 0x290   : > { %3180 = vmatprep.subr.bf16.mxu1 %v13048_v17 }
 0x292   : > { %11083 = vmatmul.mubr.msk.bf16.vlgmr.msra.gmra.mrb[0].mxu0 %vm621_vm0, %v12955_v19  ;;  %v13051_v19 = vld [vmem:[#allocation10 + $0x30c] ss:$16 sps:$4 sm:$0xff]  }
 0x293   : > { %2312 = vmatpush1.bf16.msra.mxu0 %v12956_v21  ;;  %2103 = vmatprep.mubr.bf16.mxu0 %v14488_v2  ;;  %v13054_v21 = vld [vmem:[#allocation10 + $0x32c] ss:$16 sps:$4 sm:$0xff]  }
 0x294   : > { %2313 = vmatprep.subr.bf16.mxu0 %v12965_v22  ;;  %3181 = vmatpush1.bf16.msra.mxu1 %v13046_v18  ;;  %v13052_v22 = vld [vmem:[#allocation10 + $0x328] ss:$16 sps:$4 sm:$0xff]  }
 0x295   : > { %3182 = vmatprep.subr.bf16.mxu1 %v13051_v19 }
 0x297   : > { %2314 = vmatpush1.bf16.msra.mxu0 %v12963_v25  ;;  %v13060_v25 = vld [vmem:[#allocation10 + $0x36c] ss:$16 sps:$4 sm:$0xff]  }
 0x298   : > { %3183 = vmatpush1.bf16.msra.mxu1 %v13049_v20 }
 0x299   : > { %3184 = vmatprep.subr.bf16.mxu1 %v13054_v21 }
 0x29a   : > { %11084 = vmatmul.mubr.msk.bf16.gmra.mrb[4].mxu0 %vm621_vm0, %v12959_v27  ;;  %v13063_v27 = vld [vmem:[#allocation10 + $0x38c] ss:$16 sps:$4 sm:$0xff]  }
 0x29b   : > { %2113 = vmatprep.mubr.bf16.mxu0 %v14488_v2 }
 0x29c   : > { %3185 = vmatpush1.bf16.msra.mxu1 %v13052_v22 }
 0x29d   : > { %3186 = vmatprep.subr.bf16.mxu1 %v13057_v23 }
 0x2a0   : > { %3187 = vmatpush1.bf16.msra.mxu1 %v13055_v24 }
 0x2a1   : > { %3188 = vmatprep.subr.bf16.mxu1 %v13060_v25 }
 0x2a2   : > { %11085 = vmatmul.mubr.msk.bf16.gmra.mrb[8].mxu0 %vm621_vm0, %v12960_v32  ;;  %v13067_v32 = vld [vmem:[#allocation10 + $0x3c8] ss:$16 sps:$4 sm:$0xff]  }
 0x2a3   : > { %2123 = vmatprep.mubr.bf16.mxu0 %v14488_v2 }
 0x2a4   : > { %3189 = vmatpush1.bf16.msra.mxu1 %v13058_v26 }
 0x2a5   : > { %3190 = vmatprep.subr.bf16.mxu1 %v13063_v27 }
 0x2a8   : > { %3191 = vmatpush1.bf16.msra.mxu1 %v13061_v28 }
 0x2a9   : > { %3192 = vmatprep.subr.bf16.mxu1 %v13066_v29 }
 0x2aa   : > { %11086 = vmatmul.mubr.msk.bf16.gmra.mrb[12].mxu0 %vm621_vm0, %v12961_v37  ;;  %v15200_v37 = vshrl.u32 %v2458_v36, 7 }
 0x2ab   : > { %2133 = vmatprep.mubr.bf16.mxu0 %v14488_v2 }
 0x2ac   : > { %3193 = vmatpush1.bf16.msra.mxu1 %v13064_v30  ;;  %v15203_v38 = vsub.s32 0, %v15200_v37  ;;  %v15206_v40 = vsub.s32 1, %v15200_v37 }
 0x2ad   : > { %3194 = vmatprep.subr.bf16.mxu1 %v13069_v31 }
 0x2ae   : > { %v15209_v41 = vrot.slane %v2456_v39, %v15203_v38 }
 0x2b0   : > { %3195 = vmatpush1.bf16.msra.mxu1 %v13067_v32 }
 0x2b1   : > { %3196 = vmatprep.subr.bf16.mxu1 %v13072_v33 }
 0x2b2   : > { %11087 = vmatmul.mubr.msk.bf16.gmra.mrb[16].mxu0 %vm621_vm0, %v12962_v42  ;;  %v15212_v42 = vrot.slane %v2456_v39, %v15206_v40 }
 0x2b3   : > { %2143 = vmatprep.mubr.bf16.mxu0 %v14488_v2 }
 0x2b4   : > { %3197 = vmatpush1.bf16.msra.mxu1 %v13070_v34 }
 0x2b5   : > { %3599 = vmatprep.subr.bf16.mxu1 %v13075_v35 }
 0x2ba   : > { %11088 = vmatmul.mubr.msk.bf16.gmra.mrb[20].mxu0 %vm621_vm0, %v12966_v47 }
 0x2bb   : > { %2153 = vmatprep.mubr.bf16.mxu0 %v14488_v2 }
 0x2c2   : > { %11089 = vmatmul.mubr.msk.bf16.gmra.mrb[24].mxu0 %vm621_vm0, %v12967_v52 }
 0x2c3   : > { %2163 = vmatprep.mubr.bf16.mxu0 %v14488_v2 }
 0x2ca   : > { %11090 = vmatmul.mubr.msk.bf16.gmra.mrb[28].mxu0 %vm621_vm0, %v12968_v57 }
 0x2cb   : > { %2343 = vmatprep.mubr.bf16.mxu0 %v14488_v2 }
 0x2d2   : > { %11103 = vmatmul.mubr.msk.bf16.vlgmr.msra.gmra.mrb[0].mxu0 %vm621_vm0, %v12969_v58 }
 0x2d3   : > { %2353 = vmatprep.mubr.bf16.mxu0 %v14488_v2 }
 0x2da   : > { %11104 = vmatmul.mubr.msk.bf16.gmra.mrb[4].mxu0 %vm621_vm0, %v12970_v59 }
 0x2db   : > { %2363 = vmatprep.mubr.bf16.mxu0 %v14488_v2 }
 0x2e2   : > { %11105 = vmatmul.mubr.msk.bf16.gmra.mrb[8].mxu0 %vm621_vm0, %v12971_v60 }
 0x2e3   : > { %2373 = vmatprep.mubr.bf16.mxu0 %v14488_v2 }
 0x2ea   : > { %11106 = vmatmul.mubr.msk.bf16.gmra.mrb[12].mxu0 %vm621_vm0, %v12972_v61 }
 0x2eb   : > { %2383 = vmatprep.mubr.bf16.mxu0 %v14488_v2 }
 0x2f2   : > { %11107 = vmatmul.mubr.msk.bf16.gmra.mrb[16].mxu0 %vm621_vm0, %v12973_v62 }
 0x2f3   : > { %2393 = vmatprep.mubr.bf16.mxu0 %v14488_v2 }
 0x2fa   : > { %11108 = vmatmul.mubr.msk.bf16.gmra.mrb[20].mxu0 %vm621_vm0, %v12974_v63 }
 0x2fb   : > { %2403 = vmatprep.mubr.bf16.mxu0 %v14488_v2 }
 0x302   : > { %11109 = vmatmul.mubr.msk.bf16.gmra.mrb[24].mxu0 %vm621_vm0, %v12975_v0 }
 0x303   : > { %2413 = vmatprep.mubr.bf16.mxu0 %v14488_v2 }
 0x30a   : > { %11110 = vmatmul.mubr.msk.bf16.gmra.mrb[28].mxu0 %vm621_vm0, %v12976_v1 }
 0x3a5   : > { %v2345_v43 = vpop.f32.mrb[0].mxu0 }
 0x3a6   : > { %v2468_v44 = vadd.f32 %v15209_v41, %v2345_v43  ;;  %v2347_v45 = vpop.f32.mrb[1].mxu0 }
 0x3a7   : > { %v2469_v46 = vadd.f32 %v15212_v42, %v2347_v45  ;;  %v2349_v47 = vpop.f32.mrb[2].mxu0 }
 0x3a8   : > { %v2470_v48 = vadd.f32 %v15209_v41, %v2349_v47  ;;  %v2351_v49 = vpop.f32.mrb[3].mxu0  ;;  %v2500_v51 = vmax.f32 %v2468_v44, 0.0 }
 0x3a9   : > { %v2471_v50 = vadd.f32 %v15212_v42, %v2351_v49  ;;  %v2501_v53 = vmax.f32 %v2469_v46, 0.0 }
 0x3aa   : > { %v2502_v52 = vmax.f32 %v2470_v48, 0.0 }
 0x3ab   : > { %v2503_v54 = vmax.f32 %v2471_v50, 0.0 }
 0x3ac   : > { %v15218_v55 = vpack.c.bf16 %v2502_v52, %v2500_v51 }
 0x3ad   : > { %v15220_v56 = vpack.c.bf16 %v2503_v54, %v2501_v53  ;;  %v2355_v57 = vpop.f32.mrb[4].mxu0 }
 0x3ae   : > { %v2472_v58 = vadd.f32 %v15209_v41, %v2355_v57  ;;  %v2357_v59 = vpop.f32.mrb[5].mxu0 }
 0x3af   : > { %v2473_v60 = vadd.f32 %v15212_v42, %v2357_v59  ;;  %v2359_v61 = vpop.f32.mrb[6].mxu0  ;;  %3105 = vmatprep.mubr.bf16.mxu1 %v15220_v56 }
 0x3b0   : > { %v2474_v62 = vadd.f32 %v15209_v41, %v2359_v61  ;;  %v2361_v63 = vpop.f32.mrb[7].mxu0  ;;  %3106 = vmatmul.mubr.bf16.gmra.mrb[8].mxu1 %v15218_v55  ;;  %v2504_v1 = vmax.f32 %v2472_v58, 0.0 }
 0x3b1   : > { %v2475_v0 = vadd.f32 %v15212_v42, %v2361_v63  ;;  %v2505_v4 = vmax.f32 %v2473_v60, 0.0 }
 0x3b2   : > { %v2506_v3 = vmax.f32 %v2474_v62, 0.0 }
 0x3b3   : > { %v2507_v5 = vmax.f32 %v2475_v0, 0.0 }
 0x3b4   : > { %v15228_v6 = vpack.c.bf16 %v2506_v3, %v2504_v1 }
 0x3b5   : > { %v15230_v7 = vpack.c.bf16 %v2507_v5, %v2505_v4  ;;  %v2365_v8 = vpop.f32.mrb[8].mxu0 }
 0x3b6   : > { %v2476_v9 = vadd.f32 %v15209_v41, %v2365_v8  ;;  %v2367_v10 = vpop.f32.mrb[9].mxu0 }
 0x3b7   : > { %v2477_v11 = vadd.f32 %v15212_v42, %v2367_v10  ;;  %v2369_v12 = vpop.f32.mrb[10].mxu0 }
 0x3b8   : > { %v2478_v13 = vadd.f32 %v15209_v41, %v2369_v12  ;;  %v2371_v14 = vpop.f32.mrb[11].mxu0  ;;  %v2508_v16 = vmax.f32 %v2476_v9, 0.0 }
 0x3b9   : > { %v2479_v15 = vadd.f32 %v15212_v42, %v2371_v14  ;;  %v2509_v18 = vmax.f32 %v2477_v11, 0.0 }
 0x3ba   : > { %v2510_v17 = vmax.f32 %v2478_v13, 0.0 }
 0x3bb   : > { %v2511_v19 = vmax.f32 %v2479_v15, 0.0 }
 0x3bc   : > { %v15236_v20 = vpack.c.bf16 %v2510_v17, %v2508_v16 }
 0x3bd   : > { %v15238_v21 = vpack.c.bf16 %v2511_v19, %v2509_v18  ;;  %v2375_v22 = vpop.f32.mrb[12].mxu0 }
 0x3be   : > { %v2480_v23 = vadd.f32 %v15209_v41, %v2375_v22  ;;  %v2377_v24 = vpop.f32.mrb[13].mxu0 }
 0x3bf   : > { %v2481_v25 = vadd.f32 %v15212_v42, %v2377_v24  ;;  %v2379_v26 = vpop.f32.mrb[14].mxu0  ;;  %3115 = vmatprep.mubr.bf16.mxu1 %v15238_v21 }
 0x3c0   : > { %v2482_v27 = vadd.f32 %v15209_v41, %v2379_v26  ;;  %v2381_v28 = vpop.f32.mrb[15].mxu0  ;;  %3116 = vmatmul.mubr.bf16.gmra.mrb[12].mxu1 %v15236_v20  ;;  %v2512_v30 = vmax.f32 %v2480_v23, 0.0 }
 0x3c1   : > { %v2483_v29 = vadd.f32 %v15212_v42, %v2381_v28  ;;  %v2513_v32 = vmax.f32 %v2481_v25, 0.0 }
 0x3c2   : > { %v2514_v31 = vmax.f32 %v2482_v27, 0.0 }
 0x3c3   : > { %v2515_v33 = vmax.f32 %v2483_v29, 0.0 }
 0x3c4   : > { %v15246_v34 = vpack.c.bf16 %v2514_v31, %v2512_v30 }
 0x3c5   : > { %v15248_v35 = vpack.c.bf16 %v2515_v33, %v2513_v32  ;;  %v2385_v36 = vpop.f32.mrb[16].mxu0 }
 0x3c6   : > { %v2484_v39 = vadd.f32 %v15209_v41, %v2385_v36  ;;  %v2387_v43 = vpop.f32.mrb[17].mxu0 }
 0x3c7   : > { %v2485_v44 = vadd.f32 %v15212_v42, %v2387_v43  ;;  %v2389_v45 = vpop.f32.mrb[18].mxu0 }
 0x3c8   : > { %v2486_v46 = vadd.f32 %v15209_v41, %v2389_v45  ;;  %v2391_v47 = vpop.f32.mrb[19].mxu0  ;;  %v2516_v49 = vmax.f32 %v2484_v39, 0.0 }
 0x3c9   : > { %v2487_v48 = vadd.f32 %v15212_v42, %v2391_v47  ;;  %v2517_v51 = vmax.f32 %v2485_v44, 0.0  ;;  %v13076_v47 = vld [vmem:[#allocation10 + $0x20] ss:$16 sps:$4 sm:$0xff]  }
 0x3ca   : > { %v2518_v50 = vmax.f32 %v2486_v46, 0.0 }
 0x3cb   : > { %v2519_v52 = vmax.f32 %v2487_v48, 0.0  ;;  %v13081_v48 = vld [vmem:[#allocation10 + $0x44] ss:$16 sps:$4 sm:$0xff]  }
 0x3cc   : > { %v15254_v53 = vpack.c.bf16 %v2518_v50, %v2516_v49  ;;  %v13079_v49 = vld [vmem:[#allocation10 + $0x40] ss:$16 sps:$4 sm:$0xff]   ;;  %v13084_v50 = vld [vmem:[#allocation10 + $0x64] ss:$16 sps:$4 sm:$0xff]  }
 0x3cd   : > { %v15256_v54 = vpack.c.bf16 %v2519_v52, %v2517_v51  ;;  %v2395_v57 = vpop.f32.mrb[20].mxu0  ;;  %v13082_v51 = vld [vmem:[#allocation10 + $0x60] ss:$16 sps:$4 sm:$0xff]   ;;  %v13087_v52 = vld [vmem:[#allocation10 + $0x84] ss:$16 sps:$4 sm:$0xff]  }
 0x3ce   : > { %v2488_v58 = vadd.f32 %v15209_v41, %v2395_v57  ;;  %v2397_v59 = vpop.f32.mrb[21].mxu0  ;;  %v13085_v57 = vld [vmem:[#allocation10 + $0x80] ss:$16 sps:$4 sm:$0xff]  }
 0x3cf   : > { %v2489_v60 = vadd.f32 %v15212_v42, %v2397_v59  ;;  %v2399_v61 = vpop.f32.mrb[22].mxu0  ;;  %3125 = vmatprep.mubr.bf16.mxu1 %v15256_v54  ;;  %v13088_v59 = vld [vmem:[#allocation10 + $0xa0] ss:$16 sps:$4 sm:$0xff]  }
 0x3d0   : > { %v2490_v62 = vadd.f32 %v15209_v41, %v2399_v61  ;;  %v2401_v63 = vpop.f32.mrb[23].mxu0  ;;  %3126 = vmatmul.mubr.bf16.gmra.mrb[16].mxu1 %v15254_v53  ;;  %v2520_v1 = vmax.f32 %v2488_v58, 0.0  ;;  %v13090_v58 = vld [vmem:[#allocation10 + $0xa4] ss:$16 sps:$4 sm:$0xff]   ;;  %v13091_v61 = vld [vmem:[#allocation10 + $0xc0] ss:$16 sps:$4 sm:$0xff]  }
 0x3d1   : > { %v2491_v0 = vadd.f32 %v15212_v42, %v2401_v63  ;;  %v2521_v4 = vmax.f32 %v2489_v60, 0.0  ;;  %v13093_v60 = vld [vmem:[#allocation10 + $0xc4] ss:$16 sps:$4 sm:$0xff]   ;;  %v13094_v63 = vld [vmem:[#allocation10 + $0xe0] ss:$16 sps:$4 sm:$0xff]  }
 0x3d2   : > { %v2522_v3 = vmax.f32 %v2490_v62, 0.0  ;;  %v13096_v62 = vld [vmem:[#allocation10 + $0xe4] ss:$16 sps:$4 sm:$0xff]  }
 0x3d3   : > { %v2523_v5 = vmax.f32 %v2491_v0, 0.0  ;;  %v13099_v0 = vld [vmem:[#allocation10 + $0x104] ss:$16 sps:$4 sm:$0xff]  }
 0x3d4   : > { %v15264_v8 = vpack.c.bf16 %v2522_v3, %v2520_v1  ;;  %v13097_v1 = vld [vmem:[#allocation10 + $0x100] ss:$16 sps:$4 sm:$0xff]   ;;  %v13102_v3 = vld [vmem:[#allocation10 + $0x124] ss:$16 sps:$4 sm:$0xff]  }
 0x3d5   : > { %v15266_v9 = vpack.c.bf16 %v2523_v5, %v2521_v4  ;;  %v2405_v10 = vpop.f32.mrb[24].mxu0  ;;  %v13100_v4 = vld [vmem:[#allocation10 + $0x120] ss:$16 sps:$4 sm:$0xff]   ;;  %v13105_v5 = vld [vmem:[#allocation10 + $0x144] ss:$16 sps:$4 sm:$0xff]  }
 0x3d6   : > { %v2492_v11 = vadd.f32 %v15209_v41, %v2405_v10  ;;  %v2407_v12 = vpop.f32.mrb[25].mxu0  ;;  %v13103_v10 = vld [vmem:[#allocation10 + $0x140] ss:$16 sps:$4 sm:$0xff]  }
 0x3d7   : > { %v2493_v13 = vadd.f32 %v15212_v42, %v2407_v12  ;;  %v2409_v14 = vpop.f32.mrb[26].mxu0  ;;  %v13106_v12 = vld [vmem:[#allocation10 + $0x160] ss:$16 sps:$4 sm:$0xff]  }
 0x3d8   : > { %v2494_v15 = vadd.f32 %v15209_v41, %v2409_v14  ;;  %v2411_v16 = vpop.f32.mrb[27].mxu0  ;;  %v2524_v18 = vmax.f32 %v2492_v11, 0.0  ;;  %v13108_v11 = vld [vmem:[#allocation10 + $0x164] ss:$16 sps:$4 sm:$0xff]   ;;  %v13109_v14 = vld [vmem:[#allocation10 + $0x180] ss:$16 sps:$4 sm:$0xff]  }
 0x3d9   : > { %v2495_v17 = vadd.f32 %v15212_v42, %v2411_v16  ;;  %v2525_v22 = vmax.f32 %v2493_v13, 0.0  ;;  %v13111_v13 = vld [vmem:[#allocation10 + $0x184] ss:$16 sps:$4 sm:$0xff]   ;;  %v13112_v16 = vld [vmem:[#allocation10 + $0x1a0] ss:$16 sps:$4 sm:$0xff]  }
 0x3da   : > { %v2526_v19 = vmax.f32 %v2494_v15, 0.0  ;;  %v13114_v15 = vld [vmem:[#allocation10 + $0x1a4] ss:$16 sps:$4 sm:$0xff]  }
 0x3db   : > { %v2527_v23 = vmax.f32 %v2495_v17, 0.0  ;;  %v13117_v17 = vld [vmem:[#allocation10 + $0x1c4] ss:$16 sps:$4 sm:$0xff]  }
 0x3dc   : > { %v15272_v24 = vpack.c.bf16 %v2526_v19, %v2524_v18  ;;  %v13115_v18 = vld [vmem:[#allocation10 + $0x1c0] ss:$16 sps:$4 sm:$0xff]   ;;  %v13120_v19 = vld [vmem:[#allocation10 + $0x1e4] ss:$16 sps:$4 sm:$0xff]  }
 0x3dd   : > { %v15274_v25 = vpack.c.bf16 %v2527_v23, %v2525_v22  ;;  %v2415_v26 = vpop.f32.mrb[28].mxu0  ;;  %v13118_v22 = vld [vmem:[#allocation10 + $0x1e0] ss:$16 sps:$4 sm:$0xff]   ;;  %v13123_v23 = vld [vmem:[#allocation10 + $0xc] ss:$16 sps:$4 sm:$0xff]  }
 0x3de   : > { %v2496_v27 = vadd.f32 %v15209_v41, %v2415_v26  ;;  %v2417_v28 = vpop.f32.mrb[29].mxu0  ;;  %v13121_v26 = vld [vmem:[#allocation10 + $0x8] ss:$16 sps:$4 sm:$0xff]  }
 0x3df   : > { %v2497_v29 = vadd.f32 %v15212_v42, %v2417_v28  ;;  %v2419_v30 = vpop.f32.mrb[30].mxu0  ;;  %3135 = vmatprep.mubr.bf16.mxu1 %v15274_v25  ;;  %v13124_v28 = vld [vmem:[#allocation10 + $0x28] ss:$16 sps:$4 sm:$0xff]  }
 0x3e0   : > { %v2498_v31 = vadd.f32 %v15209_v41, %v2419_v30  ;;  %v2421_v32 = vpop.f32.mrb[31].mxu0  ;;  %3136 = vmatmul.mubr.bf16.gmra.mrb[20].mxu1 %v15272_v24  ;;  %v2528_v36 = vmax.f32 %v2496_v27, 0.0  ;;  %v13073_v41 = vld [vmem:[#allocation10] ss:$16 sps:$4 sm:$0xff]   ;;  %v13126_v27 = vld [vmem:[#allocation10 + $0x2c] ss:$16 sps:$4 sm:$0xff]  }
 0x3e1   : > { %v2499_v33 = vadd.f32 %v15212_v42, %v2421_v32  ;;  %3145 = vmatprep.mubr.bf16.mxu1 %v14488_v2  ;;  %v2529_v43 = vmax.f32 %v2497_v29, 0.0  ;;  %v13078_v42 = vld [vmem:[#allocation10 + $0x24] ss:$16 sps:$4 sm:$0xff]   ;;  %v13129_v29 = vld [vmem:[#allocation10 + $0x4c] ss:$16 sps:$4 sm:$0xff]  }
 0x3e2   : > { %v2530_v39 = vmax.f32 %v2498_v31, 0.0  ;;  %v13127_v30 = vld [vmem:[#allocation10 + $0x48] ss:$16 sps:$4 sm:$0xff]   ;;  %v13132_v31 = vld [vmem:[#allocation10 + $0x6c] ss:$16 sps:$4 sm:$0xff]  }
 0x3e3   : > { %v2531_v44 = vmax.f32 %v2499_v33, 0.0  ;;  %v13130_v32 = vld [vmem:[#allocation10 + $0x68] ss:$16 sps:$4 sm:$0xff]   ;;  %v13135_v33 = vld [vmem:[#allocation10 + $0x8c] ss:$16 sps:$4 sm:$0xff]  }
 0x3e4   : > { %v15283_v45 = vpack.c.bf16 %v2530_v39, %v2528_v36  ;;  %v13133_v36 = vld [vmem:[#allocation10 + $0x88] ss:$16 sps:$4 sm:$0xff]   ;;  %v13138_v39 = vld [vmem:[#allocation10 + $0xac] ss:$16 sps:$4 sm:$0xff]  }
 0x3e5   : > { %v15285_v46 = vpack.c.bf16 %v2531_v44, %v2529_v43  ;;  %v13136_v43 = vld [vmem:[#allocation10 + $0xa8] ss:$16 sps:$4 sm:$0xff]   ;;  %v13141_v44 = vld [vmem:[#allocation10 + $0xcc] ss:$16 sps:$4 sm:$0xff]  }
 0x3e8   : > { %3146 = vmatmul.mubr.bf16.gmra.mrb[24].mxu1 %v14488_v2 }
 0x3e9   : > { %3155 = vmatprep.mubr.bf16.mxu1 %v14488_v2 }
 0x3f0   : > { %3156 = vmatmul.mubr.bf16.gmra.mrb[28].mxu1 %v14488_v2 }
 0x3f1   : > { %3198 = vmatprep.mubr.bf16.mxu1 %v14488_v2 }
 0x3f8   : > { %3199 = vmatmul.mubr.bf16.vlgmr.msra.gmra.mrb[32].mxu1 %v14488_v2 }
 0x3f9   : > { %3600 = vmatpush1.bf16.msra.mxu1 %v13073_v41  ;;  %3208 = vmatprep.mubr.bf16.mxu1 %v14488_v2  ;;  %v13139_v41 = vld [vmem:[#allocation10 + $0xc8] ss:$16 sps:$4 sm:$0xff]  }
 0x3fa   : > { %3601 = vmatprep.subr.bf16.mxu1 %v13078_v42  ;;  %v13144_v42 = vld [vmem:[#allocation10 + $0xec] ss:$16 sps:$4 sm:$0xff]  }
 0x3fd   : > { %3602 = vmatpush1.bf16.msra.mxu1 %v13076_v47  ;;  %v13142_v47 = vld [vmem:[#allocation10 + $0xe8] ss:$16 sps:$4 sm:$0xff]  }
 0x3fe   : > { %3603 = vmatprep.subr.bf16.mxu1 %v13081_v48  ;;  %v13147_v48 = vld [vmem:[#allocation10 + $0x10c] ss:$16 sps:$4 sm:$0xff]  }
 0x400   : > { %3209 = vmatmul.mubr.bf16.gmra.mrb[36].mxu1 %v14488_v2 }
 0x401   : > { %3218 = vmatprep.mubr.bf16.mxu1 %v15220_v56  ;;  %3604 = vmatpush1.bf16.msra.mxu1 %v13079_v49  ;;  %v13145_v49 = vld [vmem:[#allocation10 + $0x108] ss:$16 sps:$4 sm:$0xff]  }
 0x402   : > { %3605 = vmatprep.subr.bf16.mxu1 %v13084_v50  ;;  %v13150_v50 = vld [vmem:[#allocation10 + $0x12c] ss:$16 sps:$4 sm:$0xff]  }
 0x405   : > { %3606 = vmatpush1.bf16.msra.mxu1 %v13082_v51  ;;  %v13148_v51 = vld [vmem:[#allocation10 + $0x128] ss:$16 sps:$4 sm:$0xff]  }
 0x406   : > { %3607 = vmatprep.subr.bf16.mxu1 %v13087_v52  ;;  %v13153_v52 = vld [vmem:[#allocation10 + $0x14c] ss:$16 sps:$4 sm:$0xff]  }
 0x408   : > { %3219 = vmatmul.mubr.bf16.gmra.mrb[40].mxu1 %v15218_v55 }
 0x409   : > { %3228 = vmatprep.mubr.bf16.mxu1 %v15238_v21  ;;  %3608 = vmatpush1.bf16.msra.mxu1 %v13085_v57  ;;  %v13151_v57 = vld [vmem:[#allocation10 + $0x148] ss:$16 sps:$4 sm:$0xff]  }
 0x40a   : > { %3609 = vmatprep.subr.bf16.mxu1 %v13090_v58  ;;  %v13156_v58 = vld [vmem:[#allocation10 + $0x16c] ss:$16 sps:$4 sm:$0xff]  }
 0x40d   : > { %3610 = vmatpush1.bf16.msra.mxu1 %v13088_v59  ;;  %v13154_v59 = vld [vmem:[#allocation10 + $0x168] ss:$16 sps:$4 sm:$0xff]  }
 0x40e   : > { %3611 = vmatprep.subr.bf16.mxu1 %v13093_v60  ;;  %v13159_v60 = vld [vmem:[#allocation10 + $0x18c] ss:$16 sps:$4 sm:$0xff]  }
 0x410   : > { %3229 = vmatmul.mubr.bf16.gmra.mrb[44].mxu1 %v15236_v20 }
 0x411   : > { %3238 = vmatprep.mubr.bf16.mxu1 %v15256_v54  ;;  %3612 = vmatpush1.bf16.msra.mxu1 %v13091_v61  ;;  %v13157_v61 = vld [vmem:[#allocation10 + $0x188] ss:$16 sps:$4 sm:$0xff]  }
 0x412   : > { %3613 = vmatprep.subr.bf16.mxu1 %v13096_v62  ;;  %v13162_v62 = vld [vmem:[#allocation10 + $0x1ac] ss:$16 sps:$4 sm:$0xff]  }
 0x415   : > { %3614 = vmatpush1.bf16.msra.mxu1 %v13094_v63  ;;  %v13160_v63 = vld [vmem:[#allocation10 + $0x1a8] ss:$16 sps:$4 sm:$0xff]  }
 0x416   : > { %3615 = vmatprep.subr.bf16.mxu1 %v13099_v0  ;;  %v13165_v0 = vld [vmem:[#allocation10 + $0x1cc] ss:$16 sps:$4 sm:$0xff]  }
 0x418   : > { %3239 = vmatmul.mubr.bf16.gmra.mrb[48].mxu1 %v15254_v53 }
 0x419   : > { %3248 = vmatprep.mubr.bf16.mxu1 %v15274_v25  ;;  %3616 = vmatpush1.bf16.msra.mxu1 %v13097_v1  ;;  %v13163_v1 = vld [vmem:[#allocation10 + $0x1c8] ss:$16 sps:$4 sm:$0xff]  }
 0x41a   : > { %3617 = vmatprep.subr.bf16.mxu1 %v13102_v3  ;;  %v13168_v3 = vld [vmem:[#allocation10 + $0x1ec] ss:$16 sps:$4 sm:$0xff]  }
 0x41d   : > { %3618 = vmatpush1.bf16.msra.mxu1 %v13100_v4  ;;  %v13166_v4 = vld [vmem:[#allocation10 + $0x1e8] ss:$16 sps:$4 sm:$0xff]  }
 0x41e   : > { %3619 = vmatprep.subr.bf16.mxu1 %v13105_v5  ;;  %v13171_v5 = vld [vmem:[#allocation10 + $0x404] ss:$16 sps:$4 sm:$0xff]  }
 0x420   : > { %3249 = vmatmul.mubr.bf16.gmra.mrb[52].mxu1 %v15272_v24 }
 0x421   : > { %3620 = vmatpush1.bf16.msra.mxu1 %v13103_v10  ;;  %3258 = vmatprep.mubr.bf16.mxu1 %v14488_v2  ;;  %v13169_v10 = vld [vmem:[#allocation10 + $0x400] ss:$16 sps:$4 sm:$0xff]  }
 0x422   : > { %3621 = vmatprep.subr.bf16.mxu1 %v13108_v11  ;;  %v13174_v11 = vld [vmem:[#allocation10 + $0x424] ss:$16 sps:$4 sm:$0xff]  }
 0x425   : > { %3622 = vmatpush1.bf16.msra.mxu1 %v13106_v12  ;;  %v13172_v12 = vld [vmem:[#allocation10 + $0x420] ss:$16 sps:$4 sm:$0xff]  }
 0x426   : > { %3623 = vmatprep.subr.bf16.mxu1 %v13111_v13  ;;  %v13177_v13 = vld [vmem:[#allocation10 + $0x444] ss:$16 sps:$4 sm:$0xff]  }
 0x428   : > { %3259 = vmatmul.mubr.bf16.gmra.mrb[56].mxu1 %v14488_v2 }
 0x429   : > { %3624 = vmatpush1.bf16.msra.mxu1 %v13109_v14  ;;  %3268 = vmatprep.mubr.bf16.mxu1 %v14488_v2  ;;  %v13175_v14 = vld [vmem:[#allocation10 + $0x440] ss:$16 sps:$4 sm:$0xff]  }
 0x42a   : > { %3625 = vmatprep.subr.bf16.mxu1 %v13114_v15  ;;  %v13180_v15 = vld [vmem:[#allocation10 + $0x464] ss:$16 sps:$4 sm:$0xff]  }
 0x42d   : > { %3626 = vmatpush1.bf16.msra.mxu1 %v13112_v16  ;;  %v13178_v16 = vld [vmem:[#allocation10 + $0x460] ss:$16 sps:$4 sm:$0xff]  }
 0x42e   : > { %3627 = vmatprep.subr.bf16.mxu1 %v13117_v17  ;;  %v13183_v17 = vld [vmem:[#allocation10 + $0x484] ss:$16 sps:$4 sm:$0xff]  }
 0x430   : > { %3269 = vmatmul.mubr.bf16.gmra.mrb[60].mxu1 %v14488_v2 }
 0x431   : > { %3628 = vmatpush1.bf16.msra.mxu1 %v13115_v18  ;;  %3631 = vmatprep.mubr.bf16.mxu1 %v14488_v2  ;;  %v13181_v18 = vld [vmem:[#allocation10 + $0x480] ss:$16 sps:$4 sm:$0xff]  }
 0x432   : > { %3629 = vmatprep.subr.bf16.mxu1 %v13120_v19  ;;  %v13186_v19 = vld [vmem:[#allocation10 + $0x4a4] ss:$16 sps:$4 sm:$0xff]  }
 0x435   : > { %3630 = vmatpush1.bf16.msra.mxu1 %v13118_v22  ;;  %v13184_v22 = vld [vmem:[#allocation10 + $0x4a0] ss:$16 sps:$4 sm:$0xff]  }
 0x436   : > { %3712 = vmatprep.subr.bf16.mxu1 %v13123_v23  ;;  %v13189_v23 = vld [vmem:[#allocation10 + $0x4c4] ss:$16 sps:$4 sm:$0xff]  }
 0x438   : > { %3632 = vmatmul.mubr.bf16.vlgmr.msra.gmra.mrb[0].mxu1 %v14488_v2 }
 0x439   : > { %3713 = vmatpush1.bf16.msra.mxu1 %v13121_v26  ;;  %3641 = vmatprep.mubr.bf16.mxu1 %v14488_v2  ;;  %v13187_v26 = vld [vmem:[#allocation10 + $0x4c0] ss:$16 sps:$4 sm:$0xff]  }
 0x43a   : > { %3714 = vmatprep.subr.bf16.mxu1 %v13126_v27  ;;  %v13192_v27 = vld [vmem:[#allocation10 + $0x4e4] ss:$16 sps:$4 sm:$0xff]  }
 0x43d   : > { %3715 = vmatpush1.bf16.msra.mxu1 %v13124_v28  ;;  %v13190_v28 = vld [vmem:[#allocation10 + $0x4e0] ss:$16 sps:$4 sm:$0xff]  }
 0x43e   : > { %3716 = vmatprep.subr.bf16.mxu1 %v13129_v29  ;;  %v13195_v29 = vld [vmem:[#allocation10 + $0x504] ss:$16 sps:$4 sm:$0xff]  }
 0x440   : > { %3642 = vmatmul.mubr.bf16.gmra.mrb[4].mxu1 %v14488_v2 }
 0x441   : > { %3717 = vmatpush1.bf16.msra.mxu1 %v13127_v30  ;;  %3651 = vmatprep.mubr.bf16.mxu1 %v14488_v2  ;;  %v13193_v30 = vld [vmem:[#allocation10 + $0x500] ss:$16 sps:$4 sm:$0xff]  }
 0x442   : > { %3718 = vmatprep.subr.bf16.mxu1 %v13132_v31  ;;  %v13198_v31 = vld [vmem:[#allocation10 + $0x524] ss:$16 sps:$4 sm:$0xff]  }
 0x445   : > { %3719 = vmatpush1.bf16.msra.mxu1 %v13130_v32  ;;  %v13196_v32 = vld [vmem:[#allocation10 + $0x520] ss:$16 sps:$4 sm:$0xff]  }
 0x446   : > { %3720 = vmatprep.subr.bf16.mxu1 %v13135_v33  ;;  %v13201_v33 = vld [vmem:[#allocation10 + $0x544] ss:$16 sps:$4 sm:$0xff]  }
 0x448   : > { %3652 = vmatmul.mubr.bf16.gmra.mrb[8].mxu1 %v14488_v2 }
 0x449   : > { %3661 = vmatprep.mubr.bf16.mxu1 %v15230_v7  ;;  %3721 = vmatpush1.bf16.msra.mxu1 %v13133_v36  ;;  %v13199_v36 = vld [vmem:[#allocation10 + $0x540] ss:$16 sps:$4 sm:$0xff]  }
 0x44a   : > { %3722 = vmatprep.subr.bf16.mxu1 %v13138_v39  ;;  %v13204_v39 = vld [vmem:[#allocation10 + $0x564] ss:$16 sps:$4 sm:$0xff]  }
 0x44d   : > { %3723 = vmatpush1.bf16.msra.mxu1 %v13136_v43  ;;  %v13202_v43 = vld [vmem:[#allocation10 + $0x560] ss:$16 sps:$4 sm:$0xff]  }
 0x44e   : > { %3724 = vmatprep.subr.bf16.mxu1 %v13141_v44  ;;  %v13207_v44 = vld [vmem:[#allocation10 + $0x584] ss:$16 sps:$4 sm:$0xff]  }
 0x450   : > { %3662 = vmatmul.mubr.bf16.gmra.mrb[12].mxu1 %v15228_v6 }
 0x451   : > { %3671 = vmatprep.mubr.bf16.mxu1 %v15248_v35  ;;  %3725 = vmatpush1.bf16.msra.mxu1 %v13139_v41  ;;  %v13205_v41 = vld [vmem:[#allocation10 + $0x580] ss:$16 sps:$4 sm:$0xff]  }
 0x452   : > { %3726 = vmatprep.subr.bf16.mxu1 %v13144_v42  ;;  %v13210_v42 = vld [vmem:[#allocation10 + $0x5a4] ss:$16 sps:$4 sm:$0xff]  }
 0x455   : > { %3727 = vmatpush1.bf16.msra.mxu1 %v13142_v47  ;;  %v13208_v47 = vld [vmem:[#allocation10 + $0x5a0] ss:$16 sps:$4 sm:$0xff]  }
 0x456   : > { %3728 = vmatprep.subr.bf16.mxu1 %v13147_v48  ;;  %v13213_v48 = vld [vmem:[#allocation10 + $0x5c4] ss:$16 sps:$4 sm:$0xff]  }
 0x458   : > { %3672 = vmatmul.mubr.bf16.gmra.mrb[16].mxu1 %v15246_v34 }
 0x459   : > { %3681 = vmatprep.mubr.bf16.mxu1 %v15266_v9  ;;  %3729 = vmatpush1.bf16.msra.mxu1 %v13145_v49  ;;  %v13211_v49 = vld [vmem:[#allocation10 + $0x5c0] ss:$16 sps:$4 sm:$0xff]  }
 0x45a   : > { %3730 = vmatprep.subr.bf16.mxu1 %v13150_v50  ;;  %v13216_v50 = vld [vmem:[#allocation10 + $0x5e4] ss:$16 sps:$4 sm:$0xff]  }
 0x45d   : > { %3731 = vmatpush1.bf16.msra.mxu1 %v13148_v51  ;;  %v13214_v51 = vld [vmem:[#allocation10 + $0x5e0] ss:$16 sps:$4 sm:$0xff]  }
 0x45e   : > { %3732 = vmatprep.subr.bf16.mxu1 %v13153_v52  ;;  %v13219_v52 = vld [vmem:[#allocation10 + $0x40c] ss:$16 sps:$4 sm:$0xff]  }
 0x460   : > { %3682 = vmatmul.mubr.bf16.gmra.mrb[20].mxu1 %v15264_v8 }
 0x461   : > { %3691 = vmatprep.mubr.bf16.mxu1 %v15285_v46  ;;  %3733 = vmatpush1.bf16.msra.mxu1 %v13151_v57  ;;  %v13217_v57 = vld [vmem:[#allocation10 + $0x408] ss:$16 sps:$4 sm:$0xff]  }
 0x462   : > { %3734 = vmatprep.subr.bf16.mxu1 %v13156_v58  ;;  %v13222_v58 = vld [vmem:[#allocation10 + $0x42c] ss:$16 sps:$4 sm:$0xff]  }
 0x465   : > { %3735 = vmatpush1.bf16.msra.mxu1 %v13154_v59  ;;  %v13220_v59 = vld [vmem:[#allocation10 + $0x428] ss:$16 sps:$4 sm:$0xff]  }
 0x466   : > { %3736 = vmatprep.subr.bf16.mxu1 %v13159_v60  ;;  %v13225_v60 = vld [vmem:[#allocation10 + $0x44c] ss:$16 sps:$4 sm:$0xff]  }
 0x468   : > { %3692 = vmatmul.mubr.bf16.gmra.mrb[24].mxu1 %v15283_v45 }
 0x469   : > { %3737 = vmatpush1.bf16.msra.mxu1 %v13157_v61  ;;  %3701 = vmatprep.mubr.bf16.mxu1 %v14488_v2  ;;  %v13223_v61 = vld [vmem:[#allocation10 + $0x448] ss:$16 sps:$4 sm:$0xff]  }
 0x46a   : > { %3738 = vmatprep.subr.bf16.mxu1 %v13162_v62  ;;  %v13228_v62 = vld [vmem:[#allocation10 + $0x46c] ss:$16 sps:$4 sm:$0xff]  }
 0x46d   : > { %3739 = vmatpush1.bf16.msra.mxu1 %v13160_v63  ;;  %v13226_v63 = vld [vmem:[#allocation10 + $0x468] ss:$16 sps:$4 sm:$0xff]  }
 0x46e   : > { %3740 = vmatprep.subr.bf16.mxu1 %v13165_v0  ;;  %v13231_v0 = vld [vmem:[#allocation10 + $0x48c] ss:$16 sps:$4 sm:$0xff]  }
 0x470   : > { %3702 = vmatmul.mubr.bf16.gmra.mrb[28].mxu1 %v14488_v2 }
 0x471   : > { %3741 = vmatpush1.bf16.msra.mxu1 %v13163_v1  ;;  %3744 = vmatprep.mubr.bf16.mxu1 %v14488_v2  ;;  %v13229_v1 = vld [vmem:[#allocation10 + $0x488] ss:$16 sps:$4 sm:$0xff]  }
 0x472   : > { %3742 = vmatprep.subr.bf16.mxu1 %v13168_v3  ;;  %v13234_v3 = vld [vmem:[#allocation10 + $0x4ac] ss:$16 sps:$4 sm:$0xff]  }
 0x475   : > { %3743 = vmatpush1.bf16.msra.mxu1 %v13166_v4  ;;  %v13232_v4 = vld [vmem:[#allocation10 + $0x4a8] ss:$16 sps:$4 sm:$0xff]  }
 0x476   : > { %4226 = vmatprep.subr.bf16.mxu1 %v13171_v5  ;;  %v13237_v5 = vld [vmem:[#allocation10 + $0x4cc] ss:$16 sps:$4 sm:$0xff]  }
 0x478   : > { %3745 = vmatmul.mubr.bf16.vlgmr.msra.gmra.mrb[32].mxu1 %v14488_v2 }
 0x479   : > { %4227 = vmatpush1.bf16.msra.mxu1 %v13169_v10  ;;  %3754 = vmatprep.mubr.bf16.mxu1 %v14488_v2  ;;  %v13235_v10 = vld [vmem:[#allocation10 + $0x4c8] ss:$16 sps:$4 sm:$0xff]  }
 0x47a   : > { %4228 = vmatprep.subr.bf16.mxu1 %v13174_v11  ;;  %v13240_v11 = vld [vmem:[#allocation10 + $0x4ec] ss:$16 sps:$4 sm:$0xff]  }
 0x47d   : > { %4229 = vmatpush1.bf16.msra.mxu1 %v13172_v12  ;;  %v13238_v12 = vld [vmem:[#allocation10 + $0x4e8] ss:$16 sps:$4 sm:$0xff]  }
 0x47e   : > { %4230 = vmatprep.subr.bf16.mxu1 %v13177_v13  ;;  %v13243_v13 = vld [vmem:[#allocation10 + $0x50c] ss:$16 sps:$4 sm:$0xff]  }
 0x480   : > { %3755 = vmatmul.mubr.bf16.gmra.mrb[36].mxu1 %v14488_v2 }
 0x481   : > { %4231 = vmatpush1.bf16.msra.mxu1 %v13175_v14  ;;  %3764 = vmatprep.mubr.bf16.mxu1 %v14488_v2  ;;  %v13241_v14 = vld [vmem:[#allocation10 + $0x508] ss:$16 sps:$4 sm:$0xff]  }
 0x482   : > { %4232 = vmatprep.subr.bf16.mxu1 %v13180_v15  ;;  %v13246_v15 = vld [vmem:[#allocation10 + $0x52c] ss:$16 sps:$4 sm:$0xff]  }
 0x485   : > { %4233 = vmatpush1.bf16.msra.mxu1 %v13178_v16  ;;  %v13244_v16 = vld [vmem:[#allocation10 + $0x528] ss:$16 sps:$4 sm:$0xff]  }
 0x486   : > { %4234 = vmatprep.subr.bf16.mxu1 %v13183_v17  ;;  %v13249_v17 = vld [vmem:[#allocation10 + $0x54c] ss:$16 sps:$4 sm:$0xff]  }
 0x488   : > { %3765 = vmatmul.mubr.bf16.gmra.mrb[40].mxu1 %v14488_v2 }
 0x489   : > { %3774 = vmatprep.mubr.bf16.mxu1 %v15230_v7  ;;  %4235 = vmatpush1.bf16.msra.mxu1 %v13181_v18  ;;  %v13247_v18 = vld [vmem:[#allocation10 + $0x548] ss:$16 sps:$4 sm:$0xff]  }
 0x48a   : > { %4236 = vmatprep.subr.bf16.mxu1 %v13186_v19  ;;  %v13252_v19 = vld [vmem:[#allocation10 + $0x56c] ss:$16 sps:$4 sm:$0xff]  }
 0x48d   : > { %4237 = vmatpush1.bf16.msra.mxu1 %v13184_v22  ;;  %v13250_v22 = vld [vmem:[#allocation10 + $0x568] ss:$16 sps:$4 sm:$0xff]  }
 0x48e   : > { %4238 = vmatprep.subr.bf16.mxu1 %v13189_v23  ;;  %v13255_v23 = vld [vmem:[#allocation10 + $0x58c] ss:$16 sps:$4 sm:$0xff]  }
 0x490   : > { %3775 = vmatmul.mubr.bf16.gmra.mrb[44].mxu1 %v15228_v6 }
 0x491   : > { %3784 = vmatprep.mubr.bf16.mxu1 %v15248_v35  ;;  %4239 = vmatpush1.bf16.msra.mxu1 %v13187_v26  ;;  %v13253_v26 = vld [vmem:[#allocation10 + $0x588] ss:$16 sps:$4 sm:$0xff]  }
 0x492   : > { %4240 = vmatprep.subr.bf16.mxu1 %v13192_v27  ;;  %v13258_v27 = vld [vmem:[#allocation10 + $0x5ac] ss:$16 sps:$4 sm:$0xff]  }
 0x495   : > { %4241 = vmatpush1.bf16.msra.mxu1 %v13190_v28  ;;  %v13256_v28 = vld [vmem:[#allocation10 + $0x5a8] ss:$16 sps:$4 sm:$0xff]  }
 0x496   : > { %4242 = vmatprep.subr.bf16.mxu1 %v13195_v29  ;;  %v13261_v29 = vld [vmem:[#allocation10 + $0x5cc] ss:$16 sps:$4 sm:$0xff]  }
 0x498   : > { %3785 = vmatmul.mubr.bf16.gmra.mrb[48].mxu1 %v15246_v34 }
 0x499   : > { %3794 = vmatprep.mubr.bf16.mxu1 %v15266_v9  ;;  %4243 = vmatpush1.bf16.msra.mxu1 %v13193_v30  ;;  %v13259_v30 = vld [vmem:[#allocation10 + $0x5c8] ss:$16 sps:$4 sm:$0xff]  }
 0x49a   : > { %4244 = vmatprep.subr.bf16.mxu1 %v13198_v31  ;;  %v13264_v31 = vld [vmem:[#allocation10 + $0x5ec] ss:$16 sps:$4 sm:$0xff]  }
 0x49d   : > { %4245 = vmatpush1.bf16.msra.mxu1 %v13196_v32  ;;  %v13262_v32 = vld [vmem:[#allocation10 + $0x5e8] ss:$16 sps:$4 sm:$0xff]  }
 0x49e   : > { %4246 = vmatprep.subr.bf16.mxu1 %v13201_v33  ;;  %v13267_v33 = vld [vmem:[#allocation10 + $0x604] ss:$16 sps:$4 sm:$0xff]  }
 0x4a0   : > { %3795 = vmatmul.mubr.bf16.gmra.mrb[52].mxu1 %v15264_v8 }
 0x4a1   : > { %3804 = vmatprep.mubr.bf16.mxu1 %v15285_v46  ;;  %4247 = vmatpush1.bf16.msra.mxu1 %v13199_v36  ;;  %v13265_v36 = vld [vmem:[#allocation10 + $0x600] ss:$16 sps:$4 sm:$0xff]  }
 0x4a2   : > { %4248 = vmatprep.subr.bf16.mxu1 %v13204_v39  ;;  %v13270_v39 = vld [vmem:[#allocation10 + $0x624] ss:$16 sps:$4 sm:$0xff]  }
 0x4a5   : > { %4249 = vmatpush1.bf16.msra.mxu1 %v13202_v43  ;;  %v13268_v43 = vld [vmem:[#allocation10 + $0x620] ss:$16 sps:$4 sm:$0xff]  }
 0x4a6   : > { %4250 = vmatprep.subr.bf16.mxu1 %v13207_v44  ;;  %v13273_v44 = vld [vmem:[#allocation10 + $0x644] ss:$16 sps:$4 sm:$0xff]  }
 0x4a8   : > { %3805 = vmatmul.mubr.bf16.gmra.mrb[56].mxu1 %v15283_v45 }
 0x4a9   : > { %4251 = vmatpush1.bf16.msra.mxu1 %v13205_v41  ;;  %3814 = vmatprep.mubr.bf16.mxu1 %v14488_v2  ;;  %v13271_v41 = vld [vmem:[#allocation10 + $0x640] ss:$16 sps:$4 sm:$0xff]  }
 0x4aa   : > { %4252 = vmatprep.subr.bf16.mxu1 %v13210_v42  ;;  %v13276_v42 = vld [vmem:[#allocation10 + $0x664] ss:$16 sps:$4 sm:$0xff]  }
 0x4ad   : > { %4253 = vmatpush1.bf16.msra.mxu1 %v13208_v47  ;;  %v13274_v47 = vld [vmem:[#allocation10 + $0x660] ss:$16 sps:$4 sm:$0xff]  }
 0x4ae   : > { %4254 = vmatprep.subr.bf16.mxu1 %v13213_v48  ;;  %v13279_v48 = vld [vmem:[#allocation10 + $0x684] ss:$16 sps:$4 sm:$0xff]  }
 0x4b0   : > { %3815 = vmatmul.mubr.bf16.gmra.mrb[60].mxu1 %v14488_v2 }
 0x4b1   : > { %4255 = vmatpush1.bf16.msra.mxu1 %v13211_v49  ;;  %4258 = vmatprep.mubr.bf16.mxu1 %v14488_v2  ;;  %v13277_v49 = vld [vmem:[#allocation10 + $0x680] ss:$16 sps:$4 sm:$0xff]  }
 0x4b2   : > { %4256 = vmatprep.subr.bf16.mxu1 %v13216_v50  ;;  %v13282_v50 = vld [vmem:[#allocation10 + $0x6a4] ss:$16 sps:$4 sm:$0xff]  }
 0x4b5   : > { %4257 = vmatpush1.bf16.msra.mxu1 %v13214_v51  ;;  %v13280_v51 = vld [vmem:[#allocation10 + $0x6a0] ss:$16 sps:$4 sm:$0xff]  }
 0x4b6   : > { %4339 = vmatprep.subr.bf16.mxu1 %v13219_v52  ;;  %v13285_v52 = vld [vmem:[#allocation10 + $0x6c4] ss:$16 sps:$4 sm:$0xff]  }
 0x4b8   : > { %4259 = vmatmul.mubr.bf16.vlgmr.msra.gmra.mrb[0].mxu1 %v14488_v2 }
 0x4b9   : > { %4340 = vmatpush1.bf16.msra.mxu1 %v13217_v57  ;;  %4268 = vmatprep.mubr.bf16.mxu1 %v14488_v2  ;;  %v13283_v57 = vld [vmem:[#allocation10 + $0x6c0] ss:$16 sps:$4 sm:$0xff]  }
 0x4ba   : > { %4341 = vmatprep.subr.bf16.mxu1 %v13222_v58  ;;  %v13286_v58 = vld [vmem:[#allocation10 + $0x6e0] ss:$16 sps:$4 sm:$0xff]  }
 0x4bd   : > { %4342 = vmatpush1.bf16.msra.mxu1 %v13220_v59  ;;  %v13291_v59 = vld [vmem:[#allocation10 + $0x704] ss:$16 sps:$4 sm:$0xff]  }
 0x4be   : > { %4343 = vmatprep.subr.bf16.mxu1 %v13225_v60  ;;  %v13292_v60 = vld [vmem:[#allocation10 + $0x720] ss:$16 sps:$4 sm:$0xff]  }
 0x4c0   : > { %4269 = vmatmul.mubr.bf16.gmra.mrb[4].mxu1 %v14488_v2 }
 0x4c1   : > { %4278 = vmatprep.mubr.bf16.mxu1 %v15230_v7  ;;  %4344 = vmatpush1.bf16.msra.mxu1 %v13223_v61  ;;  %v13297_v61 = vld [vmem:[#allocation10 + $0x744] ss:$16 sps:$4 sm:$0xff]  }
 0x4c2   : > { %4345 = vmatprep.subr.bf16.mxu1 %v13228_v62  ;;  %v13298_v62 = vld [vmem:[#allocation10 + $0x760] ss:$16 sps:$4 sm:$0xff]  }
 0x4c5   : > { %4346 = vmatpush1.bf16.msra.mxu1 %v13226_v63  ;;  %v13303_v63 = vld [vmem:[#allocation10 + $0x784] ss:$16 sps:$4 sm:$0xff]  }
 0x4c6   : > { %4347 = vmatprep.subr.bf16.mxu1 %v13231_v0  ;;  %v13304_v0 = vld [vmem:[#allocation10 + $0x7a0] ss:$16 sps:$4 sm:$0xff]  }
 0x4c8   : > { %4279 = vmatmul.mubr.bf16.gmra.mrb[8].mxu1 %v15228_v6 }
 0x4c9   : > { %4288 = vmatprep.mubr.bf16.mxu1 %v15248_v35  ;;  %4348 = vmatpush1.bf16.msra.mxu1 %v13229_v1  ;;  %v13309_v1 = vld [vmem:[#allocation10 + $0x7c4] ss:$16 sps:$4 sm:$0xff]  }
 0x4ca   : > { %4349 = vmatprep.subr.bf16.mxu1 %v13234_v3  ;;  %v13312_v3 = vld [vmem:[#allocation10 + $0x7e4] ss:$16 sps:$4 sm:$0xff]  }
 0x4cd   : > { %4350 = vmatpush1.bf16.msra.mxu1 %v13232_v4  ;;  %v13361_v4 = vld [vmem:[#allocation13 + $0x400] ss:$16 sps:$4 sm:$0xff]  }
 0x4ce   : > { %4351 = vmatprep.subr.bf16.mxu1 %v13237_v5  ;;  %v13363_v5 = vld [vmem:[#allocation13 + $0x404] ss:$16 sps:$4 sm:$0xff]  }
 0x4cf   : > { %6354 = vmatprep.subr.bf16.mxu0 %v13363_v5  ;;  %v13439_v5 = vld [vmem:[#allocation13 + $0x5a0] ss:$16 sps:$4 sm:$0xff]  }
 0x4d0   : > { %4289 = vmatmul.mubr.bf16.gmra.mrb[12].mxu1 %v15246_v34  ;;  %6355 = vmatpush1.bf16.msra.mxu0 %v13361_v4  ;;  %v13351_v4 = vld [vmem:[#allocation10 + $0x78c] ss:$16 sps:$4 sm:$0xff]  }
 0x4d1   : > { %4298 = vmatprep.mubr.bf16.mxu1 %v15266_v9  ;;  %4352 = vmatpush1.bf16.msra.mxu1 %v13235_v10  ;;  %v13310_v10 = vld [vmem:[#allocation10 + $0x7e0] ss:$16 sps:$4 sm:$0xff]  }
 0x4d2   : > { %4353 = vmatprep.subr.bf16.mxu1 %v13240_v11  ;;  %v13369_v11 = vld [vmem:[#allocation13 + $0x424] ss:$16 sps:$4 sm:$0xff]  }
 0x4d3   : > { %6356 = vmatprep.subr.bf16.mxu0 %v13369_v11  ;;  %v13354_v11 = vld [vmem:[#allocation10 + $0x7ac] ss:$16 sps:$4 sm:$0xff]  }
 0x4d5   : > { %4354 = vmatpush1.bf16.msra.mxu1 %v13238_v12  ;;  %v13315_v12 = vld [vmem:[#allocation10 + $0x60c] ss:$16 sps:$4 sm:$0xff]  }
 0x4d6   : > { %4355 = vmatprep.subr.bf16.mxu1 %v13243_v13  ;;  %v13367_v13 = vld [vmem:[#allocation13 + $0x420] ss:$16 sps:$4 sm:$0xff]  }
 0x4d7   : > { %6357 = vmatpush1.bf16.msra.mxu0 %v13367_v13  ;;  %v13357_v13 = vld [vmem:[#allocation10 + $0x7cc] ss:$16 sps:$4 sm:$0xff]  }
 0x4d8   : > { %4299 = vmatmul.mubr.bf16.gmra.mrb[16].mxu1 %v15264_v8 }
 0x4d9   : > { %4308 = vmatprep.mubr.bf16.mxu1 %v15285_v46  ;;  %4356 = vmatpush1.bf16.msra.mxu1 %v13241_v14  ;;  %v13375_v14 = vld [vmem:[#allocation13 + $0x444] ss:$16 sps:$4 sm:$0xff]  }
 0x4da   : > { %4357 = vmatprep.subr.bf16.mxu1 %v13246_v15  ;;  %v13313_v15 = vld [vmem:[#allocation10 + $0x608] ss:$16 sps:$4 sm:$0xff]   ;;  %6358 = vmatprep.subr.bf16.mxu0 %v13375_v14 }
 0x4db   : > { %v13355_v14 = vld [vmem:[#allocation10 + $0x7c8] ss:$16 sps:$4 sm:$0xff]  }
 0x4dd   : > { %4358 = vmatpush1.bf16.msra.mxu1 %v13244_v16  ;;  %v13318_v16 = vld [vmem:[#allocation10 + $0x62c] ss:$16 sps:$4 sm:$0xff]  }
 0x4de   : > { %4359 = vmatprep.subr.bf16.mxu1 %v13249_v17  ;;  %v13373_v17 = vld [vmem:[#allocation13 + $0x440] ss:$16 sps:$4 sm:$0xff]  }
 0x4df   : > { %6359 = vmatpush1.bf16.msra.mxu0 %v13373_v17  ;;  %v13366_v17 = vld [vmem:[#allocation13 + $0x40c] ss:$16 sps:$4 sm:$0xff]  }
 0x4e0   : > { %4309 = vmatmul.mubr.bf16.gmra.mrb[20].mxu1 %v15283_v45 }
 0x4e1   : > { %4360 = vmatpush1.bf16.msra.mxu1 %v13247_v18  ;;  %4318 = vmatprep.mubr.bf16.mxu1 %v14488_v2  ;;  %v13381_v18 = vld [vmem:[#allocation13 + $0x464] ss:$16 sps:$4 sm:$0xff]  }
 0x4e2   : > { %4361 = vmatprep.subr.bf16.mxu1 %v13252_v19  ;;  %v13316_v19 = vld [vmem:[#allocation10 + $0x628] ss:$16 sps:$4 sm:$0xff]   ;;  %6360 = vmatprep.subr.bf16.mxu0 %v13381_v18  ;;  %v13364_v18 = vld [vmem:[#allocation13 + $0x408] ss:$16 sps:$4 sm:$0xff]  }
 0x4e5   : > { %4362 = vmatpush1.bf16.msra.mxu1 %v13250_v22  ;;  %v13321_v22 = vld [vmem:[#allocation10 + $0x64c] ss:$16 sps:$4 sm:$0xff]  }
 0x4e6   : > { %4363 = vmatprep.subr.bf16.mxu1 %v13255_v23  ;;  %v13379_v23 = vld [vmem:[#allocation13 + $0x460] ss:$16 sps:$4 sm:$0xff]  }
 0x4e7   : > { %6361 = vmatpush1.bf16.msra.mxu0 %v13379_v23  ;;  %v13378_v23 = vld [vmem:[#allocation13 + $0x44c] ss:$16 sps:$4 sm:$0xff]  }
 0x4e8   : > { %4319 = vmatmul.mubr.bf16.gmra.mrb[24].mxu1 %v14488_v2 }
 0x4e9   : > { %4364 = vmatpush1.bf16.msra.mxu1 %v13253_v26  ;;  %4328 = vmatprep.mubr.bf16.mxu1 %v14488_v2  ;;  %v13387_v26 = vld [vmem:[#allocation13 + $0x484] ss:$16 sps:$4 sm:$0xff]  }
 0x4ea   : > { %4365 = vmatprep.subr.bf16.mxu1 %v13258_v27  ;;  %v13319_v27 = vld [vmem:[#allocation10 + $0x648] ss:$16 sps:$4 sm:$0xff]   ;;  %6362 = vmatprep.subr.bf16.mxu0 %v13387_v26  ;;  %v13376_v26 = vld [vmem:[#allocation13 + $0x448] ss:$16 sps:$4 sm:$0xff]  }
 0x4ed   : > { %4366 = vmatpush1.bf16.msra.mxu1 %v13256_v28  ;;  %v13324_v28 = vld [vmem:[#allocation10 + $0x66c] ss:$16 sps:$4 sm:$0xff]  }
 0x4ee   : > { %4367 = vmatprep.subr.bf16.mxu1 %v13261_v29  ;;  %v13385_v29 = vld [vmem:[#allocation13 + $0x480] ss:$16 sps:$4 sm:$0xff]  }
 0x4ef   : > { %6363 = vmatpush1.bf16.msra.mxu0 %v13385_v29  ;;  %v13390_v29 = vld [vmem:[#allocation13 + $0x48c] ss:$16 sps:$4 sm:$0xff]  }
 0x4f0   : > { %4329 = vmatmul.mubr.bf16.gmra.mrb[28].mxu1 %v14488_v2 }
 0x4f1   : > { %4368 = vmatpush1.bf16.msra.mxu1 %v13259_v30  ;;  %4371 = vmatprep.mubr.bf16.mxu1 %v14488_v2  ;;  %v13393_v30 = vld [vmem:[#allocation13 + $0x4a4] ss:$16 sps:$4 sm:$0xff]  }
 0x4f2   : > { %4369 = vmatprep.subr.bf16.mxu1 %v13264_v31  ;;  %v13322_v31 = vld [vmem:[#allocation10 + $0x668] ss:$16 sps:$4 sm:$0xff]   ;;  %6364 = vmatprep.subr.bf16.mxu0 %v13393_v30  ;;  %v13388_v30 = vld [vmem:[#allocation13 + $0x488] ss:$16 sps:$4 sm:$0xff]  }
 0x4f5   : > { %4370 = vmatpush1.bf16.msra.mxu1 %v13262_v32  ;;  %v13327_v32 = vld [vmem:[#allocation10 + $0x68c] ss:$16 sps:$4 sm:$0xff]  }
 0x4f6   : > { %4917 = vmatprep.subr.bf16.mxu1 %v13267_v33  ;;  %v13391_v33 = vld [vmem:[#allocation13 + $0x4a0] ss:$16 sps:$4 sm:$0xff]  }
 0x4f7   : > { %6365 = vmatpush1.bf16.msra.mxu0 %v13391_v33  ;;  %v13447_v33 = vld [vmem:[#allocation13 + $0x5c4] ss:$16 sps:$4 sm:$0xff]  }
 0x4f8   : > { %4372 = vmatmul.mubr.bf16.vlgmr.msra.gmra.mrb[32].mxu1 %v14488_v2 }
 0x4f9   : > { %4918 = vmatpush1.bf16.msra.mxu1 %v13265_v36  ;;  %4381 = vmatprep.mubr.bf16.mxu1 %v14488_v2  ;;  %v13399_v36 = vld [vmem:[#allocation13 + $0x4c4] ss:$16 sps:$4 sm:$0xff]  }
 0x4fa   : > { %4919 = vmatprep.subr.bf16.mxu1 %v13270_v39  ;;  %v13325_v39 = vld [vmem:[#allocation10 + $0x688] ss:$16 sps:$4 sm:$0xff]   ;;  %6366 = vmatprep.subr.bf16.mxu0 %v13399_v36  ;;  %v13408_v36 = vld [vmem:[#allocation13 + $0x4ec] ss:$16 sps:$4 sm:$0xff]  }
 0x4fd   : > { %4920 = vmatpush1.bf16.msra.mxu1 %v13268_v43  ;;  %v13330_v43 = vld [vmem:[#allocation10 + $0x6ac] ss:$16 sps:$4 sm:$0xff]  }
 0x4fe   : > { %4921 = vmatprep.subr.bf16.mxu1 %v13273_v44  ;;  %v13397_v44 = vld [vmem:[#allocation13 + $0x4c0] ss:$16 sps:$4 sm:$0xff]  }
 0x4ff   : > { %6367 = vmatpush1.bf16.msra.mxu0 %v13397_v44  ;;  %v13459_v44 = vld [vmem:[#allocation13 + $0x604] ss:$16 sps:$4 sm:$0xff]  }
 0x500   : > { %4382 = vmatmul.mubr.bf16.gmra.mrb[36].mxu1 %v14488_v2 }
 0x501   : > { %4391 = vmatprep.mubr.bf16.mxu1 %v15230_v7  ;;  %4922 = vmatpush1.bf16.msra.mxu1 %v13271_v41  ;;  %v13288_v7 = vld [vmem:[#allocation10 + $0x6e4] ss:$16 sps:$4 sm:$0xff]   ;;  %v13405_v41 = vld [vmem:[#allocation13 + $0x4e4] ss:$16 sps:$4 sm:$0xff]  }
 0x502   : > { %4923 = vmatprep.subr.bf16.mxu1 %v13276_v42  ;;  %v13328_v42 = vld [vmem:[#allocation10 + $0x6a8] ss:$16 sps:$4 sm:$0xff]   ;;  %6368 = vmatprep.subr.bf16.mxu0 %v13405_v41  ;;  %v13412_v41 = vld [vmem:[#allocation13 + $0x508] ss:$16 sps:$4 sm:$0xff]  }
 0x505   : > { %4924 = vmatpush1.bf16.msra.mxu1 %v13274_v47  ;;  %v13333_v47 = vld [vmem:[#allocation10 + $0x6cc] ss:$16 sps:$4 sm:$0xff]  }
 0x506   : > { %4925 = vmatprep.subr.bf16.mxu1 %v13279_v48  ;;  %v13403_v48 = vld [vmem:[#allocation13 + $0x4e0] ss:$16 sps:$4 sm:$0xff]  }
 0x507   : > { %6369 = vmatpush1.bf16.msra.mxu0 %v13403_v48  ;;  %v13432_v48 = vld [vmem:[#allocation13 + $0x56c] ss:$16 sps:$4 sm:$0xff]  }
 0x508   : > { %4392 = vmatmul.mubr.bf16.gmra.mrb[40].mxu1 %v15228_v6  ;;  %v13289_v6 = vld [vmem:[#allocation10 + $0x700] ss:$16 sps:$4 sm:$0xff]  }
 0x509   : > { %4401 = vmatprep.mubr.bf16.mxu1 %v15248_v35  ;;  %4926 = vmatpush1.bf16.msra.mxu1 %v13277_v49  ;;  %v13294_v35 = vld [vmem:[#allocation10 + $0x724] ss:$16 sps:$4 sm:$0xff]   ;;  %v13411_v49 = vld [vmem:[#allocation13 + $0x504] ss:$16 sps:$4 sm:$0xff]  }
 0x50a   : > { %4927 = vmatprep.subr.bf16.mxu1 %v13282_v50  ;;  %v13331_v50 = vld [vmem:[#allocation10 + $0x6c8] ss:$16 sps:$4 sm:$0xff]   ;;  %6370 = vmatprep.subr.bf16.mxu0 %v13411_v49  ;;  %v13430_v49 = vld [vmem:[#allocation13 + $0x568] ss:$16 sps:$4 sm:$0xff]  }
 0x50d   : > { %4928 = vmatpush1.bf16.msra.mxu1 %v13280_v51  ;;  %v13336_v51 = vld [vmem:[#allocation10 + $0x6ec] ss:$16 sps:$4 sm:$0xff]  }
 0x50e   : > { %4929 = vmatprep.subr.bf16.mxu1 %v13285_v52  ;;  %v13409_v52 = vld [vmem:[#allocation13 + $0x500] ss:$16 sps:$4 sm:$0xff]  }
 0x50f   : > { %6371 = vmatpush1.bf16.msra.mxu0 %v13409_v52  ;;  %v13442_v52 = vld [vmem:[#allocation13 + $0x5a8] ss:$16 sps:$4 sm:$0xff]  }
 0x510   : > { %4402 = vmatmul.mubr.bf16.gmra.mrb[44].mxu1 %v15246_v34  ;;  %v13295_v34 = vld [vmem:[#allocation10 + $0x740] ss:$16 sps:$4 sm:$0xff]  }
 0x511   : > { %4411 = vmatprep.mubr.bf16.mxu1 %v15266_v9  ;;  %4930 = vmatpush1.bf16.msra.mxu1 %v13283_v57  ;;  %v13300_v9 = vld [vmem:[#allocation10 + $0x764] ss:$16 sps:$4 sm:$0xff]   ;;  %v13417_v57 = vld [vmem:[#allocation13 + $0x524] ss:$16 sps:$4 sm:$0xff]  }
 0x512   : > { %4931 = vmatprep.subr.bf16.mxu1 %v13288_v7  ;;  %v13334_v7 = vld [vmem:[#allocation10 + $0x6e8] ss:$16 sps:$4 sm:$0xff]   ;;  %6372 = vmatprep.subr.bf16.mxu0 %v13417_v57  ;;  %v13450_v57 = vld [vmem:[#allocation13 + $0x5cc] ss:$16 sps:$4 sm:$0xff]  }
 0x515   : > { %4932 = vmatpush1.bf16.msra.mxu1 %v13286_v58  ;;  %v13339_v58 = vld [vmem:[#allocation10 + $0x70c] ss:$16 sps:$4 sm:$0xff]  }
 0x516   : > { %4933 = vmatprep.subr.bf16.mxu1 %v13291_v59  ;;  %v13415_v59 = vld [vmem:[#allocation13 + $0x520] ss:$16 sps:$4 sm:$0xff]  }
 0x517   : > { %6373 = vmatpush1.bf16.msra.mxu0 %v13415_v59  ;;  %v13454_v59 = vld [vmem:[#allocation13 + $0x5e8] ss:$16 sps:$4 sm:$0xff]  }
 0x518   : > { %4412 = vmatmul.mubr.bf16.gmra.mrb[48].mxu1 %v15264_v8  ;;  %v13301_v8 = vld [vmem:[#allocation10 + $0x780] ss:$16 sps:$4 sm:$0xff]  }
 0x519   : > { %4421 = vmatprep.mubr.bf16.mxu1 %v15285_v46  ;;  %4934 = vmatpush1.bf16.msra.mxu1 %v13289_v6  ;;  %v13306_v46 = vld [vmem:[#allocation10 + $0x7a4] ss:$16 sps:$4 sm:$0xff]   ;;  %v13423_v6 = vld [vmem:[#allocation13 + $0x544] ss:$16 sps:$4 sm:$0xff]  }
 0x51a   : > { %4935 = vmatprep.subr.bf16.mxu1 %v13294_v35  ;;  %v13337_v35 = vld [vmem:[#allocation10 + $0x708] ss:$16 sps:$4 sm:$0xff]   ;;  %6374 = vmatprep.subr.bf16.mxu0 %v13423_v6  ;;  %v13462_v6 = vld [vmem:[#allocation13 + $0x60c] ss:$16 sps:$4 sm:$0xff]  }
 0x51d   : > { %4936 = vmatpush1.bf16.msra.mxu1 %v13292_v60  ;;  %v13342_v60 = vld [vmem:[#allocation10 + $0x72c] ss:$16 sps:$4 sm:$0xff]  }
 0x51e   : > { %4937 = vmatprep.subr.bf16.mxu1 %v13297_v61  ;;  %v13421_v61 = vld [vmem:[#allocation13 + $0x540] ss:$16 sps:$4 sm:$0xff]  }
 0x51f   : > { %6375 = vmatpush1.bf16.msra.mxu0 %v13421_v61 }
 0x520   : > { %4422 = vmatmul.mubr.bf16.gmra.mrb[52].mxu1 %v15283_v45  ;;  %v13307_v45 = vld [vmem:[#allocation10 + $0x7c0] ss:$16 sps:$4 sm:$0xff]  }
 0x521   : > { %4938 = vmatpush1.bf16.msra.mxu1 %v13295_v34  ;;  %4431 = vmatprep.mubr.bf16.mxu1 %v14488_v2  ;;  %v13429_v34 = vld [vmem:[#allocation13 + $0x564] ss:$16 sps:$4 sm:$0xff]  }
 0x522   : > { %4939 = vmatprep.subr.bf16.mxu1 %v13300_v9  ;;  %v13340_v9 = vld [vmem:[#allocation10 + $0x728] ss:$16 sps:$4 sm:$0xff]   ;;  %6376 = vmatprep.subr.bf16.mxu0 %v13429_v34 }
 0x525   : > { %4940 = vmatpush1.bf16.msra.mxu1 %v13298_v62  ;;  %v13345_v62 = vld [vmem:[#allocation10 + $0x74c] ss:$16 sps:$4 sm:$0xff]  }
 0x526   : > { %4941 = vmatprep.subr.bf16.mxu1 %v13303_v63  ;;  %v13427_v63 = vld [vmem:[#allocation13 + $0x560] ss:$16 sps:$4 sm:$0xff]  }
 0x527   : > { %6377 = vmatpush1.bf16.msra.mxu0 %v13427_v63 }
 0x528   : > { %4432 = vmatmul.mubr.bf16.gmra.mrb[56].mxu1 %v14488_v2 }
 0x529   : > { %4942 = vmatpush1.bf16.msra.mxu1 %v13301_v8  ;;  %4441 = vmatprep.mubr.bf16.mxu1 %v14488_v2  ;;  %v13435_v8 = vld [vmem:[#allocation13 + $0x584] ss:$16 sps:$4 sm:$0xff]  }
 0x52a   : > { %4943 = vmatprep.subr.bf16.mxu1 %v13306_v46  ;;  %v13343_v46 = vld [vmem:[#allocation10 + $0x748] ss:$16 sps:$4 sm:$0xff]   ;;  %6378 = vmatprep.subr.bf16.mxu0 %v13435_v8 }
 0x52d   : > { %4944 = vmatpush1.bf16.msra.mxu1 %v13304_v0  ;;  %v13348_v0 = vld [vmem:[#allocation10 + $0x76c] ss:$16 sps:$4 sm:$0xff]  }
 0x52e   : > { %4945 = vmatprep.subr.bf16.mxu1 %v13309_v1  ;;  %v13433_v1 = vld [vmem:[#allocation13 + $0x580] ss:$16 sps:$4 sm:$0xff]  }
 0x52f   : > { %6379 = vmatpush1.bf16.msra.mxu0 %v13433_v1 }
 0x530   : > { %4442 = vmatmul.mubr.bf16.gmra.mrb[60].mxu1 %v14488_v2 }
 0x531   : > { %4946 = vmatpush1.bf16.msra.mxu1 %v13307_v45  ;;  %4949 = vmatprep.mubr.bf16.mxu1 %v14488_v2  ;;  %v13441_v45 = vld [vmem:[#allocation13 + $0x5a4] ss:$16 sps:$4 sm:$0xff]  }
 0x532   : > { %4947 = vmatprep.subr.bf16.mxu1 %v13312_v3  ;;  %v13346_v3 = vld [vmem:[#allocation10 + $0x768] ss:$16 sps:$4 sm:$0xff]   ;;  %6380 = vmatprep.subr.bf16.mxu0 %v13441_v45 }
 0x533   : > { %6381 = vmatpush1.bf16.msra.mxu0 %v13439_v5 }
 0x534   : > { %6382 = vmatprep.subr.bf16.mxu0 %v13447_v33 }
 0x535   : > { %4948 = vmatpush1.bf16.msra.mxu1 %v13310_v10  ;;  %v13349_v10 = vld [vmem:[#allocation10 + $0x788] ss:$16 sps:$4 sm:$0xff]  }
 0x536   : > { %5030 = vmatprep.subr.bf16.mxu1 %v13315_v12  ;;  %v13352_v12 = vld [vmem:[#allocation10 + $0x7a8] ss:$16 sps:$4 sm:$0xff]  }
 0x538   : > { %4950 = vmatmul.mubr.bf16.vlgmr.msra.gmra.mrb[0].mxu1 %v14488_v2 }
 0x539   : > { %4959 = vmatprep.mubr.bf16.mxu1 %v15220_v56  ;;  %5031 = vmatpush1.bf16.msra.mxu1 %v13313_v15  ;;  %v13360_v15 = vld [vmem:[#allocation10 + $0x7ec] ss:$16 sps:$4 sm:$0xff]  }
 0x53a   : > { %5032 = vmatprep.subr.bf16.mxu1 %v13318_v16  ;;  %v13358_v16 = vld [vmem:[#allocation10 + $0x7e8] ss:$16 sps:$4 sm:$0xff]  }
 0x53d   : > { %5033 = vmatpush1.bf16.msra.mxu1 %v13316_v19  ;;  %v13372_v19 = vld [vmem:[#allocation13 + $0x42c] ss:$16 sps:$4 sm:$0xff]  }
 0x53e   : > { %5034 = vmatprep.subr.bf16.mxu1 %v13321_v22  ;;  %v13370_v22 = vld [vmem:[#allocation13 + $0x428] ss:$16 sps:$4 sm:$0xff]  }
 0x540   : > { %4960 = vmatmul.mubr.bf16.gmra.mrb[4].mxu1 %v15218_v55 }
 0x541   : > { %4969 = vmatprep.mubr.bf16.mxu1 %v15238_v21  ;;  %5035 = vmatpush1.bf16.msra.mxu1 %v13319_v27  ;;  %v13384_v27 = vld [vmem:[#allocation13 + $0x46c] ss:$16 sps:$4 sm:$0xff]  }
 0x542   : > { %5036 = vmatprep.subr.bf16.mxu1 %v13324_v28  ;;  %v13382_v28 = vld [vmem:[#allocation13 + $0x468] ss:$16 sps:$4 sm:$0xff]  }
 0x545   : > { %5037 = vmatpush1.bf16.msra.mxu1 %v13322_v31  ;;  %v13394_v31 = vld [vmem:[#allocation13 + $0x4a8] ss:$16 sps:$4 sm:$0xff]  }
 0x546   : > { %5038 = vmatprep.subr.bf16.mxu1 %v13327_v32  ;;  %v13402_v32 = vld [vmem:[#allocation13 + $0x4cc] ss:$16 sps:$4 sm:$0xff]  }
 0x548   : > { %4970 = vmatmul.mubr.bf16.gmra.mrb[8].mxu1 %v15236_v20 }
 0x549   : > { %4979 = vmatprep.mubr.bf16.mxu1 %v15256_v54  ;;  %5039 = vmatpush1.bf16.msra.mxu1 %v13325_v39  ;;  %v13453_v39 = vld [vmem:[#allocation13 + $0x5e4] ss:$16 sps:$4 sm:$0xff]  }
 0x54a   : > { %5040 = vmatprep.subr.bf16.mxu1 %v13330_v43  ;;  %v13414_v43 = vld [vmem:[#allocation13 + $0x50c] ss:$16 sps:$4 sm:$0xff]  }
 0x54d   : > { %5041 = vmatpush1.bf16.msra.mxu1 %v13328_v42  ;;  %v13420_v42 = vld [vmem:[#allocation13 + $0x52c] ss:$16 sps:$4 sm:$0xff]  }
 0x54e   : > { %5042 = vmatprep.subr.bf16.mxu1 %v13333_v47  ;;  %v13424_v47 = vld [vmem:[#allocation13 + $0x548] ss:$16 sps:$4 sm:$0xff]  }
 0x550   : > { %4980 = vmatmul.mubr.bf16.gmra.mrb[12].mxu1 %v15254_v53 }
 0x551   : > { %4989 = vmatprep.mubr.bf16.mxu1 %v15274_v25  ;;  %5043 = vmatpush1.bf16.msra.mxu1 %v13331_v50  ;;  %v13438_v50 = vld [vmem:[#allocation13 + $0x58c] ss:$16 sps:$4 sm:$0xff]  }
 0x552   : > { %5044 = vmatprep.subr.bf16.mxu1 %v13336_v51  ;;  %v13444_v51 = vld [vmem:[#allocation13 + $0x5ac] ss:$16 sps:$4 sm:$0xff]  }
 0x555   : > { %5045 = vmatpush1.bf16.msra.mxu1 %v13334_v7  ;;  %v13448_v7 = vld [vmem:[#allocation13 + $0x5c8] ss:$16 sps:$4 sm:$0xff]  }
 0x556   : > { %5046 = vmatprep.subr.bf16.mxu1 %v13339_v58  ;;  %v13456_v58 = vld [vmem:[#allocation13 + $0x5ec] ss:$16 sps:$4 sm:$0xff]  }
 0x558   : > { %4990 = vmatmul.mubr.bf16.gmra.mrb[16].mxu1 %v15272_v24 }
 0x559   : > { %5047 = vmatpush1.bf16.msra.mxu1 %v13337_v35  ;;  %4999 = vmatprep.mubr.bf16.mxu1 %v14488_v2  ;;  %v15402_v35 = vld [vmem:[#allocation11] sm:$0xf] }
 0x55a   : > { %5048 = vmatprep.subr.bf16.mxu1 %v13342_v60  ;;  %v15406_v60 = vrot.slane %v15402_v35, %v15203_v38  ;;  %v15410_v61 = vrot.slane %v15402_v35, %v15206_v40 }
 0x55d   : > { %5049 = vmatpush1.bf16.msra.mxu1 %v13340_v9 }
 0x55e   : > { %5050 = vmatprep.subr.bf16.mxu1 %v13345_v62 }
 0x560   : > { %5000 = vmatmul.mubr.bf16.gmra.mrb[20].mxu1 %v14488_v2 }
 0x561   : > { %5051 = vmatpush1.bf16.msra.mxu1 %v13343_v46  ;;  %5009 = vmatprep.mubr.bf16.mxu1 %v14488_v2 }
 0x562   : > { %5052 = vmatprep.subr.bf16.mxu1 %v13348_v0 }
 0x565   : > { %5053 = vmatpush1.bf16.msra.mxu1 %v13346_v3 }
 0x566   : > { %5054 = vmatprep.subr.bf16.mxu1 %v13351_v4 }
 0x568   : > { %5010 = vmatmul.mubr.bf16.gmra.mrb[24].mxu1 %v14488_v2 }
 0x569   : > { %5055 = vmatpush1.bf16.msra.mxu1 %v13349_v10  ;;  %5019 = vmatprep.mubr.bf16.mxu1 %v14488_v2 }
 0x56a   : > { %5056 = vmatprep.subr.bf16.mxu1 %v13354_v11 }
 0x56d   : > { %5057 = vmatpush1.bf16.msra.mxu1 %v13352_v12 }
 0x56e   : > { %5058 = vmatprep.subr.bf16.mxu1 %v13357_v13  ;;  %v13457_v13 = vld [vmem:[#allocation13 + $0x600] ss:$16 sps:$4 sm:$0xff]  }
 0x570   : > { %5020 = vmatmul.mubr.bf16.gmra.mrb[28].mxu1 %v14488_v2 }
 0x571   : > { %5059 = vmatpush1.bf16.msra.mxu1 %v13355_v14  ;;  %5062 = vmatprep.mubr.bf16.mxu1 %v14488_v2  ;;  %v13460_v14 = vld [vmem:[#allocation13 + $0x608] ss:$16 sps:$4 sm:$0xff]  }
 0x572   : > { %5060 = vmatprep.subr.bf16.mxu1 %v13360_v15 }
 0x575   : > { %5061 = vmatpush1.bf16.msra.mxu1 %v13358_v16 }
 0x576   : > { %6580 = vmatprep.subr.bf16.mxu1 %v13366_v17  ;;  %v13465_v17 = vld [vmem:[#allocation13 + $0x624] ss:$16 sps:$4 sm:$0xff]  }
 0x578   : > { %5063 = vmatmul.mubr.bf16.vlgmr.msra.gmra.mrb[32].mxu1 %v14488_v2 }
 0x579   : > { %5072 = vmatprep.mubr.bf16.mxu1 %v15220_v56  ;;  %6581 = vmatpush1.bf16.msra.mxu1 %v13364_v18  ;;  %v13396_v56 = vld [vmem:[#allocation13 + $0x4ac] ss:$16 sps:$4 sm:$0xff]  }
 0x57a   : > { %6582 = vmatprep.subr.bf16.mxu1 %v13372_v19  ;;  %v13468_v18 = vld [vmem:[#allocation13 + $0x62c] ss:$16 sps:$4 sm:$0xff]  }
 0x57d   : > { %6583 = vmatpush1.bf16.msra.mxu1 %v13370_v22 }
 0x57e   : > { %6584 = vmatprep.subr.bf16.mxu1 %v13378_v23 }
 0x580   : > { %5073 = vmatmul.mubr.bf16.gmra.mrb[36].mxu1 %v15218_v55  ;;  %v13400_v55 = vld [vmem:[#allocation13 + $0x4c8] ss:$16 sps:$4 sm:$0xff]  }
 0x581   : > { %5082 = vmatprep.mubr.bf16.mxu1 %v15238_v21  ;;  %6585 = vmatpush1.bf16.msra.mxu1 %v13376_v26  ;;  %v13445_v21 = vld [vmem:[#allocation13 + $0x5c0] ss:$16 sps:$4 sm:$0xff]  }
 0x582   : > { %6586 = vmatprep.subr.bf16.mxu1 %v13384_v27  ;;  %6383 = vmatpush1.bf16.msra.mxu0 %v13445_v21 }
 0x583   : > { %6384 = vmatprep.subr.bf16.mxu0 %v13453_v39 }
 0x585   : > { %6587 = vmatpush1.bf16.msra.mxu1 %v13382_v28  ;;  %v13463_v28 = vld [vmem:[#allocation13 + $0x620] ss:$16 sps:$4 sm:$0xff]  }
 0x586   : > { %6588 = vmatprep.subr.bf16.mxu1 %v13390_v29  ;;  %v13466_v29 = vld [vmem:[#allocation13 + $0x628] ss:$16 sps:$4 sm:$0xff]  }
 0x588   : > { %5083 = vmatmul.mubr.bf16.gmra.mrb[40].mxu1 %v15236_v20  ;;  %v13406_v20 = vld [vmem:[#allocation13 + $0x4e8] ss:$16 sps:$4 sm:$0xff]  }
 0x589   : > { %5092 = vmatprep.mubr.bf16.mxu1 %v15256_v54  ;;  %6589 = vmatpush1.bf16.msra.mxu1 %v13388_v30  ;;  %v13451_v54 = vld [vmem:[#allocation13 + $0x5e0] ss:$16 sps:$4 sm:$0xff]  }
 0x58a   : > { %6590 = vmatprep.subr.bf16.mxu1 %v13396_v56  ;;  %6385 = vmatpush1.bf16.msra.mxu0 %v13451_v54  ;;  %v13472_v54 = vld [vmem:[#allocation13 + $0x648] ss:$16 sps:$4 sm:$0xff]  }
 0x58b   : > { %6467 = vmatprep.subr.bf16.mxu0 %v13459_v44 }
 0x58d   : > { %6591 = vmatpush1.bf16.msra.mxu1 %v13394_v31  ;;  %v13471_v31 = vld [vmem:[#allocation13 + $0x644] ss:$16 sps:$4 sm:$0xff]  }
 0x58e   : > { %6592 = vmatprep.subr.bf16.mxu1 %v13402_v32  ;;  %v13474_v32 = vld [vmem:[#allocation13 + $0x64c] ss:$16 sps:$4 sm:$0xff]  }
 0x590   : > { %5093 = vmatmul.mubr.bf16.gmra.mrb[44].mxu1 %v15254_v53  ;;  %v13418_v53 = vld [vmem:[#allocation13 + $0x528] ss:$16 sps:$4 sm:$0xff]  }
 0x591   : > { %5102 = vmatprep.mubr.bf16.mxu1 %v15274_v25  ;;  %6593 = vmatpush1.bf16.msra.mxu1 %v13400_v55  ;;  %v13426_v25 = vld [vmem:[#allocation13 + $0x54c] ss:$16 sps:$4 sm:$0xff]  }
 0x592   : > { %6594 = vmatprep.subr.bf16.mxu1 %v13408_v36 }
 0x595   : > { %6595 = vmatpush1.bf16.msra.mxu1 %v13406_v20  ;;  %v13469_v20 = vld [vmem:[#allocation13 + $0x640] ss:$16 sps:$4 sm:$0xff]  }
 0x596   : > { %6596 = vmatprep.subr.bf16.mxu1 %v13414_v43 }
 0x598   : > { %5103 = vmatmul.mubr.bf16.gmra.mrb[48].mxu1 %v15272_v24  ;;  %v13436_v24 = vld [vmem:[#allocation13 + $0x588] ss:$16 sps:$4 sm:$0xff]  }
 0x599   : > { %5112 = vmatprep.mubr.bf16.mxu1 %v14488_v2  ;;  %6597 = vmatpush1.bf16.msra.mxu1 %v13412_v41  ;;  %v13477_v41 = vld [vmem:[#allocation13 + $0x664] ss:$16 sps:$4 sm:$0xff]  }
 0x59a   : > { %6598 = vmatprep.subr.bf16.mxu1 %v13420_v42  ;;  %v13480_v42 = vld [vmem:[#allocation13 + $0x66c] ss:$16 sps:$4 sm:$0xff]  }
 0x59d   : > { %6599 = vmatpush1.bf16.msra.mxu1 %v13418_v53 }
 0x59e   : > { %6600 = vmatprep.subr.bf16.mxu1 %v13426_v25 }
 0x5a0   : > { %5113 = vmatmul.mubr.bf16.gmra.mrb[52].mxu1 %v14488_v2 }
 0x5a1   : > { %5122 = vmatprep.mubr.bf16.mxu1 %v14488_v2  ;;  %6601 = vmatpush1.bf16.msra.mxu1 %v13424_v47 }
 0x5a2   : > { %6602 = vmatprep.subr.bf16.mxu1 %v13432_v48 }
 0x5a5   : > { %6603 = vmatpush1.bf16.msra.mxu1 %v13430_v49 }
 0x5a6   : > { %6604 = vmatprep.subr.bf16.mxu1 %v13438_v50  ;;  %v13475_v50 = vld [vmem:[#allocation13 + $0x660] ss:$16 sps:$4 sm:$0xff]  }
 0x5a8   : > { %5123 = vmatmul.mubr.bf16.gmra.mrb[56].mxu1 %v14488_v2 }
 0x5a9   : > { %5132 = vmatprep.mubr.bf16.mxu1 %v14488_v2  ;;  %6605 = vmatpush1.bf16.msra.mxu1 %v13436_v24  ;;  %v13478_v24 = vld [vmem:[#allocation13 + $0x668] ss:$16 sps:$4 sm:$0xff]  }
 0x5aa   : > { %6606 = vmatprep.subr.bf16.mxu1 %v13444_v51 }
 0x5ad   : > { %6607 = vmatpush1.bf16.msra.mxu1 %v13442_v52 }
 0x5ae   : > { %6608 = vmatprep.subr.bf16.mxu1 %v13450_v57  ;;  %v13483_v57 = vld [vmem:[#allocation13 + $0x684] ss:$16 sps:$4 sm:$0xff]  }
 0x5b0   : > { %5133 = vmatmul.mubr.bf16.gmra.mrb[60].mxu1 %v14488_v2 }
 0x5b1   : > { %6609 = vmatpush1.bf16.msra.mxu1 %v13448_v7  ;;  %v13486_v7 = vld [vmem:[#allocation13 + $0x68c] ss:$16 sps:$4 sm:$0xff]  }
 0x5b2   : > { %6610 = vmatprep.subr.bf16.mxu1 %v13456_v58 }
 0x5b5   : > { %6611 = vmatpush1.bf16.msra.mxu1 %v13454_v59 }
 0x5b6   : > { %6693 = vmatprep.subr.bf16.mxu1 %v13462_v6 }
 0x60b   : > { %v4951_v34 = vpop.f32.mrb[0].mxu1 }
 0x60c   : > { %v5229_v9 = vadd.f32 %v15406_v60, %v4951_v34  ;;  %v4953_v62 = vpop.f32.mrb[1].mxu1 }
 0x60d   : > { %v5230_v63 = vadd.f32 %v15410_v61, %v4953_v62  ;;  %v4955_v8 = vpop.f32.mrb[2].mxu1  ;;  %v13481_v62 = vld [vmem:[#allocation13 + $0x680] ss:$16 sps:$4 sm:$0xff]  }
 0x60e   : > { %v5233_v46 = vadd.f32 %v15406_v60, %v4955_v8  ;;  %v4957_v0 = vpop.f32.mrb[3].mxu1  ;;  %v5293_v45 = vmax.f32 %v5229_v9, 0.0 }
 0x60f   : > { %v5234_v1 = vadd.f32 %v15410_v61, %v4957_v0  ;;  %v5294_v4 = vmax.f32 %v5230_v63, 0.0  ;;  %v13484_v63 = vld [vmem:[#allocation13 + $0x688] ss:$16 sps:$4 sm:$0xff]   ;;  %v13489_v0 = vld [vmem:[#allocation13 + $0x6a4] ss:$16 sps:$4 sm:$0xff]  }
 0x610   : > { %v5297_v3 = vmax.f32 %v5233_v46, 0.0 }
 0x611   : > { %v5298_v5 = vmax.f32 %v5234_v1, 0.0  ;;  %v13492_v1 = vld [vmem:[#allocation13 + $0x6ac] ss:$16 sps:$4 sm:$0xff]  }
 0x612   : > { %v15416_v10 = vpack.c.bf16 %v5297_v3, %v5293_v45 }
 0x613   : > { %v15418_v11 = vpack.c.bf16 %v5298_v5, %v5294_v4  ;;  %v4961_v12 = vpop.f32.mrb[4].mxu1 }
 0x614   : > { %v5237_v15 = vadd.f32 %v15406_v60, %v4961_v12  ;;  %v4963_v16 = vpop.f32.mrb[5].mxu1 }
 0x615   : > { %v5238_v19 = vadd.f32 %v15410_v61, %v4963_v16  ;;  %v4965_v22 = vpop.f32.mrb[6].mxu1  ;;  %6386 = vmatprep.mubr.bf16.mxu0 %v15418_v11  ;;  %6612 = vmatprep.mubr.bf16.mxu1 %v15418_v11 }
 0x616   : > { %v5241_v23 = vadd.f32 %v15406_v60, %v4965_v22  ;;  %v4967_v26 = vpop.f32.mrb[7].mxu1  ;;  %6387 = vmatmul.mubr.bf16.vlgmr.msra.gmra.mrb[32].mxu0 %v15416_v10  ;;  %6613 = vmatmul.mubr.bf16.vlgmr.msra.gmra.mrb[64].mxu1 %v15416_v10  ;;  %v5301_v30 = vmax.f32 %v5237_v15, 0.0 }
 0x617   : > { %v5242_v27 = vadd.f32 %v15410_v61, %v4967_v26  ;;  %6468 = vmatpush1.bf16.msra.mxu0 %v13457_v13  ;;  %6694 = vmatpush1.bf16.msra.mxu1 %v13460_v14  ;;  %v5302_v33 = vmax.f32 %v5238_v19, 0.0  ;;  %v13487_v13 = vld [vmem:[#allocation13 + $0x6a0] ss:$16 sps:$4 sm:$0xff]   ;;  %v13490_v14 = vld [vmem:[#allocation13 + $0x6a8] ss:$16 sps:$4 sm:$0xff]  }
 0x618   : > { %v5305_v56 = vmax.f32 %v5241_v23, 0.0  ;;  %6469 = vmatprep.subr.bf16.mxu0 %v13465_v17  ;;  %6695 = vmatprep.subr.bf16.mxu1 %v13468_v18  ;;  %v13495_v17 = vld [vmem:[#allocation13 + $0x6c4] ss:$16 sps:$4 sm:$0xff]   ;;  %v13498_v18 = vld [vmem:[#allocation13 + $0x6cc] ss:$16 sps:$4 sm:$0xff]  }
 0x619   : > { %v5306_v55 = vmax.f32 %v5242_v27, 0.0 }
 0x61a   : > { %v15428_v21 = vpack.c.bf16 %v5305_v56, %v5301_v30 }
 0x61b   : > { %v15430_v36 = vpack.c.bf16 %v5306_v55, %v5302_v33  ;;  %v4971_v39 = vpop.f32.mrb[8].mxu1  ;;  %6470 = vmatpush1.bf16.msra.mxu0 %v13463_v28  ;;  %6696 = vmatpush1.bf16.msra.mxu1 %v13466_v29  ;;  %v13493_v28 = vld [vmem:[#allocation13 + $0x6c0] ss:$16 sps:$4 sm:$0xff]   ;;  %v13496_v29 = vld [vmem:[#allocation13 + $0x6c8] ss:$16 sps:$4 sm:$0xff]  }
 0x61c   : > { %v5245_v43 = vadd.f32 %v15406_v60, %v4971_v39  ;;  %v4973_v44 = vpop.f32.mrb[9].mxu1  ;;  %6471 = vmatprep.subr.bf16.mxu0 %v13471_v31  ;;  %6697 = vmatprep.subr.bf16.mxu1 %v13474_v32  ;;  %v13501_v31 = vld [vmem:[#allocation13 + $0x6e4] ss:$16 sps:$4 sm:$0xff]   ;;  %v13504_v32 = vld [vmem:[#allocation13 + $0x6ec] ss:$16 sps:$4 sm:$0xff]  }
 0x61d   : > { %v5246_v53 = vadd.f32 %v15410_v61, %v4973_v44  ;;  %v4975_v25 = vpop.f32.mrb[10].mxu1  ;;  %6396 = vmatprep.mubr.bf16.mxu0 %v15430_v36  ;;  %6622 = vmatprep.mubr.bf16.mxu1 %v15430_v36  ;;  %v13502_v44 = vld [vmem:[#allocation13 + $0x6e8] ss:$16 sps:$4 sm:$0xff]  }
 0x61e   : > { %v5249_v47 = vadd.f32 %v15406_v60, %v4975_v25  ;;  %v4977_v48 = vpop.f32.mrb[11].mxu1  ;;  %6397 = vmatmul.mubr.bf16.gmra.mrb[36].mxu0 %v15428_v21  ;;  %6623 = vmatmul.mubr.bf16.gmra.mrb[68].mxu1 %v15428_v21  ;;  %v5309_v51 = vmax.f32 %v5245_v43, 0.0  ;;  %v13499_v43 = vld [vmem:[#allocation13 + $0x6e0] ss:$16 sps:$4 sm:$0xff]   ;;  %v13510_v25 = vld [vmem:[#allocation13 + $0x70c] ss:$16 sps:$4 sm:$0xff]  }
 0x61f   : > { %v5250_v49 = vadd.f32 %v15410_v61, %v4977_v48  ;;  %6472 = vmatpush1.bf16.msra.mxu0 %v13469_v20  ;;  %6698 = vmatpush1.bf16.msra.mxu1 %v13472_v54  ;;  %v5310_v58 = vmax.f32 %v5246_v53, 0.0  ;;  %v13507_v53 = vld [vmem:[#allocation13 + $0x704] ss:$16 sps:$4 sm:$0xff]  }
 0x620   : > { %v5313_v52 = vmax.f32 %v5249_v47, 0.0  ;;  %6473 = vmatprep.subr.bf16.mxu0 %v13477_v41  ;;  %6699 = vmatprep.subr.bf16.mxu1 %v13480_v42 }
 0x621   : > { %v5314_v59 = vmax.f32 %v5250_v49, 0.0 }
 0x622   : > { %v15440_v6 = vpack.c.bf16 %v5313_v52, %v5309_v51  ;;  %v13505_v51 = vld [vmem:[#allocation13 + $0x700] ss:$16 sps:$4 sm:$0xff]   ;;  %v13508_v52 = vld [vmem:[#allocation13 + $0x708] ss:$16 sps:$4 sm:$0xff]  }
 0x623   : > { %v15442_v34 = vpack.c.bf16 %v5314_v59, %v5310_v58  ;;  %v4981_v9 = vpop.f32.mrb[12].mxu1  ;;  %6474 = vmatpush1.bf16.msra.mxu0 %v13475_v50  ;;  %6700 = vmatpush1.bf16.msra.mxu1 %v13478_v24  ;;  %v13513_v58 = vld [vmem:[#allocation13 + $0x724] ss:$16 sps:$4 sm:$0xff]   ;;  %v13516_v59 = vld [vmem:[#allocation13 + $0x72c] ss:$16 sps:$4 sm:$0xff]  }
 0x624   : > { %v5253_v8 = vadd.f32 %v15406_v60, %v4981_v9  ;;  %v4983_v46 = vpop.f32.mrb[13].mxu1  ;;  %6475 = vmatprep.subr.bf16.mxu0 %v13483_v57  ;;  %6701 = vmatprep.subr.bf16.mxu1 %v13486_v7 }
 0x625   : > { %v5254_v45 = vadd.f32 %v15410_v61, %v4983_v46  ;;  %v4985_v3 = vpop.f32.mrb[14].mxu1  ;;  %6406 = vmatprep.mubr.bf16.mxu0 %v15442_v34  ;;  %6632 = vmatprep.mubr.bf16.mxu1 %v15442_v34 }
 0x626   : > { %v5257_v4 = vadd.f32 %v15406_v60, %v4985_v3  ;;  %v4987_v5 = vpop.f32.mrb[15].mxu1  ;;  %6407 = vmatmul.mubr.bf16.gmra.mrb[40].mxu0 %v15440_v6  ;;  %6633 = vmatmul.mubr.bf16.gmra.mrb[72].mxu1 %v15440_v6  ;;  %v5317_v15 = vmax.f32 %v5253_v8, 0.0 }
 0x627   : > { %v5258_v12 = vadd.f32 %v15410_v61, %v4987_v5  ;;  %6476 = vmatpush1.bf16.msra.mxu0 %v13481_v62  ;;  %6702 = vmatpush1.bf16.msra.mxu1 %v13484_v63  ;;  %v5318_v19 = vmax.f32 %v5254_v45, 0.0  ;;  %v13522_v5 = vld [vmem:[#allocation13 + $0x74c] ss:$16 sps:$4 sm:$0xff]  }
 0x628   : > { %v5321_v16 = vmax.f32 %v5257_v4, 0.0  ;;  %6477 = vmatprep.subr.bf16.mxu0 %v13489_v0  ;;  %6703 = vmatprep.subr.bf16.mxu1 %v13492_v1  ;;  %v13511_v0 = vld [vmem:[#allocation13 + $0x720] ss:$16 sps:$4 sm:$0xff]   ;;  %v13514_v1 = vld [vmem:[#allocation13 + $0x728] ss:$16 sps:$4 sm:$0xff]  }
 0x629   : > { %v5322_v22 = vmax.f32 %v5258_v12, 0.0  ;;  %v13519_v4 = vld [vmem:[#allocation13 + $0x744] ss:$16 sps:$4 sm:$0xff]  }
 0x62a   : > { %v15452_v23 = vpack.c.bf16 %v5321_v16, %v5317_v15 }
 0x62b   : > { %v15454_v26 = vpack.c.bf16 %v5322_v22, %v5318_v19  ;;  %v4991_v27 = vpop.f32.mrb[16].mxu1  ;;  %6478 = vmatpush1.bf16.msra.mxu0 %v13487_v13  ;;  %6704 = vmatpush1.bf16.msra.mxu1 %v13490_v14 }
 0x62c   : > { %v5261_v30 = vadd.f32 %v15406_v60, %v4991_v27  ;;  %v4993_v56 = vpop.f32.mrb[17].mxu1  ;;  %6479 = vmatprep.subr.bf16.mxu0 %v13495_v17  ;;  %6705 = vmatprep.subr.bf16.mxu1 %v13498_v18  ;;  %v13517_v17 = vld [vmem:[#allocation13 + $0x740] ss:$16 sps:$4 sm:$0xff]   ;;  %v13520_v18 = vld [vmem:[#allocation13 + $0x748] ss:$16 sps:$4 sm:$0xff]  }
 0x62d   : > { %v5262_v33 = vadd.f32 %v15410_v61, %v4993_v56  ;;  %v4995_v55 = vpop.f32.mrb[18].mxu1  ;;  %6416 = vmatprep.mubr.bf16.mxu0 %v15454_v26  ;;  %6642 = vmatprep.mubr.bf16.mxu1 %v15454_v26  ;;  %v13525_v27 = vld [vmem:[#allocation13 + $0x764] ss:$16 sps:$4 sm:$0xff]  }
 0x62e   : > { %v5265_v39 = vadd.f32 %v15406_v60, %v4995_v55  ;;  %v4997_v20 = vpop.f32.mrb[19].mxu1  ;;  %6417 = vmatmul.mubr.bf16.gmra.mrb[44].mxu0 %v15452_v23  ;;  %6643 = vmatmul.mubr.bf16.gmra.mrb[76].mxu1 %v15452_v23  ;;  %v5325_v41 = vmax.f32 %v5261_v30, 0.0  ;;  %v13526_v55 = vld [vmem:[#allocation13 + $0x768] ss:$16 sps:$4 sm:$0xff]  }
 0x62f   : > { %v5266_v54 = vadd.f32 %v15410_v61, %v4997_v20  ;;  %6480 = vmatpush1.bf16.msra.mxu0 %v13493_v28  ;;  %6706 = vmatpush1.bf16.msra.mxu1 %v13496_v29  ;;  %v5326_v47 = vmax.f32 %v5262_v33, 0.0  ;;  %v13528_v28 = vld [vmem:[#allocation13 + $0x76c] ss:$16 sps:$4 sm:$0xff]   ;;  %v13523_v33 = vld [vmem:[#allocation13 + $0x760] ss:$16 sps:$4 sm:$0xff]  }
 0x630   : > { %v5329_v42 = vmax.f32 %v5265_v39, 0.0  ;;  %6481 = vmatprep.subr.bf16.mxu0 %v13501_v31  ;;  %6707 = vmatprep.subr.bf16.mxu1 %v13504_v32 }
 0x631   : > { %v5330_v48 = vmax.f32 %v5266_v54, 0.0  ;;  %v13531_v54 = vld [vmem:[#allocation13 + $0x784] ss:$16 sps:$4 sm:$0xff]  }
 0x632   : > { %v15464_v49 = vpack.c.bf16 %v5329_v42, %v5325_v41 }
 0x633   : > { %v15466_v50 = vpack.c.bf16 %v5330_v48, %v5326_v47  ;;  %v5001_v24 = vpop.f32.mrb[20].mxu1  ;;  %6482 = vmatpush1.bf16.msra.mxu0 %v13499_v43  ;;  %6708 = vmatpush1.bf16.msra.mxu1 %v13502_v44  ;;  %v13534_v43 = vld [vmem:[#allocation13 + $0x78c] ss:$16 sps:$4 sm:$0xff]   ;;  %v13529_v47 = vld [vmem:[#allocation13 + $0x780] ss:$16 sps:$4 sm:$0xff]  }
 0x634   : > { %v5269_v57 = vadd.f32 %v15406_v60, %v5001_v24  ;;  %v5003_v7 = vpop.f32.mrb[21].mxu1  ;;  %6483 = vmatprep.subr.bf16.mxu0 %v13507_v53  ;;  %6709 = vmatprep.subr.bf16.mxu1 %v13510_v25  ;;  %v13532_v48 = vld [vmem:[#allocation13 + $0x788] ss:$16 sps:$4 sm:$0xff]  }
 0x635   : > { %v5270_v9 = vadd.f32 %v15410_v61, %v5003_v7  ;;  %v5005_v62 = vpop.f32.mrb[22].mxu1  ;;  %6426 = vmatprep.mubr.bf16.mxu0 %v15466_v50  ;;  %6652 = vmatprep.mubr.bf16.mxu1 %v15466_v50  ;;  %v5219_v7 = vsub.s32 2, %v15200_v37 }
 0x636   : > { %v5273_v63 = vadd.f32 %v15406_v60, %v5005_v62  ;;  %v5007_v8 = vpop.f32.mrb[23].mxu1  ;;  %6427 = vmatmul.mubr.bf16.gmra.mrb[48].mxu0 %v15464_v49  ;;  %6653 = vmatmul.mubr.bf16.gmra.mrb[80].mxu1 %v15464_v49  ;;  %v5333_v45 = vmax.f32 %v5269_v57, 0.0  ;;  %v13540_v57 = vld [vmem:[#allocation13 + $0x7ac] ss:$16 sps:$4 sm:$0xff]  }
 0x637   : > { %v5274_v46 = vadd.f32 %v15410_v61, %v5007_v8  ;;  %6484 = vmatpush1.bf16.msra.mxu0 %v13505_v51  ;;  %6710 = vmatpush1.bf16.msra.mxu1 %v13508_v52  ;;  %v5334_v12 = vmax.f32 %v5270_v9, 0.0  ;;  %v13537_v52 = vld [vmem:[#allocation13 + $0x7a4] ss:$16 sps:$4 sm:$0xff]   ;;  %v5223_v9 = vsub.s32 3, %v15200_v37 }
 0x638   : > { %v5337_v3 = vmax.f32 %v5273_v63, 0.0  ;;  %6485 = vmatprep.subr.bf16.mxu0 %v13513_v58  ;;  %6711 = vmatprep.subr.bf16.mxu1 %v13516_v59 }
 0x639   : > { %v5338_v13 = vmax.f32 %v5274_v46, 0.0  ;;  %v13535_v46 = vld [vmem:[#allocation13 + $0x7a0] ss:$16 sps:$4 sm:$0xff]  }
 0x63a   : > { %v15476_v14 = vpack.c.bf16 %v5337_v3, %v5333_v45  ;;  %v15505_v3 = vrot.slane %v15402_v35, %v5219_v7 }
 0x63b   : > { %v15478_v15 = vpack.c.bf16 %v5338_v13, %v5334_v12  ;;  %v5011_v16 = vpop.f32.mrb[24].mxu1  ;;  %6486 = vmatpush1.bf16.msra.mxu0 %v13511_v0  ;;  %6712 = vmatpush1.bf16.msra.mxu1 %v13514_v1  ;;  %v13538_v0 = vld [vmem:[#allocation13 + $0x7a8] ss:$16 sps:$4 sm:$0xff]  }
 0x63c   : > { %v5277_v19 = vadd.f32 %v15406_v60, %v5011_v16  ;;  %v5013_v22 = vpop.f32.mrb[25].mxu1  ;;  %6487 = vmatprep.subr.bf16.mxu0 %v13519_v4  ;;  %6713 = vmatprep.subr.bf16.mxu1 %v13522_v5  ;;  %v13546_v4 = vld [vmem:[#allocation13 + $0x7cc] ss:$16 sps:$4 sm:$0xff]  }
 0x63d   : > { %v5278_v29 = vadd.f32 %v15410_v61, %v5013_v22  ;;  %v5015_v30 = vpop.f32.mrb[26].mxu1  ;;  %6436 = vmatprep.mubr.bf16.mxu0 %v15478_v15  ;;  %6662 = vmatprep.mubr.bf16.mxu1 %v15478_v15 }
 0x63e   : > { %v5281_v56 = vadd.f32 %v15406_v60, %v5015_v30  ;;  %v5017_v31 = vpop.f32.mrb[27].mxu1  ;;  %6437 = vmatmul.mubr.bf16.gmra.mrb[52].mxu0 %v15476_v14  ;;  %6663 = vmatmul.mubr.bf16.gmra.mrb[84].mxu1 %v15476_v14  ;;  %v5341_v39 = vmax.f32 %v5277_v19, 0.0  ;;  %v13544_v19 = vld [vmem:[#allocation13 + $0x7c8] ss:$16 sps:$4 sm:$0xff]  }
 0x63f   : > { %v5282_v32 = vadd.f32 %v15410_v61, %v5017_v31  ;;  %6488 = vmatpush1.bf16.msra.mxu0 %v13517_v17  ;;  %6714 = vmatpush1.bf16.msra.mxu1 %v13520_v18  ;;  %v5342_v44 = vmax.f32 %v5278_v29, 0.0  ;;  %v13541_v18 = vld [vmem:[#allocation13 + $0x7c0] ss:$16 sps:$4 sm:$0xff]   ;;  %v13552_v29 = vld [vmem:[#allocation13 + $0x7ec] ss:$16 sps:$4 sm:$0xff]  }
 0x640   : > { %v5345_v20 = vmax.f32 %v5281_v56, 0.0  ;;  %6489 = vmatprep.subr.bf16.mxu0 %v13525_v27  ;;  %6715 = vmatprep.subr.bf16.mxu1 %v13528_v28  ;;  %v13549_v28 = vld [vmem:[#allocation13 + $0x7e4] ss:$16 sps:$4 sm:$0xff]  }
 0x641   : > { %v5346_v41 = vmax.f32 %v5282_v32, 0.0 }
 0x642   : > { %v15488_v42 = vpack.c.bf16 %v5345_v20, %v5341_v39 }
 0x643   : > { %v15490_v53 = vpack.c.bf16 %v5346_v41, %v5342_v44  ;;  %v5021_v25 = vpop.f32.mrb[28].mxu1  ;;  %6490 = vmatpush1.bf16.msra.mxu0 %v13523_v33  ;;  %6716 = vmatpush1.bf16.msra.mxu1 %v13526_v55  ;;  %v13547_v33 = vld [vmem:[#allocation13 + $0x7e0] ss:$16 sps:$4 sm:$0xff]   ;;  %v13550_v55 = vld [vmem:[#allocation13 + $0x7e8] ss:$16 sps:$4 sm:$0xff]  }
 0x644   : > { %v5285_v24 = vadd.f32 %v15406_v60, %v5021_v25  ;;  %v5023_v51 = vpop.f32.mrb[29].mxu1  ;;  %6491 = vmatprep.subr.bf16.mxu0 %v13531_v54  ;;  %6717 = vmatprep.subr.bf16.mxu1 %v13534_v43  ;;  %v13555_v54 = vld [vmem:[#allocation13 + $0x4] ss:$16 sps:$4 sm:$0xff]   ;;  %v13558_v43 = vld [vmem:[#allocation13 + $0xc] ss:$16 sps:$4 sm:$0xff]  }
 0x645   : > { %v5286_v58 = vadd.f32 %v15410_v61, %v5023_v51  ;;  %v5025_v59 = vpop.f32.mrb[30].mxu1  ;;  %6446 = vmatprep.mubr.bf16.mxu0 %v15490_v53  ;;  %6672 = vmatprep.mubr.bf16.mxu1 %v15490_v53  ;;  %v13556_v51 = vld [vmem:[#allocation13 + $0x8] ss:$16 sps:$4 sm:$0xff]  }
 0x646   : > { %v5289_v62 = vadd.f32 %v15406_v60, %v5025_v59  ;;  %v5027_v63 = vpop.f32.mrb[31].mxu1  ;;  %6447 = vmatmul.mubr.bf16.gmra.mrb[56].mxu0 %v15488_v42  ;;  %6673 = vmatmul.mubr.bf16.gmra.mrb[88].mxu1 %v15488_v42  ;;  %v5349_v1 = vmax.f32 %v5285_v24, 0.0  ;;  %v13543_v60 = vld [vmem:[#allocation13 + $0x7c4] ss:$16 sps:$4 sm:$0xff]   ;;  %v13553_v24 = vld [vmem:[#allocation13] ss:$16 sps:$4 sm:$0xff]  }
 0x647   : > { %v5290_v8 = vadd.f32 %v15410_v61, %v5027_v63  ;;  %6492 = vmatpush1.bf16.msra.mxu0 %v13529_v47  ;;  %6718 = vmatpush1.bf16.msra.mxu1 %v13532_v48  ;;  %v5350_v5 = vmax.f32 %v5286_v58, 0.0  ;;  %v15510_v61 = vrot.slane %v15402_v35, %v5223_v9  ;;  %v13561_v58 = vld [vmem:[#allocation13 + $0x24] ss:$16 sps:$4 sm:$0xff]   ;;  %v13564_v59 = vld [vmem:[#allocation13 + $0x2c] ss:$16 sps:$4 sm:$0xff]  }
 0x648   : > { %v5353_v45 = vmax.f32 %v5289_v62, 0.0  ;;  %6493 = vmatprep.subr.bf16.mxu0 %v13537_v52  ;;  %6719 = vmatprep.subr.bf16.mxu1 %v13540_v57 }
 0x649   : > { %v5354_v12 = vmax.f32 %v5290_v8, 0.0 }
 0x64a   : > { %v15512_v13 = vpack.c.bf16 %v5353_v45, %v5349_v1  ;;  %v13559_v1 = vld [vmem:[#allocation13 + $0x20] ss:$16 sps:$4 sm:$0xff]   ;;  %v13562_v45 = vld [vmem:[#allocation13 + $0x28] ss:$16 sps:$4 sm:$0xff]  }
 0x64b   : > { %v15514_v16 = vpack.c.bf16 %v5354_v12, %v5350_v5  ;;  %v5064_v17 = vpop.f32.mrb[32].mxu1  ;;  %6494 = vmatpush1.bf16.msra.mxu0 %v13535_v46  ;;  %6720 = vmatpush1.bf16.msra.mxu1 %v13538_v0  ;;  %v13567_v5 = vld [vmem:[#allocation13 + $0x44] ss:$16 sps:$4 sm:$0xff]   ;;  %v13570_v12 = vld [vmem:[#allocation13 + $0x4c] ss:$16 sps:$4 sm:$0xff]  }
 0x64c   : > { %v5231_v22 = vadd.f32 %v15505_v3, %v5064_v17  ;;  %v5066_v27 = vpop.f32.mrb[33].mxu1  ;;  %6495 = vmatprep.subr.bf16.mxu0 %v13543_v60  ;;  %6721 = vmatprep.subr.bf16.mxu1 %v13546_v4 }
 0x64d   : > { %v5232_v30 = vadd.f32 %v15510_v61, %v5066_v27  ;;  %v5068_v35 = vpop.f32.mrb[34].mxu1  ;;  %6456 = vmatprep.mubr.bf16.mxu0 %v15514_v16  ;;  %6682 = vmatprep.mubr.bf16.mxu1 %v15514_v16 }
 0x64e   : > { %v5235_v56 = vadd.f32 %v15505_v3, %v5068_v35  ;;  %v5070_v31 = vpop.f32.mrb[35].mxu1  ;;  %6457 = vmatmul.mubr.bf16.gmra.mrb[60].mxu0 %v15512_v13  ;;  %6683 = vmatmul.mubr.bf16.gmra.mrb[92].mxu1 %v15512_v13  ;;  %v5295_v39 = vmax.f32 %v5231_v22, 0.0 }
 0x64f   : > { %v5236_v32 = vadd.f32 %v15510_v61, %v5070_v31  ;;  %6496 = vmatpush1.bf16.msra.mxu0 %v13541_v18  ;;  %6722 = vmatpush1.bf16.msra.mxu1 %v13544_v19  ;;  %v5296_v44 = vmax.f32 %v5232_v30, 0.0  ;;  %v13576_v31 = vld [vmem:[#allocation13 + $0x6c] ss:$16 sps:$4 sm:$0xff]  }
 0x650   : > { %v5299_v20 = vmax.f32 %v5235_v56, 0.0  ;;  %6497 = vmatprep.subr.bf16.mxu0 %v13549_v28  ;;  %6723 = vmatprep.subr.bf16.mxu1 %v13552_v29  ;;  %v13565_v28 = vld [vmem:[#allocation13 + $0x40] ss:$16 sps:$4 sm:$0xff]   ;;  %v13568_v29 = vld [vmem:[#allocation13 + $0x48] ss:$16 sps:$4 sm:$0xff]  }
 0x651   : > { %v5300_v41 = vmax.f32 %v5236_v32, 0.0  ;;  %v13573_v56 = vld [vmem:[#allocation13 + $0x64] ss:$16 sps:$4 sm:$0xff]  }
 0x652   : > { %v15524_v25 = vpack.c.bf16 %v5299_v20, %v5295_v39 }
 0x653   : > { %v15526_v47 = vpack.c.bf16 %v5300_v41, %v5296_v44  ;;  %v5074_v48 = vpop.f32.mrb[36].mxu1  ;;  %6498 = vmatpush1.bf16.msra.mxu0 %v13547_v33  ;;  %6724 = vmatpush1.bf16.msra.mxu1 %v13550_v55 }
 0x654   : > { %v5239_v52 = vadd.f32 %v15505_v3, %v5074_v48  ;;  %v5076_v57 = vpop.f32.mrb[37].mxu1  ;;  %7446 = vmatprep.subr.bf16.mxu0 %v13555_v54  ;;  %7672 = vmatprep.subr.bf16.mxu1 %v13558_v43  ;;  %v13571_v54 = vld [vmem:[#allocation13 + $0x60] ss:$16 sps:$4 sm:$0xff]   ;;  %v13574_v43 = vld [vmem:[#allocation13 + $0x68] ss:$16 sps:$4 sm:$0xff]  }
 0x655   : > { %v5240_v62 = vadd.f32 %v15510_v61, %v5076_v57  ;;  %v5078_v63 = vpop.f32.mrb[38].mxu1  ;;  %6499 = vmatprep.mubr.bf16.mxu0 %v15526_v47  ;;  %6725 = vmatprep.mubr.bf16.mxu1 %v15526_v47  ;;  %v13579_v48 = vld [vmem:[#allocation13 + $0x84] ss:$16 sps:$4 sm:$0xff]  }
 0x656   : > { %v5243_v8 = vadd.f32 %v15505_v3, %v5078_v63  ;;  %v5080_v46 = vpop.f32.mrb[39].mxu1  ;;  %6500 = vmatmul.mubr.bf16.vlgmr.msra.gmra.mrb[32].mxu0 %v15524_v25  ;;  %6726 = vmatmul.mubr.bf16.vlgmr.msra.gmra.mrb[64].mxu1 %v15524_v25  ;;  %v5303_v60 = vmax.f32 %v5239_v52, 0.0  ;;  %v13580_v63 = vld [vmem:[#allocation13 + $0x88] ss:$16 sps:$4 sm:$0xff]  }
 0x657   : > { %v5244_v0 = vadd.f32 %v15510_v61, %v5080_v46  ;;  %7447 = vmatpush1.bf16.msra.mxu0 %v13553_v24  ;;  %7673 = vmatpush1.bf16.msra.mxu1 %v13556_v51  ;;  %v5304_v17 = vmax.f32 %v5240_v62, 0.0  ;;  %v13582_v24 = vld [vmem:[#allocation13 + $0x8c] ss:$16 sps:$4 sm:$0xff]   ;;  %v13577_v62 = vld [vmem:[#allocation13 + $0x80] ss:$16 sps:$4 sm:$0xff]  }
 0x658   : > { %v5307_v4 = vmax.f32 %v5243_v8, 0.0  ;;  %7448 = vmatprep.subr.bf16.mxu0 %v13561_v58  ;;  %7674 = vmatprep.subr.bf16.mxu1 %v13564_v59 }
 0x659   : > { %v5308_v18 = vmax.f32 %v5244_v0, 0.0  ;;  %v13585_v0 = vld [vmem:[#allocation13 + $0xa4] ss:$16 sps:$4 sm:$0xff]  }
 0x65a   : > { %v15536_v19 = vpack.c.bf16 %v5307_v4, %v5303_v60 }
 0x65b   : > { %v15538_v22 = vpack.c.bf16 %v5308_v18, %v5304_v17  ;;  %v5084_v27 = vpop.f32.mrb[40].mxu1  ;;  %7449 = vmatpush1.bf16.msra.mxu0 %v13559_v1  ;;  %7675 = vmatpush1.bf16.msra.mxu1 %v13562_v45  ;;  %v13588_v1 = vld [vmem:[#allocation13 + $0xac] ss:$16 sps:$4 sm:$0xff]   ;;  %v13583_v17 = vld [vmem:[#allocation13 + $0xa0] ss:$16 sps:$4 sm:$0xff]  }
 0x65c   : > { %v5247_v30 = vadd.f32 %v15505_v3, %v5084_v27  ;;  %v5086_v35 = vpop.f32.mrb[41].mxu1  ;;  %7450 = vmatprep.subr.bf16.mxu0 %v13567_v5  ;;  %7676 = vmatprep.subr.bf16.mxu1 %v13570_v12  ;;  %v13586_v18 = vld [vmem:[#allocation13 + $0xa8] ss:$16 sps:$4 sm:$0xff]  }
 0x65d   : > { %v5248_v32 = vadd.f32 %v15510_v61, %v5086_v35  ;;  %v5088_v33 = vpop.f32.mrb[42].mxu1  ;;  %6509 = vmatprep.mubr.bf16.mxu0 %v15538_v22  ;;  %6735 = vmatprep.mubr.bf16.mxu1 %v15538_v22 }
 0x65e   : > { %v5251_v55 = vadd.f32 %v15505_v3, %v5088_v33  ;;  %v5090_v39 = vpop.f32.mrb[43].mxu1  ;;  %6510 = vmatmul.mubr.bf16.gmra.mrb[36].mxu0 %v15536_v19  ;;  %6736 = vmatmul.mubr.bf16.gmra.mrb[68].mxu1 %v15536_v19  ;;  %v5311_v44 = vmax.f32 %v5247_v30, 0.0  ;;  %v13594_v30 = vld [vmem:[#allocation13 + $0xcc] ss:$16 sps:$4 sm:$0xff]  }
 0x65f   : > { %v5252_v20 = vadd.f32 %v15510_v61, %v5090_v39  ;;  %7451 = vmatpush1.bf16.msra.mxu0 %v13565_v28  ;;  %7677 = vmatpush1.bf16.msra.mxu1 %v13568_v29  ;;  %v5312_v51 = vmax.f32 %v5248_v32, 0.0  ;;  %v13591_v29 = vld [vmem:[#allocation13 + $0xc4] ss:$16 sps:$4 sm:$0xff]   ;;  %v13592_v39 = vld [vmem:[#allocation13 + $0xc8] ss:$16 sps:$4 sm:$0xff]  }
 0x660   : > { %v5315_v41 = vmax.f32 %v5251_v55, 0.0  ;;  %7452 = vmatprep.subr.bf16.mxu0 %v13573_v56  ;;  %7678 = vmatprep.subr.bf16.mxu1 %v13576_v31  ;;  %v13589_v55 = vld [vmem:[#allocation13 + $0xc0] ss:$16 sps:$4 sm:$0xff]  }
 0x661   : > { %v5316_v52 = vmax.f32 %v5252_v20, 0.0 }
 0x662   : > { %v15548_v57 = vpack.c.bf16 %v5315_v41, %v5311_v44  ;;  %v13600_v44 = vld [vmem:[#allocation13 + $0xec] ss:$16 sps:$4 sm:$0xff]  }
 0x663   : > { %v15550_v58 = vpack.c.bf16 %v5316_v52, %v5312_v51  ;;  %v5094_v59 = vpop.f32.mrb[44].mxu1  ;;  %7453 = vmatpush1.bf16.msra.mxu0 %v13571_v54  ;;  %7679 = vmatpush1.bf16.msra.mxu1 %v13574_v43  ;;  %v13597_v43 = vld [vmem:[#allocation13 + $0xe4] ss:$16 sps:$4 sm:$0xff]  }
 0x664   : > { %v5255_v8 = vadd.f32 %v15505_v3, %v5094_v59  ;;  %v5096_v46 = vpop.f32.mrb[45].mxu1  ;;  %7454 = vmatprep.subr.bf16.mxu0 %v13579_v48  ;;  %7680 = vmatprep.subr.bf16.mxu1 %v13582_v24  ;;  %v13595_v59 = vld [vmem:[#allocation13 + $0xe0] ss:$16 sps:$4 sm:$0xff]  }
 0x665   : > { %v5256_v45 = vadd.f32 %v15510_v61, %v5096_v46  ;;  %v5098_v60 = vpop.f32.mrb[46].mxu1  ;;  %6519 = vmatprep.mubr.bf16.mxu0 %v15550_v58  ;;  %6745 = vmatprep.mubr.bf16.mxu1 %v15550_v58  ;;  %v13603_v46 = vld [vmem:[#allocation13 + $0x104] ss:$16 sps:$4 sm:$0xff]  }
 0x666   : > { %v5259_v4 = vadd.f32 %v15505_v3, %v5098_v60  ;;  %v5100_v5 = vpop.f32.mrb[47].mxu1  ;;  %6520 = vmatmul.mubr.bf16.gmra.mrb[40].mxu0 %v15548_v57  ;;  %6746 = vmatmul.mubr.bf16.gmra.mrb[72].mxu1 %v15548_v57  ;;  %v5319_v27 = vmax.f32 %v5255_v8, 0.0 }
 0x667   : > { %v5260_v12 = vadd.f32 %v15510_v61, %v5100_v5  ;;  %7455 = vmatpush1.bf16.msra.mxu0 %v13577_v62  ;;  %7681 = vmatpush1.bf16.msra.mxu1 %v13580_v63  ;;  %v5320_v35 = vmax.f32 %v5256_v45, 0.0  ;;  %v13598_v62 = vld [vmem:[#allocation13 + $0xe8] ss:$16 sps:$4 sm:$0xff]  }
 0x668   : > { %v5323_v28 = vmax.f32 %v5259_v4, 0.0  ;;  %7456 = vmatprep.subr.bf16.mxu0 %v13585_v0  ;;  %7682 = vmatprep.subr.bf16.mxu1 %v13588_v1  ;;  %v13606_v0 = vld [vmem:[#allocation13 + $0x10c] ss:$16 sps:$4 sm:$0xff]  }
 0x669   : > { %v5324_v56 = vmax.f32 %v5260_v12, 0.0  ;;  %v13601_v12 = vld [vmem:[#allocation13 + $0x100] ss:$16 sps:$4 sm:$0xff]  }
 0x66a   : > { %v15560_v31 = vpack.c.bf16 %v5323_v28, %v5319_v27  ;;  %v13609_v28 = vld [vmem:[#allocation13 + $0x124] ss:$16 sps:$4 sm:$0xff]  }
 0x66b   : > { %v15562_v32 = vpack.c.bf16 %v5324_v56, %v5320_v35  ;;  %v5104_v33 = vpop.f32.mrb[48].mxu1  ;;  %7457 = vmatpush1.bf16.msra.mxu0 %v13583_v17  ;;  %7683 = vmatpush1.bf16.msra.mxu1 %v13586_v18  ;;  %v13604_v17 = vld [vmem:[#allocation13 + $0x108] ss:$16 sps:$4 sm:$0xff]  }
 0x66c   : > { %v5263_v20 = vadd.f32 %v15505_v3, %v5104_v33  ;;  %v5106_v54 = vpop.f32.mrb[49].mxu1  ;;  %7458 = vmatprep.subr.bf16.mxu0 %v13591_v29  ;;  %7684 = vmatprep.subr.bf16.mxu1 %v13594_v30  ;;  %v13612_v29 = vld [vmem:[#allocation13 + $0x12c] ss:$16 sps:$4 sm:$0xff]  }
 0x66d   : > { %v5264_v41 = vadd.f32 %v15510_v61, %v5106_v54  ;;  %v5108_v48 = vpop.f32.mrb[50].mxu1  ;;  %6529 = vmatprep.mubr.bf16.mxu0 %v15562_v32  ;;  %6755 = vmatprep.mubr.bf16.mxu1 %v15562_v32 }
 0x66e   : > { %v5267_v24 = vadd.f32 %v15505_v3, %v5108_v48  ;;  %v5110_v51 = vpop.f32.mrb[51].mxu1  ;;  %6530 = vmatmul.mubr.bf16.gmra.mrb[44].mxu0 %v15560_v31  ;;  %6756 = vmatmul.mubr.bf16.gmra.mrb[76].mxu1 %v15560_v31  ;;  %v5327_v63 = vmax.f32 %v5263_v20, 0.0  ;;  %v13610_v20 = vld [vmem:[#allocation13 + $0x128] ss:$16 sps:$4 sm:$0xff]  }
 0x66f   : > { %v5268_v52 = vadd.f32 %v15510_v61, %v5110_v51  ;;  %7459 = vmatpush1.bf16.msra.mxu0 %v13589_v55  ;;  %7685 = vmatpush1.bf16.msra.mxu1 %v13592_v39  ;;  %v5328_v1 = vmax.f32 %v5264_v41, 0.0  ;;  %v13607_v39 = vld [vmem:[#allocation13 + $0x120] ss:$16 sps:$4 sm:$0xff]   ;;  %v13618_v41 = vld [vmem:[#allocation13 + $0x14c] ss:$16 sps:$4 sm:$0xff]  }
 0x670   : > { %v5331_v8 = vmax.f32 %v5267_v24, 0.0  ;;  %7460 = vmatprep.subr.bf16.mxu0 %v13597_v43  ;;  %7686 = vmatprep.subr.bf16.mxu1 %v13600_v44  ;;  %v13615_v44 = vld [vmem:[#allocation13 + $0x144] ss:$16 sps:$4 sm:$0xff]  }
 0x671   : > { %v5332_v45 = vmax.f32 %v5268_v52, 0.0 }
 0x672   : > { %v15572_v60 = vpack.c.bf16 %v5331_v8, %v5327_v63  ;;  %v13616_v63 = vld [vmem:[#allocation13 + $0x148] ss:$16 sps:$4 sm:$0xff]  }
 0x673   : > { %v15574_v4 = vpack.c.bf16 %v5332_v45, %v5328_v1  ;;  %v5114_v5 = vpop.f32.mrb[52].mxu1  ;;  %7461 = vmatpush1.bf16.msra.mxu0 %v13595_v59  ;;  %7687 = vmatpush1.bf16.msra.mxu1 %v13598_v62  ;;  %v13613_v62 = vld [vmem:[#allocation13 + $0x140] ss:$16 sps:$4 sm:$0xff]   ;;  %v13624_v1 = vld [vmem:[#allocation13 + $0x16c] ss:$16 sps:$4 sm:$0xff]  }
 0x674   : > { %v5271_v18 = vadd.f32 %v15505_v3, %v5114_v5  ;;  %v5116_v27 = vpop.f32.mrb[53].mxu1  ;;  %7462 = vmatprep.subr.bf16.mxu0 %v13603_v46  ;;  %7688 = vmatprep.subr.bf16.mxu1 %v13606_v0  ;;  %v13621_v0 = vld [vmem:[#allocation13 + $0x164] ss:$16 sps:$4 sm:$0xff]  }
 0x675   : > { %v5272_v30 = vadd.f32 %v15510_v61, %v5116_v27  ;;  %v5118_v35 = vpop.f32.mrb[54].mxu1  ;;  %6539 = vmatprep.mubr.bf16.mxu0 %v15574_v4  ;;  %6765 = vmatprep.mubr.bf16.mxu1 %v15574_v4  ;;  %v13619_v27 = vld [vmem:[#allocation13 + $0x160] ss:$16 sps:$4 sm:$0xff]  }
 0x676   : > { %v5275_v56 = vadd.f32 %v15505_v3, %v5118_v35  ;;  %v5120_v33 = vpop.f32.mrb[55].mxu1  ;;  %6540 = vmatmul.mubr.bf16.gmra.mrb[48].mxu0 %v15572_v60  ;;  %6766 = vmatmul.mubr.bf16.gmra.mrb[80].mxu1 %v15572_v60  ;;  %v5335_v54 = vmax.f32 %v5271_v18, 0.0  ;;  %v13627_v35 = vld [vmem:[#allocation13 + $0x184] ss:$16 sps:$4 sm:$0xff]  }
 0x677   : > { %v5276_v55 = vadd.f32 %v15510_v61, %v5120_v33  ;;  %7463 = vmatpush1.bf16.msra.mxu0 %v13601_v12  ;;  %7689 = vmatpush1.bf16.msra.mxu1 %v13604_v17  ;;  %v5336_v48 = vmax.f32 %v5272_v30, 0.0 }
 0x678   : > { %v5339_v43 = vmax.f32 %v5275_v56, 0.0  ;;  %7464 = vmatprep.subr.bf16.mxu0 %v13609_v28  ;;  %7690 = vmatprep.subr.bf16.mxu1 %v13612_v29  ;;  %v13622_v28 = vld [vmem:[#allocation13 + $0x168] ss:$16 sps:$4 sm:$0xff]   ;;  %v13630_v56 = vld [vmem:[#allocation13 + $0x18c] ss:$16 sps:$4 sm:$0xff]  }
 0x679   : > { %v5340_v24 = vmax.f32 %v5276_v55, 0.0 }
 0x67a   : > { %v15584_v51 = vpack.c.bf16 %v5339_v43, %v5335_v54  ;;  %v13625_v43 = vld [vmem:[#allocation13 + $0x180] ss:$16 sps:$4 sm:$0xff]  }
 0x67b   : > { %v15586_v52 = vpack.c.bf16 %v5340_v24, %v5336_v48  ;;  %v5124_v59 = vpop.f32.mrb[56].mxu1  ;;  %7465 = vmatpush1.bf16.msra.mxu0 %v13607_v39  ;;  %7691 = vmatpush1.bf16.msra.mxu1 %v13610_v20  ;;  %v13633_v24 = vld [vmem:[#allocation13 + $0x1a4] ss:$16 sps:$4 sm:$0xff]  }
 0x67c   : > { %v5279_v8 = vadd.f32 %v15505_v3, %v5124_v59  ;;  %v5126_v46 = vpop.f32.mrb[57].mxu1  ;;  %7466 = vmatprep.subr.bf16.mxu0 %v13615_v44  ;;  %7692 = vmatprep.subr.bf16.mxu1 %v13618_v41  ;;  %v13628_v44 = vld [vmem:[#allocation13 + $0x188] ss:$16 sps:$4 sm:$0xff]   ;;  %v13636_v59 = vld [vmem:[#allocation13 + $0x1ac] ss:$16 sps:$4 sm:$0xff]  }
 0x67d   : > { %v5280_v45 = vadd.f32 %v15510_v61, %v5126_v46  ;;  %v5128_v5 = vpop.f32.mrb[58].mxu1  ;;  %6549 = vmatprep.mubr.bf16.mxu0 %v15586_v52  ;;  %6775 = vmatprep.mubr.bf16.mxu1 %v15586_v52 }
 0x67e   : > { %v5283_v12 = vadd.f32 %v15505_v3, %v5128_v5  ;;  %v5130_v17 = vpop.f32.mrb[59].mxu1  ;;  %6550 = vmatmul.mubr.bf16.gmra.mrb[52].mxu0 %v15584_v51  ;;  %6776 = vmatmul.mubr.bf16.gmra.mrb[84].mxu1 %v15584_v51  ;;  %v5343_v29 = vmax.f32 %v5279_v8, 0.0 }
 0x67f   : > { %v5284_v18 = vadd.f32 %v15510_v61, %v5130_v17  ;;  %7467 = vmatpush1.bf16.msra.mxu0 %v13613_v62  ;;  %7693 = vmatpush1.bf16.msra.mxu1 %v13616_v63  ;;  %v5344_v33 = vmax.f32 %v5280_v45, 0.0  ;;  %v13634_v45 = vld [vmem:[#allocation13 + $0x1a8] ss:$16 sps:$4 sm:$0xff]   ;;  %v13639_v17 = vld [vmem:[#allocation13 + $0x1c4] ss:$16 sps:$4 sm:$0xff]  }
 0x680   : > { %v5347_v30 = vmax.f32 %v5283_v12, 0.0  ;;  %7468 = vmatprep.subr.bf16.mxu0 %v13621_v0  ;;  %7694 = vmatprep.subr.bf16.mxu1 %v13624_v1  ;;  %v13631_v1 = vld [vmem:[#allocation13 + $0x1a0] ss:$16 sps:$4 sm:$0xff]  }
 0x681   : > { %v5348_v55 = vmax.f32 %v5284_v18, 0.0  ;;  %v13642_v18 = vld [vmem:[#allocation13 + $0x1cc] ss:$16 sps:$4 sm:$0xff]  }
 0x682   : > { %v15596_v39 = vpack.c.bf16 %v5347_v30, %v5343_v29  ;;  %v13637_v30 = vld [vmem:[#allocation13 + $0x1c0] ss:$16 sps:$4 sm:$0xff]  }
 0x683   : > { %v15598_v20 = vpack.c.bf16 %v5348_v55, %v5344_v33  ;;  %v5134_v54 = vpop.f32.mrb[60].mxu1  ;;  %7469 = vmatpush1.bf16.msra.mxu0 %v13619_v27  ;;  %7695 = vmatpush1.bf16.msra.mxu1 %v13622_v28  ;;  %v13643_v33 = vld [vmem:[#allocation13 + $0x1e0] ss:$16 sps:$4 sm:$0xff]   ;;  %v13646_v55 = vld [vmem:[#allocation13 + $0x1e8] ss:$16 sps:$4 sm:$0xff]  }
 0x684   : > { %v5287_v41 = vadd.f32 %v15505_v3, %v5134_v54  ;;  %v5136_v48 = vpop.f32.mrb[61].mxu1  ;;  %7470 = vmatprep.subr.bf16.mxu0 %v13627_v35  ;;  %7696 = vmatprep.subr.bf16.mxu1 %v13630_v56  ;;  %v13645_v35 = vld [vmem:[#allocation13 + $0x1e4] ss:$16 sps:$4 sm:$0xff]   ;;  %v13648_v56 = vld [vmem:[#allocation13 + $0x1ec] ss:$16 sps:$4 sm:$0xff]  }
 0x685   : > { %v5288_v62 = vadd.f32 %v15510_v61, %v5136_v48  ;;  %v5138_v63 = vpop.f32.mrb[62].mxu1  ;;  %6559 = vmatprep.mubr.bf16.mxu0 %v15598_v20  ;;  %6785 = vmatprep.mubr.bf16.mxu1 %v15598_v20  ;;  %v13651_v54 = vld [vmem:[#allocation13 + $0x204] ss:$16 sps:$4 sm:$0xff]  }
 0x686   : > { %v5291_v8 = vadd.f32 %v15505_v3, %v5138_v63  ;;  %v5140_v46 = vpop.f32.mrb[63].mxu1  ;;  %6560 = vmatmul.mubr.bf16.gmra.mrb[56].mxu0 %v15596_v39  ;;  %6786 = vmatmul.mubr.bf16.gmra.mrb[88].mxu1 %v15596_v39  ;;  %v5351_v5 = vmax.f32 %v5287_v41, 0.0  ;;  %v13652_v41 = vld [vmem:[#allocation13 + $0x208] ss:$16 sps:$4 sm:$0xff]   ;;  %v13657_v48 = vld [vmem:[#allocation13 + $0x224] ss:$16 sps:$4 sm:$0xff]  }
 0x687   : > { %v5292_v0 = vadd.f32 %v15510_v61, %v5140_v46  ;;  %7471 = vmatpush1.bf16.msra.mxu0 %v13625_v43  ;;  %7697 = vmatpush1.bf16.msra.mxu1 %v13628_v44  ;;  %v5352_v27 = vmax.f32 %v5288_v62, 0.0  ;;  %v13640_v61 = vld [vmem:[#allocation13 + $0x1c8] ss:$16 sps:$4 sm:$0xff]   ;;  %v13654_v43 = vld [vmem:[#allocation13 + $0x20c] ss:$16 sps:$4 sm:$0xff]  }
 0x688   : > { %v5355_v12 = vmax.f32 %v5291_v8, 0.0  ;;  %7472 = vmatprep.subr.bf16.mxu0 %v13633_v24  ;;  %7698 = vmatprep.subr.bf16.mxu1 %v13636_v59  ;;  %v13649_v44 = vld [vmem:[#allocation13 + $0x200] ss:$16 sps:$4 sm:$0xff]   ;;  %v13660_v24 = vld [vmem:[#allocation13 + $0x22c] ss:$16 sps:$4 sm:$0xff]  }
 0x689   : > { %v5356_v28 = vmax.f32 %v5292_v0, 0.0  ;;  %v13655_v59 = vld [vmem:[#allocation13 + $0x220] ss:$16 sps:$4 sm:$0xff]   ;;  %v13658_v62 = vld [vmem:[#allocation13 + $0x228] ss:$16 sps:$4 sm:$0xff]  }
 0x68a   : > { %v15608_v3 = vpack.c.bf16 %v5355_v12, %v5351_v5  ;;  %v13663_v63 = vld [vmem:[#allocation13 + $0x244] ss:$16 sps:$4 sm:$0xff]   ;;  %v13666_v8 = vld [vmem:[#allocation13 + $0x24c] ss:$16 sps:$4 sm:$0xff]   ;;  %v13661_v46 = vld [vmem:[#allocation13 + $0x240] ss:$16 sps:$4 sm:$0xff]  }
 0x68b   : > { %v15610_v29 = vpack.c.bf16 %v5356_v28, %v5352_v27  ;;  %7473 = vmatpush1.bf16.msra.mxu0 %v13631_v1  ;;  %7699 = vmatpush1.bf16.msra.mxu1 %v13634_v45  ;;  %v13664_v0 = vld [vmem:[#allocation13 + $0x248] ss:$16 sps:$4 sm:$0xff]   ;;  %v13669_v1 = vld [vmem:[#allocation13 + $0x264] ss:$16 sps:$4 sm:$0xff]   ;;  %v13672_v45 = vld [vmem:[#allocation13 + $0x26c] ss:$16 sps:$4 sm:$0xff]  }
 0x68c   : > { %7474 = vmatprep.subr.bf16.mxu0 %v13639_v17  ;;  %7700 = vmatprep.subr.bf16.mxu1 %v13642_v18  ;;  %v13670_v5 = vld [vmem:[#allocation13 + $0x268] ss:$16 sps:$4 sm:$0xff]   ;;  %v13675_v12 = vld [vmem:[#allocation13 + $0x284] ss:$16 sps:$4 sm:$0xff]   ;;  %v13678_v17 = vld [vmem:[#allocation13 + $0x28c] ss:$16 sps:$4 sm:$0xff]  }
 0x68d   : > { %6569 = vmatprep.mubr.bf16.mxu0 %v15610_v29  ;;  %6795 = vmatprep.mubr.bf16.mxu1 %v15610_v29  ;;  %v13673_v18 = vld [vmem:[#allocation13 + $0x280] ss:$16 sps:$4 sm:$0xff]   ;;  %v13676_v27 = vld [vmem:[#allocation13 + $0x288] ss:$16 sps:$4 sm:$0xff]   ;;  %v13681_v28 = vld [vmem:[#allocation13 + $0x2a4] ss:$16 sps:$4 sm:$0xff]  }
 0x68e   : > { %6570 = vmatmul.mubr.bf16.gmra.mrb[60].mxu0 %v15608_v3  ;;  %6796 = vmatmul.mubr.bf16.gmra.mrb[92].mxu1 %v15608_v3 }
 0x68f   : > { %7475 = vmatpush1.bf16.msra.mxu0 %v13637_v30  ;;  %7701 = vmatpush1.bf16.msra.mxu1 %v13640_v61  ;;  %v13679_v30 = vld [vmem:[#allocation13 + $0x2a0] ss:$16 sps:$4 sm:$0xff]   ;;  %v13682_v61 = vld [vmem:[#allocation13 + $0x2a8] ss:$16 sps:$4 sm:$0xff]  }
 0x690   : > { %7476 = vmatprep.subr.bf16.mxu0 %v13645_v35  ;;  %7702 = vmatprep.subr.bf16.mxu1 %v13648_v56  ;;  %v13687_v35 = vld [vmem:[#allocation13 + $0x2c4] ss:$16 sps:$4 sm:$0xff]   ;;  %v13690_v56 = vld [vmem:[#allocation13 + $0x2cc] ss:$16 sps:$4 sm:$0xff]  }
 0x691   : > { %7478 = vmatprep.mubr.bf16.mxu0 %v14488_v2  ;;  %7704 = vmatprep.mubr.bf16.mxu1 %v14488_v2 }
 0x693   : > { %7477 = vmatpush1.bf16.msra.mxu0 %v13643_v33  ;;  %7703 = vmatpush1.bf16.msra.mxu1 %v13646_v55  ;;  %v13685_v33 = vld [vmem:[#allocation13 + $0x2c0] ss:$16 sps:$4 sm:$0xff]   ;;  %v13688_v55 = vld [vmem:[#allocation13 + $0x2c8] ss:$16 sps:$4 sm:$0xff]  }
 0x694   : > { %7559 = vmatprep.subr.bf16.mxu0 %v13651_v54  ;;  %7785 = vmatprep.subr.bf16.mxu1 %v13654_v43  ;;  %v13693_v54 = vld [vmem:[#allocation13 + $0x2e4] ss:$16 sps:$4 sm:$0xff]   ;;  %v13696_v43 = vld [vmem:[#allocation13 + $0x2ec] ss:$16 sps:$4 sm:$0xff]  }
 0x696   : > { %7479 = vmatmul.mubr.bf16.vlgmr.msra.gmra.mrb[32].mxu0 %v14488_v2  ;;  %7705 = vmatmul.mubr.bf16.vlgmr.msra.gmra.mrb[64].mxu1 %v14488_v2 }
 0x697   : > { %7488 = vmatprep.mubr.bf16.mxu0 %v15418_v11  ;;  %7560 = vmatpush1.bf16.msra.mxu0 %v13649_v44  ;;  %v13691_v44 = vld [vmem:[#allocation13 + $0x2e0] ss:$16 sps:$4 sm:$0xff]  }
 0x698   : > { %7714 = vmatprep.mubr.bf16.mxu1 %v15418_v11  ;;  %7786 = vmatpush1.bf16.msra.mxu1 %v13652_v41  ;;  %v13667_v11 = vld [vmem:[#allocation13 + $0x260] ss:$16 sps:$4 sm:$0xff]   ;;  %v13694_v41 = vld [vmem:[#allocation13 + $0x2e8] ss:$16 sps:$4 sm:$0xff]  }
 0x699   : > { %7561 = vmatprep.subr.bf16.mxu0 %v13657_v48  ;;  %7787 = vmatprep.subr.bf16.mxu1 %v13660_v24  ;;  %v13699_v48 = vld [vmem:[#allocation13 + $0x304] ss:$16 sps:$4 sm:$0xff]   ;;  %v13702_v24 = vld [vmem:[#allocation13 + $0x30c] ss:$16 sps:$4 sm:$0xff]  }
 0x69b   : > { %7562 = vmatpush1.bf16.msra.mxu0 %v13655_v59  ;;  %v13697_v59 = vld [vmem:[#allocation13 + $0x300] ss:$16 sps:$4 sm:$0xff]  }
 0x69c   : > { %7788 = vmatpush1.bf16.msra.mxu1 %v13658_v62  ;;  %7563 = vmatprep.subr.bf16.mxu0 %v13663_v63  ;;  %v13700_v62 = vld [vmem:[#allocation13 + $0x308] ss:$16 sps:$4 sm:$0xff]   ;;  %v13705_v63 = vld [vmem:[#allocation13 + $0x324] ss:$16 sps:$4 sm:$0xff]  }
 0x69d   : > { %7789 = vmatprep.subr.bf16.mxu1 %v13666_v8  ;;  %v13708_v8 = vld [vmem:[#allocation13 + $0x32c] ss:$16 sps:$4 sm:$0xff]  }
 0x69e   : > { %7489 = vmatmul.mubr.bf16.gmra.mrb[36].mxu0 %v15416_v10  ;;  %7715 = vmatmul.mubr.bf16.gmra.mrb[68].mxu1 %v15416_v10  ;;  %v13684_v10 = vld [vmem:[#allocation13 + $0x2ac] ss:$16 sps:$4 sm:$0xff]  }
 0x69f   : > { %7498 = vmatprep.mubr.bf16.mxu0 %v15430_v36  ;;  %7564 = vmatpush1.bf16.msra.mxu0 %v13661_v46  ;;  %v13703_v46 = vld [vmem:[#allocation13 + $0x320] ss:$16 sps:$4 sm:$0xff]  }
 0x6a0   : > { %7724 = vmatprep.mubr.bf16.mxu1 %v15430_v36  ;;  %7790 = vmatpush1.bf16.msra.mxu1 %v13664_v0  ;;  %v13706_v0 = vld [vmem:[#allocation13 + $0x328] ss:$16 sps:$4 sm:$0xff]  }
 0x6a1   : > { %7565 = vmatprep.subr.bf16.mxu0 %v13669_v1  ;;  %7791 = vmatprep.subr.bf16.mxu1 %v13672_v45  ;;  %v13711_v1 = vld [vmem:[#allocation13 + $0x344] ss:$16 sps:$4 sm:$0xff]   ;;  %v13714_v45 = vld [vmem:[#allocation13 + $0x34c] ss:$16 sps:$4 sm:$0xff]  }
 0x6a3   : > { %7566 = vmatpush1.bf16.msra.mxu0 %v13667_v11  ;;  %v13709_v11 = vld [vmem:[#allocation13 + $0x340] ss:$16 sps:$4 sm:$0xff]  }
 0x6a4   : > { %7792 = vmatpush1.bf16.msra.mxu1 %v13670_v5  ;;  %7567 = vmatprep.subr.bf16.mxu0 %v13675_v12  ;;  %v13712_v5 = vld [vmem:[#allocation13 + $0x348] ss:$16 sps:$4 sm:$0xff]   ;;  %v13717_v12 = vld [vmem:[#allocation13 + $0x364] ss:$16 sps:$4 sm:$0xff]  }
 0x6a5   : > { %7793 = vmatprep.subr.bf16.mxu1 %v13678_v17  ;;  %v13720_v17 = vld [vmem:[#allocation13 + $0x36c] ss:$16 sps:$4 sm:$0xff]  }
 0x6a6   : > { %7499 = vmatmul.mubr.bf16.gmra.mrb[40].mxu0 %v15428_v21  ;;  %7725 = vmatmul.mubr.bf16.gmra.mrb[72].mxu1 %v15428_v21 }
 0x6a7   : > { %7508 = vmatprep.mubr.bf16.mxu0 %v15442_v34  ;;  %7568 = vmatpush1.bf16.msra.mxu0 %v13673_v18  ;;  %v13715_v18 = vld [vmem:[#allocation13 + $0x360] ss:$16 sps:$4 sm:$0xff]  }
 0x6a8   : > { %7734 = vmatprep.mubr.bf16.mxu1 %v15442_v34  ;;  %7794 = vmatpush1.bf16.msra.mxu1 %v13676_v27  ;;  %v13718_v27 = vld [vmem:[#allocation13 + $0x368] ss:$16 sps:$4 sm:$0xff]  }
 0x6a9   : > { %7569 = vmatprep.subr.bf16.mxu0 %v13681_v28  ;;  %7795 = vmatprep.subr.bf16.mxu1 %v13684_v10  ;;  %v13723_v28 = vld [vmem:[#allocation13 + $0x384] ss:$16 sps:$4 sm:$0xff]   ;;  %v13726_v10 = vld [vmem:[#allocation13 + $0x38c] ss:$16 sps:$4 sm:$0xff]  }
 0x6ab   : > { %7570 = vmatpush1.bf16.msra.mxu0 %v13679_v30  ;;  %v13721_v30 = vld [vmem:[#allocation13 + $0x380] ss:$16 sps:$4 sm:$0xff]  }
 0x6ac   : > { %7796 = vmatpush1.bf16.msra.mxu1 %v13682_v61  ;;  %7571 = vmatprep.subr.bf16.mxu0 %v13687_v35  ;;  %v13724_v61 = vld [vmem:[#allocation13 + $0x388] ss:$16 sps:$4 sm:$0xff]   ;;  %v13729_v35 = vld [vmem:[#allocation13 + $0x3a4] ss:$16 sps:$4 sm:$0xff]  }
 0x6ad   : > { %7797 = vmatprep.subr.bf16.mxu1 %v13690_v56  ;;  %v13732_v56 = vld [vmem:[#allocation13 + $0x3ac] ss:$16 sps:$4 sm:$0xff]  }
 0x6ae   : > { %7509 = vmatmul.mubr.bf16.gmra.mrb[44].mxu0 %v15440_v6  ;;  %7735 = vmatmul.mubr.bf16.gmra.mrb[76].mxu1 %v15440_v6 }
 0x6af   : > { %7518 = vmatprep.mubr.bf16.mxu0 %v15454_v26  ;;  %7572 = vmatpush1.bf16.msra.mxu0 %v13685_v33  ;;  %v13727_v33 = vld [vmem:[#allocation13 + $0x3a0] ss:$16 sps:$4 sm:$0xff]  }
 0x6b0   : > { %7744 = vmatprep.mubr.bf16.mxu1 %v15454_v26  ;;  %7798 = vmatpush1.bf16.msra.mxu1 %v13688_v55  ;;  %v13730_v55 = vld [vmem:[#allocation13 + $0x3a8] ss:$16 sps:$4 sm:$0xff]  }
 0x6b1   : > { %7573 = vmatprep.subr.bf16.mxu0 %v13693_v54  ;;  %7799 = vmatprep.subr.bf16.mxu1 %v13696_v43  ;;  %v13735_v54 = vld [vmem:[#allocation13 + $0x3c4] ss:$16 sps:$4 sm:$0xff]   ;;  %v13738_v43 = vld [vmem:[#allocation13 + $0x3cc] ss:$16 sps:$4 sm:$0xff]  }
 0x6b3   : > { %7574 = vmatpush1.bf16.msra.mxu0 %v13691_v44  ;;  %v13733_v44 = vld [vmem:[#allocation13 + $0x3c0] ss:$16 sps:$4 sm:$0xff]  }
 0x6b4   : > { %7800 = vmatpush1.bf16.msra.mxu1 %v13694_v41  ;;  %7575 = vmatprep.subr.bf16.mxu0 %v13699_v48  ;;  %v13736_v41 = vld [vmem:[#allocation13 + $0x3c8] ss:$16 sps:$4 sm:$0xff]   ;;  %v13741_v48 = vld [vmem:[#allocation13 + $0x3e4] ss:$16 sps:$4 sm:$0xff]  }
 0x6b5   : > { %7801 = vmatprep.subr.bf16.mxu1 %v13702_v24  ;;  %v13744_v24 = vld [vmem:[#allocation13 + $0x3ec] ss:$16 sps:$4 sm:$0xff]  }
 0x6b6   : > { %7519 = vmatmul.mubr.bf16.gmra.mrb[48].mxu0 %v15452_v23  ;;  %7745 = vmatmul.mubr.bf16.gmra.mrb[80].mxu1 %v15452_v23 }
 0x6b7   : > { %7528 = vmatprep.mubr.bf16.mxu0 %v15466_v50  ;;  %7576 = vmatpush1.bf16.msra.mxu0 %v13697_v59  ;;  %v13739_v59 = vld [vmem:[#allocation13 + $0x3e0] ss:$16 sps:$4 sm:$0xff]  }
 0x6b8   : > { %7754 = vmatprep.mubr.bf16.mxu1 %v15466_v50  ;;  %7802 = vmatpush1.bf16.msra.mxu1 %v13700_v62  ;;  %v13742_v62 = vld [vmem:[#allocation13 + $0x3e8] ss:$16 sps:$4 sm:$0xff]  }
 0x6b9   : > { %7577 = vmatprep.subr.bf16.mxu0 %v13705_v63  ;;  %7803 = vmatprep.subr.bf16.mxu1 %v13708_v8  ;;  %v13747_v63 = vld [vmem:[#allocation13 + $0x804] ss:$16 sps:$4 sm:$0xff]   ;;  %v13750_v8 = vld [vmem:[#allocation13 + $0x80c] ss:$16 sps:$4 sm:$0xff]  }
 0x6bb   : > { %7578 = vmatpush1.bf16.msra.mxu0 %v13703_v46  ;;  %v13745_v46 = vld [vmem:[#allocation13 + $0x800] ss:$16 sps:$4 sm:$0xff]  }
 0x6bc   : > { %7804 = vmatpush1.bf16.msra.mxu1 %v13706_v0  ;;  %7579 = vmatprep.subr.bf16.mxu0 %v13711_v1  ;;  %v13748_v0 = vld [vmem:[#allocation13 + $0x808] ss:$16 sps:$4 sm:$0xff]   ;;  %v13753_v1 = vld [vmem:[#allocation13 + $0x824] ss:$16 sps:$4 sm:$0xff]  }
 0x6bd   : > { %7805 = vmatprep.subr.bf16.mxu1 %v13714_v45  ;;  %v13756_v45 = vld [vmem:[#allocation13 + $0x82c] ss:$16 sps:$4 sm:$0xff]  }
 0x6be   : > { %7529 = vmatmul.mubr.bf16.gmra.mrb[52].mxu0 %v15464_v49  ;;  %7755 = vmatmul.mubr.bf16.gmra.mrb[84].mxu1 %v15464_v49 }
 0x6bf   : > { %7538 = vmatprep.mubr.bf16.mxu0 %v15478_v15  ;;  %7580 = vmatpush1.bf16.msra.mxu0 %v13709_v11  ;;  %v13751_v11 = vld [vmem:[#allocation13 + $0x820] ss:$16 sps:$4 sm:$0xff]  }
 0x6c0   : > { %7764 = vmatprep.mubr.bf16.mxu1 %v15478_v15  ;;  %7806 = vmatpush1.bf16.msra.mxu1 %v13712_v5  ;;  %v13754_v5 = vld [vmem:[#allocation13 + $0x828] ss:$16 sps:$4 sm:$0xff]  }
 0x6c1   : > { %7581 = vmatprep.subr.bf16.mxu0 %v13717_v12  ;;  %7807 = vmatprep.subr.bf16.mxu1 %v13720_v17  ;;  %v13759_v12 = vld [vmem:[#allocation13 + $0x844] ss:$16 sps:$4 sm:$0xff]   ;;  %v13762_v17 = vld [vmem:[#allocation13 + $0x84c] ss:$16 sps:$4 sm:$0xff]  }
 0x6c3   : > { %7582 = vmatpush1.bf16.msra.mxu0 %v13715_v18  ;;  %v13757_v18 = vld [vmem:[#allocation13 + $0x840] ss:$16 sps:$4 sm:$0xff]  }
 0x6c4   : > { %7808 = vmatpush1.bf16.msra.mxu1 %v13718_v27  ;;  %7583 = vmatprep.subr.bf16.mxu0 %v13723_v28  ;;  %v13760_v27 = vld [vmem:[#allocation13 + $0x848] ss:$16 sps:$4 sm:$0xff]   ;;  %v13765_v28 = vld [vmem:[#allocation13 + $0x864] ss:$16 sps:$4 sm:$0xff]  }
 0x6c5   : > { %7809 = vmatprep.subr.bf16.mxu1 %v13726_v10  ;;  %v13768_v10 = vld [vmem:[#allocation13 + $0x86c] ss:$16 sps:$4 sm:$0xff]  }
 0x6c6   : > { %7539 = vmatmul.mubr.bf16.gmra.mrb[56].mxu0 %v15476_v14  ;;  %7765 = vmatmul.mubr.bf16.gmra.mrb[88].mxu1 %v15476_v14 }
 0x6c7   : > { %7548 = vmatprep.mubr.bf16.mxu0 %v15490_v53  ;;  %7584 = vmatpush1.bf16.msra.mxu0 %v13721_v30  ;;  %v13766_v30 = vld [vmem:[#allocation13 + $0x868] ss:$16 sps:$4 sm:$0xff]  }
 0x6c8   : > { %7774 = vmatprep.mubr.bf16.mxu1 %v15490_v53  ;;  %7810 = vmatpush1.bf16.msra.mxu1 %v13724_v61  ;;  %v13771_v61 = vld [vmem:[#allocation13 + $0x884] ss:$16 sps:$4 sm:$0xff]  }
 0x6c9   : > { %7585 = vmatprep.subr.bf16.mxu0 %v13729_v35  ;;  %7811 = vmatprep.subr.bf16.mxu1 %v13732_v56  ;;  %v13774_v35 = vld [vmem:[#allocation13 + $0x88c] ss:$16 sps:$4 sm:$0xff]   ;;  %v13769_v56 = vld [vmem:[#allocation13 + $0x880] ss:$16 sps:$4 sm:$0xff]  }
 0x6cb   : > { %7586 = vmatpush1.bf16.msra.mxu0 %v13727_v33  ;;  %v13772_v33 = vld [vmem:[#allocation13 + $0x888] ss:$16 sps:$4 sm:$0xff]  }
 0x6cc   : > { %7812 = vmatpush1.bf16.msra.mxu1 %v13730_v55  ;;  %7587 = vmatprep.subr.bf16.mxu0 %v13735_v54  ;;  %v13777_v55 = vld [vmem:[#allocation13 + $0x8a4] ss:$16 sps:$4 sm:$0xff]   ;;  %v13775_v54 = vld [vmem:[#allocation13 + $0x8a0] ss:$16 sps:$4 sm:$0xff]  }
 0x6cd   : > { %7813 = vmatprep.subr.bf16.mxu1 %v13738_v43  ;;  %v13778_v43 = vld [vmem:[#allocation13 + $0x8a8] ss:$16 sps:$4 sm:$0xff]  }
 0x6ce   : > { %7549 = vmatmul.mubr.bf16.gmra.mrb[60].mxu0 %v15488_v42  ;;  %7775 = vmatmul.mubr.bf16.gmra.mrb[92].mxu1 %v15488_v42 }
 0x6cf   : > { %7588 = vmatpush1.bf16.msra.mxu0 %v13733_v44  ;;  %7591 = vmatprep.mubr.bf16.mxu0 %v14488_v2  ;;  %v13783_v44 = vld [vmem:[#allocation13 + $0x8c4] ss:$16 sps:$4 sm:$0xff]  }
 0x6d0   : > { %7814 = vmatpush1.bf16.msra.mxu1 %v13736_v41  ;;  %7589 = vmatprep.subr.bf16.mxu0 %v13741_v48  ;;  %v13786_v41 = vld [vmem:[#allocation13 + $0x8cc] ss:$16 sps:$4 sm:$0xff]   ;;  %v13781_v48 = vld [vmem:[#allocation13 + $0x8c0] ss:$16 sps:$4 sm:$0xff]  }
 0x6d1   : > { %7815 = vmatprep.subr.bf16.mxu1 %v13744_v24  ;;  %7817 = vmatprep.mubr.bf16.mxu1 %v14488_v2  ;;  %v13784_v24 = vld [vmem:[#allocation13 + $0x8c8] ss:$16 sps:$4 sm:$0xff]  }
 0x6d3   : > { %7590 = vmatpush1.bf16.msra.mxu0 %v13739_v59  ;;  %v13789_v59 = vld [vmem:[#allocation13 + $0x8e4] ss:$16 sps:$4 sm:$0xff]  }
 0x6d4   : > { %7816 = vmatpush1.bf16.msra.mxu1 %v13742_v62  ;;  %8699 = vmatprep.subr.bf16.mxu0 %v13747_v63  ;;  %v13792_v62 = vld [vmem:[#allocation13 + $0x8ec] ss:$16 sps:$4 sm:$0xff]   ;;  %v13787_v63 = vld [vmem:[#allocation13 + $0x8e0] ss:$16 sps:$4 sm:$0xff]  }
 0x6d5   : > { %8925 = vmatprep.subr.bf16.mxu1 %v13750_v8  ;;  %v13790_v8 = vld [vmem:[#allocation13 + $0x8e8] ss:$16 sps:$4 sm:$0xff]  }
 0x6d6   : > { %7592 = vmatmul.mubr.bf16.vlgmr.msra.gmra.mrb[32].mxu0 %v14488_v2 }
 0x6d7   : > { %7818 = vmatmul.mubr.bf16.vlgmr.msra.gmra.mrb[64].mxu1 %v14488_v2  ;;  %7601 = vmatprep.mubr.bf16.mxu0 %v15526_v47 }
 0x6d8   : > { %7827 = vmatprep.mubr.bf16.mxu1 %v15526_v47  ;;  %8700 = vmatpush1.bf16.msra.mxu0 %v13745_v46  ;;  %v13763_v47 = vld [vmem:[#allocation13 + $0x860] ss:$16 sps:$4 sm:$0xff]   ;;  %v13795_v46 = vld [vmem:[#allocation13 + $0x904] ss:$16 sps:$4 sm:$0xff]  }
 0x6d9   : > { %8926 = vmatpush1.bf16.msra.mxu1 %v13748_v0  ;;  %8701 = vmatprep.subr.bf16.mxu0 %v13753_v1  ;;  %v13798_v0 = vld [vmem:[#allocation13 + $0x90c] ss:$16 sps:$4 sm:$0xff]   ;;  %v13793_v1 = vld [vmem:[#allocation13 + $0x900] ss:$16 sps:$4 sm:$0xff]  }
 0x6da   : > { %8927 = vmatprep.subr.bf16.mxu1 %v13756_v45  ;;  %v13796_v45 = vld [vmem:[#allocation13 + $0x908] ss:$16 sps:$4 sm:$0xff]  }
 0x6dc   : > { %8702 = vmatpush1.bf16.msra.mxu0 %v13751_v11  ;;  %v13801_v11 = vld [vmem:[#allocation13 + $0x924] ss:$16 sps:$4 sm:$0xff]  }
 0x6dd   : > { %8928 = vmatpush1.bf16.msra.mxu1 %v13754_v5  ;;  %8703 = vmatprep.subr.bf16.mxu0 %v13759_v12  ;;  %v13804_v5 = vld [vmem:[#allocation13 + $0x92c] ss:$16 sps:$4 sm:$0xff]   ;;  %v13799_v12 = vld [vmem:[#allocation13 + $0x920] ss:$16 sps:$4 sm:$0xff]  }
 0x6de   : > { %7602 = vmatmul.mubr.bf16.gmra.mrb[36].mxu0 %v15524_v25  ;;  %8929 = vmatprep.subr.bf16.mxu1 %v13762_v17  ;;  %v13802_v17 = vld [vmem:[#allocation13 + $0x928] ss:$16 sps:$4 sm:$0xff]  }
 0x6df   : > { %7828 = vmatmul.mubr.bf16.gmra.mrb[68].mxu1 %v15524_v25  ;;  %7611 = vmatprep.mubr.bf16.mxu0 %v15538_v22  ;;  %v13780_v25 = vld [vmem:[#allocation13 + $0x8ac] ss:$16 sps:$4 sm:$0xff]  }
 0x6e0   : > { %7837 = vmatprep.mubr.bf16.mxu1 %v15538_v22  ;;  %8704 = vmatpush1.bf16.msra.mxu0 %v13757_v18  ;;  %v13807_v18 = vld [vmem:[#allocation13 + $0x944] ss:$16 sps:$4 sm:$0xff]  }
 0x6e1   : > { %8930 = vmatpush1.bf16.msra.mxu1 %v13760_v27  ;;  %8705 = vmatprep.subr.bf16.mxu0 %v13765_v28  ;;  %v13810_v27 = vld [vmem:[#allocation13 + $0x94c] ss:$16 sps:$4 sm:$0xff]   ;;  %v13805_v28 = vld [vmem:[#allocation13 + $0x940] ss:$16 sps:$4 sm:$0xff]  }
 0x6e2   : > { %8931 = vmatprep.subr.bf16.mxu1 %v13768_v10  ;;  %v13808_v10 = vld [vmem:[#allocation13 + $0x948] ss:$16 sps:$4 sm:$0xff]  }
 0x6e4   : > { %8706 = vmatpush1.bf16.msra.mxu0 %v13763_v47  ;;  %v13813_v47 = vld [vmem:[#allocation13 + $0x964] ss:$16 sps:$4 sm:$0xff]  }
 0x6e5   : > { %8932 = vmatpush1.bf16.msra.mxu1 %v13766_v30  ;;  %8707 = vmatprep.subr.bf16.mxu0 %v13771_v61  ;;  %v13816_v30 = vld [vmem:[#allocation13 + $0x96c] ss:$16 sps:$4 sm:$0xff]   ;;  %v13811_v61 = vld [vmem:[#allocation13 + $0x960] ss:$16 sps:$4 sm:$0xff]  }
 0x6e6   : > { %7612 = vmatmul.mubr.bf16.gmra.mrb[40].mxu0 %v15536_v19  ;;  %8933 = vmatprep.subr.bf16.mxu1 %v13774_v35  ;;  %v13814_v35 = vld [vmem:[#allocation13 + $0x968] ss:$16 sps:$4 sm:$0xff]  }
 0x6e7   : > { %7838 = vmatmul.mubr.bf16.gmra.mrb[72].mxu1 %v15536_v19  ;;  %7621 = vmatprep.mubr.bf16.mxu0 %v15550_v58 }
 0x6e8   : > { %7847 = vmatprep.mubr.bf16.mxu1 %v15550_v58  ;;  %8708 = vmatpush1.bf16.msra.mxu0 %v13769_v56  ;;  %v13819_v56 = vld [vmem:[#allocation13 + $0x984] ss:$16 sps:$4 sm:$0xff]  }
 0x6e9   : > { %8934 = vmatpush1.bf16.msra.mxu1 %v13772_v33  ;;  %8709 = vmatprep.subr.bf16.mxu0 %v13777_v55  ;;  %v13822_v33 = vld [vmem:[#allocation13 + $0x98c] ss:$16 sps:$4 sm:$0xff]   ;;  %v13817_v55 = vld [vmem:[#allocation13 + $0x980] ss:$16 sps:$4 sm:$0xff]  }
 0x6ea   : > { %8935 = vmatprep.subr.bf16.mxu1 %v13780_v25  ;;  %v13820_v25 = vld [vmem:[#allocation13 + $0x988] ss:$16 sps:$4 sm:$0xff]  }
 0x6ec   : > { %8710 = vmatpush1.bf16.msra.mxu0 %v13775_v54  ;;  %v13825_v54 = vld [vmem:[#allocation13 + $0x9a4] ss:$16 sps:$4 sm:$0xff]  }
 0x6ed   : > { %8936 = vmatpush1.bf16.msra.mxu1 %v13778_v43  ;;  %8711 = vmatprep.subr.bf16.mxu0 %v13783_v44  ;;  %v13828_v43 = vld [vmem:[#allocation13 + $0x9ac] ss:$16 sps:$4 sm:$0xff]   ;;  %v13823_v44 = vld [vmem:[#allocation13 + $0x9a0] ss:$16 sps:$4 sm:$0xff]  }
 0x6ee   : > { %7622 = vmatmul.mubr.bf16.gmra.mrb[44].mxu0 %v15548_v57  ;;  %8937 = vmatprep.subr.bf16.mxu1 %v13786_v41  ;;  %v13826_v41 = vld [vmem:[#allocation13 + $0x9a8] ss:$16 sps:$4 sm:$0xff]  }
 0x6ef   : > { %7848 = vmatmul.mubr.bf16.gmra.mrb[76].mxu1 %v15548_v57  ;;  %7631 = vmatprep.mubr.bf16.mxu0 %v15562_v32 }
 0x6f0   : > { %7857 = vmatprep.mubr.bf16.mxu1 %v15562_v32  ;;  %8712 = vmatpush1.bf16.msra.mxu0 %v13781_v48  ;;  %v13831_v48 = vld [vmem:[#allocation13 + $0x9c4] ss:$16 sps:$4 sm:$0xff]  }
 0x6f1   : > { %8938 = vmatpush1.bf16.msra.mxu1 %v13784_v24  ;;  %8713 = vmatprep.subr.bf16.mxu0 %v13789_v59  ;;  %v13834_v24 = vld [vmem:[#allocation13 + $0x9cc] ss:$16 sps:$4 sm:$0xff]   ;;  %v13829_v59 = vld [vmem:[#allocation13 + $0x9c0] ss:$16 sps:$4 sm:$0xff]  }
 0x6f2   : > { %8939 = vmatprep.subr.bf16.mxu1 %v13792_v62  ;;  %v13832_v62 = vld [vmem:[#allocation13 + $0x9c8] ss:$16 sps:$4 sm:$0xff]  }
 0x6f4   : > { %8714 = vmatpush1.bf16.msra.mxu0 %v13787_v63  ;;  %v13837_v63 = vld [vmem:[#allocation13 + $0x9e4] ss:$16 sps:$4 sm:$0xff]  }
 0x6f5   : > { %8940 = vmatpush1.bf16.msra.mxu1 %v13790_v8  ;;  %8715 = vmatprep.subr.bf16.mxu0 %v13795_v46  ;;  %v13840_v8 = vld [vmem:[#allocation13 + $0x9ec] ss:$16 sps:$4 sm:$0xff]   ;;  %v13835_v46 = vld [vmem:[#allocation13 + $0x9e0] ss:$16 sps:$4 sm:$0xff]  }
 0x6f6   : > { %7632 = vmatmul.mubr.bf16.gmra.mrb[48].mxu0 %v15560_v31  ;;  %8941 = vmatprep.subr.bf16.mxu1 %v13798_v0  ;;  %v13838_v0 = vld [vmem:[#allocation13 + $0x9e8] ss:$16 sps:$4 sm:$0xff]  }
 0x6f7   : > { %7858 = vmatmul.mubr.bf16.gmra.mrb[80].mxu1 %v15560_v31  ;;  %7641 = vmatprep.mubr.bf16.mxu0 %v15574_v4 }
 0x6f8   : > { %7867 = vmatprep.mubr.bf16.mxu1 %v15574_v4  ;;  %8716 = vmatpush1.bf16.msra.mxu0 %v13793_v1  ;;  %v13843_v1 = vld [vmem:[#allocation13 + $0xa04] ss:$16 sps:$4 sm:$0xff]  }
 0x6f9   : > { %8942 = vmatpush1.bf16.msra.mxu1 %v13796_v45  ;;  %8717 = vmatprep.subr.bf16.mxu0 %v13801_v11  ;;  %v15682_v45 = vld [vmem:[#allocation13 + $0xa0c] ss:$16 sps:$4 sm:$0xff]   ;;  %v13841_v11 = vld [vmem:[#allocation13 + $0xa00] ss:$16 sps:$4 sm:$0xff]  }
 0x6fa   : > { %8943 = vmatprep.subr.bf16.mxu1 %v13804_v5  ;;  %v15684_v5 = vld [vmem:[#allocation13 + $0xa08] ss:$16 sps:$4 sm:$0xff]  }
 0x6fc   : > { %8718 = vmatpush1.bf16.msra.mxu0 %v13799_v12  ;;  %v13849_v12 = vld [vmem:[#allocation13 + $0xa24] ss:$16 sps:$4 sm:$0xff]  }
 0x6fd   : > { %8944 = vmatpush1.bf16.msra.mxu1 %v13802_v17  ;;  %8719 = vmatprep.subr.bf16.mxu0 %v13807_v18  ;;  %v13847_v17 = vld [vmem:[#allocation13 + $0xa20] ss:$16 sps:$4 sm:$0xff]   ;;  %v15694_v18 = vld [vmem:[#allocation13 + $0xa28] ss:$16 sps:$4 sm:$0xff]  }
 0x6fe   : > { %7642 = vmatmul.mubr.bf16.gmra.mrb[52].mxu0 %v15572_v60  ;;  %8945 = vmatprep.subr.bf16.mxu1 %v13810_v27  ;;  %v13855_v27 = vld [vmem:[#allocation13 + $0xa44] ss:$16 sps:$4 sm:$0xff]  }
 0x6ff   : > { %7868 = vmatmul.mubr.bf16.gmra.mrb[84].mxu1 %v15572_v60  ;;  %7651 = vmatprep.mubr.bf16.mxu0 %v15586_v52 }
 0x700   : > { %7877 = vmatprep.mubr.bf16.mxu1 %v15586_v52  ;;  %8720 = vmatpush1.bf16.msra.mxu0 %v13805_v28  ;;  %v15697_v28 = vld [vmem:[#allocation13 + $0xa4c] ss:$16 sps:$4 sm:$0xff]  }
 0x701   : > { %8946 = vmatpush1.bf16.msra.mxu1 %v13808_v10  ;;  %8721 = vmatprep.subr.bf16.mxu0 %v13813_v47  ;;  %v13853_v10 = vld [vmem:[#allocation13 + $0xa40] ss:$16 sps:$4 sm:$0xff]   ;;  %v13861_v47 = vld [vmem:[#allocation13 + $0xa64] ss:$16 sps:$4 sm:$0xff]  }
 0x702   : > { %8947 = vmatprep.subr.bf16.mxu1 %v13816_v30  ;;  %v13859_v30 = vld [vmem:[#allocation13 + $0xa60] ss:$16 sps:$4 sm:$0xff]  }
 0x704   : > { %8722 = vmatpush1.bf16.msra.mxu0 %v13811_v61  ;;  %v15710_v61 = vld [vmem:[#allocation13 + $0xa68] ss:$16 sps:$4 sm:$0xff]  }
 0x705   : > { %8948 = vmatpush1.bf16.msra.mxu1 %v13814_v35  ;;  %8723 = vmatprep.subr.bf16.mxu0 %v13819_v56  ;;  %v13867_v35 = vld [vmem:[#allocation13 + $0xa84] ss:$16 sps:$4 sm:$0xff]   ;;  %v15713_v56 = vld [vmem:[#allocation13 + $0xa8c] ss:$16 sps:$4 sm:$0xff]  }
 0x706   : > { %7652 = vmatmul.mubr.bf16.gmra.mrb[56].mxu0 %v15584_v51  ;;  %8949 = vmatprep.subr.bf16.mxu1 %v13822_v33  ;;  %v13865_v33 = vld [vmem:[#allocation13 + $0xa80] ss:$16 sps:$4 sm:$0xff]  }
 0x707   : > { %7878 = vmatmul.mubr.bf16.gmra.mrb[88].mxu1 %v15584_v51  ;;  %7661 = vmatprep.mubr.bf16.mxu0 %v15598_v20 }
 0x708   : > { %7887 = vmatprep.mubr.bf16.mxu1 %v15598_v20  ;;  %8724 = vmatpush1.bf16.msra.mxu0 %v13817_v55  ;;  %v13873_v55 = vld [vmem:[#allocation13 + $0xaa4] ss:$16 sps:$4 sm:$0xff]  }
 0x709   : > { %8950 = vmatpush1.bf16.msra.mxu1 %v13820_v25  ;;  %8725 = vmatprep.subr.bf16.mxu0 %v13825_v54  ;;  %v13871_v25 = vld [vmem:[#allocation13 + $0xaa0] ss:$16 sps:$4 sm:$0xff]   ;;  %v15726_v54 = vld [vmem:[#allocation13 + $0xaa8] ss:$16 sps:$4 sm:$0xff]  }
 0x70a   : > { %8951 = vmatprep.subr.bf16.mxu1 %v13828_v43  ;;  %v13879_v43 = vld [vmem:[#allocation13 + $0xac4] ss:$16 sps:$4 sm:$0xff]  }
 0x70c   : > { %8726 = vmatpush1.bf16.msra.mxu0 %v13823_v44  ;;  %v15729_v44 = vld [vmem:[#allocation13 + $0xacc] ss:$16 sps:$4 sm:$0xff]  }
 0x70d   : > { %8952 = vmatpush1.bf16.msra.mxu1 %v13826_v41  ;;  %8727 = vmatprep.subr.bf16.mxu0 %v13831_v48  ;;  %v13877_v41 = vld [vmem:[#allocation13 + $0xac0] ss:$16 sps:$4 sm:$0xff]   ;;  %v13885_v48 = vld [vmem:[#allocation13 + $0xae4] ss:$16 sps:$4 sm:$0xff]  }
 0x70e   : > { %7662 = vmatmul.mubr.bf16.gmra.mrb[60].mxu0 %v15596_v39  ;;  %8953 = vmatprep.subr.bf16.mxu1 %v13834_v24  ;;  %v13883_v24 = vld [vmem:[#allocation13 + $0xae0] ss:$16 sps:$4 sm:$0xff]  }
 0x70f   : > { %7888 = vmatmul.mubr.bf16.gmra.mrb[92].mxu1 %v15596_v39  ;;  %8731 = vmatprep.mubr.bf16.mxu0 %v15430_v36 }
 0x710   : > { %8728 = vmatpush1.bf16.msra.mxu0 %v13829_v59  ;;  %8957 = vmatprep.mubr.bf16.mxu1 %v15430_v36  ;;  %v15688_v36 = vld [vmem:[#allocation13 + $0xa2c] ss:$16 sps:$4 sm:$0xff]   ;;  %v15742_v59 = vld [vmem:[#allocation13 + $0xae8] ss:$16 sps:$4 sm:$0xff]  }
 0x711   : > { %8954 = vmatpush1.bf16.msra.mxu1 %v13832_v62  ;;  %8729 = vmatprep.subr.bf16.mxu0 %v13837_v63  ;;  %v13891_v62 = vld [vmem:[#allocation13 + $0xb04] ss:$16 sps:$4 sm:$0xff]   ;;  %v15745_v63 = vld [vmem:[#allocation13 + $0xb0c] ss:$16 sps:$4 sm:$0xff]  }
 0x712   : > { %8955 = vmatprep.subr.bf16.mxu1 %v13840_v8  ;;  %v13889_v8 = vld [vmem:[#allocation13 + $0xb00] ss:$16 sps:$4 sm:$0xff]  }
 0x714   : > { %8730 = vmatpush1.bf16.msra.mxu0 %v13835_v46  ;;  %v13897_v46 = vld [vmem:[#allocation13 + $0xb24] ss:$16 sps:$4 sm:$0xff]  }
 0x715   : > { %8956 = vmatpush1.bf16.msra.mxu1 %v13838_v0  ;;  %8812 = vmatprep.subr.bf16.mxu0 %v13843_v1  ;;  %v13895_v0 = vld [vmem:[#allocation13 + $0xb20] ss:$16 sps:$4 sm:$0xff]   ;;  %v15758_v1 = vld [vmem:[#allocation13 + $0xb28] ss:$16 sps:$4 sm:$0xff]  }
 0x716   : > { %11963 = vmatprep.subr.bf16.mxu1 %v15682_v45 }
 0x717   : > { %8732 = vmatmul.mubr.bf16.vlgmr.msra.gmra.mrb[32].mxu0 %v15428_v21 }
 0x718   : > { %8958 = vmatmul.mubr.bf16.vlgmr.msra.gmra.mrb[64].mxu1 %v15428_v21  ;;  %8741 = vmatprep.mubr.bf16.mxu0 %v15442_v34  ;;  %v15700_v21 = vld [vmem:[#allocation13 + $0xa48] ss:$16 sps:$4 sm:$0xff]  }
 0x719   : > { %8813 = vmatpush1.bf16.msra.mxu0 %v13841_v11  ;;  %8967 = vmatprep.mubr.bf16.mxu1 %v15442_v34  ;;  %v15704_v34 = vld [vmem:[#allocation13 + $0xa6c] ss:$16 sps:$4 sm:$0xff]   ;;  %v13903_v11 = vld [vmem:[#allocation13 + $0xb44] ss:$16 sps:$4 sm:$0xff]  }
 0x71a   : > { %11979 = vmatpush1.bf16.msra.mxu1 %v15684_v5  ;;  %8814 = vmatprep.subr.bf16.mxu0 %v13849_v12  ;;  %v15761_v12 = vld [vmem:[#allocation13 + $0xb4c] ss:$16 sps:$4 sm:$0xff]  }
 0x71b   : > { %11964 = vmatprep.subr.bf16.mxu1 %v15688_v36 }
 0x71d   : > { %8815 = vmatpush1.bf16.msra.mxu0 %v13847_v17  ;;  %v13901_v17 = vld [vmem:[#allocation13 + $0xb40] ss:$16 sps:$4 sm:$0xff]  }
 0x71e   : > { %11980 = vmatpush1.bf16.msra.mxu1 %v15694_v18  ;;  %8816 = vmatprep.subr.bf16.mxu0 %v13855_v27  ;;  %v13909_v27 = vld [vmem:[#allocation13 + $0xb64] ss:$16 sps:$4 sm:$0xff]  }
 0x71f   : > { %8742 = vmatmul.mubr.bf16.gmra.mrb[36].mxu0 %v15440_v6  ;;  %11965 = vmatprep.subr.bf16.mxu1 %v15697_v28 }
 0x720   : > { %8968 = vmatmul.mubr.bf16.gmra.mrb[68].mxu1 %v15440_v6  ;;  %8751 = vmatprep.mubr.bf16.mxu0 %v15454_v26  ;;  %v15716_v6 = vld [vmem:[#allocation13 + $0xa88] ss:$16 sps:$4 sm:$0xff]  }
 0x721   : > { %8817 = vmatpush1.bf16.msra.mxu0 %v13853_v10  ;;  %8977 = vmatprep.mubr.bf16.mxu1 %v15454_v26  ;;  %v15720_v26 = vld [vmem:[#allocation13 + $0xaac] ss:$16 sps:$4 sm:$0xff]   ;;  %v13907_v10 = vld [vmem:[#allocation13 + $0xb60] ss:$16 sps:$4 sm:$0xff]  }
 0x722   : > { %11981 = vmatpush1.bf16.msra.mxu1 %v15700_v21  ;;  %8818 = vmatprep.subr.bf16.mxu0 %v13861_v47  ;;  %v15774_v47 = vld [vmem:[#allocation13 + $0xb68] ss:$16 sps:$4 sm:$0xff]  }
 0x723   : > { %11966 = vmatprep.subr.bf16.mxu1 %v15704_v34 }
 0x725   : > { %8819 = vmatpush1.bf16.msra.mxu0 %v13859_v30  ;;  %v13915_v30 = vld [vmem:[#allocation13 + $0xb84] ss:$16 sps:$4 sm:$0xff]  }
 0x726   : > { %11982 = vmatpush1.bf16.msra.mxu1 %v15710_v61  ;;  %8820 = vmatprep.subr.bf16.mxu0 %v13867_v35  ;;  %v15777_v35 = vld [vmem:[#allocation13 + $0xb8c] ss:$16 sps:$4 sm:$0xff]  }
 0x727   : > { %8752 = vmatmul.mubr.bf16.gmra.mrb[40].mxu0 %v15452_v23  ;;  %11967 = vmatprep.subr.bf16.mxu1 %v15713_v56 }
 0x728   : > { %8978 = vmatmul.mubr.bf16.gmra.mrb[72].mxu1 %v15452_v23  ;;  %8761 = vmatprep.mubr.bf16.mxu0 %v15466_v50  ;;  %v15732_v23 = vld [vmem:[#allocation13 + $0xac8] ss:$16 sps:$4 sm:$0xff]  }
 0x729   : > { %8821 = vmatpush1.bf16.msra.mxu0 %v13865_v33  ;;  %8987 = vmatprep.mubr.bf16.mxu1 %v15466_v50  ;;  %v15736_v50 = vld [vmem:[#allocation13 + $0xaec] ss:$16 sps:$4 sm:$0xff]   ;;  %v13913_v33 = vld [vmem:[#allocation13 + $0xb80] ss:$16 sps:$4 sm:$0xff]  }
 0x72a   : > { %11983 = vmatpush1.bf16.msra.mxu1 %v15716_v6  ;;  %8822 = vmatprep.subr.bf16.mxu0 %v13873_v55  ;;  %v13921_v55 = vld [vmem:[#allocation13 + $0xba4] ss:$16 sps:$4 sm:$0xff]  }
 0x72b   : > { %11968 = vmatprep.subr.bf16.mxu1 %v15720_v26 }
 0x72d   : > { %8823 = vmatpush1.bf16.msra.mxu0 %v13871_v25  ;;  %v13919_v25 = vld [vmem:[#allocation13 + $0xba0] ss:$16 sps:$4 sm:$0xff]  }
 0x72e   : > { %11984 = vmatpush1.bf16.msra.mxu1 %v15726_v54  ;;  %8824 = vmatprep.subr.bf16.mxu0 %v13879_v43  ;;  %v15790_v43 = vld [vmem:[#allocation13 + $0xba8] ss:$16 sps:$4 sm:$0xff]  }
 0x72f   : > { %8762 = vmatmul.mubr.bf16.gmra.mrb[44].mxu0 %v15464_v49  ;;  %11969 = vmatprep.subr.bf16.mxu1 %v15729_v44 }
 0x730   : > { %8988 = vmatmul.mubr.bf16.gmra.mrb[76].mxu1 %v15464_v49  ;;  %8771 = vmatprep.mubr.bf16.mxu0 %v15478_v15  ;;  %v15748_v49 = vld [vmem:[#allocation13 + $0xb08] ss:$16 sps:$4 sm:$0xff]  }
 0x731   : > { %8825 = vmatpush1.bf16.msra.mxu0 %v13877_v41  ;;  %8997 = vmatprep.mubr.bf16.mxu1 %v15478_v15  ;;  %v15752_v15 = vld [vmem:[#allocation13 + $0xb2c] ss:$16 sps:$4 sm:$0xff]   ;;  %v13927_v41 = vld [vmem:[#allocation13 + $0xbc4] ss:$16 sps:$4 sm:$0xff]  }
 0x732   : > { %11985 = vmatpush1.bf16.msra.mxu1 %v15732_v23  ;;  %8826 = vmatprep.subr.bf16.mxu0 %v13885_v48  ;;  %v15793_v48 = vld [vmem:[#allocation13 + $0xbcc] ss:$16 sps:$4 sm:$0xff]  }
 0x733   : > { %11970 = vmatprep.subr.bf16.mxu1 %v15736_v50 }
 0x735   : > { %8827 = vmatpush1.bf16.msra.mxu0 %v13883_v24  ;;  %v13925_v24 = vld [vmem:[#allocation13 + $0xbc0] ss:$16 sps:$4 sm:$0xff]  }
 0x736   : > { %11986 = vmatpush1.bf16.msra.mxu1 %v15742_v59  ;;  %8828 = vmatprep.subr.bf16.mxu0 %v13891_v62  ;;  %v13933_v62 = vld [vmem:[#allocation13 + $0xbe4] ss:$16 sps:$4 sm:$0xff]  }
 0x737   : > { %8772 = vmatmul.mubr.bf16.gmra.mrb[48].mxu0 %v15476_v14  ;;  %11971 = vmatprep.subr.bf16.mxu1 %v15745_v63 }
 0x738   : > { %8998 = vmatmul.mubr.bf16.gmra.mrb[80].mxu1 %v15476_v14  ;;  %8781 = vmatprep.mubr.bf16.mxu0 %v15490_v53  ;;  %v15764_v14 = vld [vmem:[#allocation13 + $0xb48] ss:$16 sps:$4 sm:$0xff]  }
 0x739   : > { %8829 = vmatpush1.bf16.msra.mxu0 %v13889_v8  ;;  %9007 = vmatprep.mubr.bf16.mxu1 %v15490_v53  ;;  %v15768_v53 = vld [vmem:[#allocation13 + $0xb6c] ss:$16 sps:$4 sm:$0xff]  }
 0x73a   : > { %11987 = vmatpush1.bf16.msra.mxu1 %v15748_v49  ;;  %8830 = vmatprep.subr.bf16.mxu0 %v13897_v46  ;;  %v15800_v8 = vld [vmem:[#allocation13 + $0xbec] ss:$16 sps:$4 sm:$0xff]   ;;  %v13931_v46 = vld [vmem:[#allocation13 + $0xbe0] ss:$16 sps:$4 sm:$0xff]  }
 0x73b   : > { %11972 = vmatprep.subr.bf16.mxu1 %v15752_v15 }
 0x73d   : > { %8831 = vmatpush1.bf16.msra.mxu0 %v13895_v0  ;;  %v13934_v0 = vld [vmem:[#allocation13 + $0xbe8] ss:$16 sps:$4 sm:$0xff]  }
 0x73e   : > { %11988 = vmatpush1.bf16.msra.mxu1 %v15758_v1  ;;  %8832 = vmatprep.subr.bf16.mxu0 %v13903_v11 }
 0x73f   : > { %8782 = vmatmul.mubr.bf16.gmra.mrb[52].mxu0 %v15488_v42  ;;  %11973 = vmatprep.subr.bf16.mxu1 %v15761_v12 }
 0x740   : > { %9008 = vmatmul.mubr.bf16.gmra.mrb[84].mxu1 %v15488_v42  ;;  %8791 = vmatprep.mubr.bf16.mxu0 %v15514_v16  ;;  %v15780_v42 = vld [vmem:[#allocation13 + $0xb88] ss:$16 sps:$4 sm:$0xff]  }
 0x741   : > { %8833 = vmatpush1.bf16.msra.mxu0 %v13901_v17  ;;  %9017 = vmatprep.mubr.bf16.mxu1 %v15514_v16  ;;  %v15784_v16 = vld [vmem:[#allocation13 + $0xbac] ss:$16 sps:$4 sm:$0xff]  }
 0x742   : > { %11989 = vmatpush1.bf16.msra.mxu1 %v15764_v14  ;;  %8834 = vmatprep.subr.bf16.mxu0 %v13909_v27 }
 0x743   : > { %11974 = vmatprep.subr.bf16.mxu1 %v15768_v53 }
 0x745   : > { %8835 = vmatpush1.bf16.msra.mxu0 %v13907_v10 }
 0x746   : > { %11990 = vmatpush1.bf16.msra.mxu1 %v15774_v47  ;;  %8836 = vmatprep.subr.bf16.mxu0 %v13915_v30 }
 0x747   : > { %8792 = vmatmul.mubr.bf16.gmra.mrb[56].mxu0 %v15512_v13  ;;  %11975 = vmatprep.subr.bf16.mxu1 %v15777_v35 }
 0x748   : > { %9018 = vmatmul.mubr.bf16.gmra.mrb[88].mxu1 %v15512_v13  ;;  %8801 = vmatprep.mubr.bf16.mxu0 %v14488_v2  ;;  %v15796_v13 = vld [vmem:[#allocation13 + $0xbc8] ss:$16 sps:$4 sm:$0xff]  }
 0x749   : > { %8837 = vmatpush1.bf16.msra.mxu0 %v13913_v33  ;;  %9027 = vmatprep.mubr.bf16.mxu1 %v14488_v2 }
 0x74a   : > { %11991 = vmatpush1.bf16.msra.mxu1 %v15780_v42  ;;  %8838 = vmatprep.subr.bf16.mxu0 %v13921_v55 }
 0x74b   : > { %11976 = vmatprep.subr.bf16.mxu1 %v15784_v16 }
 0x74d   : > { %8839 = vmatpush1.bf16.msra.mxu0 %v13919_v25 }
 0x74e   : > { %11992 = vmatpush1.bf16.msra.mxu1 %v15790_v43  ;;  %8840 = vmatprep.subr.bf16.mxu0 %v13927_v41 }
 0x74f   : > { %8802 = vmatmul.mubr.bf16.gmra.mrb[60].mxu0 %v14488_v2  ;;  %11977 = vmatprep.subr.bf16.mxu1 %v15793_v48 }
 0x750   : > { %9028 = vmatmul.mubr.bf16.gmra.mrb[92].mxu1 %v14488_v2  ;;  %8844 = vmatprep.mubr.bf16.mxu0 %v15538_v22 }
 0x751   : > { %8841 = vmatpush1.bf16.msra.mxu0 %v13925_v24  ;;  %9100 = vmatprep.mubr.bf16.mxu1 %v15574_v4 }
 0x752   : > { %11993 = vmatpush1.bf16.msra.mxu1 %v15796_v13  ;;  %8842 = vmatprep.subr.bf16.mxu0 %v13933_v62 }
 0x753   : > { %11978 = vmatprep.subr.bf16.mxu1 %v15800_v8 }
 0x755   : > { %8843 = vmatpush1.bf16.msra.mxu0 %v13931_v46 }
 0x756   : > { %11994 = vmatpush1.bf16.msra.mxu1 %v13934_v0  ;;  %9038 = vmatprep.subr.bf16.mxu0 %v15682_v45 }
 0x758   : > { %8845 = vmatmul.mubr.bf16.vlgmr.msra.gmra.mrb[32].mxu0 %v15536_v19 }
 0x759   : > { %9101 = vmatmul.mubr.bf16.vlgmr.msra.gmra.mrb[76].mxu1 %v15572_v60  ;;  %8854 = vmatprep.mubr.bf16.mxu0 %v15550_v58 }
 0x75a   : > { %9039 = vmatpush1.bf16.msra.mxu0 %v15684_v5  ;;  %9110 = vmatprep.mubr.bf16.mxu1 %v15586_v52 }
 0x75b   : > { %9040 = vmatprep.subr.bf16.mxu0 %v15688_v36 }
 0x75e   : > { %9041 = vmatpush1.bf16.msra.mxu0 %v15694_v18 }
 0x75f   : > { %9042 = vmatprep.subr.bf16.mxu0 %v15697_v28 }
 0x760   : > { %8855 = vmatmul.mubr.bf16.gmra.mrb[36].mxu0 %v15548_v57 }
 0x761   : > { %9111 = vmatmul.mubr.bf16.gmra.mrb[80].mxu1 %v15584_v51  ;;  %8864 = vmatprep.mubr.bf16.mxu0 %v15562_v32 }
 0x762   : > { %9043 = vmatpush1.bf16.msra.mxu0 %v15700_v21  ;;  %9120 = vmatprep.mubr.bf16.mxu1 %v15598_v20 }
 0x763   : > { %9044 = vmatprep.subr.bf16.mxu0 %v15704_v34 }
 0x766   : > { %9045 = vmatpush1.bf16.msra.mxu0 %v15710_v61 }
 0x767   : > { %9046 = vmatprep.subr.bf16.mxu0 %v15713_v56 }
 0x768   : > { %8865 = vmatmul.mubr.bf16.gmra.mrb[40].mxu0 %v15560_v31 }
 0x769   : > { %9121 = vmatmul.mubr.bf16.gmra.mrb[84].mxu1 %v15596_v39  ;;  %8874 = vmatprep.mubr.bf16.mxu0 %v15574_v4 }
 0x76a   : > { %9047 = vmatpush1.bf16.msra.mxu0 %v15716_v6  ;;  %9130 = vmatprep.mubr.bf16.mxu1 %v15610_v29 }
 0x76b   : > { %9048 = vmatprep.subr.bf16.mxu0 %v15720_v26 }
 0x76e   : > { %9049 = vmatpush1.bf16.msra.mxu0 %v15726_v54 }
 0x76f   : > { %9050 = vmatprep.subr.bf16.mxu0 %v15729_v44 }
 0x770   : > { %8875 = vmatmul.mubr.bf16.gmra.mrb[44].mxu0 %v15572_v60 }
 0x771   : > { %9131 = vmatmul.mubr.bf16.gmra.mrb[88].mxu1 %v15608_v3  ;;  %8884 = vmatprep.mubr.bf16.mxu0 %v15586_v52 }
 0x772   : > { %9051 = vmatpush1.bf16.msra.mxu0 %v15732_v23  ;;  %9140 = vmatprep.mubr.bf16.mxu1 %v14488_v2 }
 0x773   : > { %9052 = vmatprep.subr.bf16.mxu0 %v15736_v50 }
 0x776   : > { %9053 = vmatpush1.bf16.msra.mxu0 %v15742_v59 }
 0x777   : > { %9054 = vmatprep.subr.bf16.mxu0 %v15745_v63 }
 0x778   : > { %8885 = vmatmul.mubr.bf16.gmra.mrb[48].mxu0 %v15584_v51 }
 0x779   : > { %9141 = vmatmul.mubr.bf16.gmra.mrb[92].mxu1 %v14488_v2  ;;  %8894 = vmatprep.mubr.bf16.mxu0 %v15598_v20  ;;  %v14489_v20 = vmov 0.0  }
 0x77a   : > { %9055 = vmatpush1.bf16.msra.mxu0 %v15748_v49  ;;  %9429 = vst [vmem:[#allocation5] sm:$0xff] %v14489_v20  ;;  %9430 = vst [vmem:[#allocation5 + $0x8] sm:$0xff] %v14489_v20 }
 0x77b   : > { %9056 = vmatprep.subr.bf16.mxu0 %v15752_v15  ;;  %9431 = vst [vmem:[#allocation5 + $0x10] sm:$0xff] %v14489_v20  ;;  %9432 = vst [vmem:[#allocation5 + $0x18] sm:$0xff] %v14489_v20 }
 0x77c   : > { %9433 = vst [vmem:[#allocation5 + $0x20] sm:$0xff] %v14489_v20  ;;  %9434 = vst [vmem:[#allocation5 + $0x28] sm:$0xff] %v14489_v20 }
 0x77d   : > { %9435 = vst [vmem:[#allocation5 + $0x30] sm:$0xff] %v14489_v20  ;;  %9436 = vst [vmem:[#allocation5 + $0x38] sm:$0xff] %v14489_v20 }
 0x77e   : > { %9057 = vmatpush1.bf16.msra.mxu0 %v15758_v1 }
 0x77f   : > { %9058 = vmatprep.subr.bf16.mxu0 %v15761_v12 }
 0x780   : > { %8895 = vmatmul.mubr.bf16.gmra.mrb[52].mxu0 %v15596_v39 }
 0x781   : > { %8904 = vmatprep.mubr.bf16.mxu0 %v15610_v29 }
 0x782   : > { %9059 = vmatpush1.bf16.msra.mxu0 %v15764_v14 }
 0x783   : > { %9060 = vmatprep.subr.bf16.mxu0 %v15768_v53 }
 0x786   : > { %9061 = vmatpush1.bf16.msra.mxu0 %v15774_v47 }
 0x787   : > { %9062 = vmatprep.subr.bf16.mxu0 %v15777_v35 }
 0x788   : > { %8905 = vmatmul.mubr.bf16.gmra.mrb[56].mxu0 %v15608_v3  ;;  %v9215_v3 = vld [vmem:[#allocation14] sm:$0xf] }
 0x789   : > { %8914 = vmatprep.mubr.bf16.mxu0 %v14488_v2  ;;  %v15893_v29 = vrot.slane %v9215_v3, %v15203_v38  ;;  %v15897_v45 = vrot.slane %v9215_v3, %v5219_v7  ;;  %v15900_v5 = vrot.slane %v9215_v3, %v15206_v40  ;;  %v15904_v36 = vrot.slane %v9215_v3, %v5223_v9 }
 0x78a   : > { %9063 = vmatpush1.bf16.msra.mxu0 %v15780_v42 }
 0x78b   : > { %9064 = vmatprep.subr.bf16.mxu0 %v15784_v16 }
 0x78e   : > { %9065 = vmatpush1.bf16.msra.mxu0 %v15790_v43 }
 0x78f   : > { %9066 = vmatprep.subr.bf16.mxu0 %v15793_v48 }
 0x790   : > { %8915 = vmatmul.mubr.bf16.gmra.mrb[60].mxu0 %v14488_v2 }
 0x791   : > { %9070 = vmatprep.mubr.bf16.mxu0 %v15538_v22 }
 0x792   : > { %9067 = vmatpush1.bf16.msra.mxu0 %v15796_v13 }
 0x793   : > { %9068 = vmatprep.subr.bf16.mxu0 %v15800_v8 }
 0x796   : > { %9069 = vmatpush1.bf16.msra.mxu0 %v13934_v0 }
 0x799   : > { %9071 = vmatmul.mubr.bf16.vlgmr.msra.gmra.mrb[64].mxu0 %v15536_v19 }
 0x79a   : > { %9080 = vmatprep.mubr.bf16.mxu0 %v15550_v58 }
 0x7a1   : > { %9081 = vmatmul.mubr.bf16.gmra.mrb[68].mxu0 %v15548_v57 }
 0x7a2   : > { %9090 = vmatprep.mubr.bf16.mxu0 %v15562_v32 }
 0x7a9   : > { %9091 = vmatmul.mubr.bf16.gmra.mrb[72].mxu0 %v15560_v31 }
 0x7eb   : > { %v15868_v60 = vpop.f32.mrb[64].mxu1 }
 0x7ec   : > { %v15870_v2 = vpop.f32.mrb[65].mxu1 }
 0x7ed   : > { %v15872_v22 = vpop.f32.mrb[66].mxu1 }
 0x7ee   : > { %v15874_v4 = vpop.f32.mrb[67].mxu1 }
 0x7f3   : > { %v15876_v51 = vpop.f32.mrb[68].mxu1 }
 0x7f4   : > { %v15878_v52 = vpop.f32.mrb[69].mxu1 }
 0x7f5   : > { %v15880_v19 = vpop.f32.mrb[70].mxu1 }
 0x7f6   : > { %v15882_v58 = vpop.f32.mrb[71].mxu1 }
 0x7fb   : > { %v15884_v57 = vpop.f32.mrb[72].mxu1 }
 0x7fc   : > { %v15886_v32 = vpop.f32.mrb[73].mxu1 }
 0x7fd   : > { %v15888_v31 = vpop.f32.mrb[74].mxu1 }
 0x7fe   : > { %v15890_v39 = vpop.f32.mrb[75].mxu1 }
 0x82b   : > { %v8846_v18 = vpop.f32.mrb[32].mxu0 }
 0x82c   : > { %v9237_v28 = vadd.f32 %v15893_v29, %v8846_v18  ;;  %v9102_v21 = vpop.f32.mrb[76].mxu1  ;;  %v8848_v34 = vpop.f32.mrb[33].mxu0 }
 0x82d   : > { %v9263_v61 = vadd.f32 %v15897_v45, %v9102_v21  ;;  %v9238_v38 = vadd.f32 %v15900_v5, %v8848_v34  ;;  %v9104_v56 = vpop.f32.mrb[77].mxu1  ;;  %v8850_v6 = vpop.f32.mrb[34].mxu0 }
 0x82e   : > { %v9264_v7 = vadd.f32 %v15904_v36, %v9104_v56  ;;  %v9241_v40 = vadd.f32 %v15893_v29, %v8850_v6  ;;  %v9106_v26 = vpop.f32.mrb[78].mxu1  ;;  %v8852_v54 = vpop.f32.mrb[35].mxu0  ;;  %v9301_v23 = vmax.f32 %v9237_v28, 0.0 }
 0x82f   : > { %v9267_v37 = vadd.f32 %v15897_v45, %v9106_v26  ;;  %v9242_v9 = vadd.f32 %v15900_v5, %v8852_v54  ;;  %v9108_v44 = vpop.f32.mrb[79].mxu1  ;;  %v9327_v63 = vmax.f32 %v9263_v61, 0.0  ;;  %v9302_v49 = vmax.f32 %v9238_v38, 0.0 }
 0x830   : > { %v9305_v50 = vmax.f32 %v9241_v40, 0.0  ;;  %v9268_v59 = vadd.f32 %v15904_v36, %v9108_v44  ;;  %v9328_v11 = vmax.f32 %v9264_v7, 0.0 }
 0x831   : > { %v9331_v15 = vmax.f32 %v9267_v37, 0.0  ;;  %v9306_v1 = vmax.f32 %v9242_v9, 0.0 }
 0x832   : > { %v9365_v12 = vpack.c.bf16 %v9305_v50, %v9301_v23  ;;  %v9332_v17 = vmax.f32 %v9268_v59, 0.0 }
 0x833   : > { %v9379_v14 = vpack.c.bf16 %v9331_v15, %v9327_v63  ;;  %v9366_v27 = vpack.c.bf16 %v9306_v1, %v9302_v49  ;;  %v8856_v53 = vpop.f32.mrb[36].mxu0 }
 0x834   : > { %9397 = vst [vmem:[#allocation4] sm:$0xff] %v9365_v12  ;;  %v9380_v10 = vpack.c.bf16 %v9332_v17, %v9328_v11  ;;  %v9245_v47 = vadd.f32 %v15893_v29, %v8856_v53  ;;  %v9112_v30 = vpop.f32.mrb[80].mxu1  ;;  %v8858_v35 = vpop.f32.mrb[37].mxu0 }
 0x835   : > { %9411 = vst [vmem:[#allocation4 + $0x70] sm:$0xff] %v9379_v14  ;;  %9398 = vst [vmem:[#allocation4 + $0x8] sm:$0xff] %v9366_v27  ;;  %v9271_v33 = vadd.f32 %v15897_v45, %v9112_v30  ;;  %v9246_v42 = vadd.f32 %v15900_v5, %v8858_v35  ;;  %v9114_v55 = vpop.f32.mrb[81].mxu1  ;;  %v8860_v16 = vpop.f32.mrb[38].mxu0 }
 0x836   : > { %9412 = vst [vmem:[#allocation4 + $0x78] sm:$0xff] %v9380_v10  ;;  %v9272_v25 = vadd.f32 %v15904_v36, %v9114_v55  ;;  %v9249_v43 = vadd.f32 %v15893_v29, %v8860_v16  ;;  %v9116_v41 = vpop.f32.mrb[82].mxu1  ;;  %v8862_v48 = vpop.f32.mrb[39].mxu0  ;;  %v9309_v8 = vmax.f32 %v9245_v47, 0.0 }
 0x837   : > { %v9275_v24 = vadd.f32 %v15897_v45, %v9116_v41  ;;  %v9250_v13 = vadd.f32 %v15900_v5, %v8862_v48  ;;  %v9118_v62 = vpop.f32.mrb[83].mxu1  ;;  %v9335_v20 = vmax.f32 %v9271_v33, 0.0  ;;  %v9310_v3 = vmax.f32 %v9246_v42, 0.0 }
 0x838   : > { %v9313_v46 = vmax.f32 %v9249_v43, 0.0  ;;  %v9276_v0 = vadd.f32 %v15904_v36, %v9118_v62  ;;  %v9336_v21 = vmax.f32 %v9272_v25, 0.0 }
 0x839   : > { %v9339_v18 = vmax.f32 %v9275_v24, 0.0  ;;  %v9314_v28 = vmax.f32 %v9250_v13, 0.0 }
 0x83a   : > { %v9369_v34 = vpack.c.bf16 %v9313_v46, %v9309_v8  ;;  %v9340_v61 = vmax.f32 %v9276_v0, 0.0 }
 0x83b   : > { %v9383_v38 = vpack.c.bf16 %v9339_v18, %v9335_v20  ;;  %v9370_v56 = vpack.c.bf16 %v9314_v28, %v9310_v3  ;;  %v8866_v6 = vpop.f32.mrb[40].mxu0 }
 0x83c   : > { %9401 = vst [vmem:[#allocation4 + $0x20] sm:$0xff] %v9369_v34  ;;  %v9384_v7 = vpack.c.bf16 %v9340_v61, %v9336_v21  ;;  %v9253_v40 = vadd.f32 %v15893_v29, %v8866_v6  ;;  %v9122_v26 = vpop.f32.mrb[84].mxu1  ;;  %v8868_v54 = vpop.f32.mrb[41].mxu0 }
 0x83d   : > { %9415 = vst [vmem:[#allocation4 + $0x90] sm:$0xff] %v9383_v38  ;;  %9402 = vst [vmem:[#allocation4 + $0x28] sm:$0xff] %v9370_v56  ;;  %v9279_v37 = vadd.f32 %v15897_v45, %v9122_v26  ;;  %v9254_v9 = vadd.f32 %v15900_v5, %v8868_v54  ;;  %v9124_v44 = vpop.f32.mrb[85].mxu1  ;;  %v8870_v23 = vpop.f32.mrb[42].mxu0 }
 0x83e   : > { %9416 = vst [vmem:[#allocation4 + $0x98] sm:$0xff] %v9384_v7  ;;  %v9280_v50 = vadd.f32 %v15904_v36, %v9124_v44  ;;  %v9257_v59 = vadd.f32 %v15893_v29, %v8870_v23  ;;  %v9126_v63 = vpop.f32.mrb[86].mxu1  ;;  %v8872_v49 = vpop.f32.mrb[43].mxu0  ;;  %v9317_v12 = vmax.f32 %v9253_v40, 0.0 }
 0x83f   : > { %v9283_v15 = vadd.f32 %v15897_v45, %v9126_v63  ;;  %v9258_v1 = vadd.f32 %v15900_v5, %v8872_v49  ;;  %v9128_v11 = vpop.f32.mrb[87].mxu1  ;;  %v9343_v27 = vmax.f32 %v9279_v37, 0.0  ;;  %v9318_v53 = vmax.f32 %v9254_v9, 0.0 }
 0x840   : > { %v9321_v17 = vmax.f32 %v9257_v59, 0.0  ;;  %v9284_v14 = vadd.f32 %v15904_v36, %v9128_v11  ;;  %v9344_v30 = vmax.f32 %v9280_v50, 0.0 }
 0x841   : > { %v9347_v10 = vmax.f32 %v9283_v15, 0.0  ;;  %v9322_v47 = vmax.f32 %v9258_v1, 0.0 }
 0x842   : > { %v9373_v35 = vpack.c.bf16 %v9321_v17, %v9317_v12  ;;  %v9348_v33 = vmax.f32 %v9284_v14, 0.0 }
 0x843   : > { %v9387_v42 = vpack.c.bf16 %v9347_v10, %v9343_v27  ;;  %v9374_v55 = vpack.c.bf16 %v9322_v47, %v9318_v53  ;;  %v8876_v16 = vpop.f32.mrb[44].mxu0 }
 0x844   : > { %9405 = vst [vmem:[#allocation4 + $0x40] sm:$0xff] %v9373_v35  ;;  %v9388_v25 = vpack.c.bf16 %v9348_v33, %v9344_v30  ;;  %v9261_v43 = vadd.f32 %v15893_v29, %v8876_v16  ;;  %v9132_v41 = vpop.f32.mrb[88].mxu1  ;;  %v8878_v48 = vpop.f32.mrb[45].mxu0 }
 0x845   : > { %9419 = vst [vmem:[#allocation4 + $0xb0] sm:$0xff] %v9387_v42  ;;  %9406 = vst [vmem:[#allocation4 + $0x48] sm:$0xff] %v9374_v55  ;;  %v9287_v24 = vadd.f32 %v15897_v45, %v9132_v41  ;;  %v9262_v13 = vadd.f32 %v15900_v5, %v8878_v48  ;;  %v9134_v62 = vpop.f32.mrb[89].mxu1  ;;  %v8880_v8 = vpop.f32.mrb[46].mxu0 }
 0x846   : > { %9420 = vst [vmem:[#allocation4 + $0xb8] sm:$0xff] %v9388_v25  ;;  %v9288_v46 = vadd.f32 %v15904_v36, %v9134_v62  ;;  %v9265_v0 = vadd.f32 %v15893_v29, %v8880_v8  ;;  %v9136_v20 = vpop.f32.mrb[90].mxu1  ;;  %v8882_v3 = vpop.f32.mrb[47].mxu0  ;;  %v9325_v34 = vmax.f32 %v9261_v43, 0.0 }
 0x847   : > { %v9291_v18 = vadd.f32 %v15897_v45, %v9136_v20  ;;  %v9266_v28 = vadd.f32 %v15900_v5, %v8882_v3  ;;  %v9138_v21 = vpop.f32.mrb[91].mxu1  ;;  %v9351_v56 = vmax.f32 %v9287_v24, 0.0  ;;  %v9326_v6 = vmax.f32 %v9262_v13, 0.0 }
 0x848   : > { %v9329_v61 = vmax.f32 %v9265_v0, 0.0  ;;  %v9292_v38 = vadd.f32 %v15904_v36, %v9138_v21  ;;  %v9352_v26 = vmax.f32 %v9288_v46, 0.0 }
 0x849   : > { %v9355_v7 = vmax.f32 %v9291_v18, 0.0  ;;  %v9330_v40 = vmax.f32 %v9266_v28, 0.0 }
 0x84a   : > { %v9377_v54 = vpack.c.bf16 %v9329_v61, %v9325_v34  ;;  %v9356_v37 = vmax.f32 %v9292_v38, 0.0 }
 0x84b   : > { %v9391_v9 = vpack.c.bf16 %v9355_v7, %v9351_v56  ;;  %v9378_v44 = vpack.c.bf16 %v9330_v40, %v9326_v6  ;;  %v8886_v23 = vpop.f32.mrb[48].mxu0 }
 0x84c   : > { %9409 = vst [vmem:[#allocation4 + $0x60] sm:$0xff] %v9377_v54  ;;  %v9392_v50 = vpack.c.bf16 %v9356_v37, %v9352_v26  ;;  %v9269_v59 = vadd.f32 %v15893_v29, %v8886_v23  ;;  %v9142_v63 = vpop.f32.mrb[92].mxu1  ;;  %v8888_v49 = vpop.f32.mrb[49].mxu0 }
 0x84d   : > { %9423 = vst [vmem:[#allocation4 + $0xd0] sm:$0xff] %v9391_v9  ;;  %9410 = vst [vmem:[#allocation4 + $0x68] sm:$0xff] %v9378_v44  ;;  %v9295_v15 = vadd.f32 %v15897_v45, %v9142_v63  ;;  %v9270_v1 = vadd.f32 %v15900_v5, %v8888_v49  ;;  %v9144_v11 = vpop.f32.mrb[93].mxu1  ;;  %v8890_v12 = vpop.f32.mrb[50].mxu0 }
 0x84e   : > { %9424 = vst [vmem:[#allocation4 + $0xd8] sm:$0xff] %v9392_v50  ;;  %v9296_v17 = vadd.f32 %v15904_v36, %v9144_v11  ;;  %v9273_v14 = vadd.f32 %v15893_v29, %v8890_v12  ;;  %v9146_v27 = vpop.f32.mrb[94].mxu1  ;;  %v8892_v53 = vpop.f32.mrb[51].mxu0  ;;  %v9333_v35 = vmax.f32 %v9269_v59, 0.0 }
 0x84f   : > { %v9299_v10 = vadd.f32 %v15897_v45, %v9146_v27  ;;  %v9274_v47 = vadd.f32 %v15900_v5, %v8892_v53  ;;  %v9148_v30 = vpop.f32.mrb[95].mxu1  ;;  %v9359_v55 = vmax.f32 %v9295_v15, 0.0  ;;  %v9334_v16 = vmax.f32 %v9270_v1, 0.0 }
 0x850   : > { %v9337_v33 = vmax.f32 %v9273_v14, 0.0  ;;  %v9300_v42 = vadd.f32 %v15904_v36, %v9148_v30  ;;  %v9360_v41 = vmax.f32 %v9296_v17, 0.0 }
 0x851   : > { %v9363_v25 = vmax.f32 %v9299_v10, 0.0  ;;  %v9338_v43 = vmax.f32 %v9274_v47, 0.0 }
 0x852   : > { %v9381_v48 = vpack.c.bf16 %v9337_v33, %v9333_v35  ;;  %v9364_v24 = vmax.f32 %v9300_v42, 0.0 }
 0x853   : > { %v9395_v13 = vpack.c.bf16 %v9363_v25, %v9359_v55  ;;  %v9382_v62 = vpack.c.bf16 %v9338_v43, %v9334_v16  ;;  %v8896_v8 = vpop.f32.mrb[52].mxu0 }
 0x854   : > { %9413 = vst [vmem:[#allocation4 + $0x80] sm:$0xff] %v9381_v48  ;;  %v9396_v46 = vpack.c.bf16 %v9364_v24, %v9360_v41  ;;  %v9277_v0 = vadd.f32 %v15893_v29, %v8896_v8  ;;  %v8898_v20 = vpop.f32.mrb[53].mxu0 }
 0x855   : > { %9427 = vst [vmem:[#allocation4 + $0xf0] sm:$0xff] %v9395_v13  ;;  %9414 = vst [vmem:[#allocation4 + $0x88] sm:$0xff] %v9382_v62  ;;  %v9278_v3 = vadd.f32 %v15900_v5, %v8898_v20  ;;  %v8900_v18 = vpop.f32.mrb[54].mxu0 }
 0x856   : > { %9428 = vst [vmem:[#allocation4 + $0xf8] sm:$0xff] %v9396_v46  ;;  %v9281_v28 = vadd.f32 %v15893_v29, %v8900_v18  ;;  %v8902_v21 = vpop.f32.mrb[55].mxu0  ;;  %v9341_v61 = vmax.f32 %v9277_v0, 0.0 }
 0x857   : > { %v9282_v34 = vadd.f32 %v15900_v5, %v8902_v21  ;;  %v9342_v56 = vmax.f32 %v9278_v3, 0.0 }
 0x858   : > { %v9345_v38 = vmax.f32 %v9281_v28, 0.0 }
 0x859   : > { %v9346_v6 = vmax.f32 %v9282_v34, 0.0 }
 0x85a   : > { %v9385_v7 = vpack.c.bf16 %v9345_v38, %v9341_v61 }
 0x85b   : > { %v9386_v40 = vpack.c.bf16 %v9346_v6, %v9342_v56  ;;  %v8906_v26 = vpop.f32.mrb[56].mxu0 }
 0x85c   : > { %9417 = vst [vmem:[#allocation4 + $0xa0] sm:$0xff] %v9385_v7  ;;  %v9285_v54 = vadd.f32 %v15893_v29, %v8906_v26  ;;  %v8908_v37 = vpop.f32.mrb[57].mxu0 }
 0x85d   : > { %9418 = vst [vmem:[#allocation4 + $0xa8] sm:$0xff] %v9386_v40  ;;  %v9286_v9 = vadd.f32 %v15900_v5, %v8908_v37  ;;  %v8910_v44 = vpop.f32.mrb[58].mxu0 }
 0x85e   : > { %v9289_v23 = vadd.f32 %v15893_v29, %v8910_v44  ;;  %v8912_v50 = vpop.f32.mrb[59].mxu0  ;;  %v9349_v63 = vmax.f32 %v9285_v54, 0.0 }
 0x85f   : > { %v9290_v59 = vadd.f32 %v15900_v5, %v8912_v50  ;;  %v9350_v15 = vmax.f32 %v9286_v9, 0.0 }
 0x860   : > { %v9353_v49 = vmax.f32 %v9289_v23, 0.0 }
 0x861   : > { %v9354_v1 = vmax.f32 %v9290_v59, 0.0 }
 0x862   : > { %v9389_v11 = vpack.c.bf16 %v9353_v49, %v9349_v63 }
 0x863   : > { %v9390_v12 = vpack.c.bf16 %v9354_v1, %v9350_v15  ;;  %v8916_v17 = vpop.f32.mrb[60].mxu0 }
 0x864   : > { %9421 = vst [vmem:[#allocation4 + $0xc0] sm:$0xff] %v9389_v11  ;;  %v9293_v14 = vadd.f32 %v15893_v29, %v8916_v17  ;;  %v8918_v27 = vpop.f32.mrb[61].mxu0 }
 0x865   : > { %9422 = vst [vmem:[#allocation4 + $0xc8] sm:$0xff] %v9390_v12  ;;  %v9294_v53 = vadd.f32 %v15900_v5, %v8918_v27  ;;  %v8920_v10 = vpop.f32.mrb[62].mxu0 }
 0x866   : > { %v9297_v47 = vadd.f32 %v15893_v29, %v8920_v10  ;;  %v8922_v30 = vpop.f32.mrb[63].mxu0  ;;  %v9357_v33 = vmax.f32 %v9293_v14, 0.0 }
 0x867   : > { %v9298_v35 = vadd.f32 %v15900_v5, %v8922_v30  ;;  %v9358_v55 = vmax.f32 %v9294_v53, 0.0 }
 0x868   : > { %v9361_v42 = vmax.f32 %v9297_v47, 0.0 }
 0x869   : > { %v9362_v16 = vmax.f32 %v9298_v35, 0.0 }
 0x86a   : > { %v9393_v25 = vpack.c.bf16 %v9361_v42, %v9357_v33 }
 0x86b   : > { %v9394_v43 = vpack.c.bf16 %v9362_v16, %v9358_v55 }
 0x86c   : > { %9425 = vst [vmem:[#allocation4 + $0xe0] sm:$0xff] %v9393_v25  ;;  %v9072_v41 = vpop.f32.mrb[64].mxu0 }
 0x86d   : > { %9426 = vst [vmem:[#allocation4 + $0xe8] sm:$0xff] %v9394_v43  ;;  %v9073_v48 = vadd.f32 %v9072_v41, %v15868_v60  ;;  %v9074_v24 = vpop.f32.mrb[65].mxu0 }
 0x86e   : > { %v9075_v13 = vadd.f32 %v9074_v24, %v15870_v2  ;;  %v9076_v62 = vpop.f32.mrb[66].mxu0 }
 0x86f   : > { %v9239_v29 = vadd.f32 %v15897_v45, %v9073_v48  ;;  %v9077_v8 = vadd.f32 %v9076_v62, %v15872_v22  ;;  %v9078_v5 = vpop.f32.mrb[67].mxu0 }
 0x870   : > { %v9240_v46 = vadd.f32 %v15904_v36, %v9075_v13  ;;  %v9079_v0 = vadd.f32 %v9078_v5, %v15874_v4 }
 0x871   : > { %v9243_v20 = vadd.f32 %v15897_v45, %v9077_v8  ;;  %v9303_v18 = vmax.f32 %v9239_v29, 0.0 }
 0x872   : > { %v9244_v3 = vadd.f32 %v15904_v36, %v9079_v0  ;;  %v9304_v60 = vmax.f32 %v9240_v46, 0.0 }
 0x873   : > { %v9307_v28 = vmax.f32 %v9243_v20, 0.0 }
 0x874   : > { %v9308_v21 = vmax.f32 %v9244_v3, 0.0  ;;  %v9082_v34 = vpop.f32.mrb[68].mxu0 }
 0x875   : > { %v9367_v2 = vpack.c.bf16 %v9307_v28, %v9303_v18  ;;  %v9083_v61 = vadd.f32 %v9082_v34, %v15876_v51  ;;  %v9084_v38 = vpop.f32.mrb[69].mxu0 }
 0x876   : > { %v9368_v56 = vpack.c.bf16 %v9308_v21, %v9304_v60  ;;  %v9085_v22 = vadd.f32 %v9084_v38, %v15878_v52  ;;  %v9086_v6 = vpop.f32.mrb[70].mxu0 }
 0x877   : > { %9399 = vst [vmem:[#allocation4 + $0x10] sm:$0xff] %v9367_v2  ;;  %v9247_v4 = vadd.f32 %v15897_v45, %v9083_v61  ;;  %v9087_v7 = vadd.f32 %v9086_v6, %v15880_v19  ;;  %v9088_v40 = vpop.f32.mrb[71].mxu0 }
 0x878   : > { %9400 = vst [vmem:[#allocation4 + $0x18] sm:$0xff] %v9368_v56  ;;  %v9248_v26 = vadd.f32 %v15904_v36, %v9085_v22  ;;  %v9089_v54 = vadd.f32 %v9088_v40, %v15882_v58 }
 0x879   : > { %v9251_v37 = vadd.f32 %v15897_v45, %v9087_v7  ;;  %v9311_v9 = vmax.f32 %v9247_v4, 0.0 }
 0x87a   : > { %v9252_v51 = vadd.f32 %v15904_v36, %v9089_v54  ;;  %v9312_v23 = vmax.f32 %v9248_v26, 0.0 }
 0x87b   : > { %v9315_v44 = vmax.f32 %v9251_v37, 0.0 }
 0x87c   : > { %v9316_v52 = vmax.f32 %v9252_v51, 0.0  ;;  %v9092_v50 = vpop.f32.mrb[72].mxu0 }
 0x87d   : > { %v9371_v59 = vpack.c.bf16 %v9315_v44, %v9311_v9  ;;  %v9093_v63 = vadd.f32 %v9092_v50, %v15884_v57  ;;  %v9094_v49 = vpop.f32.mrb[73].mxu0 }
 0x87e   : > { %v9372_v19 = vpack.c.bf16 %v9316_v52, %v9312_v23  ;;  %v9095_v15 = vadd.f32 %v9094_v49, %v15886_v32  ;;  %v9096_v1 = vpop.f32.mrb[74].mxu0 }
 0x87f   : > { %9403 = vst [vmem:[#allocation4 + $0x30] sm:$0xff] %v9371_v59  ;;  %v9255_v58 = vadd.f32 %v15897_v45, %v9093_v63  ;;  %v9097_v11 = vadd.f32 %v9096_v1, %v15888_v31  ;;  %v9098_v12 = vpop.f32.mrb[75].mxu0 }
 0x880   : > { %9404 = vst [vmem:[#allocation4 + $0x38] sm:$0xff] %v9372_v19  ;;  %v9256_v17 = vadd.f32 %v15904_v36, %v9095_v15  ;;  %v9099_v14 = vadd.f32 %v9098_v12, %v15890_v39 }
 0x881   : > { %v9259_v27 = vadd.f32 %v15897_v45, %v9097_v11  ;;  %v9319_v53 = vmax.f32 %v9255_v58, 0.0 }
 0x882   : > { %v9260_v57 = vadd.f32 %v15904_v36, %v9099_v14  ;;  %v9320_v47 = vmax.f32 %v9256_v17, 0.0 }
 0x883   : > { %v9323_v10 = vmax.f32 %v9259_v27, 0.0 }
 0x884   : > { %v9324_v32 = vmax.f32 %v9260_v57, 0.0 }
 0x885   : > { %v9375_v30 = vpack.c.bf16 %v9323_v10, %v9319_v53 }
 0x886   : > { %v9376_v35 = vpack.c.bf16 %v9324_v32, %v9320_v47 }
 0x887   : > { %9407 = vst [vmem:[#allocation4 + $0x50] sm:$0xff] %v9375_v30 }
 0x888   : > { %9408 = vst [vmem:[#allocation4 + $0x58] sm:$0xff] %v9376_v35 }
 0x889 PF: > { %v13937_v31 = vld [vmem:[%s14860_s13 + $0x4] ss:$16 sps:$4 sm:$0xff]   ;;  %v13939_v39 = vld [vmem:[%s14860_s13 + $0xc] ss:$16 sps:$4 sm:$0xff]   ;;  %v13941_v45 = vld [vmem:[%s14860_s13] ss:$16 sps:$4 sm:$0xff]  }
 0x88a   : > { %10220 = vmatprep.subr.bf16.mxu0 %v13937_v31  ;;  %v13942_v36 = vld [vmem:[%s14860_s13 + $0x8] ss:$16 sps:$4 sm:$0xff]   ;;  %10306 = vmatprep.subr.bf16.mxu1 %v13939_v39  ;;  %v13943_v33 = vld [vmem:[%s14860_s13 + $0x24] ss:$16 sps:$4 sm:$0xff]   ;;  %v13945_v42 = vld [vmem:[%s14860_s13 + $0x2c] ss:$16 sps:$4 sm:$0xff]  }
 0x88b   : > { %10221 = vmatpush1.bf16.msra.mxu0 %v13941_v45  ;;  %10307 = vmatpush1.bf16.msra.mxu1 %v13942_v36  ;;  %v13947_v55 = vld [vmem:[%s14860_s13 + $0x20] ss:$16 sps:$4 sm:$0xff]   ;;  %v13948_v16 = vld [vmem:[%s14860_s13 + $0x28] ss:$16 sps:$4 sm:$0xff]   ;;  %v13949_v25 = vld [vmem:[%s14860_s13 + $0x44] ss:$16 sps:$4 sm:$0xff]  }
 0x88c   : > { %10222 = vmatprep.subr.bf16.mxu0 %v13943_v33  ;;  %10308 = vmatprep.subr.bf16.mxu1 %v13945_v42  ;;  %v13951_v43 = vld [vmem:[%s14860_s13 + $0x4c] ss:$16 sps:$4 sm:$0xff]   ;;  %v13953_v41 = vld [vmem:[%s14860_s13 + $0x40] ss:$16 sps:$4 sm:$0xff]   ;;  %v13954_v48 = vld [vmem:[%s14860_s13 + $0x48] ss:$16 sps:$4 sm:$0xff]  }
 0x88d   : > { %v13955_v24 = vld [vmem:[%s14860_s13 + $0x64] ss:$16 sps:$4 sm:$0xff]   ;;  %v13957_v13 = vld [vmem:[%s14860_s13 + $0x6c] ss:$16 sps:$4 sm:$0xff]   ;;  %v13959_v62 = vld [vmem:[%s14860_s13 + $0x60] ss:$16 sps:$4 sm:$0xff]  }
 0x88e   : > { %v13960_v29 = vld [vmem:[%s14860_s13 + $0x68] ss:$16 sps:$4 sm:$0xff]   ;;  %v13961_v8 = vld [vmem:[%s14860_s13 + $0x84] ss:$16 sps:$4 sm:$0xff]   ;;  %v13963_v5 = vld [vmem:[%s14860_s13 + $0x8c] ss:$16 sps:$4 sm:$0xff]  }
 0x88f   : > { %10223 = vmatpush1.bf16.msra.mxu0 %v13947_v55  ;;  %10309 = vmatpush1.bf16.msra.mxu1 %v13948_v16  ;;  %v13965_v46 = vld [vmem:[%s14860_s13 + $0x80] ss:$16 sps:$4 sm:$0xff]   ;;  %v13966_v0 = vld [vmem:[%s14860_s13 + $0x88] ss:$16 sps:$4 sm:$0xff]   ;;  %v13967_v20 = vld [vmem:[%s14860_s13 + $0xa4] ss:$16 sps:$4 sm:$0xff]  }
 0x890   : > { %10224 = vmatprep.subr.bf16.mxu0 %v13949_v25  ;;  %10310 = vmatprep.subr.bf16.mxu1 %v13951_v43  ;;  %v13969_v3 = vld [vmem:[%s14860_s13 + $0xac] ss:$16 sps:$4 sm:$0xff]   ;;  %v13971_v18 = vld [vmem:[%s14860_s13 + $0xa0] ss:$16 sps:$4 sm:$0xff]   ;;  %v13972_v28 = vld [vmem:[%s14860_s13 + $0xa8] ss:$16 sps:$4 sm:$0xff]  }
 0x891   : > { %v13973_v60 = vld [vmem:[%s14860_s13 + $0xc4] ss:$16 sps:$4 sm:$0xff]   ;;  %v13975_v21 = vld [vmem:[%s14860_s13 + $0xcc] ss:$16 sps:$4 sm:$0xff]   ;;  %v13977_v34 = vld [vmem:[%s14860_s13 + $0xc0] ss:$16 sps:$4 sm:$0xff]  }
 0x892   : > { %v13978_v2 = vld [vmem:[%s14860_s13 + $0xc8] ss:$16 sps:$4 sm:$0xff]   ;;  %v13979_v61 = vld [vmem:[%s14860_s13 + $0xe4] ss:$16 sps:$4 sm:$0xff]   ;;  %v13981_v38 = vld [vmem:[%s14860_s13 + $0xec] ss:$16 sps:$4 sm:$0xff]  }
 0x893   : > { %10225 = vmatpush1.bf16.msra.mxu0 %v13953_v41  ;;  %10311 = vmatpush1.bf16.msra.mxu1 %v13954_v48  ;;  %v13983_v56 = vld [vmem:[%s14860_s13 + $0xe0] ss:$16 sps:$4 sm:$0xff]   ;;  %v13984_v22 = vld [vmem:[%s14860_s13 + $0xe8] ss:$16 sps:$4 sm:$0xff]   ;;  %v13985_v6 = vld [vmem:[%s14860_s13 + $0x104] ss:$16 sps:$4 sm:$0xff]  }
 0x894   : > { %10226 = vmatprep.subr.bf16.mxu0 %v13955_v24  ;;  %10312 = vmatprep.subr.bf16.mxu1 %v13957_v13  ;;  %v13987_v4 = vld [vmem:[%s14860_s13 + $0x10c] ss:$16 sps:$4 sm:$0xff]   ;;  %v13989_v7 = vld [vmem:[%s14860_s13 + $0x100] ss:$16 sps:$4 sm:$0xff]   ;;  %v13990_v40 = vld [vmem:[%s14860_s13 + $0x108] ss:$16 sps:$4 sm:$0xff]  }
 0x895   : > { %v13991_v26 = vld [vmem:[%s14860_s13 + $0x124] ss:$16 sps:$4 sm:$0xff]   ;;  %v13993_v54 = vld [vmem:[%s14860_s13 + $0x12c] ss:$16 sps:$4 sm:$0xff]   ;;  %v13995_v37 = vld [vmem:[%s14860_s13 + $0x120] ss:$16 sps:$4 sm:$0xff]  }
 0x896   : > { %v13996_v51 = vld [vmem:[%s14860_s13 + $0x128] ss:$16 sps:$4 sm:$0xff]   ;;  %v13997_v9 = vld [vmem:[%s14860_s13 + $0x144] ss:$16 sps:$4 sm:$0xff]   ;;  %s11918_s2 = sshll.u32 %s14571_s23, 5  ;;  %p11881_p11 = scmp.ne.s32.totalorder %s14571_s23, 7 }
 0x897   : > { %10227 = vmatpush1.bf16.msra.mxu0 %v13959_v62  ;;  %10313 = vmatpush1.bf16.msra.mxu1 %v13960_v29  ;;  %v13999_v44 = vld [vmem:[%s14860_s13 + $0x14c] ss:$16 sps:$4 sm:$0xff]   ;;  %v14001_v23 = vld [vmem:[%s14860_s13 + $0x140] ss:$16 sps:$4 sm:$0xff]   ;;  %v14002_v52 = vld [vmem:[%s14860_s13 + $0x148] ss:$16 sps:$4 sm:$0xff]  }
 0x898   : > { %10228 = vmatprep.subr.bf16.mxu0 %v13961_v8  ;;  %10314 = vmatprep.subr.bf16.mxu1 %v13963_v5  ;;  %v14003_v50 = vld [vmem:[%s14860_s13 + $0x164] ss:$16 sps:$4 sm:$0xff]   ;;  %v14005_v59 = vld [vmem:[%s14860_s13 + $0x16c] ss:$16 sps:$4 sm:$0xff]   ;;  %s16029_s25 = scalar_lea.vmem [#allocation4], %s11918_s2  ;;  %vm10807_vm1 = vcmask (!%p11881_p11), 31744  }
 0x899   : > { %v9449_v63 = vld [vmem:[%s16029_s25 + $0x8] sm:$0xff]  ;;  %v14008_v19 = vld [vmem:[%s14860_s13 + $0x168] ss:$16 sps:$4 sm:$0xff]   ;;  %s16273_s24 = sld [smem:[#allocation28_spill]] (!%p11881_p11) }
 0x89a   : > { %v14007_v49 = vld [vmem:[%s14860_s13 + $0x160] ss:$16 sps:$4 sm:$0xff]   ;;  %10252 = vmatprep.mubr.bf16.mxu0 %v9449_v63  ;;  %10338 = vmatprep.mubr.bf16.mxu1 %v9449_v63  ;;  %v14009_v15 = vld [vmem:[%s14860_s13 + $0x184] ss:$16 sps:$4 sm:$0xff]   ;;  %v14011_v1 = vld [vmem:[%s14860_s13 + $0x18c] ss:$16 sps:$4 sm:$0xff]  }
 0x89b   : > { %10229 = vmatpush1.bf16.msra.mxu0 %v13965_v46  ;;  %10315 = vmatpush1.bf16.msra.mxu1 %v13966_v0  ;;  %v14013_v58 = vld [vmem:[%s14860_s13 + $0x180] ss:$16 sps:$4 sm:$0xff]   ;;  %v14014_v11 = vld [vmem:[%s14860_s13 + $0x188] ss:$16 sps:$4 sm:$0xff]   ;;  %v14015_v12 = vld [vmem:[%s14860_s13 + $0x1a4] ss:$16 sps:$4 sm:$0xff]  }
 0x89c   : > { %10230 = vmatprep.subr.bf16.mxu0 %v13967_v20  ;;  %10316 = vmatprep.subr.bf16.mxu1 %v13969_v3  ;;  %v14017_v17 = vld [vmem:[%s14860_s13 + $0x1ac] ss:$16 sps:$4 sm:$0xff]   ;;  %v14019_v14 = vld [vmem:[%s14860_s13 + $0x1a0] ss:$16 sps:$4 sm:$0xff]   ;;  %v14020_v27 = vld [vmem:[%s14860_s13 + $0x1a8] ss:$16 sps:$4 sm:$0xff]  }
 0x89d   : > { %v14021_v57 = vld [vmem:[%s14860_s13 + $0x1c4] ss:$16 sps:$4 sm:$0xff]   ;;  %v14023_v53 = vld [vmem:[%s14860_s13 + $0x1cc] ss:$16 sps:$4 sm:$0xff]   ;;  %v14025_v10 = vld [vmem:[%s14860_s13 + $0x1c0] ss:$16 sps:$4 sm:$0xff]  }
 0x89e   : > { %v14026_v47 = vld [vmem:[%s14860_s13 + $0x1c8] ss:$16 sps:$4 sm:$0xff]   ;;  %v14027_v32 = vld [vmem:[%s14860_s13 + $0x1e4] ss:$16 sps:$4 sm:$0xff]   ;;  %v14029_v30 = vld [vmem:[%s14860_s13 + $0x1ec] ss:$16 sps:$4 sm:$0xff]  }
 0x89f   : > { %10231 = vmatpush1.bf16.msra.mxu0 %v13971_v18  ;;  %10317 = vmatpush1.bf16.msra.mxu1 %v13972_v28  ;;  %v14031_v35 = vld [vmem:[%s14860_s13 + $0x1e0] ss:$16 sps:$4 sm:$0xff]   ;;  %v14032_v31 = vld [vmem:[%s14860_s13 + $0x1e8] ss:$16 sps:$4 sm:$0xff]   ;;  %v14035_v39 = vld [vmem:[%s14860_s13 + $0x204] ss:$16 sps:$4 sm:$0xff]  }
 0x8a0   : > { %10232 = vmatprep.subr.bf16.mxu0 %v13973_v60  ;;  %10318 = vmatprep.subr.bf16.mxu1 %v13975_v21  ;;  %v14038_v45 = vld [vmem:[%s14860_s13 + $0x20c] ss:$16 sps:$4 sm:$0xff]   ;;  %v14033_v36 = vld [vmem:[%s14860_s13 + $0x200] ss:$16 sps:$4 sm:$0xff]   ;;  %v14036_v33 = vld [vmem:[%s14860_s13 + $0x208] ss:$16 sps:$4 sm:$0xff]  }
 0x8a1   : > { %v9448_v42 = vld [vmem:[%s16029_s25] sm:$0xff]  ;;  %v14039_v25 = vld [vmem:[%s14860_s13 + $0x220] ss:$16 sps:$4 sm:$0xff]  }
 0x8a2   : > { %v14041_v55 = vld [vmem:[%s14860_s13 + $0x224] ss:$16 sps:$4 sm:$0xff]   ;;  %v14044_v16 = vld [vmem:[%s14860_s13 + $0x22c] ss:$16 sps:$4 sm:$0xff]   ;;  %v14042_v43 = vld [vmem:[%s14860_s13 + $0x228] ss:$16 sps:$4 sm:$0xff]  }
 0x8a3   : > { %10233 = vmatpush1.bf16.msra.mxu0 %v13977_v34  ;;  %10319 = vmatpush1.bf16.msra.mxu1 %v13978_v2  ;;  %v14047_v41 = vld [vmem:[%s14860_s13 + $0x244] ss:$16 sps:$4 sm:$0xff]   ;;  %v14050_v48 = vld [vmem:[%s14860_s13 + $0x24c] ss:$16 sps:$4 sm:$0xff]   ;;  %v14045_v24 = vld [vmem:[%s14860_s13 + $0x240] ss:$16 sps:$4 sm:$0xff]  }
 0x8a4   : > { %10234 = vmatprep.subr.bf16.mxu0 %v13979_v61  ;;  %10320 = vmatprep.subr.bf16.mxu1 %v13981_v38  ;;  %v14048_v13 = vld [vmem:[%s14860_s13 + $0x248] ss:$16 sps:$4 sm:$0xff]   ;;  %v14053_v62 = vld [vmem:[%s14860_s13 + $0x264] ss:$16 sps:$4 sm:$0xff]   ;;  %v14056_v29 = vld [vmem:[%s14860_s13 + $0x26c] ss:$16 sps:$4 sm:$0xff]  }
 0x8a5   : > { %v14051_v8 = vld [vmem:[%s14860_s13 + $0x260] ss:$16 sps:$4 sm:$0xff]   ;;  %v14054_v5 = vld [vmem:[%s14860_s13 + $0x268] ss:$16 sps:$4 sm:$0xff]   ;;  %v14059_v46 = vld [vmem:[%s14860_s13 + $0x284] ss:$16 sps:$4 sm:$0xff]  }
 0x8a6   : > { %v14062_v0 = vld [vmem:[%s14860_s13 + $0x28c] ss:$16 sps:$4 sm:$0xff]   ;;  %v14057_v20 = vld [vmem:[%s14860_s13 + $0x280] ss:$16 sps:$4 sm:$0xff]   ;;  %v14060_v3 = vld [vmem:[%s14860_s13 + $0x288] ss:$16 sps:$4 sm:$0xff]  }
 0x8a7   : > { %10235 = vmatpush1.bf16.msra.mxu0 %v13983_v56  ;;  %10321 = vmatpush1.bf16.msra.mxu1 %v13984_v22  ;;  %v14065_v18 = vld [vmem:[%s14860_s13 + $0x2a4] ss:$16 sps:$4 sm:$0xff]   ;;  %v14068_v28 = vld [vmem:[%s14860_s13 + $0x2ac] ss:$16 sps:$4 sm:$0xff]   ;;  %v14063_v60 = vld [vmem:[%s14860_s13 + $0x2a0] ss:$16 sps:$4 sm:$0xff]  }
 0x8a8   : > { %10236 = vmatprep.subr.bf16.mxu0 %v13985_v6  ;;  %10322 = vmatprep.subr.bf16.mxu1 %v13987_v4  ;;  %v14066_v21 = vld [vmem:[%s14860_s13 + $0x2a8] ss:$16 sps:$4 sm:$0xff]   ;;  %v14071_v34 = vld [vmem:[%s14860_s13 + $0x2c4] ss:$16 sps:$4 sm:$0xff]   ;;  %v14074_v2 = vld [vmem:[%s14860_s13 + $0x2cc] ss:$16 sps:$4 sm:$0xff]  }
 0x8a9   : > { %v9451_v61 = vld [vmem:[%s16029_s25 + $0x18] sm:$0xff]  ;;  %v14072_v56 = vld [vmem:[%s14860_s13 + $0x2c8] ss:$16 sps:$4 sm:$0xff]  }
 0x8aa   : > { %v14069_v38 = vld [vmem:[%s14860_s13 + $0x2c0] ss:$16 sps:$4 sm:$0xff]   ;;  %v14077_v22 = vld [vmem:[%s14860_s13 + $0x2e4] ss:$16 sps:$4 sm:$0xff]   ;;  %v14080_v6 = vld [vmem:[%s14860_s13 + $0x2ec] ss:$16 sps:$4 sm:$0xff]  }
 0x8ab   : > { %10237 = vmatpush1.bf16.msra.mxu0 %v13989_v7  ;;  %10323 = vmatpush1.bf16.msra.mxu1 %v13990_v40  ;;  %v14075_v4 = vld [vmem:[%s14860_s13 + $0x2e0] ss:$16 sps:$4 sm:$0xff]   ;;  %v14078_v7 = vld [vmem:[%s14860_s13 + $0x2e8] ss:$16 sps:$4 sm:$0xff]   ;;  %v14083_v40 = vld [vmem:[%s14860_s13 + $0x304] ss:$16 sps:$4 sm:$0xff]  }
 0x8ac   : > { %10238 = vmatprep.subr.bf16.mxu0 %v13991_v26  ;;  %10324 = vmatprep.subr.bf16.mxu1 %v13993_v54  ;;  %v14086_v26 = vld [vmem:[%s14860_s13 + $0x30c] ss:$16 sps:$4 sm:$0xff]   ;;  %v14081_v54 = vld [vmem:[%s14860_s13 + $0x300] ss:$16 sps:$4 sm:$0xff]   ;;  %v14096_v63 = vld [vmem:[%s14860_s13 + $0x348] ss:$16 sps:$4 sm:$0xff]  }
 0x8af   : > { %10239 = vmatpush1.bf16.msra.mxu0 %v13995_v37  ;;  %10325 = vmatpush1.bf16.msra.mxu1 %v13996_v51  ;;  %v14084_v37 = vld [vmem:[%s14860_s13 + $0x308] ss:$16 sps:$4 sm:$0xff]   ;;  %v14089_v51 = vld [vmem:[%s14860_s13 + $0x324] ss:$16 sps:$4 sm:$0xff]  }
 0x8b0   : > { %10240 = vmatprep.subr.bf16.mxu0 %v13997_v9  ;;  %10326 = vmatprep.subr.bf16.mxu1 %v13999_v44  ;;  %v14092_v9 = vld [vmem:[%s14860_s13 + $0x32c] ss:$16 sps:$4 sm:$0xff]   ;;  %v14087_v44 = vld [vmem:[%s14860_s13 + $0x320] ss:$16 sps:$4 sm:$0xff]  }
 0x8b3   : > { %10241 = vmatpush1.bf16.msra.mxu0 %v14001_v23  ;;  %10327 = vmatpush1.bf16.msra.mxu1 %v14002_v52  ;;  %v14090_v23 = vld [vmem:[%s14860_s13 + $0x328] ss:$16 sps:$4 sm:$0xff]   ;;  %v14095_v52 = vld [vmem:[%s14860_s13 + $0x344] ss:$16 sps:$4 sm:$0xff]  }
 0x8b4   : > { %10242 = vmatprep.subr.bf16.mxu0 %v14003_v50  ;;  %10328 = vmatprep.subr.bf16.mxu1 %v14005_v59  ;;  %v14098_v50 = vld [vmem:[%s14860_s13 + $0x34c] ss:$16 sps:$4 sm:$0xff]   ;;  %v14093_v59 = vld [vmem:[%s14860_s13 + $0x340] ss:$16 sps:$4 sm:$0xff]  }
 0x8b7   : > { %10243 = vmatpush1.bf16.msra.mxu0 %v14007_v49  ;;  %10329 = vmatpush1.bf16.msra.mxu1 %v14008_v19  ;;  %v14101_v49 = vld [vmem:[%s14860_s13 + $0x364] ss:$16 sps:$4 sm:$0xff]   ;;  %v14104_v19 = vld [vmem:[%s14860_s13 + $0x36c] ss:$16 sps:$4 sm:$0xff]  }
 0x8b8   : > { %10244 = vmatprep.subr.bf16.mxu0 %v14009_v15  ;;  %10330 = vmatprep.subr.bf16.mxu1 %v14011_v1  ;;  %v14099_v15 = vld [vmem:[%s14860_s13 + $0x360] ss:$16 sps:$4 sm:$0xff]   ;;  %v14102_v1 = vld [vmem:[%s14860_s13 + $0x368] ss:$16 sps:$4 sm:$0xff]  }
 0x8bb   : > { %10245 = vmatpush1.bf16.msra.mxu0 %v14013_v58  ;;  %10331 = vmatpush1.bf16.msra.mxu1 %v14014_v11  ;;  %v14107_v58 = vld [vmem:[%s14860_s13 + $0x384] ss:$16 sps:$4 sm:$0xff]   ;;  %v14110_v11 = vld [vmem:[%s14860_s13 + $0x38c] ss:$16 sps:$4 sm:$0xff]  }
 0x8bc   : > { %10246 = vmatprep.subr.bf16.mxu0 %v14015_v12  ;;  %10332 = vmatprep.subr.bf16.mxu1 %v14017_v17  ;;  %v14105_v12 = vld [vmem:[%s14860_s13 + $0x380] ss:$16 sps:$4 sm:$0xff]   ;;  %v14108_v17 = vld [vmem:[%s14860_s13 + $0x388] ss:$16 sps:$4 sm:$0xff]  }
 0x8bf   : > { %10247 = vmatpush1.bf16.msra.mxu0 %v14019_v14  ;;  %10333 = vmatpush1.bf16.msra.mxu1 %v14020_v27  ;;  %v14113_v14 = vld [vmem:[%s14860_s13 + $0x3a4] ss:$16 sps:$4 sm:$0xff]   ;;  %v14116_v27 = vld [vmem:[%s14860_s13 + $0x3ac] ss:$16 sps:$4 sm:$0xff]  }
 0x8c0   : > { %10248 = vmatprep.subr.bf16.mxu0 %v14021_v57  ;;  %10334 = vmatprep.subr.bf16.mxu1 %v14023_v53  ;;  %v14111_v57 = vld [vmem:[%s14860_s13 + $0x3a0] ss:$16 sps:$4 sm:$0xff]   ;;  %v14114_v53 = vld [vmem:[%s14860_s13 + $0x3a8] ss:$16 sps:$4 sm:$0xff]  }
 0x8c3   : > { %10249 = vmatpush1.bf16.msra.mxu0 %v14025_v10  ;;  %10335 = vmatpush1.bf16.msra.mxu1 %v14026_v47  ;;  %v14119_v10 = vld [vmem:[%s14860_s13 + $0x3c4] ss:$16 sps:$4 sm:$0xff]   ;;  %v14122_v47 = vld [vmem:[%s14860_s13 + $0x3cc] ss:$16 sps:$4 sm:$0xff]  }
 0x8c4   : > { %10250 = vmatprep.subr.bf16.mxu0 %v14027_v32  ;;  %10336 = vmatprep.subr.bf16.mxu1 %v14029_v30  ;;  %v14117_v32 = vld [vmem:[%s14860_s13 + $0x3c0] ss:$16 sps:$4 sm:$0xff]   ;;  %v14120_v30 = vld [vmem:[%s14860_s13 + $0x3c8] ss:$16 sps:$4 sm:$0xff]  }
 0x8c7   : > { %10251 = vmatpush1.bf16.msra.mxu0 %v14031_v35  ;;  %10337 = vmatpush1.bf16.msra.mxu1 %v14032_v31  ;;  %v14125_v35 = vld [vmem:[%s14860_s13 + $0x3e4] ss:$16 sps:$4 sm:$0xff]   ;;  %v14128_v31 = vld [vmem:[%s14860_s13 + $0x3ec] ss:$16 sps:$4 sm:$0xff]  }
 0x8c8   : > { %10263 = vmatprep.subr.bf16.mxu0 %v14035_v39  ;;  %10349 = vmatprep.subr.bf16.mxu1 %v14038_v45  ;;  %v14123_v39 = vld [vmem:[%s14860_s13 + $0x3e0] ss:$16 sps:$4 sm:$0xff]   ;;  %v14126_v45 = vld [vmem:[%s14860_s13 + $0x3e8] ss:$16 sps:$4 sm:$0xff]  }
 0x8ca   : > { %10253 = vmatmul.mubr.bf16.vlgmr.msra.gmra.mrb[0].mxu0 %v9448_v42  ;;  %10339 = vmatmul.mubr.bf16.vlgmr.msra.gmra.mrb[0].mxu1 %v9448_v42  ;;  %v9439_v42 = vld [vmem:[#allocation5 + $0x10] sm:$0xff] }
 0x8cb   : > { %10264 = vmatpush1.bf16.msra.mxu0 %v14033_v36  ;;  %10350 = vmatpush1.bf16.msra.mxu1 %v14036_v33  ;;  %v9450_v36 = vld [vmem:[%s16029_s25 + $0x10] sm:$0xff]  ;;  %v9437_v33 = vld [vmem:[#allocation5] sm:$0xff] }
 0x8cc   : > { %10265 = vmatprep.subr.bf16.mxu0 %v14041_v55  ;;  %10351 = vmatprep.subr.bf16.mxu1 %v14044_v16  ;;  %v9438_v55 = vld [vmem:[#allocation5 + $0x8] sm:$0xff]  ;;  %v9440_v16 = vld [vmem:[#allocation5 + $0x18] sm:$0xff] }
 0x8cd   : > { %10295 = vmatprep.mubr.bf16.mxu0 %v9451_v61  ;;  %10381 = vmatprep.mubr.bf16.mxu1 %v9451_v61  ;;  %v14129_v61 = vld [vmem:[%s16242_s9 + $0x40] sm:$0xff] (!%p11881_p11)  }
 0x8cf   : > { %10266 = vmatpush1.bf16.msra.mxu0 %v14039_v25  ;;  %10352 = vmatpush1.bf16.msra.mxu1 %v14042_v43 }
 0x8d0   : > { %10267 = vmatprep.subr.bf16.mxu0 %v14047_v41  ;;  %10353 = vmatprep.subr.bf16.mxu1 %v14050_v48  ;;  %v9441_v41 = vld [vmem:[#allocation5 + $0x20] sm:$0xff]  ;;  %v9443_v48 = vld [vmem:[#allocation5 + $0x30] sm:$0xff] }
 0x8d3   : > { %10268 = vmatpush1.bf16.msra.mxu0 %v14045_v24  ;;  %10354 = vmatpush1.bf16.msra.mxu1 %v14048_v13 }
 0x8d4   : > { %10269 = vmatprep.subr.bf16.mxu0 %v14053_v62  ;;  %10355 = vmatprep.subr.bf16.mxu1 %v14056_v29 }
 0x8d7   : > { %10270 = vmatpush1.bf16.msra.mxu0 %v14051_v8  ;;  %10356 = vmatpush1.bf16.msra.mxu1 %v14054_v5  ;;  %v9442_v8 = vld [vmem:[#allocation5 + $0x28] sm:$0xff]  ;;  %v9444_v5 = vld [vmem:[#allocation5 + $0x38] sm:$0xff] }
 0x8d8   : > { %10271 = vmatprep.subr.bf16.mxu0 %v14059_v46  ;;  %10357 = vmatprep.subr.bf16.mxu1 %v14062_v0 }
 0x8db   : > { %10272 = vmatpush1.bf16.msra.mxu0 %v14057_v20  ;;  %10358 = vmatpush1.bf16.msra.mxu1 %v14060_v3 }
 0x8dc   : > { %10273 = vmatprep.subr.bf16.mxu0 %v14065_v18  ;;  %10359 = vmatprep.subr.bf16.mxu1 %v14068_v28 }
 0x8df   : > { %10274 = vmatpush1.bf16.msra.mxu0 %v14063_v60  ;;  %10360 = vmatpush1.bf16.msra.mxu1 %v14066_v21 }
 0x8e0   : > { %10275 = vmatprep.subr.bf16.mxu0 %v14071_v34  ;;  %10361 = vmatprep.subr.bf16.mxu1 %v14074_v2 }
 0x8e3   : > { %10276 = vmatpush1.bf16.msra.mxu0 %v14069_v38  ;;  %10362 = vmatpush1.bf16.msra.mxu1 %v14072_v56  ;;  %v14130_v38 = vld [vmem:[%s16242_s9 + $0xc0] sm:$0xff] (!%p11881_p11)  }
 0x8e4   : > { %10277 = vmatprep.subr.bf16.mxu0 %v14077_v22  ;;  %10363 = vmatprep.subr.bf16.mxu1 %v14080_v6  ;;  %v14131_v56 = vld [vmem:[%s16242_s9] sm:$0xff] (!%p11881_p11)   ;;  %v14133_v6 = vld [vmem:[%s16242_s9 + $0x48] sm:$0xff] (!%p11881_p11)  }
 0x8e5   : > { %v14132_v22 = vld [vmem:[%s16242_s9 + $0x80] sm:$0xff] (!%p11881_p11)  }
 0x8e7   : > { %10278 = vmatpush1.bf16.msra.mxu0 %v14075_v4  ;;  %10364 = vmatpush1.bf16.msra.mxu1 %v14078_v7  ;;  %v14134_v4 = vld [vmem:[%s16242_s9 + $0xc8] sm:$0xff] (!%p11881_p11)  }
 0x8e8   : > { %10279 = vmatprep.subr.bf16.mxu0 %v14083_v40  ;;  %10365 = vmatprep.subr.bf16.mxu1 %v14086_v26  ;;  %v14135_v7 = vld [vmem:[%s16242_s9 + $0x8] sm:$0xff] (!%p11881_p11)   ;;  %v14137_v26 = vld [vmem:[%s16242_s9 + $0x50] sm:$0xff] (!%p11881_p11)  }
 0x8e9   : > { %v14136_v40 = vld [vmem:[%s16242_s9 + $0x88] sm:$0xff] (!%p11881_p11)  }
 0x8eb   : > { %10280 = vmatpush1.bf16.msra.mxu0 %v14081_v54  ;;  %10366 = vmatpush1.bf16.msra.mxu1 %v14084_v37  ;;  %v14138_v54 = vld [vmem:[%s16242_s9 + $0xd0] sm:$0xff] (!%p11881_p11)  }
 0x8ec   : > { %10281 = vmatprep.subr.bf16.mxu0 %v14089_v51  ;;  %10367 = vmatprep.subr.bf16.mxu1 %v14092_v9  ;;  %v14139_v37 = vld [vmem:[%s16242_s9 + $0x10] sm:$0xff] (!%p11881_p11)   ;;  %v14141_v9 = vld [vmem:[%s16242_s9 + $0x58] sm:$0xff] (!%p11881_p11)  }
 0x8ed   : > { %v14140_v51 = vld [vmem:[%s16242_s9 + $0x90] sm:$0xff] (!%p11881_p11)  }
 0x8ef   : > { %10282 = vmatpush1.bf16.msra.mxu0 %v14087_v44  ;;  %10368 = vmatpush1.bf16.msra.mxu1 %v14090_v23  ;;  %v14142_v44 = vld [vmem:[%s16242_s9 + $0xd8] sm:$0xff] (!%p11881_p11)  }
 0x8f0   : > { %10283 = vmatprep.subr.bf16.mxu0 %v14095_v52  ;;  %10369 = vmatprep.subr.bf16.mxu1 %v14098_v50  ;;  %v14143_v23 = vld [vmem:[%s16242_s9 + $0x18] sm:$0xff] (!%p11881_p11)   ;;  %v14145_v50 = vld [vmem:[%s16242_s9 + $0x60] sm:$0xff] (!%p11881_p11)  }
 0x8f1   : > { %v14144_v52 = vld [vmem:[%s16242_s9 + $0x98] sm:$0xff] (!%p11881_p11)  }
 0x8f3   : > { %10284 = vmatpush1.bf16.msra.mxu0 %v14093_v59  ;;  %10370 = vmatpush1.bf16.msra.mxu1 %v14096_v63  ;;  %v14146_v59 = vld [vmem:[%s16242_s9 + $0xe0] sm:$0xff] (!%p11881_p11)  }
 0x8f4   : > { %10285 = vmatprep.subr.bf16.mxu0 %v14101_v49  ;;  %10371 = vmatprep.subr.bf16.mxu1 %v14104_v19  ;;  %v14147_v63 = vld [vmem:[%s16242_s9 + $0x20] sm:$0xff] (!%p11881_p11)   ;;  %v10422_v49 = vlaneseq (!%p11881_p11) }
 0x8f5   : > { %v14148_v19 = vld [vmem:[%s16242_s9 + $0xa0] sm:$0xff] (!%p11881_p11)  }
 0x8f7   : > { %10286 = vmatpush1.bf16.msra.mxu0 %v14099_v15  ;;  %10372 = vmatpush1.bf16.msra.mxu1 %v14102_v1  ;;  %v14149_v15 = vld [vmem:[%s16242_s9 + $0x68] sm:$0xff] (!%p11881_p11)  }
 0x8f8   : > { %10287 = vmatprep.subr.bf16.mxu0 %v14107_v58  ;;  %10373 = vmatprep.subr.bf16.mxu1 %v14110_v11  ;;  %v14150_v1 = vld [vmem:[%s16242_s9 + $0xe8] sm:$0xff] (!%p11881_p11)   ;;  %v10423_v11 = vshrl.u32 (!%p11881_p11), %v10422_v49, 7 }
 0x8f9   : > { %v14151_v58 = vld [vmem:[%s16242_s9 + $0x28] sm:$0xff] (!%p11881_p11)  }
 0x8fb   : > { %10288 = vmatpush1.bf16.msra.mxu0 %v14105_v12  ;;  %10374 = vmatpush1.bf16.msra.mxu1 %v14108_v17  ;;  %v14152_v12 = vld [vmem:[%s16242_s9 + $0xa8] sm:$0xff] (!%p11881_p11)   ;;  %v14153_v17 = vld [vmem:[%s16242_s9 + $0x70] sm:$0xff] (!%p11881_p11)  }
 0x8fc   : > { %10289 = vmatprep.subr.bf16.mxu0 %v14113_v14  ;;  %10375 = vmatprep.subr.bf16.mxu1 %v14116_v27  ;;  %v14154_v14 = vld [vmem:[%s16242_s9 + $0xf0] sm:$0xff] (!%p11881_p11)  }
 0x8fd   : > { %v14155_v27 = vld [vmem:[%s16242_s9 + $0x30] sm:$0xff] (!%p11881_p11)  }
 0x8ff   : > { %10290 = vmatpush1.bf16.msra.mxu0 %v14111_v57  ;;  %10376 = vmatpush1.bf16.msra.mxu1 %v14114_v53  ;;  %v10428_v57 = vsub.s32 (!%p11881_p11), 1, %v10423_v11  ;;  %v14156_v53 = vld [vmem:[%s16242_s9 + $0xb0] sm:$0xff] (!%p11881_p11)  }
 0x900   : > { %10291 = vmatprep.subr.bf16.mxu0 %v14119_v10  ;;  %10377 = vmatprep.subr.bf16.mxu1 %v14122_v47  ;;  %v10436_v10 = vsub.s32 (!%p11881_p11), 3, %v10423_v11  ;;  %v14157_v47 = vld [vmem:[%s16242_s9 + $0x78] sm:$0xff] (!%p11881_p11)  }
 0x903   : > { %10292 = vmatpush1.bf16.msra.mxu0 %v14117_v32  ;;  %10378 = vmatpush1.bf16.msra.mxu1 %v14120_v30  ;;  %v10424_v32 = vsub.s32 (!%p11881_p11), 0, %v10423_v11  ;;  %v14158_v30 = vld [vmem:[%s16242_s9 + $0xf8] sm:$0xff] (!%p11881_p11)  }
 0x904   : > { %10293 = vmatprep.subr.bf16.mxu0 %v14125_v35  ;;  %10379 = vmatprep.subr.bf16.mxu1 %v14128_v31  ;;  %v10432_v35 = vsub.s32 (!%p11881_p11), 2, %v10423_v11  ;;  %v14159_v31 = vld [vmem:[%s16242_s9 + $0x38] sm:$0xff] (!%p11881_p11)  }
 0x907   : > { %10294 = vmatpush1.bf16.msra.mxu0 %v14123_v39  ;;  %10380 = vmatpush1.bf16.msra.mxu1 %v14126_v45  ;;  %v14160_v39 = vld [vmem:[%s16242_s9 + $0xb8] sm:$0xff] (!%p11881_p11)  }
 0x908   : > { %11919 = vmatprep.subr.bf16.mxu0 (!%p11881_p11), %v14129_v61  ;;  %11941 = vmatprep.subr.bf16.mxu1 (!%p11881_p11), %v14130_v38 }
 0x90a   : > { %10296 = vmatmul.mubr.bf16.vlgmr.msra.gmra.mrb[0].mxu0 %v9450_v36  ;;  %10382 = vmatmul.mubr.bf16.vlgmr.msra.gmra.mrb[0].mxu1 %v9450_v36 }
 0x90b   : > { %11920 = vmatpush3.bf16.msra.mxu0 (!%p11881_p11), %v14131_v56  ;;  %11942 = vmatpush3.bf16.msra.mxu1 (!%p11881_p11), %v14132_v22 }
 0x90c   : > { %11921 = vmatprep.subr.bf16.mxu0 (!%p11881_p11), %v14133_v6  ;;  %11943 = vmatprep.subr.bf16.mxu1 (!%p11881_p11), %v14134_v4 }
 0x90f   : > { %11922 = vmatpush3.bf16.msra.mxu0 (!%p11881_p11), %v14135_v7  ;;  %11944 = vmatpush3.bf16.msra.mxu1 (!%p11881_p11), %v14136_v40 }
 0x910   : > { %11923 = vmatprep.subr.bf16.mxu0 (!%p11881_p11), %v14137_v26  ;;  %11945 = vmatprep.subr.bf16.mxu1 (!%p11881_p11), %v14138_v54  ;;  %v11882_v54 = vld [vmem:[#allocation18] ss:$0 sm:$0xff] (!%p11881_p11) }
 0x913   : > { %11924 = vmatpush3.bf16.msra.mxu0 (!%p11881_p11), %v14139_v37  ;;  %11946 = vmatpush3.bf16.msra.mxu1 (!%p11881_p11), %v14140_v51 }
 0x914   : > { %11925 = vmatprep.subr.bf16.mxu0 (!%p11881_p11), %v14141_v9  ;;  %11947 = vmatprep.subr.bf16.mxu1 (!%p11881_p11), %v14142_v44 }
 0x917   : > { %11926 = vmatpush3.bf16.msra.mxu0 (!%p11881_p11), %v14143_v23  ;;  %11948 = vmatpush3.bf16.msra.mxu1 (!%p11881_p11), %v14144_v52 }
 0x918   : > { %11927 = vmatprep.subr.bf16.mxu0 (!%p11881_p11), %v14145_v50  ;;  %11949 = vmatprep.subr.bf16.mxu1 (!%p11881_p11), %v14146_v59 }
 0x91b   : > { %11928 = vmatpush3.bf16.msra.mxu0 (!%p11881_p11), %v14147_v63  ;;  %11950 = vmatpush3.bf16.msra.mxu1 (!%p11881_p11), %v14148_v19 }
 0x91c   : > { %11929 = vmatprep.subr.bf16.mxu0 (!%p11881_p11), %v14149_v15  ;;  %11951 = vmatprep.subr.bf16.mxu1 (!%p11881_p11), %v14150_v1 }
 0x91f   : > { %11930 = vmatpush3.bf16.msra.mxu0 (!%p11881_p11), %v14151_v58  ;;  %11952 = vmatpush3.bf16.msra.mxu1 (!%p11881_p11), %v14152_v12 }
 0x920   : > { %11931 = vmatprep.subr.bf16.mxu0 (!%p11881_p11), %v14153_v17  ;;  %11953 = vmatprep.subr.bf16.mxu1 (!%p11881_p11), %v14154_v14 }
 0x923   : > { %11932 = vmatpush3.bf16.msra.mxu0 (!%p11881_p11), %v14155_v27  ;;  %11954 = vmatpush3.bf16.msra.mxu1 (!%p11881_p11), %v14156_v53 }
 0x924   : > { %11933 = vmatprep.subr.bf16.mxu0 (!%p11881_p11), %v14157_v47  ;;  %11955 = vmatprep.subr.bf16.mxu1 (!%p11881_p11), %v14158_v30 }
 0x927   : > { %11934 = vmatpush3.bf16.msra.mxu0 (!%p11881_p11), %v14159_v31  ;;  %11956 = vmatpush3.bf16.msra.mxu1 (!%p11881_p11), %v14160_v39 }
 0x9dd   : > { %v10297_v25 = vpop.f32.mrb[0].mxu0  ;;  %v10383_v43 = vpop.f32.mrb[0].mxu1  ;;  %10411 = sbr.rel (%p11881_p11) target bundleno = 2768 (0xad0), region = 108 }
 0x9de   : > { %v10392_v24 = vadd.f32 %v10297_v25, %v9437_v33  ;;  %v10394_v13 = vadd.f32 %v10383_v43, %v9439_v42  ;;  %v10299_v62 = vpop.f32.mrb[1].mxu0  ;;  %v10385_v29 = vpop.f32.mrb[1].mxu1  ;;  %v10420_v33 = vld [vmem:[#allocation17] sm:$0xf] (!%p11881_p11) }
 0x9df   : > { %v10393_v46 = vadd.f32 %v10299_v62, %v9438_v55  ;;  %v10395_v0 = vadd.f32 %v10385_v29, %v9440_v16  ;;  %v10301_v20 = vpop.f32.mrb[2].mxu0  ;;  %v10387_v3 = vpop.f32.mrb[2].mxu1  ;;  %v10429_v42 = vrot.slane (!%p11881_p11), %v10420_v33, %v10428_v57  ;;  %v10437_v25 = vrot.slane (!%p11881_p11), %v10420_v33, %v10436_v10 }
 0x9e0   : > { %10400 = vst [vmem:[#allocation5] sm:$0xff] %v10392_v24  ;;  %10402 = vst [vmem:[#allocation5 + $0x10] sm:$0xff] %v10394_v13  ;;  %v10396_v18 = vadd.f32 %v10301_v20, %v9441_v41  ;;  %v10398_v28 = vadd.f32 %v10387_v3, %v9443_v48  ;;  %v10303_v60 = vpop.f32.mrb[3].mxu0  ;;  %v10389_v21 = vpop.f32.mrb[3].mxu1  ;;  %v10425_v41 = vrot.slane (!%p11881_p11), %v10420_v33, %v10424_v32 }
 0x9e1   : > { %10401 = vst [vmem:[#allocation5 + $0x8] sm:$0xff] %v10393_v46  ;;  %10403 = vst [vmem:[#allocation5 + $0x18] sm:$0xff] %v10395_v0  ;;  %v10397_v34 = vadd.f32 %v10303_v60, %v9442_v8  ;;  %v10399_v2 = vadd.f32 %v10389_v21, %v9444_v5  ;;  %v10433_v48 = vrot.slane (!%p11881_p11), %v10420_v33, %v10432_v35 }
 0x9e2   : > { %10404 = vst [vmem:[#allocation5 + $0x20] sm:$0xff] %v10396_v18  ;;  %10406 = vst [vmem:[#allocation5 + $0x30] sm:$0xff] %v10398_v28 }
 0x9e3   : > { %10405 = vst [vmem:[#allocation5 + $0x28] sm:$0xff] %v10397_v34  ;;  %10407 = vst [vmem:[#allocation5 + $0x38] sm:$0xff] %v10399_v2 }
 0x9e7   : > { %v10412_v43 = vld [vmem:[#allocation5] sm:$0xff]  ;;  %v10414_v13 = vld [vmem:[#allocation5 + $0x10] sm:$0xff] }
 0x9e8   : > { %v10413_v45 = vld [vmem:[#allocation5 + $0x8] sm:$0xff]  ;;  %v10415_v55 = vld [vmem:[#allocation5 + $0x18] sm:$0xff]  ;;  %v10442_v0 = vadd.f32 %v10425_v41, %v10412_v43  ;;  %v10444_v3 = vadd.f32 %v10433_v48, %v10414_v13 }
 0x9e9   : > { %v10416_v24 = vld [vmem:[#allocation5 + $0x20] sm:$0xff]  ;;  %v10418_v62 = vld [vmem:[#allocation5 + $0x30] sm:$0xff]  ;;  %v10443_v29 = vadd.f32 %v10429_v42, %v10413_v45  ;;  %v10445_v5 = vadd.f32 %v10437_v25, %v10415_v55 }
 0x9ea   : > { %v10417_v36 = vld [vmem:[#allocation5 + $0x28] sm:$0xff]  ;;  %v10419_v16 = vld [vmem:[#allocation5 + $0x38] sm:$0xff]  ;;  %v10446_v20 = vadd.f32 %v10425_v41, %v10416_v24  ;;  %v10448_v18 = vadd.f32 %v10433_v48, %v10418_v62  ;;  %v10450_v2 = vmax.f32 %v10442_v0, 0.0  ;;  %v10452_v38 = vmax.f32 %v10444_v3, 0.0 }
 0x9eb   : > { %v10447_v8 = vadd.f32 %v10429_v42, %v10417_v36  ;;  %v10449_v46 = vadd.f32 %v10437_v25, %v10419_v16  ;;  %v10451_v28 = vmax.f32 %v10443_v29, 0.0  ;;  %v10453_v21 = vmax.f32 %v10445_v5, 0.0 }
 0x9ec   : > { %v10454_v61 = vmax.f32 %v10446_v20, 0.0  ;;  %v10456_v56 = vmax.f32 %v10448_v18, 0.0 }
 0x9ed   : > { %v10455_v60 = vmax.f32 %v10447_v8, 0.0  ;;  %v10457_v34 = vmax.f32 %v10449_v46, 0.0 }
 0x9ee   : > { %v10458_v4 = vpack.c.bf16 %v10454_v61, %v10450_v2  ;;  %v10460_v7 = vpack.c.bf16 %v10456_v56, %v10452_v38 }
 0x9ef   : > { %v10459_v22 = vpack.c.bf16 %v10455_v60, %v10451_v28  ;;  %v10461_v6 = vpack.c.bf16 %v10457_v34, %v10453_v21 }
 0x9f1   : > { %10757 = vmatprep.mubr.bf16.mxu0 %v10459_v22  ;;  %10798 = vmatprep.mubr.bf16.mxu1 %v10461_v6 }
 0x9f2   : > { %10758 = vmatmul.mubr.bf16.vlgmr.msra.gmra.mrb[0].mxu0 %v10458_v4  ;;  %10799 = vmatmul.mubr.bf16.vlgmr.msra.gmra.mrb[0].mxu1 %v10460_v7 }
 0xac5   : > { %v11935_v40 = vpop.f32.mrb[0].mxu0  ;;  %v11957_v26 = vpop.f32.mrb[0].mxu1 }
 0xac6   : > { %v11936_v37 = vpop.f32.mrb[1].mxu0  ;;  %v11958_v51 = vpop.f32.mrb[1].mxu1 }
 0xac7   : > { %v11937_v9 = vadd.f32 %v11936_v37, %v11935_v40  ;;  %v11959_v44 = vadd.f32 %v11958_v51, %v11957_v26  ;;  %v11938_v23 = vpop.f32.mrb[2].mxu0  ;;  %v11960_v52 = vpop.f32.mrb[2].mxu1 }
 0xac8   : > { %v11939_v50 = vpop.f32.mrb[3].mxu0  ;;  %v11961_v59 = vpop.f32.mrb[3].mxu1 }
 0xac9   : > { %v10760_v63 = vadd.f32 %v11937_v9, %v11882_v54  ;;  %v11940_v49 = vadd.f32 %v11939_v50, %v11938_v23  ;;  %v11962_v19 = vadd.f32 %v11961_v59, %v11960_v52 }
 0xacb   : > { %v10801_v15 = vadd.f32 %v11959_v44, %v10760_v63  ;;  %v10763_v1 = vadd.f32 %v11940_v49, %v11882_v54 }
 0xacd   : > { %10808 = vst.msk [vmem:[%s16273_s24] sm:$0xff] %vm10807_vm1, %v10801_v15  ;;  %v10804_v58 = vadd.f32 %v11962_v19, %v10763_v1 }
 0xacf   : > { %10809 = vst.msk [vmem:[%s16273_s24 + $0x8] sm:$0xff] %vm10807_vm1, %v10804_v58 }
 0xad0 PF: > { %p22_p2 = scmp.ge.s32.totalorder %s14775_s29, 10   ;;  %s16274_s17 = smov %s14465_s18 }
 0xad1   : > { %s16275_s18 = smov %s14469_s19  ;;  %s16276_s19 = smov %s14787_s28 }
 0xad2   : > { %s16277_s20 = smov %s14775_s29  ;;  %24 = sbr.rel (!%p22_p2) target bundleno = 9 (0x9), region = 152 }
 0xad9   :  { %10821 = vsyncpa [#allocation7], 1 }
 0xada   :  { %10823 = vsyncpa [#allocation7 + $0x1], 1 }
 0xadb   :  { %10824 = vsyncpa [#allocation9], 1 }
 0xadc   :  { %10825 = vsyncpa [#allocation12], 1 }
 0xadd   :  { %10826 = vsyncpa [#allocation15], 1 }

</bundles_post_ra>
